<compile_context>
chip_gen: v6e
topology: v6e:2x2x1
jax: 0.10.0
libtpu: 0.0.40
codegen_flags: <defaults>
</compile_context>

<pallas_src>
import jax
import jax.numpy as jnp
from jax.experimental import pallas as pl
from jax.experimental.pallas import tpu as pltpu


def _make_conv_kernel(Ho, Wo, Cin, Cout, taps):
    """Build a conv kernel for one batch element.

    x_ref     : (1, Hi, Wi, Cx)     input tile (padded / space-to-depth), VMEM
    w_ref     : (9*Cin, Cout)       weights (bf16), VMEM
    b_ref     : (1, Cout)           bias (f32), VMEM
    o_ref     : (1, Ho, Wo, Cout)   output tile, VMEM
    patch_ref : (Ho*Wo, 9*Cin)      bf16 im2col scratch, VMEM

    `taps` is a static list of 9 tuples (dy, dx, c0): each conv tap reads the
    contiguous slice x_ref[0, dy:dy+Ho, dx:dx+Wo, c0:c0+Cin].
    """

    def kernel(x_ref, w_ref, b_ref, o_ref, patch_ref):
        # im2col: fill the (Ho*Wo, 9*Cin) patch scratch once (bf16).
        for idx, (dy, dx, c0) in enumerate(taps):
            tap = x_ref[0, dy:dy + Ho, dx:dx + Wo, c0:c0 + Cin]
            patch_ref[:, idx * Cin:(idx + 1) * Cin] = (
                tap.reshape(Ho * Wo, Cin).astype(patch_ref.dtype))

        # Single deep-K MXU matmul: bf16 x bf16 -> f32 accumulator.
        acc = jnp.dot(patch_ref[...], w_ref[...],
                      preferred_element_type=jnp.float32)
        acc = acc + b_ref[...]           # (Ho*Wo, Cout) + (1, Cout)
        acc = jnp.maximum(acc, 0.0)      # ReLU
        o_ref[0] = acc.reshape(Ho, Wo, Cout).astype(o_ref.dtype)

    return kernel


def conv3x3_relu(x_nhwc, w, b, stride):
    """Conv2d(k=3, padding=1, stride in {1,2}) + bias + ReLU via Pallas.

    x_nhwc: (N, H, W, Cin) float32
    w     : (3, 3, Cin, Cout) float32
    b     : (Cout,) float32
    stride: static Python int (1 or 2)
    """
    N, H, W, Cin = x_nhwc.shape
    Cout = w.shape[-1]
    assert w.shape == (3, 3, Cin, Cout)
    assert stride in (1, 2)

    xp = jnp.pad(x_nhwc, ((0, 0), (1, 1), (1, 1), (0, 0)))  # (N, H+2, W+2, Cin)

    if stride == 1:
        Ho, Wo = H, W
        xin = xp
        taps = [(ky, kx, 0) for ky in range(3) for kx in range(3)]
    else:
        # Space-to-depth: xs[n, a, b, (py*2+px)*Cin + c] == xp[n, 2a+py, 2b+px, c]
        # Then output(i,j), tap (ky,kx) -> xs[n, i+ky//2, j+kx//2, plane(ky%2,kx%2)]
        # i.e. only even output positions are ever computed.
        assert H % 2 == 0 and W % 2 == 0
        Ho, Wo = H // 2, W // 2
        xs = xp.reshape(N, Ho + 1, 2, Wo + 1, 2, Cin)
        xs = jnp.transpose(xs, (0, 1, 3, 2, 4, 5))
        xin = xs.reshape(N, Ho + 1, Wo + 1, 4 * Cin)
        taps = [(ky // 2, kx // 2, ((ky % 2) * 2 + (kx % 2)) * Cin)
                for ky in range(3) for kx in range(3)]

    # Weights in im2col order (ky, kx, cin) -> rows of (9*Cin, Cout), bf16.
    w2 = w.reshape(9 * Cin, Cout).astype(jnp.bfloat16)
    b2 = b.reshape(1, Cout).astype(jnp.float32)

    Hi, Wi, Cx = xin.shape[1], xin.shape[2], xin.shape[3]
    kernel = _make_conv_kernel(Ho, Wo, Cin, Cout, taps)

    out = pl.pallas_call(
        kernel,
        out_shape=jax.ShapeDtypeStruct((N, Ho, Wo, Cout), x_nhwc.dtype),
        grid=(N,),
        in_specs=[
            pl.BlockSpec((1, Hi, Wi, Cx), lambda n: (n, 0, 0, 0)),
            pl.BlockSpec((9 * Cin, Cout), lambda n: (0, 0)),
            pl.BlockSpec((1, Cout), lambda n: (0, 0)),
        ],
        out_specs=pl.BlockSpec((1, Ho, Wo, Cout), lambda n: (n, 0, 0, 0)),
        scratch_shapes=[pltpu.VMEM((Ho * Wo, 9 * Cin), jnp.bfloat16)],
        compiler_params=pltpu.CompilerParams(
            dimension_semantics=("parallel",)),
    )(xin, w2, b2)
    return out


# ---------------------------------------------------------------------------
# Static layer configuration (stride is STATIC — not part of the traced pytree)
# ---------------------------------------------------------------------------
_LAYER_CFG = [
    # (Cin, Cout, stride)
    (3,   32, 1),   # down1.ConvBlock
    (32,  32, 2),   # down1.DCAConvBlock (modeled as ConvBlock)
    (32,  64, 1),   # down2.ConvBlock
    (64,  64, 2),   # down2.ConvBlock
    (64, 128, 1),   # down3.ConvBlock
    (128, 128, 2),  # down3.ConvBlock
    (128, 256, 1),  # middle.ConvBlock
    (256, 128, 1),  # middle.ConvBlock
]


def init_params(key):
    """Deterministic params mimicking PyTorch Conv2d default init. (w, b) only."""
    params = []
    for (cin, cout, _stride) in _LAYER_CFG:
        key, kw, kb = jax.random.split(key, 3)
        fan_in = cin * 3 * 3
        bound = float(fan_in) ** -0.5
        w = jax.random.uniform(kw, (3, 3, cin, cout), jnp.float32,
                               minval=-bound, maxval=bound)
        b = jax.random.uniform(kb, (cout,), jnp.float32,
                               minval=-bound, maxval=bound)
        params.append((w, b))
    return params


def deep_ca_unet_forward(x_nchw, params):
    """Encoder path of DeepCAUnet. x_nchw: (N, 3, H, W) float32 -> mid (N, 128, H/8, W/8)."""
    x = jnp.transpose(x_nchw, (0, 2, 3, 1))  # NCHW -> NHWC
    for (w, b), (_cin, _cout, stride) in zip(params, _LAYER_CFG):
        x = conv3x3_relu(x, w, b, stride)
    return jnp.transpose(x, (0, 3, 1, 2))    # NHWC -> NCHW


if __name__ == "__main__":
    key = jax.random.PRNGKey(0)
    kx, kp = jax.random.split(key)

    # Small, shape-consistent example: batch=2, 3 channels (down1 expects 3), 16x16.
    x = jax.random.normal(kx, (2, 3, 16, 16), jnp.float32)
    params = init_params(kp)

    mid = jax.jit(deep_ca_unet_forward)(x, params)
    mid = jax.block_until_ready(mid)

    assert mid.shape == (2, 128, 2, 2), mid.shape
    assert jnp.all(jnp.isfinite(mid))
    print("KERNEL_OK")
</pallas_src>

<mosaic_0001>
module attributes {stable_mosaic.version = 11 : i64} {
  func.func @kernel(%arg0: i32, %arg1: memref<1x18x18x3xf32, #tpu.memory_space<vmem>>, %arg2: memref<27x32xbf16, #tpu.memory_space<vmem>>, %arg3: memref<1x32xf32, #tpu.memory_space<vmem>>, %arg4: memref<1x16x16x32xf32, #tpu.memory_space<vmem>>, %arg5: memref<256x27xbf16, #tpu.memory_space<vmem>>) attributes {dimension_semantics = [#tpu.dimension_semantics<parallel>], iteration_bounds = array<i64: 2>, scalar_prefetch = 0 : i64, scratch_operands = 1 : i64, tpu.core_type = #tpu.core_type<tc>, window_params = [{transform_indices = @transform_0, window_bounds = array<i64: 1, 18, 18, 3>}, {pipeline_mode = #tpu.pipeline_mode<synchronous>, transform_indices = @transform_1, window_bounds = array<i64: 27, 32>}, {pipeline_mode = #tpu.pipeline_mode<synchronous>, transform_indices = @transform_2, window_bounds = array<i64: 1, 32>}, {transform_indices = @transform_3, window_bounds = array<i64: 1, 16, 16, 32>}]} {
    %c0 = arith.constant 0 : index
    %c0_0 = arith.constant 0 : index
    %c0_1 = arith.constant 0 : index
    %c0_2 = arith.constant 0 : index
    %0 = vector.load %arg1[%c0, %c0_0, %c0_1, %c0_2] : memref<1x18x18x3xf32, #tpu.memory_space<vmem>>, vector<1x16x16x3xf32>
    %1 = vector.shape_cast %0 : vector<1x16x16x3xf32> to vector<16x16x3xf32>
    %2 = vector.shape_cast %1 : vector<16x16x3xf32> to vector<256x3xf32>
    %3 = arith.truncf %2 : vector<256x3xf32> to vector<256x3xbf16>
    %c0_3 = arith.constant 0 : index
    %c0_4 = arith.constant 0 : index
    %4 = vector.load %arg5[%c0_3, %c0_4] : memref<256x27xbf16, #tpu.memory_space<vmem>>, vector<256x3xbf16>
    tpu.vector_store %arg5[%c0_3, %c0_4], %3 {strides = array<i32>} : memref<256x27xbf16, #tpu.memory_space<vmem>>, vector<256x3xbf16>,
    %c0_5 = arith.constant 0 : index
    %c0_6 = arith.constant 0 : index
    %c1 = arith.constant 1 : index
    %c0_7 = arith.constant 0 : index
    %5 = vector.load %arg1[%c0_5, %c0_6, %c1, %c0_7] : memref<1x18x18x3xf32, #tpu.memory_space<vmem>>, vector<1x16x16x3xf32>
    %6 = vector.shape_cast %5 : vector<1x16x16x3xf32> to vector<16x16x3xf32>
    %7 = vector.shape_cast %6 : vector<16x16x3xf32> to vector<256x3xf32>
    %8 = arith.truncf %7 : vector<256x3xf32> to vector<256x3xbf16>
    %c0_8 = arith.constant 0 : index
    %c3 = arith.constant 3 : index
    %9 = vector.load %arg5[%c0_8, %c3] : memref<256x27xbf16, #tpu.memory_space<vmem>>, vector<256x3xbf16>
    tpu.vector_store %arg5[%c0_8, %c3], %8 {strides = array<i32>} : memref<256x27xbf16, #tpu.memory_space<vmem>>, vector<256x3xbf16>,
    %c0_9 = arith.constant 0 : index
    %c0_10 = arith.constant 0 : index
    %c2 = arith.constant 2 : index
    %c0_11 = arith.constant 0 : index
    %10 = vector.load %arg1[%c0_9, %c0_10, %c2, %c0_11] : memref<1x18x18x3xf32, #tpu.memory_space<vmem>>, vector<1x16x16x3xf32>
    %11 = vector.shape_cast %10 : vector<1x16x16x3xf32> to vector<16x16x3xf32>
    %12 = vector.shape_cast %11 : vector<16x16x3xf32> to vector<256x3xf32>
    %13 = arith.truncf %12 : vector<256x3xf32> to vector<256x3xbf16>
    %c0_12 = arith.constant 0 : index
    %c6 = arith.constant 6 : index
    %14 = vector.load %arg5[%c0_12, %c6] : memref<256x27xbf16, #tpu.memory_space<vmem>>, vector<256x3xbf16>
    tpu.vector_store %arg5[%c0_12, %c6], %13 {strides = array<i32>} : memref<256x27xbf16, #tpu.memory_space<vmem>>, vector<256x3xbf16>,
    %c0_13 = arith.constant 0 : index
    %c1_14 = arith.constant 1 : index
    %c0_15 = arith.constant 0 : index
    %c0_16 = arith.constant 0 : index
    %15 = vector.load %arg1[%c0_13, %c1_14, %c0_15, %c0_16] : memref<1x18x18x3xf32, #tpu.memory_space<vmem>>, vector<1x16x16x3xf32>
    %16 = vector.shape_cast %15 : vector<1x16x16x3xf32> to vector<16x16x3xf32>
    %17 = vector.shape_cast %16 : vector<16x16x3xf32> to vector<256x3xf32>
    %18 = arith.truncf %17 : vector<256x3xf32> to vector<256x3xbf16>
    %c0_17 = arith.constant 0 : index
    %c9 = arith.constant 9 : index
    %19 = vector.load %arg5[%c0_17, %c9] : memref<256x27xbf16, #tpu.memory_space<vmem>>, vector<256x3xbf16>
    tpu.vector_store %arg5[%c0_17, %c9], %18 {strides = array<i32>} : memref<256x27xbf16, #tpu.memory_space<vmem>>, vector<256x3xbf16>,
    %c0_18 = arith.constant 0 : index
    %c1_19 = arith.constant 1 : index
    %c1_20 = arith.constant 1 : index
    %c0_21 = arith.constant 0 : index
    %20 = vector.load %arg1[%c0_18, %c1_19, %c1_20, %c0_21] : memref<1x18x18x3xf32, #tpu.memory_space<vmem>>, vector<1x16x16x3xf32>
    %21 = vector.shape_cast %20 : vector<1x16x16x3xf32> to vector<16x16x3xf32>
    %22 = vector.shape_cast %21 : vector<16x16x3xf32> to vector<256x3xf32>
    %23 = arith.truncf %22 : vector<256x3xf32> to vector<256x3xbf16>
    %c0_22 = arith.constant 0 : index
    %c12 = arith.constant 12 : index
    %24 = vector.load %arg5[%c0_22, %c12] : memref<256x27xbf16, #tpu.memory_space<vmem>>, vector<256x3xbf16>
    tpu.vector_store %arg5[%c0_22, %c12], %23 {strides = array<i32>} : memref<256x27xbf16, #tpu.memory_space<vmem>>, vector<256x3xbf16>,
    %c0_23 = arith.constant 0 : index
    %c1_24 = arith.constant 1 : index
    %c2_25 = arith.constant 2 : index
    %c0_26 = arith.constant 0 : index
    %25 = vector.load %arg1[%c0_23, %c1_24, %c2_25, %c0_26] : memref<1x18x18x3xf32, #tpu.memory_space<vmem>>, vector<1x16x16x3xf32>
    %26 = vector.shape_cast %25 : vector<1x16x16x3xf32> to vector<16x16x3xf32>
    %27 = vector.shape_cast %26 : vector<16x16x3xf32> to vector<256x3xf32>
    %28 = arith.truncf %27 : vector<256x3xf32> to vector<256x3xbf16>
    %c0_27 = arith.constant 0 : index
    %c15 = arith.constant 15 : index
    %29 = vector.load %arg5[%c0_27, %c15] : memref<256x27xbf16, #tpu.memory_space<vmem>>, vector<256x3xbf16>
    tpu.vector_store %arg5[%c0_27, %c15], %28 {strides = array<i32>} : memref<256x27xbf16, #tpu.memory_space<vmem>>, vector<256x3xbf16>,
    %c0_28 = arith.constant 0 : index
    %c2_29 = arith.constant 2 : index
    %c0_30 = arith.constant 0 : index
    %c0_31 = arith.constant 0 : index
    %30 = vector.load %arg1[%c0_28, %c2_29, %c0_30, %c0_31] : memref<1x18x18x3xf32, #tpu.memory_space<vmem>>, vector<1x16x16x3xf32>
    %31 = vector.shape_cast %30 : vector<1x16x16x3xf32> to vector<16x16x3xf32>
    %32 = vector.shape_cast %31 : vector<16x16x3xf32> to vector<256x3xf32>
    %33 = arith.truncf %32 : vector<256x3xf32> to vector<256x3xbf16>
    %c0_32 = arith.constant 0 : index
    %c18 = arith.constant 18 : index
    %34 = vector.load %arg5[%c0_32, %c18] : memref<256x27xbf16, #tpu.memory_space<vmem>>, vector<256x3xbf16>
    tpu.vector_store %arg5[%c0_32, %c18], %33 {strides = array<i32>} : memref<256x27xbf16, #tpu.memory_space<vmem>>, vector<256x3xbf16>,
    %c0_33 = arith.constant 0 : index
    %c2_34 = arith.constant 2 : index
    %c1_35 = arith.constant 1 : index
    %c0_36 = arith.constant 0 : index
    %35 = vector.load %arg1[%c0_33, %c2_34, %c1_35, %c0_36] : memref<1x18x18x3xf32, #tpu.memory_space<vmem>>, vector<1x16x16x3xf32>
    %36 = vector.shape_cast %35 : vector<1x16x16x3xf32> to vector<16x16x3xf32>
    %37 = vector.shape_cast %36 : vector<16x16x3xf32> to vector<256x3xf32>
    %38 = arith.truncf %37 : vector<256x3xf32> to vector<256x3xbf16>
    %c0_37 = arith.constant 0 : index
    %c21 = arith.constant 21 : index
    %39 = vector.load %arg5[%c0_37, %c21] : memref<256x27xbf16, #tpu.memory_space<vmem>>, vector<256x3xbf16>
    tpu.vector_store %arg5[%c0_37, %c21], %38 {strides = array<i32>} : memref<256x27xbf16, #tpu.memory_space<vmem>>, vector<256x3xbf16>,
    %c0_38 = arith.constant 0 : index
    %c2_39 = arith.constant 2 : index
    %c2_40 = arith.constant 2 : index
    %c0_41 = arith.constant 0 : index
    %40 = vector.load %arg1[%c0_38, %c2_39, %c2_40, %c0_41] : memref<1x18x18x3xf32, #tpu.memory_space<vmem>>, vector<1x16x16x3xf32>
    %41 = vector.shape_cast %40 : vector<1x16x16x3xf32> to vector<16x16x3xf32>
    %42 = vector.shape_cast %41 : vector<16x16x3xf32> to vector<256x3xf32>
    %43 = arith.truncf %42 : vector<256x3xf32> to vector<256x3xbf16>
    %c0_42 = arith.constant 0 : index
    %c24 = arith.constant 24 : index
    %44 = vector.load %arg5[%c0_42, %c24] : memref<256x27xbf16, #tpu.memory_space<vmem>>, vector<256x3xbf16>
    tpu.vector_store %arg5[%c0_42, %c24], %43 {strides = array<i32>} : memref<256x27xbf16, #tpu.memory_space<vmem>>, vector<256x3xbf16>,
    %c0_43 = arith.constant 0 : index
    %c0_44 = arith.constant 0 : index
    %45 = vector.load %arg5[%c0_43, %c0_44] : memref<256x27xbf16, #tpu.memory_space<vmem>>, vector<256x27xbf16>
    %c0_45 = arith.constant 0 : index
    %c0_46 = arith.constant 0 : index
    %46 = vector.load %arg2[%c0_45, %c0_46] : memref<27x32xbf16, #tpu.memory_space<vmem>>, vector<27x32xbf16>
    %cst = arith.constant dense<0.000000e+00> : vector<256x32xf32>
    %47 = tpu.matmul %45, %46, %cst {dimension_numbers = #tpu.dot_dimension_numbers<[1], [0], [0], [1], [0, 0, 1, 1], [], []>} : vector<256x27xbf16>, vector<27x32xbf16>, vector<256x32xf32> -> vector<256x32xf32>
    %c0_47 = arith.constant 0 : index
    %c0_48 = arith.constant 0 : index
    %48 = vector.load %arg3[%c0_47, %c0_48] : memref<1x32xf32, #tpu.memory_space<vmem>>, vector<1x32xf32>
    %49 = vector.broadcast %48 : vector<1x32xf32> to vector<256x32xf32>
    %50 = arith.addf %47, %49 : vector<256x32xf32>
    %cst_49 = arith.constant 0.000000e+00 : f32
    %51 = vector.broadcast %cst_49 : f32 to vector<256x32xf32>
    %52 = arith.maximumf %50, %51 : vector<256x32xf32>
    %53 = vector.shape_cast %52 : vector<256x32xf32> to vector<16x16x32xf32>
    %c0_50 = arith.constant 0 : index
    %c0_51 = arith.constant 0 : index
    %c0_52 = arith.constant 0 : index
    %c0_53 = arith.constant 0 : index
    %54 = vector.load %arg4[%c0_50, %c0_51, %c0_52, %c0_53] : memref<1x16x16x32xf32, #tpu.memory_space<vmem>>, vector<1x16x16x32xf32>
    %55 = vector.shape_cast %54 : vector<1x16x16x32xf32> to vector<16x16x32xf32>
    %56 = vector.shape_cast %53 : vector<16x16x32xf32> to vector<1x16x16x32xf32>
    tpu.vector_store %arg4[%c0_50, %c0_51, %c0_52, %c0_53], %56 {strides = array<i32>} : memref<1x16x16x32xf32, #tpu.memory_space<vmem>>, vector<1x16x16x32xf32>,
    return
  }
  func.func @transform_0(%arg0: i32) -> (i32, i32, i32, i32) {
    %c0_i32 = arith.constant 0 : i32
    %c0_i32_0 = arith.constant 0 : i32
    %c0_i32_1 = arith.constant 0 : i32
    %c0_i32_2 = arith.constant 0 : i32
    return %arg0, %c0_i32, %c0_i32_0, %c0_i32_1 : i32, i32, i32, i32
  }
  func.func @transform_1(%arg0: i32) -> (i32, i32) {
    %c0_i32 = arith.constant 0 : i32
    %c0_i32_0 = arith.constant 0 : i32
    %c0_i32_1 = arith.constant 0 : i32
    return %c0_i32, %c0_i32_0 : i32, i32
  }
  func.func @transform_2(%arg0: i32) -> (i32, i32) {
    %c0_i32 = arith.constant 0 : i32
    %c0_i32_0 = arith.constant 0 : i32
    %c0_i32_1 = arith.constant 0 : i32
    return %c0_i32, %c0_i32_0 : i32, i32
  }
  func.func @transform_3(%arg0: i32) -> (i32, i32, i32, i32) {
    %c0_i32 = arith.constant 0 : i32
    %c0_i32_0 = arith.constant 0 : i32
    %c0_i32_1 = arith.constant 0 : i32
    %c0_i32_2 = arith.constant 0 : i32
    return %arg0, %c0_i32, %c0_i32_0, %c0_i32_1 : i32, i32, i32, i32
  }
}

module attributes {stable_mosaic.version = 11 : i64} {
  func.func @kernel(%arg0: i32, %arg1: memref<1x9x9x128xf32, #tpu.memory_space<vmem>>, %arg2: memref<288x32xbf16, #tpu.memory_space<vmem>>, %arg3: memref<1x32xf32, #tpu.memory_space<vmem>>, %arg4: memref<1x8x8x32xf32, #tpu.memory_space<vmem>>, %arg5: memref<64x288xbf16, #tpu.memory_space<vmem>>) attributes {dimension_semantics = [#tpu.dimension_semantics<parallel>], iteration_bounds = array<i64: 2>, scalar_prefetch = 0 : i64, scratch_operands = 1 : i64, tpu.core_type = #tpu.core_type<tc>, window_params = [{transform_indices = @transform_0, window_bounds = array<i64: 1, 9, 9, 128>}, {pipeline_mode = #tpu.pipeline_mode<synchronous>, transform_indices = @transform_1, window_bounds = array<i64: 288, 32>}, {pipeline_mode = #tpu.pipeline_mode<synchronous>, transform_indices = @transform_2, window_bounds = array<i64: 1, 32>}, {transform_indices = @transform_3, window_bounds = array<i64: 1, 8, 8, 32>}]} {
    %c0 = arith.constant 0 : index
    %c0_0 = arith.constant 0 : index
    %c0_1 = arith.constant 0 : index
    %c0_2 = arith.constant 0 : index
    %0 = vector.load %arg1[%c0, %c0_0, %c0_1, %c0_2] : memref<1x9x9x128xf32, #tpu.memory_space<vmem>>, vector<1x8x8x32xf32>
    %1 = vector.shape_cast %0 : vector<1x8x8x32xf32> to vector<8x8x32xf32>
    %2 = vector.shape_cast %1 : vector<8x8x32xf32> to vector<64x32xf32>
    %3 = arith.truncf %2 : vector<64x32xf32> to vector<64x32xbf16>
    %c0_3 = arith.constant 0 : index
    %c0_4 = arith.constant 0 : index
    %4 = vector.load %arg5[%c0_3, %c0_4] : memref<64x288xbf16, #tpu.memory_space<vmem>>, vector<64x32xbf16>
    tpu.vector_store %arg5[%c0_3, %c0_4], %3 {strides = array<i32>} : memref<64x288xbf16, #tpu.memory_space<vmem>>, vector<64x32xbf16>,
    %c0_5 = arith.constant 0 : index
    %c0_6 = arith.constant 0 : index
    %c0_7 = arith.constant 0 : index
    %c32 = arith.constant 32 : index
    %5 = vector.load %arg1[%c0_5, %c0_6, %c0_7, %c32] : memref<1x9x9x128xf32, #tpu.memory_space<vmem>>, vector<1x8x8x32xf32>
    %6 = vector.shape_cast %5 : vector<1x8x8x32xf32> to vector<8x8x32xf32>
    %7 = vector.shape_cast %6 : vector<8x8x32xf32> to vector<64x32xf32>
    %8 = arith.truncf %7 : vector<64x32xf32> to vector<64x32xbf16>
    %c0_8 = arith.constant 0 : index
    %c32_9 = arith.constant 32 : index
    %9 = vector.load %arg5[%c0_8, %c32_9] : memref<64x288xbf16, #tpu.memory_space<vmem>>, vector<64x32xbf16>
    tpu.vector_store %arg5[%c0_8, %c32_9], %8 {strides = array<i32>} : memref<64x288xbf16, #tpu.memory_space<vmem>>, vector<64x32xbf16>,
    %c0_10 = arith.constant 0 : index
    %c0_11 = arith.constant 0 : index
    %c1 = arith.constant 1 : index
    %c0_12 = arith.constant 0 : index
    %10 = vector.load %arg1[%c0_10, %c0_11, %c1, %c0_12] : memref<1x9x9x128xf32, #tpu.memory_space<vmem>>, vector<1x8x8x32xf32>
    %11 = vector.shape_cast %10 : vector<1x8x8x32xf32> to vector<8x8x32xf32>
    %12 = vector.shape_cast %11 : vector<8x8x32xf32> to vector<64x32xf32>
    %13 = arith.truncf %12 : vector<64x32xf32> to vector<64x32xbf16>
    %c0_13 = arith.constant 0 : index
    %c64 = arith.constant 64 : index
    %14 = vector.load %arg5[%c0_13, %c64] : memref<64x288xbf16, #tpu.memory_space<vmem>>, vector<64x32xbf16>
    tpu.vector_store %arg5[%c0_13, %c64], %13 {strides = array<i32>} : memref<64x288xbf16, #tpu.memory_space<vmem>>, vector<64x32xbf16>,
    %c0_14 = arith.constant 0 : index
    %c0_15 = arith.constant 0 : index
    %c0_16 = arith.constant 0 : index
    %c64_17 = arith.constant 64 : index
    %15 = vector.load %arg1[%c0_14, %c0_15, %c0_16, %c64_17] : memref<1x9x9x128xf32, #tpu.memory_space<vmem>>, vector<1x8x8x32xf32>
    %16 = vector.shape_cast %15 : vector<1x8x8x32xf32> to vector<8x8x32xf32>
    %17 = vector.shape_cast %16 : vector<8x8x32xf32> to vector<64x32xf32>
    %18 = arith.truncf %17 : vector<64x32xf32> to vector<64x32xbf16>
    %c0_18 = arith.constant 0 : index
    %c96 = arith.constant 96 : index
    %19 = vector.load %arg5[%c0_18, %c96] : memref<64x288xbf16, #tpu.memory_space<vmem>>, vector<64x32xbf16>
    tpu.vector_store %arg5[%c0_18, %c96], %18 {strides = array<i32>} : memref<64x288xbf16, #tpu.memory_space<vmem>>, vector<64x32xbf16>,
    %c0_19 = arith.constant 0 : index
    %c0_20 = arith.constant 0 : index
    %c0_21 = arith.constant 0 : index
    %c96_22 = arith.constant 96 : index
    %20 = vector.load %arg1[%c0_19, %c0_20, %c0_21, %c96_22] : memref<1x9x9x128xf32, #tpu.memory_space<vmem>>, vector<1x8x8x32xf32>
    %21 = vector.shape_cast %20 : vector<1x8x8x32xf32> to vector<8x8x32xf32>
    %22 = vector.shape_cast %21 : vector<8x8x32xf32> to vector<64x32xf32>
    %23 = arith.truncf %22 : vector<64x32xf32> to vector<64x32xbf16>
    %c0_23 = arith.constant 0 : index
    %c128 = arith.constant 128 : index
    %24 = vector.load %arg5[%c0_23, %c128] : memref<64x288xbf16, #tpu.memory_space<vmem>>, vector<64x32xbf16>
    tpu.vector_store %arg5[%c0_23, %c128], %23 {strides = array<i32>} : memref<64x288xbf16, #tpu.memory_space<vmem>>, vector<64x32xbf16>,
    %c0_24 = arith.constant 0 : index
    %c0_25 = arith.constant 0 : index
    %c1_26 = arith.constant 1 : index
    %c64_27 = arith.constant 64 : index
    %25 = vector.load %arg1[%c0_24, %c0_25, %c1_26, %c64_27] : memref<1x9x9x128xf32, #tpu.memory_space<vmem>>, vector<1x8x8x32xf32>
    %26 = vector.shape_cast %25 : vector<1x8x8x32xf32> to vector<8x8x32xf32>
    %27 = vector.shape_cast %26 : vector<8x8x32xf32> to vector<64x32xf32>
    %28 = arith.truncf %27 : vector<64x32xf32> to vector<64x32xbf16>
    %c0_28 = arith.constant 0 : index
    %c160 = arith.constant 160 : index
    %29 = vector.load %arg5[%c0_28, %c160] : memref<64x288xbf16, #tpu.memory_space<vmem>>, vector<64x32xbf16>
    tpu.vector_store %arg5[%c0_28, %c160], %28 {strides = array<i32>} : memref<64x288xbf16, #tpu.memory_space<vmem>>, vector<64x32xbf16>,
    %c0_29 = arith.constant 0 : index
    %c1_30 = arith.constant 1 : index
    %c0_31 = arith.constant 0 : index
    %c0_32 = arith.constant 0 : index
    %30 = vector.load %arg1[%c0_29, %c1_30, %c0_31, %c0_32] : memref<1x9x9x128xf32, #tpu.memory_space<vmem>>, vector<1x8x8x32xf32>
    %31 = vector.shape_cast %30 : vector<1x8x8x32xf32> to vector<8x8x32xf32>
    %32 = vector.shape_cast %31 : vector<8x8x32xf32> to vector<64x32xf32>
    %33 = arith.truncf %32 : vector<64x32xf32> to vector<64x32xbf16>
    %c0_33 = arith.constant 0 : index
    %c192 = arith.constant 192 : index
    %34 = vector.load %arg5[%c0_33, %c192] : memref<64x288xbf16, #tpu.memory_space<vmem>>, vector<64x32xbf16>
    tpu.vector_store %arg5[%c0_33, %c192], %33 {strides = array<i32>} : memref<64x288xbf16, #tpu.memory_space<vmem>>, vector<64x32xbf16>,
    %c0_34 = arith.constant 0 : index
    %c1_35 = arith.constant 1 : index
    %c0_36 = arith.constant 0 : index
    %c32_37 = arith.constant 32 : index
    %35 = vector.load %arg1[%c0_34, %c1_35, %c0_36, %c32_37] : memref<1x9x9x128xf32, #tpu.memory_space<vmem>>, vector<1x8x8x32xf32>
    %36 = vector.shape_cast %35 : vector<1x8x8x32xf32> to vector<8x8x32xf32>
    %37 = vector.shape_cast %36 : vector<8x8x32xf32> to vector<64x32xf32>
    %38 = arith.truncf %37 : vector<64x32xf32> to vector<64x32xbf16>
    %c0_38 = arith.constant 0 : index
    %c224 = arith.constant 224 : index
    %39 = vector.load %arg5[%c0_38, %c224] : memref<64x288xbf16, #tpu.memory_space<vmem>>, vector<64x32xbf16>
    tpu.vector_store %arg5[%c0_38, %c224], %38 {strides = array<i32>} : memref<64x288xbf16, #tpu.memory_space<vmem>>, vector<64x32xbf16>,
    %c0_39 = arith.constant 0 : index
    %c1_40 = arith.constant 1 : index
    %c1_41 = arith.constant 1 : index
    %c0_42 = arith.constant 0 : index
    %40 = vector.load %arg1[%c0_39, %c1_40, %c1_41, %c0_42] : memref<1x9x9x128xf32, #tpu.memory_space<vmem>>, vector<1x8x8x32xf32>
    %41 = vector.shape_cast %40 : vector<1x8x8x32xf32> to vector<8x8x32xf32>
    %42 = vector.shape_cast %41 : vector<8x8x32xf32> to vector<64x32xf32>
    %43 = arith.truncf %42 : vector<64x32xf32> to vector<64x32xbf16>
    %c0_43 = arith.constant 0 : index
    %c256 = arith.constant 256 : index
    %44 = vector.load %arg5[%c0_43, %c256] : memref<64x288xbf16, #tpu.memory_space<vmem>>, vector<64x32xbf16>
    tpu.vector_store %arg5[%c0_43, %c256], %43 {strides = array<i32>} : memref<64x288xbf16, #tpu.memory_space<vmem>>, vector<64x32xbf16>,
    %c0_44 = arith.constant 0 : index
    %c0_45 = arith.constant 0 : index
    %45 = vector.load %arg5[%c0_44, %c0_45] : memref<64x288xbf16, #tpu.memory_space<vmem>>, vector<64x288xbf16>
    %c0_46 = arith.constant 0 : index
    %c0_47 = arith.constant 0 : index
    %46 = vector.load %arg2[%c0_46, %c0_47] : memref<288x32xbf16, #tpu.memory_space<vmem>>, vector<288x32xbf16>
    %cst = arith.constant dense<0.000000e+00> : vector<64x32xf32>
    %47 = tpu.matmul %45, %46, %cst {dimension_numbers = #tpu.dot_dimension_numbers<[1], [0], [0], [1], [0, 0, 1, 1], [], []>} : vector<64x288xbf16>, vector<288x32xbf16>, vector<64x32xf32> -> vector<64x32xf32>
    %c0_48 = arith.constant 0 : index
    %c0_49 = arith.constant 0 : index
    %48 = vector.load %arg3[%c0_48, %c0_49] : memref<1x32xf32, #tpu.memory_space<vmem>>, vector<1x32xf32>
    %49 = vector.broadcast %48 : vector<1x32xf32> to vector<64x32xf32>
    %50 = arith.addf %47, %49 : vector<64x32xf32>
    %cst_50 = arith.constant 0.000000e+00 : f32
    %51 = vector.broadcast %cst_50 : f32 to vector<64x32xf32>
    %52 = arith.maximumf %50, %51 : vector<64x32xf32>
    %53 = vector.shape_cast %52 : vector<64x32xf32> to vector<8x8x32xf32>
    %c0_51 = arith.constant 0 : index
    %c0_52 = arith.constant 0 : index
    %c0_53 = arith.constant 0 : index
    %c0_54 = arith.constant 0 : index
    %54 = vector.load %arg4[%c0_51, %c0_52, %c0_53, %c0_54] : memref<1x8x8x32xf32, #tpu.memory_space<vmem>>, vector<1x8x8x32xf32>
    %55 = vector.shape_cast %54 : vector<1x8x8x32xf32> to vector<8x8x32xf32>
    %56 = vector.shape_cast %53 : vector<8x8x32xf32> to vector<1x8x8x32xf32>
    tpu.vector_store %arg4[%c0_51, %c0_52, %c0_53, %c0_54], %56 {strides = array<i32>} : memref<1x8x8x32xf32, #tpu.memory_space<vmem>>, vector<1x8x8x32xf32>,
    return
  }
  func.func @transform_0(%arg0: i32) -> (i32, i32, i32, i32) {
    %c0_i32 = arith.constant 0 : i32
    %c0_i32_0 = arith.constant 0 : i32
    %c0_i32_1 = arith.constant 0 : i32
    %c0_i32_2 = arith.constant 0 : i32
    return %arg0, %c0_i32, %c0_i32_0, %c0_i32_1 : i32, i32, i32, i32
  }
  func.func @transform_1(%arg0: i32) -> (i32, i32) {
    %c0_i32 = arith.constant 0 : i32
    %c0_i32_0 = arith.constant 0 : i32
    %c0_i32_1 = arith.constant 0 : i32
    return %c0_i32, %c0_i32_0 : i32, i32
  }
  func.func @transform_2(%arg0: i32) -> (i32, i32) {
    %c0_i32 = arith.constant 0 : i32
    %c0_i32_0 = arith.constant 0 : i32
    %c0_i32_1 = arith.constant 0 : i32
    return %c0_i32, %c0_i32_0 : i32, i32
  }
  func.func @transform_3(%arg0: i32) -> (i32, i32, i32, i32) {
    %c0_i32 = arith.constant 0 : i32
    %c0_i32_0 = arith.constant 0 : i32
    %c0_i32_1 = arith.constant 0 : i32
    %c0_i32_2 = arith.constant 0 : i32
    return %arg0, %c0_i32, %c0_i32_0, %c0_i32_1 : i32, i32, i32, i32
  }
}

module attributes {stable_mosaic.version = 11 : i64} {
  func.func @kernel(%arg0: i32, %arg1: memref<1x10x10x32xf32, #tpu.memory_space<vmem>>, %arg2: memref<288x64xbf16, #tpu.memory_space<vmem>>, %arg3: memref<1x64xf32, #tpu.memory_space<vmem>>, %arg4: memref<1x8x8x64xf32, #tpu.memory_space<vmem>>, %arg5: memref<64x288xbf16, #tpu.memory_space<vmem>>) attributes {dimension_semantics = [#tpu.dimension_semantics<parallel>], iteration_bounds = array<i64: 2>, scalar_prefetch = 0 : i64, scratch_operands = 1 : i64, tpu.core_type = #tpu.core_type<tc>, window_params = [{transform_indices = @transform_0, window_bounds = array<i64: 1, 10, 10, 32>}, {pipeline_mode = #tpu.pipeline_mode<synchronous>, transform_indices = @transform_1, window_bounds = array<i64: 288, 64>}, {pipeline_mode = #tpu.pipeline_mode<synchronous>, transform_indices = @transform_2, window_bounds = array<i64: 1, 64>}, {transform_indices = @transform_3, window_bounds = array<i64: 1, 8, 8, 64>}]} {
    %c0 = arith.constant 0 : index
    %c0_0 = arith.constant 0 : index
    %c0_1 = arith.constant 0 : index
    %c0_2 = arith.constant 0 : index
    %0 = vector.load %arg1[%c0, %c0_0, %c0_1, %c0_2] : memref<1x10x10x32xf32, #tpu.memory_space<vmem>>, vector<1x8x8x32xf32>
    %1 = vector.shape_cast %0 : vector<1x8x8x32xf32> to vector<8x8x32xf32>
    %2 = vector.shape_cast %1 : vector<8x8x32xf32> to vector<64x32xf32>
    %3 = arith.truncf %2 : vector<64x32xf32> to vector<64x32xbf16>
    %c0_3 = arith.constant 0 : index
    %c0_4 = arith.constant 0 : index
    %4 = vector.load %arg5[%c0_3, %c0_4] : memref<64x288xbf16, #tpu.memory_space<vmem>>, vector<64x32xbf16>
    tpu.vector_store %arg5[%c0_3, %c0_4], %3 {strides = array<i32>} : memref<64x288xbf16, #tpu.memory_space<vmem>>, vector<64x32xbf16>,
    %c0_5 = arith.constant 0 : index
    %c0_6 = arith.constant 0 : index
    %c1 = arith.constant 1 : index
    %c0_7 = arith.constant 0 : index
    %5 = vector.load %arg1[%c0_5, %c0_6, %c1, %c0_7] : memref<1x10x10x32xf32, #tpu.memory_space<vmem>>, vector<1x8x8x32xf32>
    %6 = vector.shape_cast %5 : vector<1x8x8x32xf32> to vector<8x8x32xf32>
    %7 = vector.shape_cast %6 : vector<8x8x32xf32> to vector<64x32xf32>
    %8 = arith.truncf %7 : vector<64x32xf32> to vector<64x32xbf16>
    %c0_8 = arith.constant 0 : index
    %c32 = arith.constant 32 : index
    %9 = vector.load %arg5[%c0_8, %c32] : memref<64x288xbf16, #tpu.memory_space<vmem>>, vector<64x32xbf16>
    tpu.vector_store %arg5[%c0_8, %c32], %8 {strides = array<i32>} : memref<64x288xbf16, #tpu.memory_space<vmem>>, vector<64x32xbf16>,
    %c0_9 = arith.constant 0 : index
    %c0_10 = arith.constant 0 : index
    %c2 = arith.constant 2 : index
    %c0_11 = arith.constant 0 : index
    %10 = vector.load %arg1[%c0_9, %c0_10, %c2, %c0_11] : memref<1x10x10x32xf32, #tpu.memory_space<vmem>>, vector<1x8x8x32xf32>
    %11 = vector.shape_cast %10 : vector<1x8x8x32xf32> to vector<8x8x32xf32>
    %12 = vector.shape_cast %11 : vector<8x8x32xf32> to vector<64x32xf32>
    %13 = arith.truncf %12 : vector<64x32xf32> to vector<64x32xbf16>
    %c0_12 = arith.constant 0 : index
    %c64 = arith.constant 64 : index
    %14 = vector.load %arg5[%c0_12, %c64] : memref<64x288xbf16, #tpu.memory_space<vmem>>, vector<64x32xbf16>
    tpu.vector_store %arg5[%c0_12, %c64], %13 {strides = array<i32>} : memref<64x288xbf16, #tpu.memory_space<vmem>>, vector<64x32xbf16>,
    %c0_13 = arith.constant 0 : index
    %c1_14 = arith.constant 1 : index
    %c0_15 = arith.constant 0 : index
    %c0_16 = arith.constant 0 : index
    %15 = vector.load %arg1[%c0_13, %c1_14, %c0_15, %c0_16] : memref<1x10x10x32xf32, #tpu.memory_space<vmem>>, vector<1x8x8x32xf32>
    %16 = vector.shape_cast %15 : vector<1x8x8x32xf32> to vector<8x8x32xf32>
    %17 = vector.shape_cast %16 : vector<8x8x32xf32> to vector<64x32xf32>
    %18 = arith.truncf %17 : vector<64x32xf32> to vector<64x32xbf16>
    %c0_17 = arith.constant 0 : index
    %c96 = arith.constant 96 : index
    %19 = vector.load %arg5[%c0_17, %c96] : memref<64x288xbf16, #tpu.memory_space<vmem>>, vector<64x32xbf16>
    tpu.vector_store %arg5[%c0_17, %c96], %18 {strides = array<i32>} : memref<64x288xbf16, #tpu.memory_space<vmem>>, vector<64x32xbf16>,
    %c0_18 = arith.constant 0 : index
    %c1_19 = arith.constant 1 : index
    %c1_20 = arith.constant 1 : index
    %c0_21 = arith.constant 0 : index
    %20 = vector.load %arg1[%c0_18, %c1_19, %c1_20, %c0_21] : memref<1x10x10x32xf32, #tpu.memory_space<vmem>>, vector<1x8x8x32xf32>
    %21 = vector.shape_cast %20 : vector<1x8x8x32xf32> to vector<8x8x32xf32>
    %22 = vector.shape_cast %21 : vector<8x8x32xf32> to vector<64x32xf32>
    %23 = arith.truncf %22 : vector<64x32xf32> to vector<64x32xbf16>
    %c0_22 = arith.constant 0 : index
    %c128 = arith.constant 128 : index
    %24 = vector.load %arg5[%c0_22, %c128] : memref<64x288xbf16, #tpu.memory_space<vmem>>, vector<64x32xbf16>
    tpu.vector_store %arg5[%c0_22, %c128], %23 {strides = array<i32>} : memref<64x288xbf16, #tpu.memory_space<vmem>>, vector<64x32xbf16>,
    %c0_23 = arith.constant 0 : index
    %c1_24 = arith.constant 1 : index
    %c2_25 = arith.constant 2 : index
    %c0_26 = arith.constant 0 : index
    %25 = vector.load %arg1[%c0_23, %c1_24, %c2_25, %c0_26] : memref<1x10x10x32xf32, #tpu.memory_space<vmem>>, vector<1x8x8x32xf32>
    %26 = vector.shape_cast %25 : vector<1x8x8x32xf32> to vector<8x8x32xf32>
    %27 = vector.shape_cast %26 : vector<8x8x32xf32> to vector<64x32xf32>
    %28 = arith.truncf %27 : vector<64x32xf32> to vector<64x32xbf16>
    %c0_27 = arith.constant 0 : index
    %c160 = arith.constant 160 : index
    %29 = vector.load %arg5[%c0_27, %c160] : memref<64x288xbf16, #tpu.memory_space<vmem>>, vector<64x32xbf16>
    tpu.vector_store %arg5[%c0_27, %c160], %28 {strides = array<i32>} : memref<64x288xbf16, #tpu.memory_space<vmem>>, vector<64x32xbf16>,
    %c0_28 = arith.constant 0 : index
    %c2_29 = arith.constant 2 : index
    %c0_30 = arith.constant 0 : index
    %c0_31 = arith.constant 0 : index
    %30 = vector.load %arg1[%c0_28, %c2_29, %c0_30, %c0_31] : memref<1x10x10x32xf32, #tpu.memory_space<vmem>>, vector<1x8x8x32xf32>
    %31 = vector.shape_cast %30 : vector<1x8x8x32xf32> to vector<8x8x32xf32>
    %32 = vector.shape_cast %31 : vector<8x8x32xf32> to vector<64x32xf32>
    %33 = arith.truncf %32 : vector<64x32xf32> to vector<64x32xbf16>
    %c0_32 = arith.constant 0 : index
    %c192 = arith.constant 192 : index
    %34 = vector.load %arg5[%c0_32, %c192] : memref<64x288xbf16, #tpu.memory_space<vmem>>, vector<64x32xbf16>
    tpu.vector_store %arg5[%c0_32, %c192], %33 {strides = array<i32>} : memref<64x288xbf16, #tpu.memory_space<vmem>>, vector<64x32xbf16>,
    %c0_33 = arith.constant 0 : index
    %c2_34 = arith.constant 2 : index
    %c1_35 = arith.constant 1 : index
    %c0_36 = arith.constant 0 : index
    %35 = vector.load %arg1[%c0_33, %c2_34, %c1_35, %c0_36] : memref<1x10x10x32xf32, #tpu.memory_space<vmem>>, vector<1x8x8x32xf32>
    %36 = vector.shape_cast %35 : vector<1x8x8x32xf32> to vector<8x8x32xf32>
    %37 = vector.shape_cast %36 : vector<8x8x32xf32> to vector<64x32xf32>
    %38 = arith.truncf %37 : vector<64x32xf32> to vector<64x32xbf16>
    %c0_37 = arith.constant 0 : index
    %c224 = arith.constant 224 : index
    %39 = vector.load %arg5[%c0_37, %c224] : memref<64x288xbf16, #tpu.memory_space<vmem>>, vector<64x32xbf16>
    tpu.vector_store %arg5[%c0_37, %c224], %38 {strides = array<i32>} : memref<64x288xbf16, #tpu.memory_space<vmem>>, vector<64x32xbf16>,
    %c0_38 = arith.constant 0 : index
    %c2_39 = arith.constant 2 : index
    %c2_40 = arith.constant 2 : index
    %c0_41 = arith.constant 0 : index
    %40 = vector.load %arg1[%c0_38, %c2_39, %c2_40, %c0_41] : memref<1x10x10x32xf32, #tpu.memory_space<vmem>>, vector<1x8x8x32xf32>
    %41 = vector.shape_cast %40 : vector<1x8x8x32xf32> to vector<8x8x32xf32>
    %42 = vector.shape_cast %41 : vector<8x8x32xf32> to vector<64x32xf32>
    %43 = arith.truncf %42 : vector<64x32xf32> to vector<64x32xbf16>
    %c0_42 = arith.constant 0 : index
    %c256 = arith.constant 256 : index
    %44 = vector.load %arg5[%c0_42, %c256] : memref<64x288xbf16, #tpu.memory_space<vmem>>, vector<64x32xbf16>
    tpu.vector_store %arg5[%c0_42, %c256], %43 {strides = array<i32>} : memref<64x288xbf16, #tpu.memory_space<vmem>>, vector<64x32xbf16>,
    %c0_43 = arith.constant 0 : index
    %c0_44 = arith.constant 0 : index
    %45 = vector.load %arg5[%c0_43, %c0_44] : memref<64x288xbf16, #tpu.memory_space<vmem>>, vector<64x288xbf16>
    %c0_45 = arith.constant 0 : index
    %c0_46 = arith.constant 0 : index
    %46 = vector.load %arg2[%c0_45, %c0_46] : memref<288x64xbf16, #tpu.memory_space<vmem>>, vector<288x64xbf16>
    %cst = arith.constant dense<0.000000e+00> : vector<64x64xf32>
    %47 = tpu.matmul %45, %46, %cst {dimension_numbers = #tpu.dot_dimension_numbers<[1], [0], [0], [1], [0, 0, 1, 1], [], []>} : vector<64x288xbf16>, vector<288x64xbf16>, vector<64x64xf32> -> vector<64x64xf32>
    %c0_47 = arith.constant 0 : index
    %c0_48 = arith.constant 0 : index
    %48 = vector.load %arg3[%c0_47, %c0_48] : memref<1x64xf32, #tpu.memory_space<vmem>>, vector<1x64xf32>
    %49 = vector.broadcast %48 : vector<1x64xf32> to vector<64x64xf32>
    %50 = arith.addf %47, %49 : vector<64x64xf32>
    %cst_49 = arith.constant 0.000000e+00 : f32
    %51 = vector.broadcast %cst_49 : f32 to vector<64x64xf32>
    %52 = arith.maximumf %50, %51 : vector<64x64xf32>
    %53 = vector.shape_cast %52 : vector<64x64xf32> to vector<8x8x64xf32>
    %c0_50 = arith.constant 0 : index
    %c0_51 = arith.constant 0 : index
    %c0_52 = arith.constant 0 : index
    %c0_53 = arith.constant 0 : index
    %54 = vector.load %arg4[%c0_50, %c0_51, %c0_52, %c0_53] : memref<1x8x8x64xf32, #tpu.memory_space<vmem>>, vector<1x8x8x64xf32>
    %55 = vector.shape_cast %54 : vector<1x8x8x64xf32> to vector<8x8x64xf32>
    %56 = vector.shape_cast %53 : vector<8x8x64xf32> to vector<1x8x8x64xf32>
    tpu.vector_store %arg4[%c0_50, %c0_51, %c0_52, %c0_53], %56 {strides = array<i32>} : memref<1x8x8x64xf32, #tpu.memory_space<vmem>>, vector<1x8x8x64xf32>,
    return
  }
  func.func @transform_0(%arg0: i32) -> (i32, i32, i32, i32) {
    %c0_i32 = arith.constant 0 : i32
    %c0_i32_0 = arith.constant 0 : i32
    %c0_i32_1 = arith.constant 0 : i32
    %c0_i32_2 = arith.constant 0 : i32
    return %arg0, %c0_i32, %c0_i32_0, %c0_i32_1 : i32, i32, i32, i32
  }
  func.func @transform_1(%arg0: i32) -> (i32, i32) {
    %c0_i32 = arith.constant 0 : i32
    %c0_i32_0 = arith.constant 0 : i32
    %c0_i32_1 = arith.constant 0 : i32
    return %c0_i32, %c0_i32_0 : i32, i32
  }
  func.func @transform_2(%arg0: i32) -> (i32, i32) {
    %c0_i32 = arith.constant 0 : i32
    %c0_i32_0 = arith.constant 0 : i32
    %c0_i32_1 = arith.constant 0 : i32
    return %c0_i32, %c0_i32_0 : i32, i32
  }
  func.func @transform_3(%arg0: i32) -> (i32, i32, i32, i32) {
    %c0_i32 = arith.constant 0 : i32
    %c0_i32_0 = arith.constant 0 : i32
    %c0_i32_1 = arith.constant 0 : i32
    %c0_i32_2 = arith.constant 0 : i32
    return %arg0, %c0_i32, %c0_i32_0, %c0_i32_1 : i32, i32, i32, i32
  }
}

module attributes {stable_mosaic.version = 11 : i64} {
  func.func @kernel(%arg0: i32, %arg1: memref<1x5x5x256xf32, #tpu.memory_space<vmem>>, %arg2: memref<576x64xbf16, #tpu.memory_space<vmem>>, %arg3: memref<1x64xf32, #tpu.memory_space<vmem>>, %arg4: memref<1x4x4x64xf32, #tpu.memory_space<vmem>>, %arg5: memref<16x576xbf16, #tpu.memory_space<vmem>>) attributes {dimension_semantics = [#tpu.dimension_semantics<parallel>], iteration_bounds = array<i64: 2>, scalar_prefetch = 0 : i64, scratch_operands = 1 : i64, tpu.core_type = #tpu.core_type<tc>, window_params = [{transform_indices = @transform_0, window_bounds = array<i64: 1, 5, 5, 256>}, {pipeline_mode = #tpu.pipeline_mode<synchronous>, transform_indices = @transform_1, window_bounds = array<i64: 576, 64>}, {pipeline_mode = #tpu.pipeline_mode<synchronous>, transform_indices = @transform_2, window_bounds = array<i64: 1, 64>}, {transform_indices = @transform_3, window_bounds = array<i64: 1, 4, 4, 64>}]} {
    %c0 = arith.constant 0 : index
    %c0_0 = arith.constant 0 : index
    %c0_1 = arith.constant 0 : index
    %c0_2 = arith.constant 0 : index
    %0 = vector.load %arg1[%c0, %c0_0, %c0_1, %c0_2] : memref<1x5x5x256xf32, #tpu.memory_space<vmem>>, vector<1x4x4x64xf32>
    %1 = vector.shape_cast %0 : vector<1x4x4x64xf32> to vector<4x4x64xf32>
    %2 = vector.shape_cast %1 : vector<4x4x64xf32> to vector<16x64xf32>
    %3 = arith.truncf %2 : vector<16x64xf32> to vector<16x64xbf16>
    %c0_3 = arith.constant 0 : index
    %c0_4 = arith.constant 0 : index
    %4 = vector.load %arg5[%c0_3, %c0_4] : memref<16x576xbf16, #tpu.memory_space<vmem>>, vector<16x64xbf16>
    tpu.vector_store %arg5[%c0_3, %c0_4], %3 {strides = array<i32>} : memref<16x576xbf16, #tpu.memory_space<vmem>>, vector<16x64xbf16>,
    %c0_5 = arith.constant 0 : index
    %c0_6 = arith.constant 0 : index
    %c0_7 = arith.constant 0 : index
    %c64 = arith.constant 64 : index
    %5 = vector.load %arg1[%c0_5, %c0_6, %c0_7, %c64] : memref<1x5x5x256xf32, #tpu.memory_space<vmem>>, vector<1x4x4x64xf32>
    %6 = vector.shape_cast %5 : vector<1x4x4x64xf32> to vector<4x4x64xf32>
    %7 = vector.shape_cast %6 : vector<4x4x64xf32> to vector<16x64xf32>
    %8 = arith.truncf %7 : vector<16x64xf32> to vector<16x64xbf16>
    %c0_8 = arith.constant 0 : index
    %c64_9 = arith.constant 64 : index
    %9 = vector.load %arg5[%c0_8, %c64_9] : memref<16x576xbf16, #tpu.memory_space<vmem>>, vector<16x64xbf16>
    tpu.vector_store %arg5[%c0_8, %c64_9], %8 {strides = array<i32>} : memref<16x576xbf16, #tpu.memory_space<vmem>>, vector<16x64xbf16>,
    %c0_10 = arith.constant 0 : index
    %c0_11 = arith.constant 0 : index
    %c1 = arith.constant 1 : index
    %c0_12 = arith.constant 0 : index
    %10 = vector.load %arg1[%c0_10, %c0_11, %c1, %c0_12] : memref<1x5x5x256xf32, #tpu.memory_space<vmem>>, vector<1x4x4x64xf32>
    %11 = vector.shape_cast %10 : vector<1x4x4x64xf32> to vector<4x4x64xf32>
    %12 = vector.shape_cast %11 : vector<4x4x64xf32> to vector<16x64xf32>
    %13 = arith.truncf %12 : vector<16x64xf32> to vector<16x64xbf16>
    %c0_13 = arith.constant 0 : index
    %c128 = arith.constant 128 : index
    %14 = vector.load %arg5[%c0_13, %c128] : memref<16x576xbf16, #tpu.memory_space<vmem>>, vector<16x64xbf16>
    tpu.vector_store %arg5[%c0_13, %c128], %13 {strides = array<i32>} : memref<16x576xbf16, #tpu.memory_space<vmem>>, vector<16x64xbf16>,
    %c0_14 = arith.constant 0 : index
    %c0_15 = arith.constant 0 : index
    %c0_16 = arith.constant 0 : index
    %c128_17 = arith.constant 128 : index
    %15 = vector.load %arg1[%c0_14, %c0_15, %c0_16, %c128_17] : memref<1x5x5x256xf32, #tpu.memory_space<vmem>>, vector<1x4x4x64xf32>
    %16 = vector.shape_cast %15 : vector<1x4x4x64xf32> to vector<4x4x64xf32>
    %17 = vector.shape_cast %16 : vector<4x4x64xf32> to vector<16x64xf32>
    %18 = arith.truncf %17 : vector<16x64xf32> to vector<16x64xbf16>
    %c0_18 = arith.constant 0 : index
    %c192 = arith.constant 192 : index
    %19 = vector.load %arg5[%c0_18, %c192] : memref<16x576xbf16, #tpu.memory_space<vmem>>, vector<16x64xbf16>
    tpu.vector_store %arg5[%c0_18, %c192], %18 {strides = array<i32>} : memref<16x576xbf16, #tpu.memory_space<vmem>>, vector<16x64xbf16>,
    %c0_19 = arith.constant 0 : index
    %c0_20 = arith.constant 0 : index
    %c0_21 = arith.constant 0 : index
    %c192_22 = arith.constant 192 : index
    %20 = vector.load %arg1[%c0_19, %c0_20, %c0_21, %c192_22] : memref<1x5x5x256xf32, #tpu.memory_space<vmem>>, vector<1x4x4x64xf32>
    %21 = vector.shape_cast %20 : vector<1x4x4x64xf32> to vector<4x4x64xf32>
    %22 = vector.shape_cast %21 : vector<4x4x64xf32> to vector<16x64xf32>
    %23 = arith.truncf %22 : vector<16x64xf32> to vector<16x64xbf16>
    %c0_23 = arith.constant 0 : index
    %c256 = arith.constant 256 : index
    %24 = vector.load %arg5[%c0_23, %c256] : memref<16x576xbf16, #tpu.memory_space<vmem>>, vector<16x64xbf16>
    tpu.vector_store %arg5[%c0_23, %c256], %23 {strides = array<i32>} : memref<16x576xbf16, #tpu.memory_space<vmem>>, vector<16x64xbf16>,
    %c0_24 = arith.constant 0 : index
    %c0_25 = arith.constant 0 : index
    %c1_26 = arith.constant 1 : index
    %c128_27 = arith.constant 128 : index
    %25 = vector.load %arg1[%c0_24, %c0_25, %c1_26, %c128_27] : memref<1x5x5x256xf32, #tpu.memory_space<vmem>>, vector<1x4x4x64xf32>
    %26 = vector.shape_cast %25 : vector<1x4x4x64xf32> to vector<4x4x64xf32>
    %27 = vector.shape_cast %26 : vector<4x4x64xf32> to vector<16x64xf32>
    %28 = arith.truncf %27 : vector<16x64xf32> to vector<16x64xbf16>
    %c0_28 = arith.constant 0 : index
    %c320 = arith.constant 320 : index
    %29 = vector.load %arg5[%c0_28, %c320] : memref<16x576xbf16, #tpu.memory_space<vmem>>, vector<16x64xbf16>
    tpu.vector_store %arg5[%c0_28, %c320], %28 {strides = array<i32>} : memref<16x576xbf16, #tpu.memory_space<vmem>>, vector<16x64xbf16>,
    %c0_29 = arith.constant 0 : index
    %c1_30 = arith.constant 1 : index
    %c0_31 = arith.constant 0 : index
    %c0_32 = arith.constant 0 : index
    %30 = vector.load %arg1[%c0_29, %c1_30, %c0_31, %c0_32] : memref<1x5x5x256xf32, #tpu.memory_space<vmem>>, vector<1x4x4x64xf32>
    %31 = vector.shape_cast %30 : vector<1x4x4x64xf32> to vector<4x4x64xf32>
    %32 = vector.shape_cast %31 : vector<4x4x64xf32> to vector<16x64xf32>
    %33 = arith.truncf %32 : vector<16x64xf32> to vector<16x64xbf16>
    %c0_33 = arith.constant 0 : index
    %c384 = arith.constant 384 : index
    %34 = vector.load %arg5[%c0_33, %c384] : memref<16x576xbf16, #tpu.memory_space<vmem>>, vector<16x64xbf16>
    tpu.vector_store %arg5[%c0_33, %c384], %33 {strides = array<i32>} : memref<16x576xbf16, #tpu.memory_space<vmem>>, vector<16x64xbf16>,
    %c0_34 = arith.constant 0 : index
    %c1_35 = arith.constant 1 : index
    %c0_36 = arith.constant 0 : index
    %c64_37 = arith.constant 64 : index
    %35 = vector.load %arg1[%c0_34, %c1_35, %c0_36, %c64_37] : memref<1x5x5x256xf32, #tpu.memory_space<vmem>>, vector<1x4x4x64xf32>
    %36 = vector.shape_cast %35 : vector<1x4x4x64xf32> to vector<4x4x64xf32>
    %37 = vector.shape_cast %36 : vector<4x4x64xf32> to vector<16x64xf32>
    %38 = arith.truncf %37 : vector<16x64xf32> to vector<16x64xbf16>
    %c0_38 = arith.constant 0 : index
    %c448 = arith.constant 448 : index
    %39 = vector.load %arg5[%c0_38, %c448] : memref<16x576xbf16, #tpu.memory_space<vmem>>, vector<16x64xbf16>
    tpu.vector_store %arg5[%c0_38, %c448], %38 {strides = array<i32>} : memref<16x576xbf16, #tpu.memory_space<vmem>>, vector<16x64xbf16>,
    %c0_39 = arith.constant 0 : index
    %c1_40 = arith.constant 1 : index
    %c1_41 = arith.constant 1 : index
    %c0_42 = arith.constant 0 : index
    %40 = vector.load %arg1[%c0_39, %c1_40, %c1_41, %c0_42] : memref<1x5x5x256xf32, #tpu.memory_space<vmem>>, vector<1x4x4x64xf32>
    %41 = vector.shape_cast %40 : vector<1x4x4x64xf32> to vector<4x4x64xf32>
    %42 = vector.shape_cast %41 : vector<4x4x64xf32> to vector<16x64xf32>
    %43 = arith.truncf %42 : vector<16x64xf32> to vector<16x64xbf16>
    %c0_43 = arith.constant 0 : index
    %c512 = arith.constant 512 : index
    %44 = vector.load %arg5[%c0_43, %c512] : memref<16x576xbf16, #tpu.memory_space<vmem>>, vector<16x64xbf16>
    tpu.vector_store %arg5[%c0_43, %c512], %43 {strides = array<i32>} : memref<16x576xbf16, #tpu.memory_space<vmem>>, vector<16x64xbf16>,
    %c0_44 = arith.constant 0 : index
    %c0_45 = arith.constant 0 : index
    %45 = vector.load %arg5[%c0_44, %c0_45] : memref<16x576xbf16, #tpu.memory_space<vmem>>, vector<16x576xbf16>
    %c0_46 = arith.constant 0 : index
    %c0_47 = arith.constant 0 : index
    %46 = vector.load %arg2[%c0_46, %c0_47] : memref<576x64xbf16, #tpu.memory_space<vmem>>, vector<576x64xbf16>
    %cst = arith.constant dense<0.000000e+00> : vector<16x64xf32>
    %47 = tpu.matmul %45, %46, %cst {dimension_numbers = #tpu.dot_dimension_numbers<[1], [0], [0], [1], [0, 0, 1, 1], [], []>} : vector<16x576xbf16>, vector<576x64xbf16>, vector<16x64xf32> -> vector<16x64xf32>
    %c0_48 = arith.constant 0 : index
    %c0_49 = arith.constant 0 : index
    %48 = vector.load %arg3[%c0_48, %c0_49] : memref<1x64xf32, #tpu.memory_space<vmem>>, vector<1x64xf32>
    %49 = vector.broadcast %48 : vector<1x64xf32> to vector<16x64xf32>
    %50 = arith.addf %47, %49 : vector<16x64xf32>
    %cst_50 = arith.constant 0.000000e+00 : f32
    %51 = vector.broadcast %cst_50 : f32 to vector<16x64xf32>
    %52 = arith.maximumf %50, %51 : vector<16x64xf32>
    %53 = vector.shape_cast %52 : vector<16x64xf32> to vector<4x4x64xf32>
    %c0_51 = arith.constant 0 : index
    %c0_52 = arith.constant 0 : index
    %c0_53 = arith.constant 0 : index
    %c0_54 = arith.constant 0 : index
    %54 = vector.load %arg4[%c0_51, %c0_52, %c0_53, %c0_54] : memref<1x4x4x64xf32, #tpu.memory_space<vmem>>, vector<1x4x4x64xf32>
    %55 = vector.shape_cast %54 : vector<1x4x4x64xf32> to vector<4x4x64xf32>
    %56 = vector.shape_cast %53 : vector<4x4x64xf32> to vector<1x4x4x64xf32>
    tpu.vector_store %arg4[%c0_51, %c0_52, %c0_53, %c0_54], %56 {strides = array<i32>} : memref<1x4x4x64xf32, #tpu.memory_space<vmem>>, vector<1x4x4x64xf32>,
    return
  }
  func.func @transform_0(%arg0: i32) -> (i32, i32, i32, i32) {
    %c0_i32 = arith.constant 0 : i32
    %c0_i32_0 = arith.constant 0 : i32
    %c0_i32_1 = arith.constant 0 : i32
    %c0_i32_2 = arith.constant 0 : i32
    return %arg0, %c0_i32, %c0_i32_0, %c0_i32_1 : i32, i32, i32, i32
  }
  func.func @transform_1(%arg0: i32) -> (i32, i32) {
    %c0_i32 = arith.constant 0 : i32
    %c0_i32_0 = arith.constant 0 : i32
    %c0_i32_1 = arith.constant 0 : i32
    return %c0_i32, %c0_i32_0 : i32, i32
  }
  func.func @transform_2(%arg0: i32) -> (i32, i32) {
    %c0_i32 = arith.constant 0 : i32
    %c0_i32_0 = arith.constant 0 : i32
    %c0_i32_1 = arith.constant 0 : i32
    return %c0_i32, %c0_i32_0 : i32, i32
  }
  func.func @transform_3(%arg0: i32) -> (i32, i32, i32, i32) {
    %c0_i32 = arith.constant 0 : i32
    %c0_i32_0 = arith.constant 0 : i32
    %c0_i32_1 = arith.constant 0 : i32
    %c0_i32_2 = arith.constant 0 : i32
    return %arg0, %c0_i32, %c0_i32_0, %c0_i32_1 : i32, i32, i32, i32
  }
}

module attributes {stable_mosaic.version = 11 : i64} {
  func.func @kernel(%arg0: i32, %arg1: memref<1x6x6x64xf32, #tpu.memory_space<vmem>>, %arg2: memref<576x128xbf16, #tpu.memory_space<vmem>>, %arg3: memref<1x128xf32, #tpu.memory_space<vmem>>, %arg4: memref<1x4x4x128xf32, #tpu.memory_space<vmem>>, %arg5: memref<16x576xbf16, #tpu.memory_space<vmem>>) attributes {dimension_semantics = [#tpu.dimension_semantics<parallel>], iteration_bounds = array<i64: 2>, scalar_prefetch = 0 : i64, scratch_operands = 1 : i64, tpu.core_type = #tpu.core_type<tc>, window_params = [{transform_indices = @transform_0, window_bounds = array<i64: 1, 6, 6, 64>}, {pipeline_mode = #tpu.pipeline_mode<synchronous>, transform_indices = @transform_1, window_bounds = array<i64: 576, 128>}, {pipeline_mode = #tpu.pipeline_mode<synchronous>, transform_indices = @transform_2, window_bounds = array<i64: 1, 128>}, {transform_indices = @transform_3, window_bounds = array<i64: 1, 4, 4, 128>}]} {
    %c0 = arith.constant 0 : index
    %c0_0 = arith.constant 0 : index
    %c0_1 = arith.constant 0 : index
    %c0_2 = arith.constant 0 : index
    %0 = vector.load %arg1[%c0, %c0_0, %c0_1, %c0_2] : memref<1x6x6x64xf32, #tpu.memory_space<vmem>>, vector<1x4x4x64xf32>
    %1 = vector.shape_cast %0 : vector<1x4x4x64xf32> to vector<4x4x64xf32>
    %2 = vector.shape_cast %1 : vector<4x4x64xf32> to vector<16x64xf32>
    %3 = arith.truncf %2 : vector<16x64xf32> to vector<16x64xbf16>
    %c0_3 = arith.constant 0 : index
    %c0_4 = arith.constant 0 : index
    %4 = vector.load %arg5[%c0_3, %c0_4] : memref<16x576xbf16, #tpu.memory_space<vmem>>, vector<16x64xbf16>
    tpu.vector_store %arg5[%c0_3, %c0_4], %3 {strides = array<i32>} : memref<16x576xbf16, #tpu.memory_space<vmem>>, vector<16x64xbf16>,
    %c0_5 = arith.constant 0 : index
    %c0_6 = arith.constant 0 : index
    %c1 = arith.constant 1 : index
    %c0_7 = arith.constant 0 : index
    %5 = vector.load %arg1[%c0_5, %c0_6, %c1, %c0_7] : memref<1x6x6x64xf32, #tpu.memory_space<vmem>>, vector<1x4x4x64xf32>
    %6 = vector.shape_cast %5 : vector<1x4x4x64xf32> to vector<4x4x64xf32>
    %7 = vector.shape_cast %6 : vector<4x4x64xf32> to vector<16x64xf32>
    %8 = arith.truncf %7 : vector<16x64xf32> to vector<16x64xbf16>
    %c0_8 = arith.constant 0 : index
    %c64 = arith.constant 64 : index
    %9 = vector.load %arg5[%c0_8, %c64] : memref<16x576xbf16, #tpu.memory_space<vmem>>, vector<16x64xbf16>
    tpu.vector_store %arg5[%c0_8, %c64], %8 {strides = array<i32>} : memref<16x576xbf16, #tpu.memory_space<vmem>>, vector<16x64xbf16>,
    %c0_9 = arith.constant 0 : index
    %c0_10 = arith.constant 0 : index
    %c2 = arith.constant 2 : index
    %c0_11 = arith.constant 0 : index
    %10 = vector.load %arg1[%c0_9, %c0_10, %c2, %c0_11] : memref<1x6x6x64xf32, #tpu.memory_space<vmem>>, vector<1x4x4x64xf32>
    %11 = vector.shape_cast %10 : vector<1x4x4x64xf32> to vector<4x4x64xf32>
    %12 = vector.shape_cast %11 : vector<4x4x64xf32> to vector<16x64xf32>
    %13 = arith.truncf %12 : vector<16x64xf32> to vector<16x64xbf16>
    %c0_12 = arith.constant 0 : index
    %c128 = arith.constant 128 : index
    %14 = vector.load %arg5[%c0_12, %c128] : memref<16x576xbf16, #tpu.memory_space<vmem>>, vector<16x64xbf16>
    tpu.vector_store %arg5[%c0_12, %c128], %13 {strides = array<i32>} : memref<16x576xbf16, #tpu.memory_space<vmem>>, vector<16x64xbf16>,
    %c0_13 = arith.constant 0 : index
    %c1_14 = arith.constant 1 : index
    %c0_15 = arith.constant 0 : index
    %c0_16 = arith.constant 0 : index
    %15 = vector.load %arg1[%c0_13, %c1_14, %c0_15, %c0_16] : memref<1x6x6x64xf32, #tpu.memory_space<vmem>>, vector<1x4x4x64xf32>
    %16 = vector.shape_cast %15 : vector<1x4x4x64xf32> to vector<4x4x64xf32>
    %17 = vector.shape_cast %16 : vector<4x4x64xf32> to vector<16x64xf32>
    %18 = arith.truncf %17 : vector<16x64xf32> to vector<16x64xbf16>
    %c0_17 = arith.constant 0 : index
    %c192 = arith.constant 192 : index
    %19 = vector.load %arg5[%c0_17, %c192] : memref<16x576xbf16, #tpu.memory_space<vmem>>, vector<16x64xbf16>
    tpu.vector_store %arg5[%c0_17, %c192], %18 {strides = array<i32>} : memref<16x576xbf16, #tpu.memory_space<vmem>>, vector<16x64xbf16>,
    %c0_18 = arith.constant 0 : index
    %c1_19 = arith.constant 1 : index
    %c1_20 = arith.constant 1 : index
    %c0_21 = arith.constant 0 : index
    %20 = vector.load %arg1[%c0_18, %c1_19, %c1_20, %c0_21] : memref<1x6x6x64xf32, #tpu.memory_space<vmem>>, vector<1x4x4x64xf32>
    %21 = vector.shape_cast %20 : vector<1x4x4x64xf32> to vector<4x4x64xf32>
    %22 = vector.shape_cast %21 : vector<4x4x64xf32> to vector<16x64xf32>
    %23 = arith.truncf %22 : vector<16x64xf32> to vector<16x64xbf16>
    %c0_22 = arith.constant 0 : index
    %c256 = arith.constant 256 : index
    %24 = vector.load %arg5[%c0_22, %c256] : memref<16x576xbf16, #tpu.memory_space<vmem>>, vector<16x64xbf16>
    tpu.vector_store %arg5[%c0_22, %c256], %23 {strides = array<i32>} : memref<16x576xbf16, #tpu.memory_space<vmem>>, vector<16x64xbf16>,
    %c0_23 = arith.constant 0 : index
    %c1_24 = arith.constant 1 : index
    %c2_25 = arith.constant 2 : index
    %c0_26 = arith.constant 0 : index
    %25 = vector.load %arg1[%c0_23, %c1_24, %c2_25, %c0_26] : memref<1x6x6x64xf32, #tpu.memory_space<vmem>>, vector<1x4x4x64xf32>
    %26 = vector.shape_cast %25 : vector<1x4x4x64xf32> to vector<4x4x64xf32>
    %27 = vector.shape_cast %26 : vector<4x4x64xf32> to vector<16x64xf32>
    %28 = arith.truncf %27 : vector<16x64xf32> to vector<16x64xbf16>
    %c0_27 = arith.constant 0 : index
    %c320 = arith.constant 320 : index
    %29 = vector.load %arg5[%c0_27, %c320] : memref<16x576xbf16, #tpu.memory_space<vmem>>, vector<16x64xbf16>
    tpu.vector_store %arg5[%c0_27, %c320], %28 {strides = array<i32>} : memref<16x576xbf16, #tpu.memory_space<vmem>>, vector<16x64xbf16>,
    %c0_28 = arith.constant 0 : index
    %c2_29 = arith.constant 2 : index
    %c0_30 = arith.constant 0 : index
    %c0_31 = arith.constant 0 : index
    %30 = vector.load %arg1[%c0_28, %c2_29, %c0_30, %c0_31] : memref<1x6x6x64xf32, #tpu.memory_space<vmem>>, vector<1x4x4x64xf32>
    %31 = vector.shape_cast %30 : vector<1x4x4x64xf32> to vector<4x4x64xf32>
    %32 = vector.shape_cast %31 : vector<4x4x64xf32> to vector<16x64xf32>
    %33 = arith.truncf %32 : vector<16x64xf32> to vector<16x64xbf16>
    %c0_32 = arith.constant 0 : index
    %c384 = arith.constant 384 : index
    %34 = vector.load %arg5[%c0_32, %c384] : memref<16x576xbf16, #tpu.memory_space<vmem>>, vector<16x64xbf16>
    tpu.vector_store %arg5[%c0_32, %c384], %33 {strides = array<i32>} : memref<16x576xbf16, #tpu.memory_space<vmem>>, vector<16x64xbf16>,
    %c0_33 = arith.constant 0 : index
    %c2_34 = arith.constant 2 : index
    %c1_35 = arith.constant 1 : index
    %c0_36 = arith.constant 0 : index
    %35 = vector.load %arg1[%c0_33, %c2_34, %c1_35, %c0_36] : memref<1x6x6x64xf32, #tpu.memory_space<vmem>>, vector<1x4x4x64xf32>
    %36 = vector.shape_cast %35 : vector<1x4x4x64xf32> to vector<4x4x64xf32>
    %37 = vector.shape_cast %36 : vector<4x4x64xf32> to vector<16x64xf32>
    %38 = arith.truncf %37 : vector<16x64xf32> to vector<16x64xbf16>
    %c0_37 = arith.constant 0 : index
    %c448 = arith.constant 448 : index
    %39 = vector.load %arg5[%c0_37, %c448] : memref<16x576xbf16, #tpu.memory_space<vmem>>, vector<16x64xbf16>
    tpu.vector_store %arg5[%c0_37, %c448], %38 {strides = array<i32>} : memref<16x576xbf16, #tpu.memory_space<vmem>>, vector<16x64xbf16>,
    %c0_38 = arith.constant 0 : index
    %c2_39 = arith.constant 2 : index
    %c2_40 = arith.constant 2 : index
    %c0_41 = arith.constant 0 : index
    %40 = vector.load %arg1[%c0_38, %c2_39, %c2_40, %c0_41] : memref<1x6x6x64xf32, #tpu.memory_space<vmem>>, vector<1x4x4x64xf32>
    %41 = vector.shape_cast %40 : vector<1x4x4x64xf32> to vector<4x4x64xf32>
    %42 = vector.shape_cast %41 : vector<4x4x64xf32> to vector<16x64xf32>
    %43 = arith.truncf %42 : vector<16x64xf32> to vector<16x64xbf16>
    %c0_42 = arith.constant 0 : index
    %c512 = arith.constant 512 : index
    %44 = vector.load %arg5[%c0_42, %c512] : memref<16x576xbf16, #tpu.memory_space<vmem>>, vector<16x64xbf16>
    tpu.vector_store %arg5[%c0_42, %c512], %43 {strides = array<i32>} : memref<16x576xbf16, #tpu.memory_space<vmem>>, vector<16x64xbf16>,
    %c0_43 = arith.constant 0 : index
    %c0_44 = arith.constant 0 : index
    %45 = vector.load %arg5[%c0_43, %c0_44] : memref<16x576xbf16, #tpu.memory_space<vmem>>, vector<16x576xbf16>
    %c0_45 = arith.constant 0 : index
    %c0_46 = arith.constant 0 : index
    %46 = vector.load %arg2[%c0_45, %c0_46] : memref<576x128xbf16, #tpu.memory_space<vmem>>, vector<576x128xbf16>
    %cst = arith.constant dense<0.000000e+00> : vector<16x128xf32>
    %47 = tpu.matmul %45, %46, %cst {dimension_numbers = #tpu.dot_dimension_numbers<[1], [0], [0], [1], [0, 0, 1, 1], [], []>} : vector<16x576xbf16>, vector<576x128xbf16>, vector<16x128xf32> -> vector<16x128xf32>
    %c0_47 = arith.constant 0 : index
    %c0_48 = arith.constant 0 : index
    %48 = vector.load %arg3[%c0_47, %c0_48] : memref<1x128xf32, #tpu.memory_space<vmem>>, vector<1x128xf32>
    %49 = vector.broadcast %48 : vector<1x128xf32> to vector<16x128xf32>
    %50 = arith.addf %47, %49 : vector<16x128xf32>
    %cst_49 = arith.constant 0.000000e+00 : f32
    %51 = vector.broadcast %cst_49 : f32 to vector<16x128xf32>
    %52 = arith.maximumf %50, %51 : vector<16x128xf32>
    %53 = vector.shape_cast %52 : vector<16x128xf32> to vector<4x4x128xf32>
    %c0_50 = arith.constant 0 : index
    %c0_51 = arith.constant 0 : index
    %c0_52 = arith.constant 0 : index
    %c0_53 = arith.constant 0 : index
    %54 = vector.load %arg4[%c0_50, %c0_51, %c0_52, %c0_53] : memref<1x4x4x128xf32, #tpu.memory_space<vmem>>, vector<1x4x4x128xf32>
    %55 = vector.shape_cast %54 : vector<1x4x4x128xf32> to vector<4x4x128xf32>
    %56 = vector.shape_cast %53 : vector<4x4x128xf32> to vector<1x4x4x128xf32>
    tpu.vector_store %arg4[%c0_50, %c0_51, %c0_52, %c0_53], %56 {strides = array<i32>} : memref<1x4x4x128xf32, #tpu.memory_space<vmem>>, vector<1x4x4x128xf32>,
    return
  }
  func.func @transform_0(%arg0: i32) -> (i32, i32, i32, i32) {
    %c0_i32 = arith.constant 0 : i32
    %c0_i32_0 = arith.constant 0 : i32
    %c0_i32_1 = arith.constant 0 : i32
    %c0_i32_2 = arith.constant 0 : i32
    return %arg0, %c0_i32, %c0_i32_0, %c0_i32_1 : i32, i32, i32, i32
  }
  func.func @transform_1(%arg0: i32) -> (i32, i32) {
    %c0_i32 = arith.constant 0 : i32
    %c0_i32_0 = arith.constant 0 : i32
    %c0_i32_1 = arith.constant 0 : i32
    return %c0_i32, %c0_i32_0 : i32, i32
  }
  func.func @transform_2(%arg0: i32) -> (i32, i32) {
    %c0_i32 = arith.constant 0 : i32
    %c0_i32_0 = arith.constant 0 : i32
    %c0_i32_1 = arith.constant 0 : i32
    return %c0_i32, %c0_i32_0 : i32, i32
  }
  func.func @transform_3(%arg0: i32) -> (i32, i32, i32, i32) {
    %c0_i32 = arith.constant 0 : i32
    %c0_i32_0 = arith.constant 0 : i32
    %c0_i32_1 = arith.constant 0 : i32
    %c0_i32_2 = arith.constant 0 : i32
    return %arg0, %c0_i32, %c0_i32_0, %c0_i32_1 : i32, i32, i32, i32
  }
}

module attributes {stable_mosaic.version = 11 : i64} {
  func.func @kernel(%arg0: i32, %arg1: memref<1x3x3x512xf32, #tpu.memory_space<vmem>>, %arg2: memref<1152x128xbf16, #tpu.memory_space<vmem>>, %arg3: memref<1x128xf32, #tpu.memory_space<vmem>>, %arg4: memref<1x2x2x128xf32, #tpu.memory_space<vmem>>, %arg5: memref<4x1152xbf16, #tpu.memory_space<vmem>>) attributes {dimension_semantics = [#tpu.dimension_semantics<parallel>], iteration_bounds = array<i64: 2>, scalar_prefetch = 0 : i64, scratch_operands = 1 : i64, tpu.core_type = #tpu.core_type<tc>, window_params = [{transform_indices = @transform_0, window_bounds = array<i64: 1, 3, 3, 512>}, {pipeline_mode = #tpu.pipeline_mode<synchronous>, transform_indices = @transform_1, window_bounds = array<i64: 1152, 128>}, {pipeline_mode = #tpu.pipeline_mode<synchronous>, transform_indices = @transform_2, window_bounds = array<i64: 1, 128>}, {transform_indices = @transform_3, window_bounds = array<i64: 1, 2, 2, 128>}]} {
    %c0 = arith.constant 0 : index
    %c0_0 = arith.constant 0 : index
    %c0_1 = arith.constant 0 : index
    %c0_2 = arith.constant 0 : index
    %0 = vector.load %arg1[%c0, %c0_0, %c0_1, %c0_2] : memref<1x3x3x512xf32, #tpu.memory_space<vmem>>, vector<1x2x2x128xf32>
    %1 = vector.shape_cast %0 : vector<1x2x2x128xf32> to vector<2x2x128xf32>
    %2 = vector.shape_cast %1 : vector<2x2x128xf32> to vector<4x128xf32>
    %3 = arith.truncf %2 : vector<4x128xf32> to vector<4x128xbf16>
    %c0_3 = arith.constant 0 : index
    %c0_4 = arith.constant 0 : index
    %4 = vector.load %arg5[%c0_3, %c0_4] : memref<4x1152xbf16, #tpu.memory_space<vmem>>, vector<4x128xbf16>
    tpu.vector_store %arg5[%c0_3, %c0_4], %3 {strides = array<i32>} : memref<4x1152xbf16, #tpu.memory_space<vmem>>, vector<4x128xbf16>,
    %c0_5 = arith.constant 0 : index
    %c0_6 = arith.constant 0 : index
    %c0_7 = arith.constant 0 : index
    %c128 = arith.constant 128 : index
    %5 = vector.load %arg1[%c0_5, %c0_6, %c0_7, %c128] : memref<1x3x3x512xf32, #tpu.memory_space<vmem>>, vector<1x2x2x128xf32>
    %6 = vector.shape_cast %5 : vector<1x2x2x128xf32> to vector<2x2x128xf32>
    %7 = vector.shape_cast %6 : vector<2x2x128xf32> to vector<4x128xf32>
    %8 = arith.truncf %7 : vector<4x128xf32> to vector<4x128xbf16>
    %c0_8 = arith.constant 0 : index
    %c128_9 = arith.constant 128 : index
    %9 = vector.load %arg5[%c0_8, %c128_9] : memref<4x1152xbf16, #tpu.memory_space<vmem>>, vector<4x128xbf16>
    tpu.vector_store %arg5[%c0_8, %c128_9], %8 {strides = array<i32>} : memref<4x1152xbf16, #tpu.memory_space<vmem>>, vector<4x128xbf16>,
    %c0_10 = arith.constant 0 : index
    %c0_11 = arith.constant 0 : index
    %c1 = arith.constant 1 : index
    %c0_12 = arith.constant 0 : index
    %10 = vector.load %arg1[%c0_10, %c0_11, %c1, %c0_12] : memref<1x3x3x512xf32, #tpu.memory_space<vmem>>, vector<1x2x2x128xf32>
    %11 = vector.shape_cast %10 : vector<1x2x2x128xf32> to vector<2x2x128xf32>
    %12 = vector.shape_cast %11 : vector<2x2x128xf32> to vector<4x128xf32>
    %13 = arith.truncf %12 : vector<4x128xf32> to vector<4x128xbf16>
    %c0_13 = arith.constant 0 : index
    %c256 = arith.constant 256 : index
    %14 = vector.load %arg5[%c0_13, %c256] : memref<4x1152xbf16, #tpu.memory_space<vmem>>, vector<4x128xbf16>
    tpu.vector_store %arg5[%c0_13, %c256], %13 {strides = array<i32>} : memref<4x1152xbf16, #tpu.memory_space<vmem>>, vector<4x128xbf16>,
    %c0_14 = arith.constant 0 : index
    %c0_15 = arith.constant 0 : index
    %c0_16 = arith.constant 0 : index
    %c256_17 = arith.constant 256 : index
    %15 = vector.load %arg1[%c0_14, %c0_15, %c0_16, %c256_17] : memref<1x3x3x512xf32, #tpu.memory_space<vmem>>, vector<1x2x2x128xf32>
    %16 = vector.shape_cast %15 : vector<1x2x2x128xf32> to vector<2x2x128xf32>
    %17 = vector.shape_cast %16 : vector<2x2x128xf32> to vector<4x128xf32>
    %18 = arith.truncf %17 : vector<4x128xf32> to vector<4x128xbf16>
    %c0_18 = arith.constant 0 : index
    %c384 = arith.constant 384 : index
    %19 = vector.load %arg5[%c0_18, %c384] : memref<4x1152xbf16, #tpu.memory_space<vmem>>, vector<4x128xbf16>
    tpu.vector_store %arg5[%c0_18, %c384], %18 {strides = array<i32>} : memref<4x1152xbf16, #tpu.memory_space<vmem>>, vector<4x128xbf16>,
    %c0_19 = arith.constant 0 : index
    %c0_20 = arith.constant 0 : index
    %c0_21 = arith.constant 0 : index
    %c384_22 = arith.constant 384 : index
    %20 = vector.load %arg1[%c0_19, %c0_20, %c0_21, %c384_22] : memref<1x3x3x512xf32, #tpu.memory_space<vmem>>, vector<1x2x2x128xf32>
    %21 = vector.shape_cast %20 : vector<1x2x2x128xf32> to vector<2x2x128xf32>
    %22 = vector.shape_cast %21 : vector<2x2x128xf32> to vector<4x128xf32>
    %23 = arith.truncf %22 : vector<4x128xf32> to vector<4x128xbf16>
    %c0_23 = arith.constant 0 : index
    %c512 = arith.constant 512 : index
    %24 = vector.load %arg5[%c0_23, %c512] : memref<4x1152xbf16, #tpu.memory_space<vmem>>, vector<4x128xbf16>
    tpu.vector_store %arg5[%c0_23, %c512], %23 {strides = array<i32>} : memref<4x1152xbf16, #tpu.memory_space<vmem>>, vector<4x128xbf16>,
    %c0_24 = arith.constant 0 : index
    %c0_25 = arith.constant 0 : index
    %c1_26 = arith.constant 1 : index
    %c256_27 = arith.constant 256 : index
    %25 = vector.load %arg1[%c0_24, %c0_25, %c1_26, %c256_27] : memref<1x3x3x512xf32, #tpu.memory_space<vmem>>, vector<1x2x2x128xf32>
    %26 = vector.shape_cast %25 : vector<1x2x2x128xf32> to vector<2x2x128xf32>
    %27 = vector.shape_cast %26 : vector<2x2x128xf32> to vector<4x128xf32>
    %28 = arith.truncf %27 : vector<4x128xf32> to vector<4x128xbf16>
    %c0_28 = arith.constant 0 : index
    %c640 = arith.constant 640 : index
    %29 = vector.load %arg5[%c0_28, %c640] : memref<4x1152xbf16, #tpu.memory_space<vmem>>, vector<4x128xbf16>
    tpu.vector_store %arg5[%c0_28, %c640], %28 {strides = array<i32>} : memref<4x1152xbf16, #tpu.memory_space<vmem>>, vector<4x128xbf16>,
    %c0_29 = arith.constant 0 : index
    %c1_30 = arith.constant 1 : index
    %c0_31 = arith.constant 0 : index
    %c0_32 = arith.constant 0 : index
    %30 = vector.load %arg1[%c0_29, %c1_30, %c0_31, %c0_32] : memref<1x3x3x512xf32, #tpu.memory_space<vmem>>, vector<1x2x2x128xf32>
    %31 = vector.shape_cast %30 : vector<1x2x2x128xf32> to vector<2x2x128xf32>
    %32 = vector.shape_cast %31 : vector<2x2x128xf32> to vector<4x128xf32>
    %33 = arith.truncf %32 : vector<4x128xf32> to vector<4x128xbf16>
    %c0_33 = arith.constant 0 : index
    %c768 = arith.constant 768 : index
    %34 = vector.load %arg5[%c0_33, %c768] : memref<4x1152xbf16, #tpu.memory_space<vmem>>, vector<4x128xbf16>
    tpu.vector_store %arg5[%c0_33, %c768], %33 {strides = array<i32>} : memref<4x1152xbf16, #tpu.memory_space<vmem>>, vector<4x128xbf16>,
    %c0_34 = arith.constant 0 : index
    %c1_35 = arith.constant 1 : index
    %c0_36 = arith.constant 0 : index
    %c128_37 = arith.constant 128 : index
    %35 = vector.load %arg1[%c0_34, %c1_35, %c0_36, %c128_37] : memref<1x3x3x512xf32, #tpu.memory_space<vmem>>, vector<1x2x2x128xf32>
    %36 = vector.shape_cast %35 : vector<1x2x2x128xf32> to vector<2x2x128xf32>
    %37 = vector.shape_cast %36 : vector<2x2x128xf32> to vector<4x128xf32>
    %38 = arith.truncf %37 : vector<4x128xf32> to vector<4x128xbf16>
    %c0_38 = arith.constant 0 : index
    %c896 = arith.constant 896 : index
    %39 = vector.load %arg5[%c0_38, %c896] : memref<4x1152xbf16, #tpu.memory_space<vmem>>, vector<4x128xbf16>
    tpu.vector_store %arg5[%c0_38, %c896], %38 {strides = array<i32>} : memref<4x1152xbf16, #tpu.memory_space<vmem>>, vector<4x128xbf16>,
    %c0_39 = arith.constant 0 : index
    %c1_40 = arith.constant 1 : index
    %c1_41 = arith.constant 1 : index
    %c0_42 = arith.constant 0 : index
    %40 = vector.load %arg1[%c0_39, %c1_40, %c1_41, %c0_42] : memref<1x3x3x512xf32, #tpu.memory_space<vmem>>, vector<1x2x2x128xf32>
    %41 = vector.shape_cast %40 : vector<1x2x2x128xf32> to vector<2x2x128xf32>
    %42 = vector.shape_cast %41 : vector<2x2x128xf32> to vector<4x128xf32>
    %43 = arith.truncf %42 : vector<4x128xf32> to vector<4x128xbf16>
    %c0_43 = arith.constant 0 : index
    %c1024 = arith.constant 1024 : index
    %44 = vector.load %arg5[%c0_43, %c1024] : memref<4x1152xbf16, #tpu.memory_space<vmem>>, vector<4x128xbf16>
    tpu.vector_store %arg5[%c0_43, %c1024], %43 {strides = array<i32>} : memref<4x1152xbf16, #tpu.memory_space<vmem>>, vector<4x128xbf16>,
    %c0_44 = arith.constant 0 : index
    %c0_45 = arith.constant 0 : index
    %45 = vector.load %arg5[%c0_44, %c0_45] : memref<4x1152xbf16, #tpu.memory_space<vmem>>, vector<4x1152xbf16>
    %c0_46 = arith.constant 0 : index
    %c0_47 = arith.constant 0 : index
    %46 = vector.load %arg2[%c0_46, %c0_47] : memref<1152x128xbf16, #tpu.memory_space<vmem>>, vector<1152x128xbf16>
    %cst = arith.constant dense<0.000000e+00> : vector<4x128xf32>
    %47 = tpu.matmul %45, %46, %cst {dimension_numbers = #tpu.dot_dimension_numbers<[1], [0], [0], [1], [0, 0, 1, 1], [], []>} : vector<4x1152xbf16>, vector<1152x128xbf16>, vector<4x128xf32> -> vector<4x128xf32>
    %c0_48 = arith.constant 0 : index
    %c0_49 = arith.constant 0 : index
    %48 = vector.load %arg3[%c0_48, %c0_49] : memref<1x128xf32, #tpu.memory_space<vmem>>, vector<1x128xf32>
    %49 = vector.broadcast %48 : vector<1x128xf32> to vector<4x128xf32>
    %50 = arith.addf %47, %49 : vector<4x128xf32>
    %cst_50 = arith.constant 0.000000e+00 : f32
    %51 = vector.broadcast %cst_50 : f32 to vector<4x128xf32>
    %52 = arith.maximumf %50, %51 : vector<4x128xf32>
    %53 = vector.shape_cast %52 : vector<4x128xf32> to vector<2x2x128xf32>
    %c0_51 = arith.constant 0 : index
    %c0_52 = arith.constant 0 : index
    %c0_53 = arith.constant 0 : index
    %c0_54 = arith.constant 0 : index
    %54 = vector.load %arg4[%c0_51, %c0_52, %c0_53, %c0_54] : memref<1x2x2x128xf32, #tpu.memory_space<vmem>>, vector<1x2x2x128xf32>
    %55 = vector.shape_cast %54 : vector<1x2x2x128xf32> to vector<2x2x128xf32>
    %56 = vector.shape_cast %53 : vector<2x2x128xf32> to vector<1x2x2x128xf32>
    tpu.vector_store %arg4[%c0_51, %c0_52, %c0_53, %c0_54], %56 {strides = array<i32>} : memref<1x2x2x128xf32, #tpu.memory_space<vmem>>, vector<1x2x2x128xf32>,
    return
  }
  func.func @transform_0(%arg0: i32) -> (i32, i32, i32, i32) {
    %c0_i32 = arith.constant 0 : i32
    %c0_i32_0 = arith.constant 0 : i32
    %c0_i32_1 = arith.constant 0 : i32
    %c0_i32_2 = arith.constant 0 : i32
    return %arg0, %c0_i32, %c0_i32_0, %c0_i32_1 : i32, i32, i32, i32
  }
  func.func @transform_1(%arg0: i32) -> (i32, i32) {
    %c0_i32 = arith.constant 0 : i32
    %c0_i32_0 = arith.constant 0 : i32
    %c0_i32_1 = arith.constant 0 : i32
    return %c0_i32, %c0_i32_0 : i32, i32
  }
  func.func @transform_2(%arg0: i32) -> (i32, i32) {
    %c0_i32 = arith.constant 0 : i32
    %c0_i32_0 = arith.constant 0 : i32
    %c0_i32_1 = arith.constant 0 : i32
    return %c0_i32, %c0_i32_0 : i32, i32
  }
  func.func @transform_3(%arg0: i32) -> (i32, i32, i32, i32) {
    %c0_i32 = arith.constant 0 : i32
    %c0_i32_0 = arith.constant 0 : i32
    %c0_i32_1 = arith.constant 0 : i32
    %c0_i32_2 = arith.constant 0 : i32
    return %arg0, %c0_i32, %c0_i32_0, %c0_i32_1 : i32, i32, i32, i32
  }
}

module attributes {stable_mosaic.version = 11 : i64} {
  func.func @kernel(%arg0: i32, %arg1: memref<1x4x4x128xf32, #tpu.memory_space<vmem>>, %arg2: memref<1152x256xbf16, #tpu.memory_space<vmem>>, %arg3: memref<1x256xf32, #tpu.memory_space<vmem>>, %arg4: memref<1x2x2x256xf32, #tpu.memory_space<vmem>>, %arg5: memref<4x1152xbf16, #tpu.memory_space<vmem>>) attributes {dimension_semantics = [#tpu.dimension_semantics<parallel>], iteration_bounds = array<i64: 2>, scalar_prefetch = 0 : i64, scratch_operands = 1 : i64, tpu.core_type = #tpu.core_type<tc>, window_params = [{transform_indices = @transform_0, window_bounds = array<i64: 1, 4, 4, 128>}, {pipeline_mode = #tpu.pipeline_mode<synchronous>, transform_indices = @transform_1, window_bounds = array<i64: 1152, 256>}, {pipeline_mode = #tpu.pipeline_mode<synchronous>, transform_indices = @transform_2, window_bounds = array<i64: 1, 256>}, {transform_indices = @transform_3, window_bounds = array<i64: 1, 2, 2, 256>}]} {
    %c0 = arith.constant 0 : index
    %c0_0 = arith.constant 0 : index
    %c0_1 = arith.constant 0 : index
    %c0_2 = arith.constant 0 : index
    %0 = vector.load %arg1[%c0, %c0_0, %c0_1, %c0_2] : memref<1x4x4x128xf32, #tpu.memory_space<vmem>>, vector<1x2x2x128xf32>
    %1 = vector.shape_cast %0 : vector<1x2x2x128xf32> to vector<2x2x128xf32>
    %2 = vector.shape_cast %1 : vector<2x2x128xf32> to vector<4x128xf32>
    %3 = arith.truncf %2 : vector<4x128xf32> to vector<4x128xbf16>
    %c0_3 = arith.constant 0 : index
    %c0_4 = arith.constant 0 : index
    %4 = vector.load %arg5[%c0_3, %c0_4] : memref<4x1152xbf16, #tpu.memory_space<vmem>>, vector<4x128xbf16>
    tpu.vector_store %arg5[%c0_3, %c0_4], %3 {strides = array<i32>} : memref<4x1152xbf16, #tpu.memory_space<vmem>>, vector<4x128xbf16>,
    %c0_5 = arith.constant 0 : index
    %c0_6 = arith.constant 0 : index
    %c1 = arith.constant 1 : index
    %c0_7 = arith.constant 0 : index
    %5 = vector.load %arg1[%c0_5, %c0_6, %c1, %c0_7] : memref<1x4x4x128xf32, #tpu.memory_space<vmem>>, vector<1x2x2x128xf32>
    %6 = vector.shape_cast %5 : vector<1x2x2x128xf32> to vector<2x2x128xf32>
    %7 = vector.shape_cast %6 : vector<2x2x128xf32> to vector<4x128xf32>
    %8 = arith.truncf %7 : vector<4x128xf32> to vector<4x128xbf16>
    %c0_8 = arith.constant 0 : index
    %c128 = arith.constant 128 : index
    %9 = vector.load %arg5[%c0_8, %c128] : memref<4x1152xbf16, #tpu.memory_space<vmem>>, vector<4x128xbf16>
    tpu.vector_store %arg5[%c0_8, %c128], %8 {strides = array<i32>} : memref<4x1152xbf16, #tpu.memory_space<vmem>>, vector<4x128xbf16>,
    %c0_9 = arith.constant 0 : index
    %c0_10 = arith.constant 0 : index
    %c2 = arith.constant 2 : index
    %c0_11 = arith.constant 0 : index
    %10 = vector.load %arg1[%c0_9, %c0_10, %c2, %c0_11] : memref<1x4x4x128xf32, #tpu.memory_space<vmem>>, vector<1x2x2x128xf32>
    %11 = vector.shape_cast %10 : vector<1x2x2x128xf32> to vector<2x2x128xf32>
    %12 = vector.shape_cast %11 : vector<2x2x128xf32> to vector<4x128xf32>
    %13 = arith.truncf %12 : vector<4x128xf32> to vector<4x128xbf16>
    %c0_12 = arith.constant 0 : index
    %c256 = arith.constant 256 : index
    %14 = vector.load %arg5[%c0_12, %c256] : memref<4x1152xbf16, #tpu.memory_space<vmem>>, vector<4x128xbf16>
    tpu.vector_store %arg5[%c0_12, %c256], %13 {strides = array<i32>} : memref<4x1152xbf16, #tpu.memory_space<vmem>>, vector<4x128xbf16>,
    %c0_13 = arith.constant 0 : index
    %c1_14 = arith.constant 1 : index
    %c0_15 = arith.constant 0 : index
    %c0_16 = arith.constant 0 : index
    %15 = vector.load %arg1[%c0_13, %c1_14, %c0_15, %c0_16] : memref<1x4x4x128xf32, #tpu.memory_space<vmem>>, vector<1x2x2x128xf32>
    %16 = vector.shape_cast %15 : vector<1x2x2x128xf32> to vector<2x2x128xf32>
    %17 = vector.shape_cast %16 : vector<2x2x128xf32> to vector<4x128xf32>
    %18 = arith.truncf %17 : vector<4x128xf32> to vector<4x128xbf16>
    %c0_17 = arith.constant 0 : index
    %c384 = arith.constant 384 : index
    %19 = vector.load %arg5[%c0_17, %c384] : memref<4x1152xbf16, #tpu.memory_space<vmem>>, vector<4x128xbf16>
    tpu.vector_store %arg5[%c0_17, %c384], %18 {strides = array<i32>} : memref<4x1152xbf16, #tpu.memory_space<vmem>>, vector<4x128xbf16>,
    %c0_18 = arith.constant 0 : index
    %c1_19 = arith.constant 1 : index
    %c1_20 = arith.constant 1 : index
    %c0_21 = arith.constant 0 : index
    %20 = vector.load %arg1[%c0_18, %c1_19, %c1_20, %c0_21] : memref<1x4x4x128xf32, #tpu.memory_space<vmem>>, vector<1x2x2x128xf32>
    %21 = vector.shape_cast %20 : vector<1x2x2x128xf32> to vector<2x2x128xf32>
    %22 = vector.shape_cast %21 : vector<2x2x128xf32> to vector<4x128xf32>
    %23 = arith.truncf %22 : vector<4x128xf32> to vector<4x128xbf16>
    %c0_22 = arith.constant 0 : index
    %c512 = arith.constant 512 : index
    %24 = vector.load %arg5[%c0_22, %c512] : memref<4x1152xbf16, #tpu.memory_space<vmem>>, vector<4x128xbf16>
    tpu.vector_store %arg5[%c0_22, %c512], %23 {strides = array<i32>} : memref<4x1152xbf16, #tpu.memory_space<vmem>>, vector<4x128xbf16>,
    %c0_23 = arith.constant 0 : index
    %c1_24 = arith.constant 1 : index
    %c2_25 = arith.constant 2 : index
    %c0_26 = arith.constant 0 : index
    %25 = vector.load %arg1[%c0_23, %c1_24, %c2_25, %c0_26] : memref<1x4x4x128xf32, #tpu.memory_space<vmem>>, vector<1x2x2x128xf32>
    %26 = vector.shape_cast %25 : vector<1x2x2x128xf32> to vector<2x2x128xf32>
    %27 = vector.shape_cast %26 : vector<2x2x128xf32> to vector<4x128xf32>
    %28 = arith.truncf %27 : vector<4x128xf32> to vector<4x128xbf16>
    %c0_27 = arith.constant 0 : index
    %c640 = arith.constant 640 : index
    %29 = vector.load %arg5[%c0_27, %c640] : memref<4x1152xbf16, #tpu.memory_space<vmem>>, vector<4x128xbf16>
    tpu.vector_store %arg5[%c0_27, %c640], %28 {strides = array<i32>} : memref<4x1152xbf16, #tpu.memory_space<vmem>>, vector<4x128xbf16>,
    %c0_28 = arith.constant 0 : index
    %c2_29 = arith.constant 2 : index
    %c0_30 = arith.constant 0 : index
    %c0_31 = arith.constant 0 : index
    %30 = vector.load %arg1[%c0_28, %c2_29, %c0_30, %c0_31] : memref<1x4x4x128xf32, #tpu.memory_space<vmem>>, vector<1x2x2x128xf32>
    %31 = vector.shape_cast %30 : vector<1x2x2x128xf32> to vector<2x2x128xf32>
    %32 = vector.shape_cast %31 : vector<2x2x128xf32> to vector<4x128xf32>
    %33 = arith.truncf %32 : vector<4x128xf32> to vector<4x128xbf16>
    %c0_32 = arith.constant 0 : index
    %c768 = arith.constant 768 : index
    %34 = vector.load %arg5[%c0_32, %c768] : memref<4x1152xbf16, #tpu.memory_space<vmem>>, vector<4x128xbf16>
    tpu.vector_store %arg5[%c0_32, %c768], %33 {strides = array<i32>} : memref<4x1152xbf16, #tpu.memory_space<vmem>>, vector<4x128xbf16>,
    %c0_33 = arith.constant 0 : index
    %c2_34 = arith.constant 2 : index
    %c1_35 = arith.constant 1 : index
    %c0_36 = arith.constant 0 : index
    %35 = vector.load %arg1[%c0_33, %c2_34, %c1_35, %c0_36] : memref<1x4x4x128xf32, #tpu.memory_space<vmem>>, vector<1x2x2x128xf32>
    %36 = vector.shape_cast %35 : vector<1x2x2x128xf32> to vector<2x2x128xf32>
    %37 = vector.shape_cast %36 : vector<2x2x128xf32> to vector<4x128xf32>
    %38 = arith.truncf %37 : vector<4x128xf32> to vector<4x128xbf16>
    %c0_37 = arith.constant 0 : index
    %c896 = arith.constant 896 : index
    %39 = vector.load %arg5[%c0_37, %c896] : memref<4x1152xbf16, #tpu.memory_space<vmem>>, vector<4x128xbf16>
    tpu.vector_store %arg5[%c0_37, %c896], %38 {strides = array<i32>} : memref<4x1152xbf16, #tpu.memory_space<vmem>>, vector<4x128xbf16>,
    %c0_38 = arith.constant 0 : index
    %c2_39 = arith.constant 2 : index
    %c2_40 = arith.constant 2 : index
    %c0_41 = arith.constant 0 : index
    %40 = vector.load %arg1[%c0_38, %c2_39, %c2_40, %c0_41] : memref<1x4x4x128xf32, #tpu.memory_space<vmem>>, vector<1x2x2x128xf32>
    %41 = vector.shape_cast %40 : vector<1x2x2x128xf32> to vector<2x2x128xf32>
    %42 = vector.shape_cast %41 : vector<2x2x128xf32> to vector<4x128xf32>
    %43 = arith.truncf %42 : vector<4x128xf32> to vector<4x128xbf16>
    %c0_42 = arith.constant 0 : index
    %c1024 = arith.constant 1024 : index
    %44 = vector.load %arg5[%c0_42, %c1024] : memref<4x1152xbf16, #tpu.memory_space<vmem>>, vector<4x128xbf16>
    tpu.vector_store %arg5[%c0_42, %c1024], %43 {strides = array<i32>} : memref<4x1152xbf16, #tpu.memory_space<vmem>>, vector<4x128xbf16>,
    %c0_43 = arith.constant 0 : index
    %c0_44 = arith.constant 0 : index
    %45 = vector.load %arg5[%c0_43, %c0_44] : memref<4x1152xbf16, #tpu.memory_space<vmem>>, vector<4x1152xbf16>
    %c0_45 = arith.constant 0 : index
    %c0_46 = arith.constant 0 : index
    %46 = vector.load %arg2[%c0_45, %c0_46] : memref<1152x256xbf16, #tpu.memory_space<vmem>>, vector<1152x256xbf16>
    %cst = arith.constant dense<0.000000e+00> : vector<4x256xf32>
    %47 = tpu.matmul %45, %46, %cst {dimension_numbers = #tpu.dot_dimension_numbers<[1], [0], [0], [1], [0, 0, 1, 1], [], []>} : vector<4x1152xbf16>, vector<1152x256xbf16>, vector<4x256xf32> -> vector<4x256xf32>
    %c0_47 = arith.constant 0 : index
    %c0_48 = arith.constant 0 : index
    %48 = vector.load %arg3[%c0_47, %c0_48] : memref<1x256xf32, #tpu.memory_space<vmem>>, vector<1x256xf32>
    %49 = vector.broadcast %48 : vector<1x256xf32> to vector<4x256xf32>
    %50 = arith.addf %47, %49 : vector<4x256xf32>
    %cst_49 = arith.constant 0.000000e+00 : f32
    %51 = vector.broadcast %cst_49 : f32 to vector<4x256xf32>
    %52 = arith.maximumf %50, %51 : vector<4x256xf32>
    %53 = vector.shape_cast %52 : vector<4x256xf32> to vector<2x2x256xf32>
    %c0_50 = arith.constant 0 : index
    %c0_51 = arith.constant 0 : index
    %c0_52 = arith.constant 0 : index
    %c0_53 = arith.constant 0 : index
    %54 = vector.load %arg4[%c0_50, %c0_51, %c0_52, %c0_53] : memref<1x2x2x256xf32, #tpu.memory_space<vmem>>, vector<1x2x2x256xf32>
    %55 = vector.shape_cast %54 : vector<1x2x2x256xf32> to vector<2x2x256xf32>
    %56 = vector.shape_cast %53 : vector<2x2x256xf32> to vector<1x2x2x256xf32>
    tpu.vector_store %arg4[%c0_50, %c0_51, %c0_52, %c0_53], %56 {strides = array<i32>} : memref<1x2x2x256xf32, #tpu.memory_space<vmem>>, vector<1x2x2x256xf32>,
    return
  }
  func.func @transform_0(%arg0: i32) -> (i32, i32, i32, i32) {
    %c0_i32 = arith.constant 0 : i32
    %c0_i32_0 = arith.constant 0 : i32
    %c0_i32_1 = arith.constant 0 : i32
    %c0_i32_2 = arith.constant 0 : i32
    return %arg0, %c0_i32, %c0_i32_0, %c0_i32_1 : i32, i32, i32, i32
  }
  func.func @transform_1(%arg0: i32) -> (i32, i32) {
    %c0_i32 = arith.constant 0 : i32
    %c0_i32_0 = arith.constant 0 : i32
    %c0_i32_1 = arith.constant 0 : i32
    return %c0_i32, %c0_i32_0 : i32, i32
  }
  func.func @transform_2(%arg0: i32) -> (i32, i32) {
    %c0_i32 = arith.constant 0 : i32
    %c0_i32_0 = arith.constant 0 : i32
    %c0_i32_1 = arith.constant 0 : i32
    return %c0_i32, %c0_i32_0 : i32, i32
  }
  func.func @transform_3(%arg0: i32) -> (i32, i32, i32, i32) {
    %c0_i32 = arith.constant 0 : i32
    %c0_i32_0 = arith.constant 0 : i32
    %c0_i32_1 = arith.constant 0 : i32
    %c0_i32_2 = arith.constant 0 : i32
    return %arg0, %c0_i32, %c0_i32_0, %c0_i32_1 : i32, i32, i32, i32
  }
}

module attributes {stable_mosaic.version = 11 : i64} {
  func.func @kernel(%arg0: i32, %arg1: memref<1x4x4x256xf32, #tpu.memory_space<vmem>>, %arg2: memref<2304x128xbf16, #tpu.memory_space<vmem>>, %arg3: memref<1x128xf32, #tpu.memory_space<vmem>>, %arg4: memref<1x2x2x128xf32, #tpu.memory_space<vmem>>, %arg5: memref<4x2304xbf16, #tpu.memory_space<vmem>>) attributes {dimension_semantics = [#tpu.dimension_semantics<parallel>], iteration_bounds = array<i64: 2>, scalar_prefetch = 0 : i64, scratch_operands = 1 : i64, tpu.core_type = #tpu.core_type<tc>, window_params = [{transform_indices = @transform_0, window_bounds = array<i64: 1, 4, 4, 256>}, {pipeline_mode = #tpu.pipeline_mode<synchronous>, transform_indices = @transform_1, window_bounds = array<i64: 2304, 128>}, {pipeline_mode = #tpu.pipeline_mode<synchronous>, transform_indices = @transform_2, window_bounds = array<i64: 1, 128>}, {transform_indices = @transform_3, window_bounds = array<i64: 1, 2, 2, 128>}]} {
    %c0 = arith.constant 0 : index
    %c0_0 = arith.constant 0 : index
    %c0_1 = arith.constant 0 : index
    %c0_2 = arith.constant 0 : index
    %0 = vector.load %arg1[%c0, %c0_0, %c0_1, %c0_2] : memref<1x4x4x256xf32, #tpu.memory_space<vmem>>, vector<1x2x2x256xf32>
    %1 = vector.shape_cast %0 : vector<1x2x2x256xf32> to vector<2x2x256xf32>
    %2 = vector.shape_cast %1 : vector<2x2x256xf32> to vector<4x256xf32>
    %3 = arith.truncf %2 : vector<4x256xf32> to vector<4x256xbf16>
    %c0_3 = arith.constant 0 : index
    %c0_4 = arith.constant 0 : index
    %4 = vector.load %arg5[%c0_3, %c0_4] : memref<4x2304xbf16, #tpu.memory_space<vmem>>, vector<4x256xbf16>
    tpu.vector_store %arg5[%c0_3, %c0_4], %3 {strides = array<i32>} : memref<4x2304xbf16, #tpu.memory_space<vmem>>, vector<4x256xbf16>,
    %c0_5 = arith.constant 0 : index
    %c0_6 = arith.constant 0 : index
    %c1 = arith.constant 1 : index
    %c0_7 = arith.constant 0 : index
    %5 = vector.load %arg1[%c0_5, %c0_6, %c1, %c0_7] : memref<1x4x4x256xf32, #tpu.memory_space<vmem>>, vector<1x2x2x256xf32>
    %6 = vector.shape_cast %5 : vector<1x2x2x256xf32> to vector<2x2x256xf32>
    %7 = vector.shape_cast %6 : vector<2x2x256xf32> to vector<4x256xf32>
    %8 = arith.truncf %7 : vector<4x256xf32> to vector<4x256xbf16>
    %c0_8 = arith.constant 0 : index
    %c256 = arith.constant 256 : index
    %9 = vector.load %arg5[%c0_8, %c256] : memref<4x2304xbf16, #tpu.memory_space<vmem>>, vector<4x256xbf16>
    tpu.vector_store %arg5[%c0_8, %c256], %8 {strides = array<i32>} : memref<4x2304xbf16, #tpu.memory_space<vmem>>, vector<4x256xbf16>,
    %c0_9 = arith.constant 0 : index
    %c0_10 = arith.constant 0 : index
    %c2 = arith.constant 2 : index
    %c0_11 = arith.constant 0 : index
    %10 = vector.load %arg1[%c0_9, %c0_10, %c2, %c0_11] : memref<1x4x4x256xf32, #tpu.memory_space<vmem>>, vector<1x2x2x256xf32>
    %11 = vector.shape_cast %10 : vector<1x2x2x256xf32> to vector<2x2x256xf32>
    %12 = vector.shape_cast %11 : vector<2x2x256xf32> to vector<4x256xf32>
    %13 = arith.truncf %12 : vector<4x256xf32> to vector<4x256xbf16>
    %c0_12 = arith.constant 0 : index
    %c512 = arith.constant 512 : index
    %14 = vector.load %arg5[%c0_12, %c512] : memref<4x2304xbf16, #tpu.memory_space<vmem>>, vector<4x256xbf16>
    tpu.vector_store %arg5[%c0_12, %c512], %13 {strides = array<i32>} : memref<4x2304xbf16, #tpu.memory_space<vmem>>, vector<4x256xbf16>,
    %c0_13 = arith.constant 0 : index
    %c1_14 = arith.constant 1 : index
    %c0_15 = arith.constant 0 : index
    %c0_16 = arith.constant 0 : index
    %15 = vector.load %arg1[%c0_13, %c1_14, %c0_15, %c0_16] : memref<1x4x4x256xf32, #tpu.memory_space<vmem>>, vector<1x2x2x256xf32>
    %16 = vector.shape_cast %15 : vector<1x2x2x256xf32> to vector<2x2x256xf32>
    %17 = vector.shape_cast %16 : vector<2x2x256xf32> to vector<4x256xf32>
    %18 = arith.truncf %17 : vector<4x256xf32> to vector<4x256xbf16>
    %c0_17 = arith.constant 0 : index
    %c768 = arith.constant 768 : index
    %19 = vector.load %arg5[%c0_17, %c768] : memref<4x2304xbf16, #tpu.memory_space<vmem>>, vector<4x256xbf16>
    tpu.vector_store %arg5[%c0_17, %c768], %18 {strides = array<i32>} : memref<4x2304xbf16, #tpu.memory_space<vmem>>, vector<4x256xbf16>,
    %c0_18 = arith.constant 0 : index
    %c1_19 = arith.constant 1 : index
    %c1_20 = arith.constant 1 : index
    %c0_21 = arith.constant 0 : index
    %20 = vector.load %arg1[%c0_18, %c1_19, %c1_20, %c0_21] : memref<1x4x4x256xf32, #tpu.memory_space<vmem>>, vector<1x2x2x256xf32>
    %21 = vector.shape_cast %20 : vector<1x2x2x256xf32> to vector<2x2x256xf32>
    %22 = vector.shape_cast %21 : vector<2x2x256xf32> to vector<4x256xf32>
    %23 = arith.truncf %22 : vector<4x256xf32> to vector<4x256xbf16>
    %c0_22 = arith.constant 0 : index
    %c1024 = arith.constant 1024 : index
    %24 = vector.load %arg5[%c0_22, %c1024] : memref<4x2304xbf16, #tpu.memory_space<vmem>>, vector<4x256xbf16>
    tpu.vector_store %arg5[%c0_22, %c1024], %23 {strides = array<i32>} : memref<4x2304xbf16, #tpu.memory_space<vmem>>, vector<4x256xbf16>,
    %c0_23 = arith.constant 0 : index
    %c1_24 = arith.constant 1 : index
    %c2_25 = arith.constant 2 : index
    %c0_26 = arith.constant 0 : index
    %25 = vector.load %arg1[%c0_23, %c1_24, %c2_25, %c0_26] : memref<1x4x4x256xf32, #tpu.memory_space<vmem>>, vector<1x2x2x256xf32>
    %26 = vector.shape_cast %25 : vector<1x2x2x256xf32> to vector<2x2x256xf32>
    %27 = vector.shape_cast %26 : vector<2x2x256xf32> to vector<4x256xf32>
    %28 = arith.truncf %27 : vector<4x256xf32> to vector<4x256xbf16>
    %c0_27 = arith.constant 0 : index
    %c1280 = arith.constant 1280 : index
    %29 = vector.load %arg5[%c0_27, %c1280] : memref<4x2304xbf16, #tpu.memory_space<vmem>>, vector<4x256xbf16>
    tpu.vector_store %arg5[%c0_27, %c1280], %28 {strides = array<i32>} : memref<4x2304xbf16, #tpu.memory_space<vmem>>, vector<4x256xbf16>,
    %c0_28 = arith.constant 0 : index
    %c2_29 = arith.constant 2 : index
    %c0_30 = arith.constant 0 : index
    %c0_31 = arith.constant 0 : index
    %30 = vector.load %arg1[%c0_28, %c2_29, %c0_30, %c0_31] : memref<1x4x4x256xf32, #tpu.memory_space<vmem>>, vector<1x2x2x256xf32>
    %31 = vector.shape_cast %30 : vector<1x2x2x256xf32> to vector<2x2x256xf32>
    %32 = vector.shape_cast %31 : vector<2x2x256xf32> to vector<4x256xf32>
    %33 = arith.truncf %32 : vector<4x256xf32> to vector<4x256xbf16>
    %c0_32 = arith.constant 0 : index
    %c1536 = arith.constant 1536 : index
    %34 = vector.load %arg5[%c0_32, %c1536] : memref<4x2304xbf16, #tpu.memory_space<vmem>>, vector<4x256xbf16>
    tpu.vector_store %arg5[%c0_32, %c1536], %33 {strides = array<i32>} : memref<4x2304xbf16, #tpu.memory_space<vmem>>, vector<4x256xbf16>,
    %c0_33 = arith.constant 0 : index
    %c2_34 = arith.constant 2 : index
    %c1_35 = arith.constant 1 : index
    %c0_36 = arith.constant 0 : index
    %35 = vector.load %arg1[%c0_33, %c2_34, %c1_35, %c0_36] : memref<1x4x4x256xf32, #tpu.memory_space<vmem>>, vector<1x2x2x256xf32>
    %36 = vector.shape_cast %35 : vector<1x2x2x256xf32> to vector<2x2x256xf32>
    %37 = vector.shape_cast %36 : vector<2x2x256xf32> to vector<4x256xf32>
    %38 = arith.truncf %37 : vector<4x256xf32> to vector<4x256xbf16>
    %c0_37 = arith.constant 0 : index
    %c1792 = arith.constant 1792 : index
    %39 = vector.load %arg5[%c0_37, %c1792] : memref<4x2304xbf16, #tpu.memory_space<vmem>>, vector<4x256xbf16>
    tpu.vector_store %arg5[%c0_37, %c1792], %38 {strides = array<i32>} : memref<4x2304xbf16, #tpu.memory_space<vmem>>, vector<4x256xbf16>,
    %c0_38 = arith.constant 0 : index
    %c2_39 = arith.constant 2 : index
    %c2_40 = arith.constant 2 : index
    %c0_41 = arith.constant 0 : index
    %40 = vector.load %arg1[%c0_38, %c2_39, %c2_40, %c0_41] : memref<1x4x4x256xf32, #tpu.memory_space<vmem>>, vector<1x2x2x256xf32>
    %41 = vector.shape_cast %40 : vector<1x2x2x256xf32> to vector<2x2x256xf32>
    %42 = vector.shape_cast %41 : vector<2x2x256xf32> to vector<4x256xf32>
    %43 = arith.truncf %42 : vector<4x256xf32> to vector<4x256xbf16>
    %c0_42 = arith.constant 0 : index
    %c2048 = arith.constant 2048 : index
    %44 = vector.load %arg5[%c0_42, %c2048] : memref<4x2304xbf16, #tpu.memory_space<vmem>>, vector<4x256xbf16>
    tpu.vector_store %arg5[%c0_42, %c2048], %43 {strides = array<i32>} : memref<4x2304xbf16, #tpu.memory_space<vmem>>, vector<4x256xbf16>,
    %c0_43 = arith.constant 0 : index
    %c0_44 = arith.constant 0 : index
    %45 = vector.load %arg5[%c0_43, %c0_44] : memref<4x2304xbf16, #tpu.memory_space<vmem>>, vector<4x2304xbf16>
    %c0_45 = arith.constant 0 : index
    %c0_46 = arith.constant 0 : index
    %46 = vector.load %arg2[%c0_45, %c0_46] : memref<2304x128xbf16, #tpu.memory_space<vmem>>, vector<2304x128xbf16>
    %cst = arith.constant dense<0.000000e+00> : vector<4x128xf32>
    %47 = tpu.matmul %45, %46, %cst {dimension_numbers = #tpu.dot_dimension_numbers<[1], [0], [0], [1], [0, 0, 1, 1], [], []>} : vector<4x2304xbf16>, vector<2304x128xbf16>, vector<4x128xf32> -> vector<4x128xf32>
    %c0_47 = arith.constant 0 : index
    %c0_48 = arith.constant 0 : index
    %48 = vector.load %arg3[%c0_47, %c0_48] : memref<1x128xf32, #tpu.memory_space<vmem>>, vector<1x128xf32>
    %49 = vector.broadcast %48 : vector<1x128xf32> to vector<4x128xf32>
    %50 = arith.addf %47, %49 : vector<4x128xf32>
    %cst_49 = arith.constant 0.000000e+00 : f32
    %51 = vector.broadcast %cst_49 : f32 to vector<4x128xf32>
    %52 = arith.maximumf %50, %51 : vector<4x128xf32>
    %53 = vector.shape_cast %52 : vector<4x128xf32> to vector<2x2x128xf32>
    %c0_50 = arith.constant 0 : index
    %c0_51 = arith.constant 0 : index
    %c0_52 = arith.constant 0 : index
    %c0_53 = arith.constant 0 : index
    %54 = vector.load %arg4[%c0_50, %c0_51, %c0_52, %c0_53] : memref<1x2x2x128xf32, #tpu.memory_space<vmem>>, vector<1x2x2x128xf32>
    %55 = vector.shape_cast %54 : vector<1x2x2x128xf32> to vector<2x2x128xf32>
    %56 = vector.shape_cast %53 : vector<2x2x128xf32> to vector<1x2x2x128xf32>
    tpu.vector_store %arg4[%c0_50, %c0_51, %c0_52, %c0_53], %56 {strides = array<i32>} : memref<1x2x2x128xf32, #tpu.memory_space<vmem>>, vector<1x2x2x128xf32>,
    return
  }
  func.func @transform_0(%arg0: i32) -> (i32, i32, i32, i32) {
    %c0_i32 = arith.constant 0 : i32
    %c0_i32_0 = arith.constant 0 : i32
    %c0_i32_1 = arith.constant 0 : i32
    %c0_i32_2 = arith.constant 0 : i32
    return %arg0, %c0_i32, %c0_i32_0, %c0_i32_1 : i32, i32, i32, i32
  }
  func.func @transform_1(%arg0: i32) -> (i32, i32) {
    %c0_i32 = arith.constant 0 : i32
    %c0_i32_0 = arith.constant 0 : i32
    %c0_i32_1 = arith.constant 0 : i32
    return %c0_i32, %c0_i32_0 : i32, i32
  }
  func.func @transform_2(%arg0: i32) -> (i32, i32) {
    %c0_i32 = arith.constant 0 : i32
    %c0_i32_0 = arith.constant 0 : i32
    %c0_i32_1 = arith.constant 0 : i32
    return %c0_i32, %c0_i32_0 : i32, i32
  }
  func.func @transform_3(%arg0: i32) -> (i32, i32, i32, i32) {
    %c0_i32 = arith.constant 0 : i32
    %c0_i32_0 = arith.constant 0 : i32
    %c0_i32_1 = arith.constant 0 : i32
    %c0_i32_2 = arith.constant 0 : i32
    return %arg0, %c0_i32, %c0_i32_0, %c0_i32_1 : i32, i32, i32, i32
  }
}

</mosaic_0001>

<bundles_post_ra>
// kernel: deep_ca_unet_forward.9
= control target key start
LH: loop header
LB: loop body
LE: loop exit
PB: predicated region body
PF: predicated region fallthrough
CT: control target
= control target key end

     0   :  { %s1510_s12 = smov 0   ;;  %s1855_s0 = inlined_call_operand.vmem [shape: f32[2,9,9,128], index: 0, kind: input, shape index: {}]   ;;  %s1856_s1 = inlined_call_operand.vmem [shape: bf16[288,32], index: 1, kind: input, shape index: {}]   ;;  %s1857_s2 = inlined_call_operand.vmem [shape: f32[1,32], index: 2, kind: input, shape index: {}]   ;;  %s1858_s3 = inlined_call_operand.vmem [shape: f32[2,8,8,32], index: 3, kind: output, shape index: {}]  }
   0x1 LB: > { %s1146_s13 = sadd.s32 4294967295, %s1485_s12   ;;  %p1150_p0 = scmp.ge.s32.totalorder %s1485_s12, 1  ;;  %s1485_s12 = sphi %s1510_s12, %s13_s12  }
   0x2   : > { %p137_p1 = scmp.lt.s32.totalorder %s1485_s12, 3 }
   0x4   : > { %p138_p2 = pnand %p1150_p0, %p137_p1 }
   0x5   : > { %p161_p3 = scmp.lt.s32.totalorder (!%p138_p2), %s1146_s13, 1  ;;  %s1487_s30 = smov (!%p138_p2), 96  }
   0x6   : > { %141 = sbr.rel (%p138_p2) target bundleno = 443 (0x1bb), region = 32  ;;  %s1488_s4 = smov (!%p138_p2), 32  }
   0x7   : > { %s1489_s17 = smov (!%p138_p2), 64  }
   0xb   : > { %v1446_v0 = vld [vmem:[%s1856_s1 + $0x78] sm:$0xff]   ;;  %s1860_s13 = smov (!%p161_p3, %s1146_s13), 1  ;;  %v1448_v2 = vld [vmem:[%s1856_s1 + $0x70] sm:$0xff]   ;;  %v1450_v4 = vld [vmem:[%s1856_s1 + $0x68] sm:$0xff]   ;;  %vm212_vm0 = vcmask 257024   ;;  %vm261_vm1 = vcmask 519424  }
   0xc   : > { %v1447_v1 = vld [vmem:[%s1856_s1 + $0x38] sm:$0xff]   ;;  %1360 = vmatprep.subr.bf16.mxu0 %v1446_v0  ;;  %1418 = vmatprep.subr.bf16.mxu1 %v1446_v0  ;;  %s1434_s20 = smul.u32 144, %s1860_s13  ;;  %v1449_v3 = vld [vmem:[%s1856_s1 + $0x30] sm:$0xff]   ;;  %v1451_v5 = vld [vmem:[%s1856_s1 + $0x28] sm:$0xff]   ;;  %vm326_vm2 = vcmask 781824   ;;  %vm391_vm3 = vcmask 1044224  }
   0xd   : > { %1361 = vmatpush3.bf16.msra.mxu0 %v1447_v1  ;;  %1426 = vmatpush3.bf16.msra.mxu1 %v1447_v1  ;;  %v1452_v38 = vld [vmem:[%s1856_s1 + $0x60] sm:$0xff]   ;;  %v1454_v40 = vld [vmem:[%s1856_s1 + $0x58] sm:$0xff]   ;;  %v1456_v42 = vld [vmem:[%s1856_s1 + $0x50] sm:$0xff]   ;;  %vm932_vm4 = vcmask 261120   ;;  %s1287_s7 = sshll.u32 %s1860_s13, 6 }
   0xe   : > { %1362 = vmatprep.subr.bf16.mxu0 %v1448_v2  ;;  %1419 = vmatprep.subr.bf16.mxu1 %v1448_v2  ;;  %s1539_s27 = scalar_lea.vmem %s1855_s0, %s1434_s20  ;;  %v1453_v39 = vld [vmem:[%s1856_s1 + $0x20] sm:$0xff]   ;;  %v1455_v41 = vld [vmem:[%s1856_s1 + $0x18] sm:$0xff]   ;;  %v1457_v43 = vld [vmem:[%s1856_s1 + $0x10] sm:$0xff]   ;;  %s1834_s10 = scalar_lea.vmem %s1858_s3, %s1287_s7 }
   0xf   : > { %v464_v6 = vld [vmem:[%s1539_s27 + $0x1] sm:$0xff]  ;;  %v465_v8 = vld [vmem:[%s1539_s27 + $0x11] sm:$0xff] }
  0x10   : > { %v400_v7 = vld [vmem:[%s1539_s27] sm:$0xff]  ;;  %v1547_v9 = vpack.c.bf16 %v464_v6, %v464_v6  ;;  %v1551_v11 = vpack.c.bf16 %v465_v8, %v465_v8  ;;  %v401_v12 = vld [vmem:[%s1539_s27 + $0x10] sm:$0xff]  ;;  %v1458_v44 = vld [vmem:[%s1856_s1 + $0x48] sm:$0xff]  }
  0x11   : > { %v1549_v10 = vpack.c.bf16 %v400_v7, %v400_v7  ;;  %v1203_v13 = vld [vmem:[%s1539_s27 + $0x20] sm:$0xff]  ;;  %v407_v14 = vld [vmem:[%s1539_s27 + $0x70] sm:$0xff]  ;;  %1363 = vmatpush3.bf16.msra.mxu0 %v1449_v3  ;;  %1427 = vmatpush3.bf16.msra.mxu1 %v1449_v3  ;;  %v1556_v15 = vpack.c.bf16 %v401_v12, %v401_v12  ;;  %v1459_v45 = vld [vmem:[%s1856_s1 + $0x8] sm:$0xff]  }
  0x12   : > { %v1558_v16 = vpack.c.bf16 %v1203_v13, %v1203_v13  ;;  %v1560_v17 = vpack.c.bf16 %v407_v14, %v407_v14  ;;  %v406_v18 = vld [vmem:[%s1539_s27 + $0x60] sm:$0xff]  ;;  %v471_v19 = vld [vmem:[%s1539_s27 + $0x71] sm:$0xff]  ;;  %1364 = vmatprep.subr.bf16.mxu0 %v1450_v4  ;;  %1420 = vmatprep.subr.bf16.mxu1 %v1450_v4  ;;  %697 = vst.msk [vmem:[#allocation2 + $0x8] sm:$0xf] %vm212_vm0, %v1551_v11  ;;  %v1715_v50 = vld [vmem:[%s1856_s1 + $0x88] sm:$0xff]  }
  0x13   : > { %v470_v20 = vld [vmem:[%s1539_s27 + $0x61] sm:$0xff]  ;;  %496 = vrot.lane.b32.xlu1 %v1547_v9, %s1487_s30  ;;  %432 = vrot.lane.b32.xlu0 %v1549_v10, %s1488_s4  ;;  %v1569_v21 = vpack.c.bf16 %v406_v18, %v406_v18  ;;  %v1571_v22 = vpack.c.bf16 %v471_v19, %v471_v19  ;;  %v403_v24 = vld [vmem:[%s1539_s27 + $0x30] sm:$0xff]  ;;  %213 = vst.msk [vmem:[#allocation2] sm:$0xf] %vm212_vm0, %v1549_v10  ;;  %214 = vst.msk [vmem:[#allocation2 + $0xc] sm:$0xf] %vm212_vm0, %v1556_v15 }
  0x14   : > { %v1573_v23 = vpack.c.bf16 %v470_v20, %v470_v20  ;;  %v1580_v25 = vpack.c.bf16 %v403_v24, %v403_v24  ;;  %v467_v26 = vld [vmem:[%s1539_s27 + $0x31] sm:$0xff]  ;;  %v466_v27 = vld [vmem:[%s1539_s27 + $0x21] sm:$0xff]  ;;  %262 = vst.msk [vmem:[#allocation2] sm:$0xf] %vm261_vm1, %v1549_v10  ;;  %263 = vst.msk [vmem:[#allocation2 + $0xc] sm:$0xf] %vm261_vm1, %v1556_v15 }
  0x15   : > { %v1205_v28 = vld [vmem:[%s1539_s27 + $0x40] sm:$0xff]  ;;  %220 = vst.msk [vmem:[#allocation2 + $0x54] sm:$0xf] %vm212_vm0, %v1560_v17  ;;  %215 = vst.msk [vmem:[#allocation2 + $0x18] sm:$0xf] %vm212_vm0, %v1558_v16  ;;  %v1593_v29 = vpack.c.bf16 %v467_v26, %v467_v26  ;;  %v1595_v30 = vpack.c.bf16 %v466_v27, %v466_v27  ;;  %v405_v32 = vld [vmem:[%s1539_s27 + $0x50] sm:$0xff]  ;;  %1365 = vmatpush3.bf16.msra.mxu0 %v1451_v5  ;;  %1428 = vmatpush3.bf16.msra.mxu1 %v1451_v5 }
  0x16   : > { %v1597_v31 = vpack.c.bf16 %v1205_v28, %v1205_v28  ;;  %v469_v33 = vld [vmem:[%s1539_s27 + $0x51] sm:$0xff]  ;;  %v468_v34 = vld [vmem:[%s1539_s27 + $0x41] sm:$0xff]  ;;  %269 = vst.msk [vmem:[#allocation2 + $0x54] sm:$0xf] %vm261_vm1, %v1560_v17  ;;  %264 = vst.msk [vmem:[#allocation2 + $0x18] sm:$0xf] %vm261_vm1, %v1558_v16  ;;  %v1614_v35 = vpack.c.bf16 %v405_v32, %v405_v32  ;;  %1366 = vmatprep.subr.bf16.mxu0 %v1452_v38  ;;  %1421 = vmatprep.subr.bf16.mxu1 %v1452_v38 }
  0x17   : > { %219 = vst.msk [vmem:[#allocation2 + $0x48] sm:$0xf] %vm212_vm0, %v1569_v21  ;;  %702 = vst.msk [vmem:[#allocation2 + $0x44] sm:$0xf] %vm212_vm0, %v1573_v23  ;;  %v1616_v36 = vpack.c.bf16 %v469_v33, %v469_v33  ;;  %v1618_v37 = vpack.c.bf16 %v468_v34, %v468_v34  ;;  %498 = vrot.lane.b32.xlu1 %v1551_v11, %s1487_s30  ;;  %434 = vrot.lane.b32.xlu0 %v1556_v15, %s1488_s4  ;;  %v1460_v46 = vld [vmem:[%s1856_s1 + $0x40] sm:$0xff]  }
  0x18   : > { %703 = vst.msk [vmem:[#allocation2 + $0x50] sm:$0xf] %vm212_vm0, %v1571_v22  ;;  %216 = vst.msk [vmem:[#allocation2 + $0x24] sm:$0xf] %vm212_vm0, %v1580_v25  ;;  %v1461_v47 = vld [vmem:[%s1856_s1] sm:$0xff]  }
  0x19   : > { %268 = vst.msk [vmem:[#allocation2 + $0x48] sm:$0xf] %vm261_vm1, %v1569_v21  ;;  %265 = vst.msk [vmem:[#allocation2 + $0x24] sm:$0xf] %vm261_vm1, %v1580_v25  ;;  %1367 = vmatpush3.bf16.msra.mxu0 %v1453_v39  ;;  %1429 = vmatpush3.bf16.msra.mxu1 %v1453_v39  ;;  %v1209_v48 = vld [vmem:[%s1539_s27 + $0x80] sm:$0xff] }
  0x1a   : > { %698 = vst.msk [vmem:[#allocation2 + $0x14] sm:$0xf] %vm212_vm0, %v1595_v30  ;;  %699 = vst.msk [vmem:[#allocation2 + $0x20] sm:$0xf] %vm212_vm0, %v1593_v29  ;;  %1368 = vmatprep.subr.bf16.mxu0 %v1454_v40  ;;  %1422 = vmatprep.subr.bf16.mxu1 %v1454_v40  ;;  %v1343_v49 = vpack.c.bf16 %v1209_v48, %v1209_v48  ;;  %v1241_v51 = vld [vmem:[%s1539_s27 + $0x81] sm:$0xff] }
  0x1b   : > { %217 = vst.msk [vmem:[#allocation2 + $0x30] sm:$0xf] %vm212_vm0, %v1597_v31  ;;  %700 = vst.msk [vmem:[#allocation2 + $0x2c] sm:$0xf] %vm212_vm0, %v1618_v37  ;;  %304 = vrot.lane.b32.xlu1 %v1551_v11, %s1489_s17  ;;  %302 = vrot.lane.b32.xlu0 %v1547_v9, %s1489_s17  ;;  %v1359_v52 = vpack.c.bf16 %v1241_v51, %v1241_v51 }
  0x1c   : > { %701 = vst.msk [vmem:[#allocation2 + $0x38] sm:$0xf] %vm212_vm0, %v1616_v36  ;;  %218 = vst.msk [vmem:[#allocation2 + $0x3c] sm:$0xf] %vm212_vm0, %v1614_v35 }
  0x1d   : > { %266 = vst.msk [vmem:[#allocation2 + $0x30] sm:$0xf] %vm261_vm1, %v1597_v31  ;;  %267 = vst.msk [vmem:[#allocation2 + $0x3c] sm:$0xf] %vm261_vm1, %v1614_v35  ;;  %1369 = vmatpush3.bf16.msra.mxu0 %v1455_v41  ;;  %1430 = vmatpush3.bf16.msra.mxu1 %v1455_v41 }
  0x1e   : > { %1370 = vmatprep.subr.bf16.mxu0 %v1456_v42  ;;  %1423 = vmatprep.subr.bf16.mxu1 %v1456_v42  ;;  %704 = vst.msk [vmem:[#allocation2 + $0x5c] sm:$0xf] %vm212_vm0, %v1359_v52 }
  0x1f   : > { %563 = vrot.lane.b32.xlu1 %v1558_v16, %s1489_s17  ;;  %561 = vrot.lane.b32.xlu0 %v1556_v15, %s1489_s17 }
  0x21   : > { %1371 = vmatpush3.bf16.msra.mxu0 %v1457_v43  ;;  %1431 = vmatpush3.bf16.msra.mxu1 %v1457_v43 }
  0x22   : > { %1372 = vmatprep.subr.bf16.mxu0 %v1458_v44  ;;  %1424 = vmatprep.subr.bf16.mxu1 %v1458_v44  ;;  %v1471_v27 = vld [vmem:[#allocation2 + $0x20] ss:$12 sps:$4 sm:$0xff]  }
  0x23   : > { %369 = vrot.lane.b32.xlu1 %v1556_v15, %s1488_s4  ;;  %367 = vrot.lane.b32.xlu0 %v1549_v10, %s1488_s4  ;;  %v1472_v28 = vld [vmem:[#allocation2 + $0x38] ss:$12 sps:$4 sm:$0xff]  }
  0x25   : > { %1373 = vmatpush3.bf16.msra.mxu0 %v1459_v45  ;;  %1432 = vmatpush3.bf16.msra.mxu1 %v1459_v45  ;;  %v1473_v33 = vld [vmem:[#allocation2 + $0x50] ss:$12 sps:$4 sm:$0xff]  }
  0x26   : > { %1374 = vmatprep.subr.bf16.mxu0 %v1460_v46  ;;  %1425 = vmatprep.subr.bf16.mxu1 %v1460_v46 }
  0x27   : > { %627 = vrot.lane.b32.xlu1 %v1558_v16, %s1489_s17  ;;  %625 = vrot.lane.b32.xlu0 %v1556_v15, %s1489_s17 }
  0x29   : > { %1375 = vmatpush3.bf16.msra.mxu0 %v1461_v47  ;;  %1433 = vmatpush3.bf16.msra.mxu1 %v1461_v47 }
  0x2a   : > { %1406 = vmatprep.subr.bf16.mxu1 %v1715_v50 }
  0x2b   : > { %446 = vrot.lane.b32.xlu1 %v1560_v17, %s1488_s4  ;;  %444 = vrot.lane.b32.xlu0 %v1569_v21, %s1488_s4 }
  0x2f   : > { %510 = vrot.lane.b32.xlu1 %v1571_v22, %s1487_s30  ;;  %508 = vrot.lane.b32.xlu0 %v1573_v23, %s1487_s30 }
  0x33   : > { %316 = vrot.lane.b32.xlu1 %v1571_v22, %s1489_s17  ;;  %314 = vrot.lane.b32.xlu0 %v1573_v23, %s1489_s17  ;;  %v1469_v22 = vld [vmem:[%s1856_s1 + $0x80] sm:$0xff]  }
  0x37   : > { %575 = vrot.lane.b32.xlu1 %v1343_v49, %s1489_s17  ;;  %573 = vrot.lane.b32.xlu0 %v1560_v17, %s1489_s17 }
  0x3b   : > { %381 = vrot.lane.b32.xlu1 %v1560_v17, %s1488_s4  ;;  %379 = vrot.lane.b32.xlu0 %v1569_v21, %s1488_s4 }
  0x3f   : > { %639 = vrot.lane.b32.xlu1 %v1343_v49, %s1489_s17  ;;  %637 = vrot.lane.b32.xlu0 %v1560_v17, %s1489_s17 }
  0x43   : > { %438 = vrot.lane.b32.xlu1 %v1580_v25, %s1488_s4  ;;  %436 = vrot.lane.b32.xlu0 %v1558_v16, %s1488_s4 }
  0x47   : > { %502 = vrot.lane.b32.xlu1 %v1593_v29, %s1487_s30  ;;  %500 = vrot.lane.b32.xlu0 %v1595_v30, %s1487_s30 }
  0x4b   : > { %308 = vrot.lane.b32.xlu1 %v1593_v29, %s1489_s17  ;;  %306 = vrot.lane.b32.xlu0 %v1595_v30, %s1489_s17 }
  0x4f   : > { %567 = vrot.lane.b32.xlu1 %v1597_v31, %s1489_s17  ;;  %565 = vrot.lane.b32.xlu0 %v1580_v25, %s1489_s17 }
  0x53   : > { %373 = vrot.lane.b32.xlu1 %v1580_v25, %s1488_s4  ;;  %371 = vrot.lane.b32.xlu0 %v1558_v16, %s1488_s4 }
  0x57   : > { %631 = vrot.lane.b32.xlu1 %v1597_v31, %s1489_s17  ;;  %629 = vrot.lane.b32.xlu0 %v1580_v25, %s1489_s17 }
  0x5b   : > { %442 = vrot.lane.b32.xlu1 %v1614_v35, %s1488_s4  ;;  %440 = vrot.lane.b32.xlu0 %v1597_v31, %s1488_s4 }
  0x5f   : > { %506 = vrot.lane.b32.xlu1 %v1616_v36, %s1487_s30  ;;  %504 = vrot.lane.b32.xlu0 %v1618_v37, %s1487_s30 }
  0x63   : > { %312 = vrot.lane.b32.xlu1 %v1616_v36, %s1489_s17  ;;  %310 = vrot.lane.b32.xlu0 %v1618_v37, %s1489_s17 }
  0x67   : > { %571 = vrot.lane.b32.xlu1 %v1569_v21, %s1489_s17  ;;  %569 = vrot.lane.b32.xlu0 %v1614_v35, %s1489_s17 }
  0x6b   : > { %377 = vrot.lane.b32.xlu1 %v1614_v35, %s1488_s4  ;;  %375 = vrot.lane.b32.xlu0 %v1597_v31, %s1488_s4 }
  0x6f   : > { %635 = vrot.lane.b32.xlu1 %v1569_v21, %s1489_s17  ;;  %633 = vrot.lane.b32.xlu0 %v1614_v35, %s1489_s17  ;;  %v1470_v21 = vld [vmem:[#allocation2 + $0x8] ss:$12 sps:$4 sm:$0xff]  }
  0x85   : > { %v497_v53 = vpop.permute.xlu1 %496  ;;  %v433_v54 = vpop.permute.xlu0 %432 }
  0x86   : > { %456 = vst.msk [vmem:[#allocation2 + $0x4] sm:$0xf] %vm212_vm0, %v433_v54 }
  0x87   : > { %520 = vst.msk [vmem:[#allocation2 + $0x4] sm:$0xf] %vm261_vm1, %v497_v53 }
  0x89   : > { %v499_v55 = vpop.permute.xlu1 %498  ;;  %v435_v56 = vpop.permute.xlu0 %434 }
  0x8a   : > { %457 = vst.msk [vmem:[#allocation2 + $0x10] sm:$0xf] %vm212_vm0, %v435_v56 }
  0x8b   : > { %521 = vst.msk [vmem:[#allocation2 + $0x10] sm:$0xf] %vm261_vm1, %v499_v55 }
  0x8d   : > { %v305_v57 = vpop.permute.xlu1 %304  ;;  %v303_v58 = vpop.permute.xlu0 %302 }
  0x8e   : > { %328 = vst.msk [vmem:[#allocation2 + $0xc] sm:$0xf] %vm326_vm2, %v305_v57  ;;  %327 = vst.msk [vmem:[#allocation2] sm:$0xf] %vm326_vm2, %v303_v58 }
  0x91   : > { %v564_v59 = vpop.permute.xlu1 %563  ;;  %v562_v60 = vpop.permute.xlu0 %561 }
  0x92   : > { %586 = vst.msk [vmem:[#allocation2 + $0x10] sm:$0xf] %vm326_vm2, %v564_v59  ;;  %585 = vst.msk [vmem:[#allocation2 + $0x4] sm:$0xf] %vm326_vm2, %v562_v60 }
  0x95   : > { %v370_v61 = vpop.permute.xlu1 %369  ;;  %v368_v62 = vpop.permute.xlu0 %367 }
  0x96   : > { %393 = vst.msk [vmem:[#allocation2 + $0xc] sm:$0xf] %vm391_vm3, %v370_v61  ;;  %392 = vst.msk [vmem:[#allocation2] sm:$0xf] %vm391_vm3, %v368_v62  ;;  %v1250_v61 = vld [vmem:[%s1857_s2] ss:$0 sm:$0xff] }
  0x99   : > { %v628_v63 = vpop.permute.xlu1 %627  ;;  %v626_v0 = vpop.permute.xlu0 %625 }
  0x9a   : > { %650 = vst.msk [vmem:[#allocation2 + $0x10] sm:$0xf] %vm391_vm3, %v628_v63  ;;  %649 = vst.msk [vmem:[#allocation2 + $0x4] sm:$0xf] %vm391_vm3, %v626_v0 }
  0x9d   : > { %v447_v1 = vpop.permute.xlu1 %446  ;;  %v445_v2 = vpop.permute.xlu0 %444  ;;  %v1462_v5 = vld [vmem:[#allocation2] ss:$12 sps:$4 sm:$0xff]  }
  0x9e   : > { %463 = vst.msk [vmem:[#allocation2 + $0x58] sm:$0xf] %vm212_vm0, %v447_v1  ;;  %462 = vst.msk [vmem:[#allocation2 + $0x4c] sm:$0xf] %vm212_vm0, %v445_v2 }
  0xa1   : > { %v511_v3 = vpop.permute.xlu1 %510  ;;  %v509_v4 = vpop.permute.xlu0 %508  ;;  %v1464_v6 = vld [vmem:[#allocation2 + $0x4] ss:$12 sps:$4 sm:$0xff]  }
  0xa2   : > { %527 = vst.msk [vmem:[#allocation2 + $0x58] sm:$0xf] %vm261_vm1, %v511_v3  ;;  %526 = vst.msk [vmem:[#allocation2 + $0x4c] sm:$0xf] %vm261_vm1, %v509_v4  ;;  %977 = vmatprep.mubr.bf16.mxu0 %v1464_v6 }
  0xa3   : > { %978 = vmatmul.mubr.bf16.vlgmr.msra.gmra.mxu0 %v1462_v5 }
  0xa5   : > { %v317_v7 = vpop.permute.xlu1 %316  ;;  %v315_v8 = vpop.permute.xlu0 %314 }
  0xa6   : > { %334 = vst.msk [vmem:[#allocation2 + $0x54] sm:$0xf] %vm326_vm2, %v317_v7  ;;  %333 = vst.msk [vmem:[#allocation2 + $0x48] sm:$0xf] %vm326_vm2, %v315_v8 }
  0xa9   : > { %v576_v9 = vpop.permute.xlu1 %575  ;;  %v574_v10 = vpop.permute.xlu0 %573 }
  0xaa   : > { %592 = vst.msk [vmem:[#allocation2 + $0x58] sm:$0xf] %vm326_vm2, %v576_v9  ;;  %591 = vst.msk [vmem:[#allocation2 + $0x4c] sm:$0xf] %vm326_vm2, %v574_v10 }
  0xad   : > { %v382_v11 = vpop.permute.xlu1 %381  ;;  %v380_v12 = vpop.permute.xlu0 %379 }
  0xae   : > { %399 = vst.msk [vmem:[#allocation2 + $0x54] sm:$0xf] %vm391_vm3, %v382_v11  ;;  %398 = vst.msk [vmem:[#allocation2 + $0x48] sm:$0xf] %vm391_vm3, %v380_v12 }
  0xb1   : > { %v640_v13 = vpop.permute.xlu1 %639  ;;  %v638_v14 = vpop.permute.xlu0 %637 }
  0xb2   : > { %656 = vst.msk [vmem:[#allocation2 + $0x58] sm:$0xf] %vm391_vm3, %v640_v13  ;;  %655 = vst.msk [vmem:[#allocation2 + $0x4c] sm:$0xf] %vm391_vm3, %v638_v14 }
  0xb5   : > { %v439_v15 = vpop.permute.xlu1 %438  ;;  %v437_v16 = vpop.permute.xlu0 %436  ;;  %v1465_v19 = vld [vmem:[#allocation2 + $0x48] ss:$12 sps:$4 sm:$0xff]  }
  0xb6   : > { %459 = vst.msk [vmem:[#allocation2 + $0x28] sm:$0xf] %vm212_vm0, %v439_v15  ;;  %458 = vst.msk [vmem:[#allocation2 + $0x1c] sm:$0xf] %vm212_vm0, %v437_v16 }
  0xb9   : > { %v503_v17 = vpop.permute.xlu1 %502  ;;  %v501_v18 = vpop.permute.xlu0 %500  ;;  %v1467_v20 = vld [vmem:[#allocation2 + $0x4c] ss:$12 sps:$4 sm:$0xff]  }
  0xba   : > { %523 = vst.msk [vmem:[#allocation2 + $0x28] sm:$0xf] %vm261_vm1, %v503_v17  ;;  %522 = vst.msk [vmem:[#allocation2 + $0x1c] sm:$0xf] %vm261_vm1, %v501_v18  ;;  %1001 = vmatprep.mubr.bf16.mxu1 %v1467_v20 }
  0xbb   : > { %1002 = vmatmul.mubr.bf16.vlgmr.msra.gmra.mxu1 %v1465_v19 }
  0xbc   : > { %1407 = vmatpush3.bf16.msra.mxu1 %v1715_v50  ;;  %1410 = vmatprep.mubr.msk.bf16.mxu1 %vm932_vm4, %v1470_v21 }
  0xbd   : > { %v309_v23 = vpop.permute.xlu1 %308  ;;  %v307_v24 = vpop.permute.xlu0 %306  ;;  %1408 = vmatprep.subr.bf16.mxu1 %v1469_v22 }
  0xbe   : > { %330 = vst.msk [vmem:[#allocation2 + $0x24] sm:$0xf] %vm326_vm2, %v309_v23  ;;  %329 = vst.msk [vmem:[#allocation2 + $0x18] sm:$0xf] %vm326_vm2, %v307_v24 }
  0xc0   : > { %1409 = vmatpush3.bf16.msra.mxu1 %v1469_v22 }
  0xc1   : > { %v568_v25 = vpop.permute.xlu1 %567  ;;  %v566_v26 = vpop.permute.xlu0 %565 }
  0xc2   : > { %588 = vst.msk [vmem:[#allocation2 + $0x28] sm:$0xf] %vm326_vm2, %v568_v25  ;;  %587 = vst.msk [vmem:[#allocation2 + $0x1c] sm:$0xf] %vm326_vm2, %v566_v26 }
  0xc3   : > { %1411 = vmatmul.mubr.msk.bf16.vlgmr.msra.gmra.mxu1 %vm932_vm4, %v1471_v27 }
  0xc4   : > { %1414 = vmatprep.mubr.msk.bf16.mxu1 %vm932_vm4, %v1472_v28 }
  0xc5   : > { %v374_v29 = vpop.permute.xlu1 %373  ;;  %v372_v30 = vpop.permute.xlu0 %371 }
  0xc6   : > { %395 = vst.msk [vmem:[#allocation2 + $0x24] sm:$0xf] %vm391_vm3, %v374_v29  ;;  %394 = vst.msk [vmem:[#allocation2 + $0x18] sm:$0xf] %vm391_vm3, %v372_v30 }
  0xc9   : > { %v632_v31 = vpop.permute.xlu1 %631  ;;  %v630_v32 = vpop.permute.xlu0 %629 }
  0xca   : > { %652 = vst.msk [vmem:[#allocation2 + $0x28] sm:$0xf] %vm391_vm3, %v632_v31  ;;  %651 = vst.msk [vmem:[#allocation2 + $0x1c] sm:$0xf] %vm391_vm3, %v630_v32 }
  0xcb   : > { %1415 = vmatmul.mubr.msk.bf16.gmra.mxu1 %vm932_vm4, %v1473_v33 }
  0xcd   : > { %v443_v34 = vpop.permute.xlu1 %442  ;;  %v441_v35 = vpop.permute.xlu0 %440 }
  0xce   : > { %461 = vst.msk [vmem:[#allocation2 + $0x40] sm:$0xf] %vm212_vm0, %v443_v34  ;;  %460 = vst.msk [vmem:[#allocation2 + $0x34] sm:$0xf] %vm212_vm0, %v441_v35 }
  0xd1   : > { %v507_v36 = vpop.permute.xlu1 %506  ;;  %v505_v37 = vpop.permute.xlu0 %504  ;;  %v709_v38 = vld [vmem:[#allocation2 + $0x18] sm:$0xff]  ;;  %v711_v39 = vld [vmem:[#allocation2 + $0x24] sm:$0xff] }
  0xd2   : > { %v1474_v40 = vld [vmem:[#allocation2 + $0x1c] ss:$12 sps:$4 sm:$0xff]   ;;  %525 = vst.msk [vmem:[#allocation2 + $0x40] sm:$0xf] %vm261_vm1, %v507_v36  ;;  %524 = vst.msk [vmem:[#allocation2 + $0x34] sm:$0xf] %vm261_vm1, %v505_v37  ;;  %v1254_v41 = vcombine.low %v709_v38, %v711_v39 }
  0xd3   : > { %985 = vmatprep.mubr.bf16.mxu0 %v1474_v40 }
  0xd4   : > { %986 = vmatmul.mubr.bf16.gmra.mxu0 %v1254_v41 }
  0xd5   : > { %v313_v42 = vpop.permute.xlu1 %312  ;;  %v311_v43 = vpop.permute.xlu0 %310 }
  0xd6   : > { %332 = vst.msk [vmem:[#allocation2 + $0x3c] sm:$0xf] %vm326_vm2, %v313_v42  ;;  %331 = vst.msk [vmem:[#allocation2 + $0x30] sm:$0xf] %vm326_vm2, %v311_v43 }
  0xd9   : > { %v572_v44 = vpop.permute.xlu1 %571  ;;  %v570_v45 = vpop.permute.xlu0 %569 }
  0xda   : > { %590 = vst.msk [vmem:[#allocation2 + $0x40] sm:$0xf] %vm326_vm2, %v572_v44  ;;  %589 = vst.msk [vmem:[#allocation2 + $0x34] sm:$0xf] %vm326_vm2, %v570_v45 }
  0xdd   : > { %v378_v46 = vpop.permute.xlu1 %377  ;;  %v376_v47 = vpop.permute.xlu0 %375 }
  0xde   : > { %397 = vst.msk [vmem:[#allocation2 + $0x3c] sm:$0xf] %vm391_vm3, %v378_v46  ;;  %396 = vst.msk [vmem:[#allocation2 + $0x30] sm:$0xf] %vm391_vm3, %v376_v47 }
  0xe1   : > { %v636_v48 = vpop.permute.xlu1 %635  ;;  %v634_v49 = vpop.permute.xlu0 %633 }
  0xe2   : > { %654 = vst.msk [vmem:[#allocation2 + $0x40] sm:$0xf] %vm391_vm3, %v636_v48  ;;  %653 = vst.msk [vmem:[#allocation2 + $0x34] sm:$0xf] %vm391_vm3, %v634_v49 }
  0xe5   : > { %v1478_v51 = vld [vmem:[#allocation2 + $0x30] ss:$12 sps:$4 sm:$0xff]  }
  0xe9   : > { %v1476_v50 = vld [vmem:[#allocation2 + $0x34] ss:$12 sps:$4 sm:$0xff]  }
  0xea   : > { %993 = vmatprep.mubr.bf16.mxu0 %v1476_v50 }
  0xeb   : > { %994 = vmatmul.mubr.bf16.gmra.mxu0 %v1478_v51 }
 0x163   : > { %v1376_v52 = vpop.f32.mrf.mxu0 }
 0x165   : > { %v1377_v53 = vpop.f32.mrf.mxu0 }
 0x166   : > { %v1378_v58 = vadd.f32 %v1377_v53, %v1376_v52 }
 0x167   : > { %v1379_v55 = vpop.f32.mrf.mxu0 }
 0x168   : > { %v980_v0 = vadd.f32 %v1378_v58, %v1250_v61 }
 0x169   : > { %v1380_v59 = vpop.f32.mrf.mxu0 }
 0x16a   : > { %v1381_v63 = vadd.f32 %v1380_v59, %v1379_v55 }
 0x16c   : > { %v983_v6 = vadd.f32 %v1381_v63, %v1250_v61 }
 0x17b   : > { %v1394_v54 = vpop.f32.mrf.mxu1 }
 0x17d   : > { %v1395_v56 = vpop.f32.mrf.mxu1 }
 0x17e   : > { %v1396_v2 = vadd.f32 %v1395_v56, %v1394_v54 }
 0x17f   : > { %v1397_v57 = vpop.f32.mrf.mxu1 }
 0x180   : > { %v1004_v10 = vadd.f32 %v1396_v2, %v1250_v61 }
 0x181   : > { %v1398_v60 = vpop.f32.mrf.mxu1 }
 0x182   : > { %v1399_v8 = vadd.f32 %v1398_v60, %v1397_v57 }
 0x183   : > { %v1412_v62 = vpop.f32.mrf.mxu1 }
 0x184   : > { %v1007_v16 = vadd.f32 %v1399_v8, %v1250_v61 }
 0x185   : > { %v1044_v1 = vpop.f32.mrf.mxu1 }
 0x186   : > { %v1045_v3 = vadd.f32 %v1044_v1, %v980_v0 }
 0x187   : > { %v1413_v4 = vpop.f32.mrf.mxu1 }
 0x188   : > { %v1075_v5 = vmax.f32 %v1045_v3, 0.0 }
 0x189   : > { %v1047_v7 = vpop.f32.mrf.mxu1 }
 0x18a   : > { %1083 = vst.msk [vmem:[%s1834_s10] sm:$0xff] %vm932_vm4, %v1075_v5  ;;  %v1048_v9 = vadd.f32 %v1047_v7, %v983_v6 }
 0x18b   : > { %v1416_v11 = vpop.f32.mrf.mxu1 }
 0x18c   : > { %v1076_v12 = vmax.f32 %v1048_v9, 0.0  ;;  %v1069_v13 = vadd.f32 %v1416_v11, %v1004_v10 }
 0x18d   : > { %v1060_v14 = vpop.f32.mrf.mxu1 }
 0x18e   : > { %1084 = vst.msk [vmem:[%s1834_s10 + $0x8] sm:$0xff] %vm932_vm4, %v1076_v12  ;;  %v1081_v15 = vmax.f32 %v1069_v13, 0.0 }
 0x18f   : > { %v1417_v17 = vpop.f32.mrf.mxu1 }
 0x190   : > { %1089 = vst.msk [vmem:[%s1834_s10 + $0x30] sm:$0xff] %vm932_vm4, %v1081_v15  ;;  %v1072_v18 = vadd.f32 %v1417_v17, %v1007_v16 }
 0x191   : > { %v1063_v42 = vpop.f32.mrf.mxu1 }
 0x192   : > { %v1082_v19 = vmax.f32 %v1072_v18, 0.0 }
 0x194   : > { %v1382_v20 = vpop.f32.mrf.mxu0  ;;  %1090 = vst.msk [vmem:[%s1834_s10 + $0x38] sm:$0xff] %vm932_vm4, %v1082_v19 }
 0x196   : > { %v1383_v21 = vpop.f32.mrf.mxu0 }
 0x197   : > { %v1384_v22 = vadd.f32 %v1383_v21, %v1382_v20 }
 0x198   : > { %v1385_v23 = vpop.f32.mrf.mxu0 }
 0x199   : > { %v988_v24 = vadd.f32 %v1384_v22, %v1250_v61 }
 0x19a   : > { %v1386_v25 = vpop.f32.mrf.mxu0 }
 0x19b   : > { %v1053_v26 = vadd.f32 %v1412_v62, %v988_v24  ;;  %v1387_v27 = vadd.f32 %v1386_v25, %v1385_v23 }
 0x19d   : > { %v1077_v28 = vmax.f32 %v1053_v26, 0.0  ;;  %v991_v29 = vadd.f32 %v1387_v27, %v1250_v61 }
 0x19f   : > { %1085 = vst.msk [vmem:[%s1834_s10 + $0x10] sm:$0xff] %vm932_vm4, %v1077_v28  ;;  %v1056_v30 = vadd.f32 %v1413_v4, %v991_v29 }
 0x1a1   : > { %v1078_v31 = vmax.f32 %v1056_v30, 0.0 }
 0x1a3   : > { %1086 = vst.msk [vmem:[%s1834_s10 + $0x18] sm:$0xff] %vm932_vm4, %v1078_v31 }
 0x1ab   : > { %v1388_v32 = vpop.f32.mrf.mxu0 }
 0x1ad   : > { %v1389_v33 = vpop.f32.mrf.mxu0 }
 0x1ae   : > { %v1390_v34 = vadd.f32 %v1389_v33, %v1388_v32 }
 0x1af   : > { %v1391_v35 = vpop.f32.mrf.mxu0 }
 0x1b0   : > { %v996_v36 = vadd.f32 %v1390_v34, %v1250_v61 }
 0x1b1   : > { %v1392_v37 = vpop.f32.mrf.mxu0 }
 0x1b2   : > { %v1061_v38 = vadd.f32 %v1060_v14, %v996_v36  ;;  %v1393_v39 = vadd.f32 %v1392_v37, %v1391_v35 }
 0x1b4   : > { %v1079_v40 = vmax.f32 %v1061_v38, 0.0  ;;  %v999_v41 = vadd.f32 %v1393_v39, %v1250_v61 }
 0x1b6   : > { %1087 = vst.msk [vmem:[%s1834_s10 + $0x20] sm:$0xff] %vm932_vm4, %v1079_v40  ;;  %v1064_v43 = vadd.f32 %v1063_v42, %v999_v41 }
 0x1b8   : > { %v1080_v44 = vmax.f32 %v1064_v43, 0.0 }
 0x1ba   : > { %1088 = vst.msk [vmem:[%s1834_s10 + $0x28] sm:$0xff] %vm932_vm4, %v1080_v44 }
 0x1bb PF: > { %s13_s12 = sadd.s32 1, %s1485_s12  }
 0x1bc   : > { %p10_p4 = scmp.ge.s32.totalorder %s13_s12, 4  }
 0x1be   :  { %12 = sbr.rel (!%p10_p4) target bundleno = 1 (0x1), region = 63 }

// kernel: deep_ca_unet_forward.8
= control target key start
LH: loop header
LB: loop body
LE: loop exit
PB: predicated region body
PF: predicated region fallthrough
CT: control target
= control target key end

     0   :  { %8 = vsyncpa [#allocation4], 0  ;;  %s3908_s12 = smov 0   ;;  %s5117_s0 = inlined_call_operand.vmem [shape: f32[2,18,18,3], index: 0, kind: input, shape index: {}]   ;;  %s5118_s1 = inlined_call_operand.vmem [shape: bf16[27,32], index: 1, kind: input, shape index: {}]   ;;  %s5119_s2 = inlined_call_operand.hbm [shape: f32[1,32], index: 2, kind: input, shape index: {}]   ;;  %s5120_s3 = inlined_call_operand.vmem [shape: f32[2,16,16,32], index: 3, kind: output, shape index: {}]  }
   0x1 LB: > { %s2919_s13 = sadd.s32 4294967295, %s3876_s12   ;;  %p2921_p0 = scmp.ge.s32.totalorder %s3876_s12, 1  ;;  %s3876_s12 = sphi %s3908_s12, %s14_s12  }
   0x2   : > { %p113_p1 = scmp.lt.s32.totalorder %s3876_s12, 3  ;;  %p3802_p3 = scmp.eq.s32.totalorder %s2919_s13, 0 }
   0x3   : > { %s3878_s15 = smov [#allocation3]  }
   0x4   : > { %p3916_p2 = pnand %p2921_p0, %p113_p1  ;;  %s129_s16 = sshll.u32 %s3878_s15, 4  ;;  %s130_s16 = int_to_ptr.vmem [resolvable:$true] %s129_s16 }
   0x5   : > { %s3851_s17 = scalar_lea.vmem %s130_s16, 16  ;;  %s3858_s18 = scalar_lea.vmem %s130_s16, 32 }
   0x6   : > { %p3798_p4 = pneg %p3916_p2  ;;  %p3852_p7 = scmp.ne.s32.totalorder %s130_s16, %s3851_s17 }
   0x7   : > { %p3859_p10 = scmp.lt.s32.totalorder %s130_s16, %s130_s16  ;;  %p3860_p11 = scmp.lt.s32.totalorder %s3858_s18, %s3851_s17 }
   0x8   : > { %p3799_p5 = pnand %p3802_p3, %p3798_p4 }
   0x9   : > { %p3861_p12 = por %p3860_p11, %p3859_p10 }
   0xa   : > { %p3842_p6 = pneg %p3799_p5 }
   0xc   : > { %p3854_p8 = pnand %p3852_p7, %p3842_p6 }
   0xe   : > { %p3855_p9 = pneg %p3854_p8 }
  0x10   : > { %p3862_p13 = pnand %p3861_p12, %p3855_p9 }
  0x12   : > { %3865 = shalt.err (!%p3862_p13)
}
  0x13   : > { %3801 = dma.hbm_to_vmem [thread:$0]  (!%p3799_p5), %s5119_s2, 16, %s130_s16, [#allocation4]  }
  0x14   : > { %150 = sbr.rel (%p3916_p2) target bundleno = 870 (0x366), region = 32 }
  0x19   : > { %3871 = dma.done.wait (%p3802_p3), [#allocation4], 16  }
  0x1a   : > { %3873 = vsyncadd (%p3802_p3), [#allocation4], 4294967280  ;;  %p174_p0 = scmp.lt.s32.totalorder %s2919_s13, 1  ;;  %s3879_s25 = smov 3   ;;  %vm345_vm0 = vcmask 19456   ;;  %vm602_vm1 = vcmask 44056  }
  0x1b   : > { %s3880_s26 = smov 6   ;;  %s3881_s27 = smov 9   ;;  %vm859_vm2 = vcmask 68656   ;;  %vm1117_vm3 = vcmask 93256   ;;  %vm2619_vm4 = vcmask 1044480   ;;  %vm2620_vm5 = vcmask 1045504  }
  0x1c   : > { %s5129_s13 = smov (!%p174_p0, %s2919_s13), 1  ;;  %s3882_s28 = smov 12   ;;  %vm1374_vm6 = vcmask 117856   ;;  %vm1631_vm7 = vcmask 142456   ;;  %vm1889_vm8 = vcmask 167056   ;;  %vm2146_vm9 = vcmask 191656  }
  0x1d   : > { %s3793_s21 = smul.u32 432, %s5129_s13  ;;  %s3883_s29 = smov 15   ;;  %vm2403_vm10 = vcmask 216256   ;;  %vm2570_vm11 = vcmask 220160   ;;  %vm2819_vm12 = vcmask 261120  }
  0x1e   : > { %s3884_s30 = smov 18   ;;  %s3885_s4 = smov 21  }
  0x1f   : > { %s3936_s24 = scalar_lea.vmem %s5117_s0, %s3793_s21  ;;  %s3887_s9 = smov 24  }
  0x20   : > { %v380_v0 = vld [vmem:[%s3936_s24 + $0x19] sm:$0xff]  ;;  %v378_v1 = vld [vmem:[%s3936_s24 + $0x1] sm:$0xff]  ;;  %v379_v5 = vld [vmem:[%s3936_s24 + $0x9] sm:$0xff]  ;;  %s3446_s10 = sshll.u32 %s5129_s13, 8 }
  0x21   : > { %v381_v2 = vld [vmem:[%s3936_s24 + $0x21] sm:$0xff]  ;;  %v3941_v3 = vpack.c.bf16 %v380_v0, %v380_v0  ;;  %v3479_v4 = vpack.c.bf16 %v378_v1, %v378_v1  ;;  %v3480_v7 = vpack.c.bf16 %v379_v5, %v379_v5  ;;  %v383_v8 = vld [vmem:[%s3936_s24 + $0x39] sm:$0xff]  ;;  %v382_v9 = vld [vmem:[%s3936_s24 + $0x31] sm:$0xff]  ;;  %s4997_s15 = scalar_lea.vmem %s5120_s3, %s3446_s10 }
  0x22   : > { %v3947_v6 = vpack.c.bf16 %v381_v2, %v381_v2  ;;  %v3954_v10 = vpack.c.bf16 %v383_v8, %v383_v8  ;;  %v3956_v11 = vpack.c.bf16 %v382_v9, %v382_v9  ;;  %v385_v12 = vld [vmem:[%s3936_s24 + $0x51] sm:$0xff]  ;;  %v384_v13 = vld [vmem:[%s3936_s24 + $0x49] sm:$0xff]  ;;  %v386_v17 = vld [vmem:[%s3936_s24 + $0x61] sm:$0xff] }
  0x23   : > { %510 = vrot.lane.b32.xlu1 %v3941_v3, %s3879_s25  ;;  %506 = vrot.lane.b32.xlu0 %v3479_v4, %s3879_s25  ;;  %v3964_v14 = vpack.c.bf16 %v385_v12, %v385_v12  ;;  %v3966_v15 = vpack.c.bf16 %v384_v13, %v384_v13  ;;  %v387_v16 = vld [vmem:[%s3936_s24 + $0x69] sm:$0xff]  ;;  %v3976_v19 = vpack.c.bf16 %v386_v17, %v386_v17  ;;  %v389_v20 = vld [vmem:[%s3936_s24 + $0x81] sm:$0xff] }
  0x24   : > { %v3974_v18 = vpack.c.bf16 %v387_v16, %v387_v16  ;;  %v388_v21 = vld [vmem:[%s3936_s24 + $0x79] sm:$0xff]  ;;  %v3984_v22 = vpack.c.bf16 %v389_v20, %v389_v20  ;;  %v390_v25 = vld [vmem:[%s3936_s24 + $0x91] sm:$0xff]  ;;  %v186_v32 = vld [vmem:[%s3936_s24 + $0x8] sm:$0xff] }
  0x25   : > { %v3986_v23 = vpack.c.bf16 %v388_v21, %v388_v21  ;;  %v391_v24 = vld [vmem:[%s3936_s24 + $0x99] sm:$0xff]  ;;  %v3491_v33 = vpack.c.bf16 %v390_v25, %v390_v25  ;;  %v393_v34 = vld [vmem:[%s3936_s24 + $0xb1] sm:$0xff]  ;;  %v392_v35 = vld [vmem:[%s3936_s24 + $0xa9] sm:$0xff]  ;;  %v3448_v37 = vpack.c.bf16 %v186_v32, %v186_v32 }
  0x26   : > { %v187_v26 = vld [vmem:[%s3936_s24 + $0x18] sm:$0xff]  ;;  %v185_v27 = vld [vmem:[%s3936_s24] sm:$0xff]  ;;  %v3492_v28 = vpack.c.bf16 %v391_v24, %v391_v24  ;;  %v4005_v38 = vld [vmem:[%s3936_s24 + $0xc9] sm:$0xff]  ;;  %v3494_v46 = vpack.c.bf16 %v393_v34, %v393_v34  ;;  %v3493_v47 = vpack.c.bf16 %v392_v35, %v392_v35 }
  0x27   : > { %512 = vrot.lane.b32.xlu1 %v3947_v6, %s3879_s25  ;;  %508 = vrot.lane.b32.xlu0 %v3480_v7, %s3879_s25  ;;  %v3992_v29 = vpack.c.bf16 %v187_v26, %v187_v26  ;;  %v3447_v30 = vpack.c.bf16 %v185_v27, %v185_v27  ;;  %v188_v31 = vld [vmem:[%s3936_s24 + $0x20] sm:$0xff]  ;;  %v190_v39 = vld [vmem:[%s3936_s24 + $0x38] sm:$0xff]  ;;  %347 = vst.msk [vmem:[#allocation2 + $0x4] sm:$0xf] %vm345_vm0, %v3448_v37 }
  0x28   : > { %v4002_v36 = vpack.c.bf16 %v188_v31, %v188_v31  ;;  %v189_v40 = vld [vmem:[%s3936_s24 + $0x30] sm:$0xff]  ;;  %v4013_v41 = vld [vmem:[%s3936_s24 + $0xc1] sm:$0xff]  ;;  %v4018_v42 = vpack.c.bf16 %v190_v39, %v190_v39  ;;  %v195_v56 = vld [vmem:[%s3936_s24 + $0x78] sm:$0xff]  ;;  %v3496_v63 = vpack.c.bf16 %v4005_v38, %v4005_v38 }
  0x29   : > { %348 = vst.msk [vmem:[#allocation2 + $0x8] sm:$0xf] %vm345_vm0, %v3992_v29  ;;  %346 = vst.msk [vmem:[#allocation2] sm:$0xf] %vm345_vm0, %v3447_v30  ;;  %v4020_v43 = vpack.c.bf16 %v189_v40, %v189_v40  ;;  %v192_v44 = vld [vmem:[%s3936_s24 + $0x50] sm:$0xff]  ;;  %v191_v45 = vld [vmem:[%s3936_s24 + $0x48] sm:$0xff]  ;;  %v4049_v58 = vpack.c.bf16 %v195_v56, %v195_v56  ;;  %v3495_v9 = vpack.c.bf16 %v4013_v41, %v4013_v41 }
  0x2a   : > { %349 = vst.msk [vmem:[#allocation2 + $0xc] sm:$0xf] %vm345_vm0, %v4002_v36  ;;  %v4024_v48 = vpack.c.bf16 %v192_v44, %v192_v44  ;;  %v4026_v49 = vpack.c.bf16 %v191_v45, %v191_v45  ;;  %v194_v50 = vld [vmem:[%s3936_s24 + $0x68] sm:$0xff]  ;;  %v193_v51 = vld [vmem:[%s3936_s24 + $0x60] sm:$0xff]  ;;  %351 = vst.msk [vmem:[#allocation2 + $0x14] sm:$0xf] %vm345_vm0, %v4018_v42 }
  0x2b   : > { %516 = vrot.lane.b32.xlu1 %v3954_v10, %s3879_s25  ;;  %514 = vrot.lane.b32.xlu0 %v3956_v11, %s3879_s25  ;;  %v196_v52 = vld [vmem:[%s3936_s24 + $0x80] sm:$0xff]  ;;  %350 = vst.msk [vmem:[#allocation2 + $0x10] sm:$0xf] %vm345_vm0, %v4020_v43  ;;  %v4037_v53 = vpack.c.bf16 %v194_v50, %v194_v50  ;;  %v4039_v54 = vpack.c.bf16 %v193_v51, %v193_v51  ;;  %v198_v57 = vld [vmem:[%s3936_s24 + $0x98] sm:$0xff]  ;;  %356 = vst.msk [vmem:[#allocation2 + $0x28] sm:$0xf] %vm345_vm0, %v4049_v58 }
  0x2c   : > { %v4041_v55 = vpack.c.bf16 %v196_v52, %v196_v52  ;;  %353 = vst.msk [vmem:[#allocation2 + $0x1c] sm:$0xf] %vm345_vm0, %v4024_v48  ;;  %352 = vst.msk [vmem:[#allocation2 + $0x18] sm:$0xf] %vm345_vm0, %v4026_v49  ;;  %v4051_v59 = vpack.c.bf16 %v198_v57, %v198_v57  ;;  %v197_v60 = vld [vmem:[%s3936_s24 + $0x90] sm:$0xff]  ;;  %v199_v62 = vld [vmem:[%s3936_s24 + $0xa8] sm:$0xff] }
  0x2d   : > { %v200_v61 = vld [vmem:[%s3936_s24 + $0xb0] sm:$0xff]  ;;  %v397_v0 = vld [vmem:[%s3936_s24 + $0xe1] sm:$0xff]  ;;  %355 = vst.msk [vmem:[#allocation2 + $0x24] sm:$0xf] %vm345_vm0, %v4037_v53  ;;  %354 = vst.msk [vmem:[#allocation2 + $0x20] sm:$0xf] %vm345_vm0, %v4039_v54  ;;  %v4065_v1 = vpack.c.bf16 %v197_v60, %v197_v60  ;;  %v4069_v4 = vpack.c.bf16 %v199_v62, %v199_v62 }
  0x2e   : > { %357 = vst.msk [vmem:[#allocation2 + $0x2c] sm:$0xf] %vm345_vm0, %v4041_v55  ;;  %v4067_v2 = vpack.c.bf16 %v200_v61, %v200_v61  ;;  %v202_v5 = vld [vmem:[%s3936_s24 + $0xc8] sm:$0xff]  ;;  %v201_v7 = vld [vmem:[%s3936_s24 + $0xc0] sm:$0xff]  ;;  %359 = vst.msk [vmem:[#allocation2 + $0x34] sm:$0xf] %vm345_vm0, %v4051_v59 }
  0x2f   : > { %520 = vrot.lane.b32.xlu1 %v3964_v14, %s3879_s25  ;;  %518 = vrot.lane.b32.xlu0 %v3966_v15, %s3879_s25  ;;  %v204_v8 = vld [vmem:[%s3936_s24 + $0xe0] sm:$0xff]  ;;  %v4081_v13 = vpack.c.bf16 %v202_v5, %v202_v5  ;;  %v4083_v16 = vpack.c.bf16 %v201_v7, %v201_v7  ;;  %v203_v20 = vld [vmem:[%s3936_s24 + $0xd8] sm:$0xff]  ;;  %358 = vst.msk [vmem:[#allocation2 + $0x30] sm:$0xf] %vm345_vm0, %v4065_v1  ;;  %360 = vst.msk [vmem:[#allocation2 + $0x38] sm:$0xf] %vm345_vm0, %v4069_v4 }
  0x30   : > { %v396_v12 = vld [vmem:[%s3936_s24 + $0xd9] sm:$0xff]  ;;  %v4085_v17 = vpack.c.bf16 %v204_v8, %v204_v8  ;;  %v205_v24 = vld [vmem:[%s3936_s24 + $0xf0] sm:$0xff]  ;;  %361 = vst.msk [vmem:[#allocation2 + $0x3c] sm:$0xf] %vm345_vm0, %v4067_v2  ;;  %v4098_v25 = vpack.c.bf16 %v203_v20, %v203_v20  ;;  %v207_v30 = vld [vmem:[%s3936_s24 + $0x108] sm:$0xff] }
  0x31   : > { %v206_v21 = vld [vmem:[%s3936_s24 + $0xf8] sm:$0xff]  ;;  %v4102_v27 = vpack.c.bf16 %v205_v24, %v205_v24  ;;  %363 = vst.msk [vmem:[#allocation2 + $0x44] sm:$0xf] %vm345_vm0, %v4081_v13  ;;  %362 = vst.msk [vmem:[#allocation2 + $0x40] sm:$0xf] %vm345_vm0, %v4083_v16  ;;  %v4114_v32 = vpack.c.bf16 %v207_v30, %v207_v30  ;;  %v210_v34 = vld [vmem:[%s3936_s24 + $0x128] sm:$0xff]  ;;  %v4132_v37 = vpack.c.bf16 %v396_v12, %v396_v12 }
  0x32   : > { %v4100_v26 = vpack.c.bf16 %v206_v21, %v206_v21  ;;  %365 = vst.msk [vmem:[#allocation2 + $0x4c] sm:$0xf] %vm345_vm0, %v4085_v17  ;;  %364 = vst.msk [vmem:[#allocation2 + $0x48] sm:$0xf] %vm345_vm0, %v4098_v25  ;;  %v209_v35 = vld [vmem:[%s3936_s24 + $0x120] sm:$0xff]  ;;  %v4135_v39 = vpack.c.bf16 %v210_v34, %v210_v34  ;;  %v398_v41 = vld [vmem:[%s3936_s24 + $0xf1] sm:$0xff] }
  0x33   : > { %524 = vrot.lane.b32.xlu1 %v3974_v18, %s3879_s25  ;;  %522 = vrot.lane.b32.xlu0 %v3976_v19, %s3879_s25  ;;  %366 = vst.msk [vmem:[#allocation2 + $0x50] sm:$0xf] %vm345_vm0, %v4102_v27  ;;  %368 = vst.msk [vmem:[#allocation2 + $0x58] sm:$0xf] %vm345_vm0, %v4114_v32  ;;  %v399_v38 = vld [vmem:[%s3936_s24 + $0xf9] sm:$0xff]  ;;  %v4137_v40 = vpack.c.bf16 %v209_v35, %v209_v35  ;;  %v401_v50 = vld [vmem:[%s3936_s24 + $0x111] sm:$0xff] }
  0x34   : > { %367 = vst.msk [vmem:[#allocation2 + $0x54] sm:$0xf] %vm345_vm0, %v4100_v26  ;;  %371 = vst.msk [vmem:[#allocation2 + $0x64] sm:$0xf] %vm345_vm0, %v4135_v39  ;;  %v4144_v44 = vpack.c.bf16 %v399_v38, %v399_v38  ;;  %v212_v45 = vld [vmem:[%s3936_s24 + $0x140] sm:$0xff]  ;;  %v400_v56 = vld [vmem:[%s3936_s24 + $0x109] sm:$0xff]  ;;  %v3502_v57 = vpack.c.bf16 %v401_v50, %v401_v50 }
  0x35   : > { %370 = vst.msk [vmem:[#allocation2 + $0x60] sm:$0xf] %vm345_vm0, %v4137_v40  ;;  %v4155_v51 = vpack.c.bf16 %v212_v45, %v212_v45  ;;  %v214_v60 = vld [vmem:[%s3936_s24 + $0x158] sm:$0xff]  ;;  %v213_v61 = vld [vmem:[%s3936_s24 + $0x150] sm:$0xff]  ;;  %v3501_v62 = vpack.c.bf16 %v400_v56, %v400_v56  ;;  %v402_v7 = vld [vmem:[%s3936_s24 + $0x121] sm:$0xff] }
  0x36   : > { %v4173_v5 = vpack.c.bf16 %v213_v61, %v213_v61  ;;  %v215_v12 = vld [vmem:[%s3936_s24 + $0x168] sm:$0xff]  ;;  %v3503_v20 = vpack.c.bf16 %v402_v7, %v402_v7  ;;  %v404_v30 = vld [vmem:[%s3936_s24 + $0x139] sm:$0xff]  ;;  %v409_v50 = vld [vmem:[%s3936_s24 + $0x171] sm:$0xff] }
  0x37   : > { %528 = vrot.lane.b32.xlu1 %v3984_v22, %s3879_s25  ;;  %526 = vrot.lane.b32.xlu0 %v3986_v23, %s3879_s25  ;;  %373 = vst.msk [vmem:[#allocation2 + $0x6c] sm:$0xf] %vm345_vm0, %v4155_v51  ;;  %v4186_v24 = vpack.c.bf16 %v215_v12, %v215_v12  ;;  %v3505_v35 = vpack.c.bf16 %v404_v30, %v404_v30  ;;  %v407_v38 = vld [vmem:[%s3936_s24 + $0x159] sm:$0xff]  ;;  %v408_v56 = vld [vmem:[%s3936_s24 + $0x169] sm:$0xff] }
  0x38   : > { %374 = vst.msk [vmem:[#allocation2 + $0x70] sm:$0xf] %vm345_vm0, %v4173_v5  ;;  %v3508_v45 = vpack.c.bf16 %v407_v38, %v407_v38  ;;  %v636_v61 = vld [vmem:[%s3936_s24 + $0xa] sm:$0xff]  ;;  %v639_v30 = vld [vmem:[%s3936_s24 + $0x32] sm:$0xff] }
  0x39   : > { %376 = vst.msk [vmem:[#allocation2 + $0x78] sm:$0xf] %vm345_vm0, %v4186_v24  ;;  %v642_v38 = vld [vmem:[%s3936_s24 + $0x52] sm:$0xff] }
  0x3b   : > { %532 = vrot.lane.b32.xlu1 %v3492_v28, %s3879_s25  ;;  %530 = vrot.lane.b32.xlu0 %v3491_v33, %s3879_s25  ;;  %v208_v28 = vld [vmem:[%s3936_s24 + $0x110] sm:$0xff]  ;;  %v4122_v33 = vpack.c.bf16 %v397_v0, %v397_v0  ;;  %v4171_v0 = vpack.c.bf16 %v214_v60, %v214_v60  ;;  %v3509_v60 = vpack.c.bf16 %v408_v56, %v408_v56  ;;  %v643_v56 = vld [vmem:[%s3936_s24 + $0x62] sm:$0xff] }
  0x3c   : > { %v4112_v31 = vpack.c.bf16 %v208_v28, %v208_v28  ;;  %v405_v28 = vld [vmem:[%s3936_s24 + $0x141] sm:$0xff] }
  0x3d   : > { %375 = vst.msk [vmem:[#allocation2 + $0x74] sm:$0xf] %vm345_vm0, %v4171_v0  ;;  %v3506_v34 = vpack.c.bf16 %v405_v28, %v405_v28  ;;  %v640_v28 = vld [vmem:[%s3936_s24 + $0x3a] sm:$0xff] }
  0x3e   : > { %369 = vst.msk [vmem:[#allocation2 + $0x5c] sm:$0xf] %vm345_vm0, %v4112_v31 }
  0x3f   : > { %536 = vrot.lane.b32.xlu1 %v3494_v46, %s3879_s25  ;;  %534 = vrot.lane.b32.xlu0 %v3493_v47, %s3879_s25  ;;  %v211_v46 = vld [vmem:[%s3936_s24 + $0x138] sm:$0xff]  ;;  %v4152_v47 = vpack.c.bf16 %v398_v41, %v398_v41 }
  0x40   : > { %v4157_v52 = vpack.c.bf16 %v211_v46, %v211_v46  ;;  %v406_v41 = vld [vmem:[%s3936_s24 + $0x151] sm:$0xff] }
  0x41   : > { %v3507_v46 = vpack.c.bf16 %v406_v41, %v406_v41  ;;  %v641_v41 = vld [vmem:[%s3936_s24 + $0x4a] sm:$0xff] }
  0x42   : > { %372 = vst.msk [vmem:[#allocation2 + $0x68] sm:$0xf] %vm345_vm0, %v4157_v52 }
  0x43   : > { %540 = vrot.lane.b32.xlu1 %v3496_v63, %s3879_s25  ;;  %538 = vrot.lane.b32.xlu0 %v3495_v9, %s3879_s25  ;;  %v403_v63 = vld [vmem:[%s3936_s24 + $0x129] sm:$0xff] }
  0x44   : > { %v3504_v8 = vpack.c.bf16 %v403_v63, %v403_v63  ;;  %v216_v9 = vld [vmem:[%s3936_s24 + $0x170] sm:$0xff]  ;;  %v3512_v63 = vpack.c.bf16 %v636_v61, %v636_v61  ;;  %v646_v61 = vld [vmem:[%s3936_s24 + $0x82] sm:$0xff] }
  0x45   : > { %v4184_v21 = vpack.c.bf16 %v216_v9, %v216_v9  ;;  %v637_v9 = vld [vmem:[%s3936_s24 + $0x1a] sm:$0xff] }
  0x47   : > { %544 = vrot.lane.b32.xlu1 %v4122_v33, %s3879_s25  ;;  %542 = vrot.lane.b32.xlu0 %v4132_v37, %s3879_s25  ;;  %377 = vst.msk [vmem:[#allocation2 + $0x7c] sm:$0xf] %vm345_vm0, %v4184_v21 }
  0x4b   : > { %548 = vrot.lane.b32.xlu1 %v4144_v44, %s3879_s25  ;;  %546 = vrot.lane.b32.xlu0 %v4152_v47, %s3879_s25 }
  0x4f   : > { %552 = vrot.lane.b32.xlu1 %v3502_v57, %s3879_s25  ;;  %550 = vrot.lane.b32.xlu0 %v3501_v62, %s3879_s25  ;;  %v3510_v57 = vpack.c.bf16 %v409_v50, %v409_v50  ;;  %v635_v62 = vld [vmem:[%s3936_s24 + $0x2] sm:$0xff]  ;;  %v644_v50 = vld [vmem:[%s3936_s24 + $0x6a] sm:$0xff] }
  0x50   : > { %v3511_v7 = vpack.c.bf16 %v635_v62, %v635_v62  ;;  %v645_v62 = vld [vmem:[%s3936_s24 + $0x7a] sm:$0xff] }
  0x53   : > { %556 = vrot.lane.b32.xlu1 %v3504_v8, %s3879_s25  ;;  %554 = vrot.lane.b32.xlu0 %v3503_v20, %s3879_s25  ;;  %v638_v8 = vld [vmem:[%s3936_s24 + $0x22] sm:$0xff]  ;;  %v4214_v20 = vpack.c.bf16 %v637_v9, %v637_v9  ;;  %v647_v9 = vld [vmem:[%s3936_s24 + $0x92] sm:$0xff] }
  0x54   : > { %v4212_v12 = vpack.c.bf16 %v638_v8, %v638_v8  ;;  %v648_v8 = vld [vmem:[%s3936_s24 + $0x9a] sm:$0xff] }
  0x57   : > { %560 = vrot.lane.b32.xlu1 %v3506_v34, %s3879_s25  ;;  %558 = vrot.lane.b32.xlu0 %v3505_v35, %s3879_s25  ;;  %v4222_v34 = vpack.c.bf16 %v640_v28, %v640_v28  ;;  %v4224_v35 = vpack.c.bf16 %v639_v30, %v639_v30  ;;  %v3524_v28 = vpack.c.bf16 %v648_v8, %v648_v8  ;;  %v656_v8 = vld [vmem:[%s3936_s24 + $0xfa] sm:$0xff] }
  0x58   : > { %v3523_v30 = vpack.c.bf16 %v647_v9, %v647_v9  ;;  %v655_v9 = vld [vmem:[%s3936_s24 + $0xf2] sm:$0xff] }
  0x5b   : > { %564 = vrot.lane.b32.xlu1 %v3508_v45, %s3879_s25  ;;  %562 = vrot.lane.b32.xlu0 %v3507_v46, %s3879_s25  ;;  %v3518_v45 = vpack.c.bf16 %v642_v38, %v642_v38  ;;  %v3517_v46 = vpack.c.bf16 %v641_v41, %v641_v41  ;;  %v650_v38 = vld [vmem:[%s3936_s24 + $0xb2] sm:$0xff]  ;;  %v649_v41 = vld [vmem:[%s3936_s24 + $0xaa] sm:$0xff] }
  0x5f   : > { %568 = vrot.lane.b32.xlu1 %v3510_v57, %s3879_s25  ;;  %566 = vrot.lane.b32.xlu0 %v3509_v60, %s3879_s25  ;;  %v3520_v57 = vpack.c.bf16 %v644_v50, %v644_v50  ;;  %v3519_v60 = vpack.c.bf16 %v643_v56, %v643_v56  ;;  %v652_v50 = vld [vmem:[%s3936_s24 + $0xca] sm:$0xff]  ;;  %v651_v56 = vld [vmem:[%s3936_s24 + $0xc2] sm:$0xff] }
  0x63   : > { %765 = vrot.lane.b32.xlu1 %v3512_v63, %s3880_s26  ;;  %763 = vrot.lane.b32.xlu0 %v3511_v7, %s3880_s26  ;;  %v3522_v63 = vpack.c.bf16 %v646_v61, %v646_v61  ;;  %v3521_v7 = vpack.c.bf16 %v645_v62, %v645_v62  ;;  %v654_v61 = vld [vmem:[%s3936_s24 + $0xe2] sm:$0xff]  ;;  %v653_v62 = vld [vmem:[%s3936_s24 + $0xda] sm:$0xff] }
  0x67   : > { %769 = vrot.lane.b32.xlu1 %v4212_v12, %s3880_s26  ;;  %767 = vrot.lane.b32.xlu0 %v4214_v20, %s3880_s26 }
  0x6b   : > { %773 = vrot.lane.b32.xlu1 %v4222_v34, %s3880_s26  ;;  %771 = vrot.lane.b32.xlu0 %v4224_v35, %s3880_s26 }
  0x6f   : > { %777 = vrot.lane.b32.xlu1 %v3518_v45, %s3880_s26  ;;  %775 = vrot.lane.b32.xlu0 %v3517_v46, %s3880_s26  ;;  %v3526_v45 = vpack.c.bf16 %v650_v38, %v650_v38  ;;  %v3525_v46 = vpack.c.bf16 %v649_v41, %v649_v41  ;;  %v658_v38 = vld [vmem:[%s3936_s24 + $0x112] sm:$0xff]  ;;  %v657_v41 = vld [vmem:[%s3936_s24 + $0x10a] sm:$0xff] }
  0x73   : > { %781 = vrot.lane.b32.xlu1 %v3520_v57, %s3880_s26  ;;  %779 = vrot.lane.b32.xlu0 %v3519_v60, %s3880_s26  ;;  %v3528_v57 = vpack.c.bf16 %v652_v50, %v652_v50  ;;  %v3527_v60 = vpack.c.bf16 %v651_v56, %v651_v56  ;;  %v660_v50 = vld [vmem:[%s3936_s24 + $0x12a] sm:$0xff]  ;;  %v659_v56 = vld [vmem:[%s3936_s24 + $0x122] sm:$0xff] }
  0x77   : > { %785 = vrot.lane.b32.xlu1 %v3522_v63, %s3880_s26  ;;  %783 = vrot.lane.b32.xlu0 %v3521_v7, %s3880_s26  ;;  %v4256_v63 = vpack.c.bf16 %v654_v61, %v654_v61  ;;  %v4258_v7 = vpack.c.bf16 %v653_v62, %v653_v62  ;;  %v662_v61 = vld [vmem:[%s3936_s24 + $0x142] sm:$0xff]  ;;  %v661_v62 = vld [vmem:[%s3936_s24 + $0x13a] sm:$0xff] }
  0x7b   : > { %789 = vrot.lane.b32.xlu1 %v3524_v28, %s3880_s26  ;;  %787 = vrot.lane.b32.xlu0 %v3523_v30, %s3880_s26  ;;  %v4266_v28 = vpack.c.bf16 %v656_v8, %v656_v8  ;;  %v4268_v30 = vpack.c.bf16 %v655_v9, %v655_v9  ;;  %v3538_v8 = vpack.c.bf16 %v662_v61, %v662_v61 }
  0x7c   : > { %v3537_v9 = vpack.c.bf16 %v661_v62, %v661_v62 }
  0x7d   : > { %5124 = vst [vmem:[#allocation6_spill] sm:$0xff] %v4266_v28  ;;  %5125 = vst [vmem:[#allocation7_spill] sm:$0xff] %v4268_v30 }
  0x7f   : > { %793 = vrot.lane.b32.xlu1 %v3526_v45, %s3880_s26  ;;  %791 = vrot.lane.b32.xlu0 %v3525_v46, %s3880_s26  ;;  %v3534_v45 = vpack.c.bf16 %v658_v38, %v658_v38  ;;  %v3533_v46 = vpack.c.bf16 %v657_v41, %v657_v41  ;;  %v664_v38 = vld [vmem:[%s3936_s24 + $0x15a] sm:$0xff]  ;;  %v663_v41 = vld [vmem:[%s3936_s24 + $0x152] sm:$0xff] }
  0x83   : > { %797 = vrot.lane.b32.xlu1 %v3528_v57, %s3880_s26  ;;  %795 = vrot.lane.b32.xlu0 %v3527_v60, %s3880_s26  ;;  %v3536_v57 = vpack.c.bf16 %v660_v50, %v660_v50  ;;  %v3535_v60 = vpack.c.bf16 %v659_v56, %v659_v56  ;;  %v666_v50 = vld [vmem:[%s3936_s24 + $0x172] sm:$0xff]  ;;  %v665_v56 = vld [vmem:[%s3936_s24 + $0x16a] sm:$0xff] }
  0x87   : > { %801 = vrot.lane.b32.xlu1 %v4256_v63, %s3880_s26  ;;  %799 = vrot.lane.b32.xlu0 %v4258_v7, %s3880_s26 }
  0x8b   : > { %805 = vrot.lane.b32.xlu1 %v4266_v28, %s3880_s26  ;;  %803 = vrot.lane.b32.xlu0 %v4268_v30, %s3880_s26 }
  0x8f   : > { %809 = vrot.lane.b32.xlu1 %v3534_v45, %s3880_s26  ;;  %807 = vrot.lane.b32.xlu0 %v3533_v46, %s3880_s26  ;;  %v3540_v45 = vpack.c.bf16 %v664_v38, %v664_v38  ;;  %v3539_v46 = vpack.c.bf16 %v663_v41, %v663_v41 }
  0x93   : > { %813 = vrot.lane.b32.xlu1 %v3536_v57, %s3880_s26  ;;  %811 = vrot.lane.b32.xlu0 %v3535_v60, %s3880_s26 }
  0x95   : > { %v511_v30 = vpop.permute.xlu1 %510  ;;  %v507_v28 = vpop.permute.xlu0 %506 }
  0x96   : > { %605 = vst.msk [vmem:[#allocation2 + $0x8] sm:$0xf] %vm602_vm1, %v511_v30  ;;  %603 = vst.msk [vmem:[#allocation2] sm:$0xf] %vm602_vm1, %v507_v28  ;;  %v3542_v30 = vpack.c.bf16 %v666_v50, %v666_v50  ;;  %v3541_v28 = vpack.c.bf16 %v665_v56, %v665_v56 }
  0x97   : > { %817 = vrot.lane.b32.xlu1 %v3538_v8, %s3880_s26  ;;  %815 = vrot.lane.b32.xlu0 %v3537_v9, %s3880_s26 }
  0x99   : > { %v513_v57 = vpop.permute.xlu1 %512  ;;  %v509_v60 = vpop.permute.xlu0 %508 }
  0x9a   : > { %606 = vst.msk [vmem:[#allocation2 + $0xc] sm:$0xf] %vm602_vm1, %v513_v57  ;;  %604 = vst.msk [vmem:[#allocation2 + $0x4] sm:$0xf] %vm602_vm1, %v509_v60 }
  0x9b   : > { %821 = vrot.lane.b32.xlu1 %v3540_v45, %s3880_s26  ;;  %819 = vrot.lane.b32.xlu0 %v3539_v46, %s3880_s26 }
  0x9d   : > { %v517_v61 = vpop.permute.xlu1 %516  ;;  %v515_v62 = vpop.permute.xlu0 %514 }
  0x9e   : > { %608 = vst.msk [vmem:[#allocation2 + $0x14] sm:$0xf] %vm602_vm1, %v517_v61  ;;  %607 = vst.msk [vmem:[#allocation2 + $0x10] sm:$0xf] %vm602_vm1, %v515_v62 }
  0x9f   : > { %825 = vrot.lane.b32.xlu1 %v3542_v30, %s3880_s26  ;;  %823 = vrot.lane.b32.xlu0 %v3541_v28, %s3880_s26 }
  0xa1   : > { %v521_v8 = vpop.permute.xlu1 %520  ;;  %v519_v9 = vpop.permute.xlu0 %518 }
  0xa2   : > { %610 = vst.msk [vmem:[#allocation2 + $0x1c] sm:$0xf] %vm602_vm1, %v521_v8  ;;  %609 = vst.msk [vmem:[#allocation2 + $0x18] sm:$0xf] %vm602_vm1, %v519_v9  ;;  %v3056_v8 = vld [vmem:[%s3936_s24 + $0x188] sm:$0xff]  ;;  %v3055_v9 = vld [vmem:[%s3936_s24 + $0x180] sm:$0xff] }
  0xa3   : > { %1023 = vrot.lane.b32.xlu1 %v4002_v36, %s3881_s27  ;;  %1021 = vrot.lane.b32.xlu0 %v3992_v29, %s3881_s27 }
  0xa5   : > { %v525_v38 = vpop.permute.xlu1 %524  ;;  %v523_v41 = vpop.permute.xlu0 %522 }
  0xa6   : > { %612 = vst.msk [vmem:[#allocation2 + $0x24] sm:$0xf] %vm602_vm1, %v525_v38  ;;  %611 = vst.msk [vmem:[#allocation2 + $0x20] sm:$0xf] %vm602_vm1, %v523_v41 }
  0xa7   : > { %1027 = vrot.lane.b32.xlu1 %v4018_v42, %s3881_s27  ;;  %1025 = vrot.lane.b32.xlu0 %v4020_v43, %s3881_s27 }
  0xa9   : > { %v529_v45 = vpop.permute.xlu1 %528  ;;  %v527_v46 = vpop.permute.xlu0 %526 }
  0xaa   : > { %614 = vst.msk [vmem:[#allocation2 + $0x2c] sm:$0xf] %vm602_vm1, %v529_v45  ;;  %613 = vst.msk [vmem:[#allocation2 + $0x28] sm:$0xf] %vm602_vm1, %v527_v46  ;;  %v3574_v45 = vpack.c.bf16 %v3056_v8, %v3056_v8  ;;  %v3573_v46 = vpack.c.bf16 %v3055_v9, %v3055_v9 }
  0xab   : > { %1031 = vrot.lane.b32.xlu1 %v4024_v48, %s3881_s27  ;;  %1029 = vrot.lane.b32.xlu0 %v4026_v49, %s3881_s27 }
  0xad   : > { %v533_v29 = vpop.permute.xlu1 %532  ;;  %v531_v36 = vpop.permute.xlu0 %530 }
  0xae   : > { %616 = vst.msk [vmem:[#allocation2 + $0x34] sm:$0xf] %vm602_vm1, %v533_v29  ;;  %615 = vst.msk [vmem:[#allocation2 + $0x30] sm:$0xf] %vm602_vm1, %v531_v36 }
  0xaf   : > { %1035 = vrot.lane.b32.xlu1 %v4037_v53, %s3881_s27  ;;  %1033 = vrot.lane.b32.xlu0 %v4039_v54, %s3881_s27 }
  0xb1   : > { %v537_v50 = vpop.permute.xlu1 %536  ;;  %v535_v56 = vpop.permute.xlu0 %534 }
  0xb2   : > { %618 = vst.msk [vmem:[#allocation2 + $0x3c] sm:$0xf] %vm602_vm1, %v537_v50  ;;  %617 = vst.msk [vmem:[#allocation2 + $0x38] sm:$0xf] %vm602_vm1, %v535_v56 }
  0xb3   : > { %1039 = vrot.lane.b32.xlu1 %v4041_v55, %s3881_s27  ;;  %1037 = vrot.lane.b32.xlu0 %v4049_v58, %s3881_s27 }
  0xb5   : > { %v541_v57 = vpop.permute.xlu1 %540  ;;  %v539_v60 = vpop.permute.xlu0 %538 }
  0xb6   : > { %620 = vst.msk [vmem:[#allocation2 + $0x44] sm:$0xf] %vm602_vm1, %v541_v57  ;;  %619 = vst.msk [vmem:[#allocation2 + $0x40] sm:$0xf] %vm602_vm1, %v539_v60 }
  0xb7   : > { %1043 = vrot.lane.b32.xlu1 %v4051_v59, %s3881_s27  ;;  %1041 = vrot.lane.b32.xlu0 %v4065_v1, %s3881_s27 }
  0xb9   : > { %v545_v53 = vpop.permute.xlu1 %544  ;;  %v543_v54 = vpop.permute.xlu0 %542 }
  0xba   : > { %622 = vst.msk [vmem:[#allocation2 + $0x4c] sm:$0xf] %vm602_vm1, %v545_v53  ;;  %621 = vst.msk [vmem:[#allocation2 + $0x48] sm:$0xf] %vm602_vm1, %v543_v54 }
  0xbb   : > { %1047 = vrot.lane.b32.xlu1 %v4067_v2, %s3881_s27  ;;  %1045 = vrot.lane.b32.xlu0 %v4069_v4, %s3881_s27 }
  0xbd   : > { %v549_v55 = vpop.permute.xlu1 %548  ;;  %v547_v58 = vpop.permute.xlu0 %546 }
  0xbe   : > { %624 = vst.msk [vmem:[#allocation2 + $0x54] sm:$0xf] %vm602_vm1, %v549_v55  ;;  %623 = vst.msk [vmem:[#allocation2 + $0x50] sm:$0xf] %vm602_vm1, %v547_v58  ;;  %v3298_v58 = vld [vmem:[%s3936_s24 + $0xf9] sm:$0xff] }
  0xbf   : > { %1051 = vrot.lane.b32.xlu1 %v4081_v13, %s3881_s27  ;;  %1049 = vrot.lane.b32.xlu0 %v4083_v16, %s3881_s27 }
  0xc1   : > { %v553_v59 = vpop.permute.xlu1 %552  ;;  %v551_v1 = vpop.permute.xlu0 %550 }
  0xc2   : > { %626 = vst.msk [vmem:[#allocation2 + $0x5c] sm:$0xf] %vm602_vm1, %v553_v59  ;;  %625 = vst.msk [vmem:[#allocation2 + $0x58] sm:$0xf] %vm602_vm1, %v551_v1 }
  0xc3   : > { %1055 = vrot.lane.b32.xlu1 %v4085_v17, %s3881_s27  ;;  %1053 = vrot.lane.b32.xlu0 %v4098_v25, %s3881_s27 }
  0xc5   : > { %v557_v2 = vpop.permute.xlu1 %556  ;;  %v555_v4 = vpop.permute.xlu0 %554 }
  0xc6   : > { %628 = vst.msk [vmem:[#allocation2 + $0x64] sm:$0xf] %vm602_vm1, %v557_v2  ;;  %627 = vst.msk [vmem:[#allocation2 + $0x60] sm:$0xf] %vm602_vm1, %v555_v4  ;;  %v3283_v4 = vld [vmem:[%s3936_s24 + $0x49] sm:$0xff] }
  0xc7   : > { %1059 = vrot.lane.b32.xlu1 %v4100_v26, %s3881_s27  ;;  %1057 = vrot.lane.b32.xlu0 %v4102_v27, %s3881_s27 }
  0xc9   : > { %v561_v13 = vpop.permute.xlu1 %560  ;;  %v559_v16 = vpop.permute.xlu0 %558 }
  0xca   : > { %630 = vst.msk [vmem:[#allocation2 + $0x6c] sm:$0xf] %vm602_vm1, %v561_v13  ;;  %629 = vst.msk [vmem:[#allocation2 + $0x68] sm:$0xf] %vm602_vm1, %v559_v16 }
  0xcb   : > { %1063 = vrot.lane.b32.xlu1 %v4112_v31, %s3881_s27  ;;  %1061 = vrot.lane.b32.xlu0 %v4114_v32, %s3881_s27 }
  0xcd   : > { %v565_v17 = vpop.permute.xlu1 %564  ;;  %v563_v25 = vpop.permute.xlu0 %562 }
  0xce   : > { %632 = vst.msk [vmem:[#allocation2 + $0x74] sm:$0xf] %vm602_vm1, %v565_v17  ;;  %631 = vst.msk [vmem:[#allocation2 + $0x70] sm:$0xf] %vm602_vm1, %v563_v25  ;;  %v3673_v25 = vpack.c.bf16 %v3283_v4, %v3283_v4  ;;  %v3175_v4 = vld [vmem:[%s3936_s24 + $0x122] sm:$0xff] }
  0xcf   : > { %1067 = vrot.lane.b32.xlu1 %v4135_v39, %s3881_s27  ;;  %1065 = vrot.lane.b32.xlu0 %v4137_v40, %s3881_s27 }
  0xd1   : > { %v569_v30 = vpop.permute.xlu1 %568  ;;  %v567_v28 = vpop.permute.xlu0 %566 }
  0xd2   : > { %634 = vst.msk [vmem:[#allocation2 + $0x7c] sm:$0xf] %vm602_vm1, %v569_v30  ;;  %633 = vst.msk [vmem:[#allocation2 + $0x78] sm:$0xf] %vm602_vm1, %v567_v28  ;;  %v3300_v30 = vld [vmem:[%s3936_s24 + $0x111] sm:$0xff]  ;;  %v3299_v28 = vld [vmem:[%s3936_s24 + $0x109] sm:$0xff] }
  0xd3   : > { %1071 = vrot.lane.b32.xlu1 %v4155_v51, %s3881_s27  ;;  %1069 = vrot.lane.b32.xlu0 %v4157_v52, %s3881_s27  ;;  %v4506_v8 = vpack.c.bf16 %v3300_v30, %v3300_v30  ;;  %v4508_v9 = vpack.c.bf16 %v3299_v28, %v3299_v28  ;;  %v3222_v30 = vld [vmem:[%s3936_s24 + $0x68] sm:$0xff]  ;;  %v3221_v28 = vld [vmem:[%s3936_s24 + $0x60] sm:$0xff] }
  0xd5   : > { %v766_v61 = vpop.permute.xlu1 %765  ;;  %v764_v62 = vpop.permute.xlu0 %763 }
  0xd6   : > { %861 = vst.msk [vmem:[#allocation2 + $0x4] sm:$0xf] %vm859_vm2, %v766_v61  ;;  %860 = vst.msk [vmem:[#allocation2] sm:$0xf] %vm859_vm2, %v764_v62 }
  0xd7   : > { %1075 = vrot.lane.b32.xlu1 %v4171_v0, %s3881_s27  ;;  %1073 = vrot.lane.b32.xlu0 %v4173_v5, %s3881_s27 }
  0xd9   : > { %v770_v38 = vpop.permute.xlu1 %769  ;;  %v768_v41 = vpop.permute.xlu0 %767 }
  0xda   : > { %863 = vst.msk [vmem:[#allocation2 + $0xc] sm:$0xf] %vm859_vm2, %v770_v38  ;;  %862 = vst.msk [vmem:[#allocation2 + $0x8] sm:$0xf] %vm859_vm2, %v768_v41  ;;  %v3822_v38 = vld [vmem:[%s5118_s1 + $0x8] sm:$0x3f]  }
  0xdb   : > { %1079 = vrot.lane.b32.xlu1 %v4184_v21, %s3881_s27  ;;  %1077 = vrot.lane.b32.xlu0 %v4186_v24, %s3881_s27  ;;  %v3886_v41 = vmov 65535  }
  0xdd   : > { %v774_v0 = vpop.permute.xlu1 %773  ;;  %v772_v29 = vpop.permute.xlu0 %771 }
  0xde   : > { %865 = vst.msk [vmem:[#allocation2 + $0x14] sm:$0xf] %vm859_vm2, %v774_v0  ;;  %864 = vst.msk [vmem:[#allocation2 + $0x10] sm:$0xf] %vm859_vm2, %v772_v29  ;;  %v3345_v0 = vld [vmem:[%s3936_s24 + $0x32] sm:$0xff] }
  0xdf   : > { %1083 = vrot.lane.b32.xlu1 %v3574_v45, %s3881_s27  ;;  %1081 = vrot.lane.b32.xlu0 %v3573_v46, %s3881_s27  ;;  %v2621_v45 = vsel %vm2619_vm4, 4294967295, %v3886_v41  ;;  %v3346_v46 = vld [vmem:[%s3936_s24 + $0x3a] sm:$0xff] }
  0xe0   : > { %v2622_v29 = vsel %vm2620_vm5, %v2621_v45, 0  ;;  %v3224_v45 = vld [vmem:[%s3936_s24 + $0x80] sm:$0xff] }
  0xe1   : > { %v778_v5 = vpop.permute.xlu1 %777  ;;  %v776_v36 = vpop.permute.xlu0 %775 }
  0xe2   : > { %867 = vst.msk [vmem:[#allocation2 + $0x1c] sm:$0xf] %vm859_vm2, %v778_v5  ;;  %866 = vst.msk [vmem:[#allocation2 + $0x18] sm:$0xf] %vm859_vm2, %v776_v36 }
  0xe3   : > { %1280 = vrot.lane.b32.xlu1 %v3947_v6, %s3882_s28  ;;  %1278 = vrot.lane.b32.xlu0 %v3941_v3, %s3882_s28 }
  0xe5   : > { %v782_v21 = vpop.permute.xlu1 %781  ;;  %v780_v24 = vpop.permute.xlu0 %779 }
  0xe6   : > { %869 = vst.msk [vmem:[#allocation2 + $0x24] sm:$0xf] %vm859_vm2, %v782_v21  ;;  %868 = vst.msk [vmem:[#allocation2 + $0x20] sm:$0xf] %vm859_vm2, %v780_v24  ;;  %v2624_v21 = vand.u32 %v3822_v38, %v2622_v29  ;;  %v3704_v24 = vpack.c.bf16 %v3346_v46, %v3346_v46  ;;  %v3223_v46 = vld [vmem:[%s3936_s24 + $0x78] sm:$0xff] }
  0xe7   : > { %1284 = vrot.lane.b32.xlu1 %v3954_v10, %s3882_s28  ;;  %1282 = vrot.lane.b32.xlu0 %v3956_v11, %s3882_s28 }
  0xe8   : > { %3753 = vmatprep.subr.bf16.mxu0 %v2624_v21  ;;  %3789 = vmatprep.subr.bf16.mxu1 %v2624_v21 }
  0xe9   : > { %v786_v50 = vpop.permute.xlu1 %785  ;;  %v784_v56 = vpop.permute.xlu0 %783  ;;  %3754 = vmatpush3.bf16.msra.mxu0 %v2624_v21  ;;  %3791 = vmatpush3.bf16.msra.mxu1 %v2624_v21 }
  0xea   : > { %871 = vst.msk [vmem:[#allocation2 + $0x2c] sm:$0xf] %vm859_vm2, %v786_v50  ;;  %870 = vst.msk [vmem:[#allocation2 + $0x28] sm:$0xf] %vm859_vm2, %v784_v56  ;;  %v3703_v50 = vpack.c.bf16 %v3345_v0, %v3345_v0  ;;  %v3362_v56 = vld [vmem:[%s3936_s24 + $0xfa] sm:$0xff] }
  0xeb   : > { %1288 = vrot.lane.b32.xlu1 %v3964_v14, %s3882_s28  ;;  %1286 = vrot.lane.b32.xlu0 %v3966_v15, %s3882_s28 }
  0xed   : > { %v790_v3 = vpop.permute.xlu1 %789  ;;  %v788_v6 = vpop.permute.xlu0 %787 }
  0xee   : > { %873 = vst.msk [vmem:[#allocation2 + $0x34] sm:$0xf] %vm859_vm2, %v790_v3  ;;  %872 = vst.msk [vmem:[#allocation2 + $0x30] sm:$0xf] %vm859_vm2, %v788_v6  ;;  %v3361_v3 = vld [vmem:[%s3936_s24 + $0xf2] sm:$0xff] }
  0xef   : > { %1292 = vrot.lane.b32.xlu1 %v3974_v18, %s3882_s28  ;;  %1290 = vrot.lane.b32.xlu0 %v3976_v19, %s3882_s28 }
  0xf1   : > { %v794_v10 = vpop.permute.xlu1 %793  ;;  %v792_v11 = vpop.permute.xlu0 %791 }
  0xf2   : > { %875 = vst.msk [vmem:[#allocation2 + $0x3c] sm:$0xf] %vm859_vm2, %v794_v10  ;;  %874 = vst.msk [vmem:[#allocation2 + $0x38] sm:$0xf] %vm859_vm2, %v792_v11  ;;  %v3824_v11 = vld [vmem:[%s5118_s1] sm:$0xff]  }
  0xf3   : > { %1296 = vrot.lane.b32.xlu1 %v3984_v22, %s3882_s28  ;;  %1294 = vrot.lane.b32.xlu0 %v3986_v23, %s3882_s28 }
  0xf4   : > { %3755 = vmatprep.subr.bf16.mxu0 %v3824_v11  ;;  %3790 = vmatprep.subr.bf16.mxu1 %v3824_v11 }
  0xf5   : > { %v798_v14 = vpop.permute.xlu1 %797  ;;  %v796_v15 = vpop.permute.xlu0 %795  ;;  %3756 = vmatpush3.bf16.msra.mxu0 %v3824_v11  ;;  %3792 = vmatpush3.bf16.msra.mxu1 %v3824_v11 }
  0xf6   : > { %877 = vst.msk [vmem:[#allocation2 + $0x44] sm:$0xf] %vm859_vm2, %v798_v14  ;;  %876 = vst.msk [vmem:[#allocation2 + $0x40] sm:$0xf] %vm859_vm2, %v796_v15  ;;  %v3720_v14 = vpack.c.bf16 %v3362_v56, %v3362_v56  ;;  %v3719_v15 = vpack.c.bf16 %v3361_v3, %v3361_v3  ;;  %v3285_v56 = vld [vmem:[%s3936_s24 + $0x61] sm:$0xff] }
  0xf7   : > { %1312 = vrot.lane.b32.xlu1 %v4122_v33, %s3882_s28  ;;  %1310 = vrot.lane.b32.xlu0 %v4132_v37, %s3882_s28 }
  0xf9   : > { %v802_v18 = vpop.permute.xlu1 %801  ;;  %v800_v19 = vpop.permute.xlu0 %799 }
  0xfa   : > { %879 = vst.msk [vmem:[#allocation2 + $0x4c] sm:$0xf] %vm859_vm2, %v802_v18  ;;  %878 = vst.msk [vmem:[#allocation2 + $0x48] sm:$0xf] %vm859_vm2, %v800_v19  ;;  %v3348_v18 = vld [vmem:[%s3936_s24 + $0x52] sm:$0xff]  ;;  %v3347_v19 = vld [vmem:[%s3936_s24 + $0x4a] sm:$0xff] }
  0xfb   : > { %1316 = vrot.lane.b32.xlu1 %v4144_v44, %s3882_s28  ;;  %1314 = vrot.lane.b32.xlu0 %v4152_v47, %s3882_s28 }
  0xfd   : > { %v806_v22 = vpop.permute.xlu1 %805  ;;  %v804_v23 = vpop.permute.xlu0 %803 }
  0xfe   : > { %881 = vst.msk [vmem:[#allocation2 + $0x54] sm:$0xf] %vm859_vm2, %v806_v22  ;;  %880 = vst.msk [vmem:[#allocation2 + $0x50] sm:$0xf] %vm859_vm2, %v804_v23 }
  0xff   : > { %1537 = vrot.lane.b32.xlu1 %v4212_v12, %s3883_s29  ;;  %1535 = vrot.lane.b32.xlu0 %v4214_v20, %s3883_s29 }
 0x101   : > { %v810_v33 = vpop.permute.xlu1 %809  ;;  %v808_v37 = vpop.permute.xlu0 %807 }
 0x102   : > { %883 = vst.msk [vmem:[#allocation2 + $0x5c] sm:$0xf] %vm859_vm2, %v810_v33  ;;  %882 = vst.msk [vmem:[#allocation2 + $0x58] sm:$0xf] %vm859_vm2, %v808_v37  ;;  %v3706_v33 = vpack.c.bf16 %v3348_v18, %v3348_v18  ;;  %v3705_v37 = vpack.c.bf16 %v3347_v19, %v3347_v19 }
 0x103   : > { %1569 = vrot.lane.b32.xlu1 %v4256_v63, %s3883_s29  ;;  %1567 = vrot.lane.b32.xlu0 %v4258_v7, %s3883_s29  ;;  %v5126_v63 = vld [vmem:[#allocation6_spill] sm:$0xff]  ;;  %v5127_v7 = vld [vmem:[#allocation7_spill] sm:$0xff] }
 0x105   : > { %v814_v44 = vpop.permute.xlu1 %813  ;;  %v812_v47 = vpop.permute.xlu0 %811 }
 0x106   : > { %885 = vst.msk [vmem:[#allocation2 + $0x64] sm:$0xf] %vm859_vm2, %v814_v44  ;;  %884 = vst.msk [vmem:[#allocation2 + $0x60] sm:$0xf] %vm859_vm2, %v812_v47  ;;  %v3364_v44 = vld [vmem:[%s3936_s24 + $0x112] sm:$0xff]  ;;  %v3363_v47 = vld [vmem:[%s3936_s24 + $0x10a] sm:$0xff] }
 0x107   : > { %1541 = vrot.lane.b32.xlu1 %v4222_v34, %s3883_s29  ;;  %1539 = vrot.lane.b32.xlu0 %v4224_v35, %s3883_s29 }
 0x109   : > { %v818_v12 = vpop.permute.xlu1 %817  ;;  %v816_v20 = vpop.permute.xlu0 %815 }
 0x10a   : > { %887 = vst.msk [vmem:[#allocation2 + $0x6c] sm:$0xf] %vm859_vm2, %v818_v12  ;;  %886 = vst.msk [vmem:[#allocation2 + $0x68] sm:$0xf] %vm859_vm2, %v816_v20 }
 0x10b   : > { %1573 = vrot.lane.b32.xlu1 %v5126_v63, %s3883_s29  ;;  %1571 = vrot.lane.b32.xlu0 %v5127_v7, %s3883_s29  ;;  %v3722_v63 = vpack.c.bf16 %v3364_v44, %v3364_v44  ;;  %v3721_v7 = vpack.c.bf16 %v3363_v47, %v3363_v47 }
 0x10d   : > { %v822_v57 = vpop.permute.xlu1 %821  ;;  %v820_v60 = vpop.permute.xlu0 %819 }
 0x10e   : > { %889 = vst.msk [vmem:[#allocation2 + $0x74] sm:$0xf] %vm859_vm2, %v822_v57  ;;  %888 = vst.msk [vmem:[#allocation2 + $0x70] sm:$0xf] %vm859_vm2, %v820_v60 }
 0x10f   : > { %1795 = vrot.lane.b32.xlu1 %v4018_v42, %s3884_s30  ;;  %1793 = vrot.lane.b32.xlu0 %v4020_v43, %s3884_s30  ;;  %v3282_v43 = vld [vmem:[%s3936_s24 + $0x39] sm:$0xff] }
 0x111   : > { %v826_v34 = vpop.permute.xlu1 %825  ;;  %v824_v35 = vpop.permute.xlu0 %823 }
 0x112   : > { %891 = vst.msk [vmem:[#allocation2 + $0x7c] sm:$0xf] %vm859_vm2, %v826_v34  ;;  %890 = vst.msk [vmem:[#allocation2 + $0x78] sm:$0xf] %vm859_vm2, %v824_v35  ;;  %v3112_v34 = vld [vmem:[%s3936_s24 + $0x129] sm:$0xff]  ;;  %v3111_v35 = vld [vmem:[%s3936_s24 + $0x121] sm:$0xff] }
 0x113   : > { %1827 = vrot.lane.b32.xlu1 %v4100_v26, %s3884_s30  ;;  %1825 = vrot.lane.b32.xlu0 %v4102_v27, %s3884_s30  ;;  %v3281_v26 = vld [vmem:[%s3936_s24 + $0x31] sm:$0xff] }
 0x114   : > { %v3671_v27 = vpack.c.bf16 %v3281_v26, %v3281_v26  ;;  %v4556_v26 = vpack.c.bf16 %v3111_v35, %v3111_v35 }
 0x115   : > { %v1024_v53 = vpop.permute.xlu1 %1023  ;;  %v1022_v42 = vpop.permute.xlu0 %1021 }
 0x116   : > { %1119 = vst.msk [vmem:[#allocation2 + $0x4] sm:$0xf] %vm1117_vm3, %v1024_v53  ;;  %1118 = vst.msk [vmem:[#allocation2] sm:$0xf] %vm1117_vm3, %v1022_v42 }
 0x117   : > { %1799 = vrot.lane.b32.xlu1 %v4024_v48, %s3884_s30  ;;  %1797 = vrot.lane.b32.xlu0 %v4026_v49, %s3884_s30  ;;  %v3672_v48 = vpack.c.bf16 %v3282_v43, %v3282_v43  ;;  %v3297_v49 = vld [vmem:[%s3936_s24 + $0xf1] sm:$0xff]  ;;  %v4554_v43 = vpack.c.bf16 %v3112_v34, %v3112_v34 }
 0x118   : > { %v3687_v2 = vpack.c.bf16 %v3297_v49, %v3297_v49  ;;  %v3159_v49 = vld [vmem:[%s3936_s24 + $0x62] sm:$0xff] }
 0x119   : > { %v1028_v54 = vpop.permute.xlu1 %1027  ;;  %v1026_v55 = vpop.permute.xlu0 %1025 }
 0x11a   : > { %1121 = vst.msk [vmem:[#allocation2 + $0xc] sm:$0xf] %vm1117_vm3, %v1028_v54  ;;  %1120 = vst.msk [vmem:[#allocation2 + $0x8] sm:$0xf] %vm1117_vm3, %v1026_v55 }
 0x11b   : > { %1831 = vrot.lane.b32.xlu1 %v4112_v31, %s3884_s30  ;;  %1829 = vrot.lane.b32.xlu0 %v4114_v32, %s3884_s30  ;;  %v3688_v31 = vpack.c.bf16 %v3298_v58, %v3298_v58  ;;  %v3284_v32 = vld [vmem:[%s3936_s24 + $0x51] sm:$0xff] }
 0x11c   : > { %v3674_v17 = vpack.c.bf16 %v3284_v32, %v3284_v32  ;;  %v3160_v58 = vld [vmem:[%s3936_s24 + $0x6a] sm:$0xff] }
 0x11d   : > { %v1032_v59 = vpop.permute.xlu1 %1031  ;;  %v1030_v1 = vpop.permute.xlu0 %1029  ;;  %v3176_v32 = vld [vmem:[%s3936_s24 + $0x12a] sm:$0xff] }
 0x11e   : > { %1123 = vst.msk [vmem:[#allocation2 + $0x14] sm:$0xf] %vm1117_vm3, %v1032_v59  ;;  %1122 = vst.msk [vmem:[#allocation2 + $0x10] sm:$0xf] %vm1117_vm3, %v1030_v1 }
 0x11f   : > { %2052 = vrot.lane.b32.xlu1 %v3672_v48, %s3885_s4  ;;  %2050 = vrot.lane.b32.xlu0 %v3671_v27, %s3885_s4 }
 0x121   : > { %v1036_v13 = vpop.permute.xlu1 %1035  ;;  %v1034_v16 = vpop.permute.xlu0 %1033 }
 0x122   : > { %1125 = vst.msk [vmem:[#allocation2 + $0x1c] sm:$0xf] %vm1117_vm3, %v1036_v13  ;;  %1124 = vst.msk [vmem:[#allocation2 + $0x18] sm:$0xf] %vm1117_vm3, %v1034_v16 }
 0x123   : > { %2084 = vrot.lane.b32.xlu1 %v3688_v31, %s3885_s4  ;;  %2082 = vrot.lane.b32.xlu0 %v3687_v2, %s3885_s4  ;;  %v4574_v31 = vpack.c.bf16 %v3160_v58, %v3160_v58  ;;  %v4576_v2 = vpack.c.bf16 %v3159_v49, %v3159_v49 }
 0x125   : > { %v1040_v61 = vpop.permute.xlu1 %1039  ;;  %v1038_v62 = vpop.permute.xlu0 %1037 }
 0x126   : > { %1127 = vst.msk [vmem:[#allocation2 + $0x24] sm:$0xf] %vm1117_vm3, %v1040_v61  ;;  %1126 = vst.msk [vmem:[#allocation2 + $0x20] sm:$0xf] %vm1117_vm3, %v1038_v62 }
 0x127   : > { %2056 = vrot.lane.b32.xlu1 %v3674_v17, %s3885_s4  ;;  %2054 = vrot.lane.b32.xlu0 %v3673_v25, %s3885_s4  ;;  %v4586_v17 = vpack.c.bf16 %v3176_v32, %v3176_v32  ;;  %v4588_v25 = vpack.c.bf16 %v3175_v4, %v3175_v4 }
 0x129   : > { %v1044_v5 = vpop.permute.xlu1 %1043  ;;  %v1042_v36 = vpop.permute.xlu0 %1041 }
 0x12a   : > { %1129 = vst.msk [vmem:[#allocation2 + $0x2c] sm:$0xf] %vm1117_vm3, %v1044_v5  ;;  %1128 = vst.msk [vmem:[#allocation2 + $0x28] sm:$0xf] %vm1117_vm3, %v1042_v36  ;;  %v3646_v5 = vpack.c.bf16 %v3224_v45, %v3224_v45  ;;  %v3645_v36 = vpack.c.bf16 %v3223_v46, %v3223_v46 }
 0x12b   : > { %2088 = vrot.lane.b32.xlu1 %v4506_v8, %s3885_s4  ;;  %2086 = vrot.lane.b32.xlu0 %v4508_v9, %s3885_s4 }
 0x12d   : > { %v1048_v6 = vpop.permute.xlu1 %1047  ;;  %v1046_v10 = vpop.permute.xlu0 %1045 }
 0x12e   : > { %1131 = vst.msk [vmem:[#allocation2 + $0x34] sm:$0xf] %vm1117_vm3, %v1048_v6  ;;  %1130 = vst.msk [vmem:[#allocation2 + $0x30] sm:$0xf] %vm1117_vm3, %v1046_v10  ;;  %v3675_v6 = vpack.c.bf16 %v3285_v56, %v3285_v56 }
 0x12f   : > { %2309 = vrot.lane.b32.xlu1 %v3704_v24, %s3887_s9  ;;  %2307 = vrot.lane.b32.xlu0 %v3703_v50, %s3887_s9  ;;  %v3286_v50 = vld [vmem:[%s3936_s24 + $0x69] sm:$0xff] }
 0x131   : > { %v1052_v22 = vpop.permute.xlu1 %1051  ;;  %v1050_v23 = vpop.permute.xlu0 %1049 }
 0x132   : > { %1133 = vst.msk [vmem:[#allocation2 + $0x3c] sm:$0xf] %vm1117_vm3, %v1052_v22  ;;  %1132 = vst.msk [vmem:[#allocation2 + $0x38] sm:$0xf] %vm1117_vm3, %v1050_v23  ;;  %v3304_v22 = vld [vmem:[%s3936_s24 + $0x141] sm:$0xff]  ;;  %v3303_v23 = vld [vmem:[%s3936_s24 + $0x139] sm:$0xff] }
 0x133   : > { %2341 = vrot.lane.b32.xlu1 %v3720_v14, %s3887_s9  ;;  %2339 = vrot.lane.b32.xlu0 %v3719_v15, %s3887_s9  ;;  %v3288_v14 = vld [vmem:[%s3936_s24 + $0x81] sm:$0xff]  ;;  %v3287_v15 = vld [vmem:[%s3936_s24 + $0x79] sm:$0xff]  ;;  %v3694_v44 = vpack.c.bf16 %v3304_v22, %v3304_v22  ;;  %v3693_v47 = vpack.c.bf16 %v3303_v23, %v3303_v23 }
 0x134   : > { %v3677_v19 = vpack.c.bf16 %v3287_v15, %v3287_v15  ;;  %v3241_v15 = vld [vmem:[%s3936_s24 + $0x150] sm:$0xff]  ;;  %v3227_v23 = vld [vmem:[%s3936_s24 + $0xa8] sm:$0xff] }
 0x135   : > { %v1056_v12 = vpop.permute.xlu1 %1055  ;;  %v1054_v20 = vpop.permute.xlu0 %1053  ;;  %v3228_v22 = vld [vmem:[%s3936_s24 + $0xb0] sm:$0xff] }
 0x136   : > { %1135 = vst.msk [vmem:[#allocation2 + $0x44] sm:$0xf] %vm1117_vm3, %v1056_v12  ;;  %1134 = vst.msk [vmem:[#allocation2 + $0x40] sm:$0xf] %vm1117_vm3, %v1054_v20 }
 0x137   : > { %2313 = vrot.lane.b32.xlu1 %v3706_v33, %s3887_s9  ;;  %2311 = vrot.lane.b32.xlu0 %v3705_v37, %s3887_s9 }
 0x139   : > { %v1060_v57 = vpop.permute.xlu1 %1059  ;;  %v1058_v60 = vpop.permute.xlu0 %1057 }
 0x13a   : > { %1137 = vst.msk [vmem:[#allocation2 + $0x4c] sm:$0xf] %vm1117_vm3, %v1060_v57  ;;  %1136 = vst.msk [vmem:[#allocation2 + $0x48] sm:$0xf] %vm1117_vm3, %v1058_v60  ;;  %v3352_v57 = vld [vmem:[%s3936_s24 + $0x82] sm:$0xff]  ;;  %v3351_v60 = vld [vmem:[%s3936_s24 + $0x7a] sm:$0xff] }
 0x13b   : > { %2345 = vrot.lane.b32.xlu1 %v3722_v63, %s3887_s9  ;;  %2343 = vrot.lane.b32.xlu0 %v3721_v7, %s3887_s9 }
 0x13d   : > { %v1064_v53 = vpop.permute.xlu1 %1063  ;;  %v1062_v42 = vpop.permute.xlu0 %1061 }
 0x13e   : > { %1139 = vst.msk [vmem:[#allocation2 + $0x54] sm:$0xf] %vm1117_vm3, %v1064_v53  ;;  %1138 = vst.msk [vmem:[#allocation2 + $0x50] sm:$0xf] %vm1117_vm3, %v1062_v42  ;;  %v3710_v53 = vpack.c.bf16 %v3352_v57, %v3352_v57  ;;  %v3709_v42 = vpack.c.bf16 %v3351_v60, %v3351_v60 }
 0x13f   : > { %1320 = vrot.lane.b32.xlu1 %v4506_v8, %s3882_s28  ;;  %1318 = vrot.lane.b32.xlu0 %v4508_v9, %s3882_s28  ;;  %v3644_v8 = vpack.c.bf16 %v3222_v30, %v3222_v30  ;;  %v3643_v9 = vpack.c.bf16 %v3221_v28, %v3221_v28 }
 0x141   : > { %v1068_v54 = vpop.permute.xlu1 %1067  ;;  %v1066_v55 = vpop.permute.xlu0 %1065 }
 0x142   : > { %1141 = vst.msk [vmem:[#allocation2 + $0x5c] sm:$0xf] %vm1117_vm3, %v1068_v54  ;;  %1140 = vst.msk [vmem:[#allocation2 + $0x58] sm:$0xf] %vm1117_vm3, %v1066_v55 }
 0x143   : > { %1324 = vrot.lane.b32.xlu1 %v4554_v43, %s3882_s28  ;;  %1322 = vrot.lane.b32.xlu0 %v4556_v26, %s3882_s28 }
 0x145   : > { %v1072_v48 = vpop.permute.xlu1 %1071  ;;  %v1070_v27 = vpop.permute.xlu0 %1069 }
 0x146   : > { %1143 = vst.msk [vmem:[#allocation2 + $0x64] sm:$0xf] %vm1117_vm3, %v1072_v48  ;;  %1142 = vst.msk [vmem:[#allocation2 + $0x60] sm:$0xf] %vm1117_vm3, %v1070_v27 }
 0x147   : > { %1545 = vrot.lane.b32.xlu1 %v3706_v33, %s3883_s29  ;;  %1543 = vrot.lane.b32.xlu0 %v3705_v37, %s3883_s29 }
 0x149   : > { %v1076_v59 = vpop.permute.xlu1 %1075  ;;  %v1074_v1 = vpop.permute.xlu0 %1073 }
 0x14a   : > { %1145 = vst.msk [vmem:[#allocation2 + $0x6c] sm:$0xf] %vm1117_vm3, %v1076_v59  ;;  %1144 = vst.msk [vmem:[#allocation2 + $0x68] sm:$0xf] %vm1117_vm3, %v1074_v1  ;;  %v3100_v59 = vld [vmem:[%s3936_s24 + $0x99] sm:$0xff]  ;;  %v3099_v1 = vld [vmem:[%s3936_s24 + $0x91] sm:$0xff] }
 0x14b   : > { %1577 = vrot.lane.b32.xlu1 %v3722_v63, %s3883_s29  ;;  %1575 = vrot.lane.b32.xlu0 %v3721_v7, %s3883_s29  ;;  %v4674_v32 = vpack.c.bf16 %v3100_v59, %v3100_v59  ;;  %v4676_v4 = vpack.c.bf16 %v3099_v1, %v3099_v1 }
 0x14d   : > { %v1080_v13 = vpop.permute.xlu1 %1079  ;;  %v1078_v16 = vpop.permute.xlu0 %1077 }
 0x14e   : > { %1147 = vst.msk [vmem:[#allocation2 + $0x74] sm:$0xf] %vm1117_vm3, %v1080_v13  ;;  %1146 = vst.msk [vmem:[#allocation2 + $0x70] sm:$0xf] %vm1117_vm3, %v1078_v16  ;;  %v3116_v13 = vld [vmem:[%s3936_s24 + $0x159] sm:$0xff]  ;;  %v3115_v16 = vld [vmem:[%s3936_s24 + $0x151] sm:$0xff] }
 0x14f   : > { %1549 = vrot.lane.b32.xlu1 %v4574_v31, %s3883_s29  ;;  %1547 = vrot.lane.b32.xlu0 %v4576_v2, %s3883_s29  ;;  %v4686_v30 = vpack.c.bf16 %v3116_v13, %v3116_v13  ;;  %v4688_v28 = vpack.c.bf16 %v3115_v16, %v3115_v16 }
 0x151   : > { %v1084_v61 = vpop.permute.xlu1 %1083  ;;  %v1082_v62 = vpop.permute.xlu0 %1081 }
 0x152   : > { %1149 = vst.msk [vmem:[#allocation2 + $0x7c] sm:$0xf] %vm1117_vm3, %v1084_v61  ;;  %1148 = vst.msk [vmem:[#allocation2 + $0x78] sm:$0xf] %vm1117_vm3, %v1082_v62 }
 0x153   : > { %1581 = vrot.lane.b32.xlu1 %v4586_v17, %s3883_s29  ;;  %1579 = vrot.lane.b32.xlu0 %v4588_v25, %s3883_s29 }
 0x155   : > { %v1281_v38 = vpop.permute.xlu1 %1280  ;;  %v1279_v41 = vpop.permute.xlu0 %1278 }
 0x156   : > { %1376 = vst.msk [vmem:[#allocation2 + $0x4] sm:$0xf] %vm1374_vm6, %v1281_v38  ;;  %1375 = vst.msk [vmem:[#allocation2] sm:$0xf] %vm1374_vm6, %v1279_v41  ;;  %v3164_v38 = vld [vmem:[%s3936_s24 + $0x9a] sm:$0xff]  ;;  %v3163_v41 = vld [vmem:[%s3936_s24 + $0x92] sm:$0xff] }
 0x157   : > { %1803 = vrot.lane.b32.xlu1 %v3644_v8, %s3884_s30  ;;  %1801 = vrot.lane.b32.xlu0 %v3643_v9, %s3884_s30 }
 0x159   : > { %v1285_v0 = vpop.permute.xlu1 %1284  ;;  %v1283_v29 = vpop.permute.xlu0 %1282 }
 0x15a   : > { %1378 = vst.msk [vmem:[#allocation2 + $0xc] sm:$0xf] %vm1374_vm6, %v1285_v0  ;;  %1377 = vst.msk [vmem:[#allocation2 + $0x8] sm:$0xf] %vm1374_vm6, %v1283_v29  ;;  %v4706_v0 = vpack.c.bf16 %v3164_v38, %v3164_v38  ;;  %v4708_v29 = vpack.c.bf16 %v3163_v41, %v3163_v41 }
 0x15b   : > { %1835 = vrot.lane.b32.xlu1 %v4135_v39, %s3884_s30  ;;  %1833 = vrot.lane.b32.xlu0 %v4137_v40, %s3884_s30  ;;  %v3676_v40 = vpack.c.bf16 %v3286_v50, %v3286_v50 }
 0x15d   : > { %v1289_v21 = vpop.permute.xlu1 %1288  ;;  %v1287_v24 = vpop.permute.xlu0 %1286 }
 0x15e   : > { %1380 = vst.msk [vmem:[#allocation2 + $0x14] sm:$0xf] %vm1374_vm6, %v1289_v21  ;;  %1379 = vst.msk [vmem:[#allocation2 + $0x10] sm:$0xf] %vm1374_vm6, %v1287_v24 }
 0x15f   : > { %1807 = vrot.lane.b32.xlu1 %v3646_v5, %s3884_s30  ;;  %1805 = vrot.lane.b32.xlu0 %v3645_v36, %s3884_s30  ;;  %v3180_v5 = vld [vmem:[%s3936_s24 + $0x15a] sm:$0xff]  ;;  %v3179_v36 = vld [vmem:[%s3936_s24 + $0x152] sm:$0xff] }
 0x160   : > { %v4718_v50 = vpack.c.bf16 %v3180_v5, %v3180_v5  ;;  %v4720_v56 = vpack.c.bf16 %v3179_v36, %v3179_v36 }
 0x161   : > { %v1293_v39 = vpop.permute.xlu1 %1292  ;;  %v1291_v3 = vpop.permute.xlu0 %1290 }
 0x162   : > { %1382 = vst.msk [vmem:[#allocation2 + $0x1c] sm:$0xf] %vm1374_vm6, %v1293_v39  ;;  %1381 = vst.msk [vmem:[#allocation2 + $0x18] sm:$0xf] %vm1374_vm6, %v1291_v3  ;;  %v3226_v39 = vld [vmem:[%s3936_s24 + $0x98] sm:$0xff]  ;;  %v3225_v3 = vld [vmem:[%s3936_s24 + $0x90] sm:$0xff] }
 0x163   : > { %1839 = vrot.lane.b32.xlu1 %v4155_v51, %s3884_s30  ;;  %1837 = vrot.lane.b32.xlu0 %v4157_v52, %s3884_s30  ;;  %v3678_v52 = vpack.c.bf16 %v3288_v14, %v3288_v14  ;;  %v3242_v14 = vld [vmem:[%s3936_s24 + $0x158] sm:$0xff] }
 0x165   : > { %v1297_v10 = vpop.permute.xlu1 %1296  ;;  %v1295_v11 = vpop.permute.xlu0 %1294 }
 0x166   : > { %1384 = vst.msk [vmem:[#allocation2 + $0x24] sm:$0xf] %vm1374_vm6, %v1297_v10  ;;  %1383 = vst.msk [vmem:[#allocation2 + $0x20] sm:$0xf] %vm1374_vm6, %v1295_v11  ;;  %v3648_v10 = vpack.c.bf16 %v3226_v39, %v3226_v39  ;;  %v3647_v11 = vpack.c.bf16 %v3225_v3, %v3225_v3  ;;  %v3104_v39 = vld [vmem:[%s3936_s24 + $0xc9] sm:$0xff]  ;;  %v3103_v3 = vld [vmem:[%s3936_s24 + $0xc1] sm:$0xff] }
 0x167   : > { %2060 = vrot.lane.b32.xlu1 %v3676_v40, %s3885_s4  ;;  %2058 = vrot.lane.b32.xlu0 %v3675_v6, %s3885_s4 }
 0x169   : > { %v1313_v51 = vpop.permute.xlu1 %1312  ;;  %v1311_v18 = vpop.permute.xlu0 %1310 }
 0x16a   : > { %1392 = vst.msk [vmem:[#allocation2 + $0x44] sm:$0xf] %vm1374_vm6, %v1313_v51  ;;  %1391 = vst.msk [vmem:[#allocation2 + $0x40] sm:$0xf] %vm1374_vm6, %v1311_v18 }
 0x16b   : > { %2092 = vrot.lane.b32.xlu1 %v4554_v43, %s3885_s4  ;;  %2090 = vrot.lane.b32.xlu0 %v4556_v26, %s3885_s4  ;;  %v3368_v43 = vld [vmem:[%s3936_s24 + $0x142] sm:$0xff]  ;;  %v3367_v26 = vld [vmem:[%s3936_s24 + $0x13a] sm:$0xff] }
 0x16c   : > { %v3726_v48 = vpack.c.bf16 %v3368_v43, %v3368_v43  ;;  %v3725_v27 = vpack.c.bf16 %v3367_v26, %v3367_v26 }
 0x16d   : > { %v1317_v33 = vpop.permute.xlu1 %1316  ;;  %v1315_v37 = vpop.permute.xlu0 %1314 }
 0x16e   : > { %1394 = vst.msk [vmem:[#allocation2 + $0x4c] sm:$0xf] %vm1374_vm6, %v1317_v33  ;;  %1393 = vst.msk [vmem:[#allocation2 + $0x48] sm:$0xf] %vm1374_vm6, %v1315_v37 }
 0x16f   : > { %2064 = vrot.lane.b32.xlu1 %v3678_v52, %s3885_s4  ;;  %2062 = vrot.lane.b32.xlu0 %v3677_v19, %s3885_s4  ;;  %v3664_v52 = vpack.c.bf16 %v3242_v14, %v3242_v14  ;;  %v3663_v19 = vpack.c.bf16 %v3241_v15, %v3241_v15  ;;  %v3120_v14 = vld [vmem:[%s3936_s24 + $0x189] sm:$0xff]  ;;  %v3119_v15 = vld [vmem:[%s3936_s24 + $0x181] sm:$0xff] }
 0x171   : > { %v1538_v12 = vpop.permute.xlu1 %1537  ;;  %v1536_v20 = vpop.permute.xlu0 %1535 }
 0x172   : > { %1633 = vst.msk [vmem:[#allocation2 + $0x4] sm:$0xf] %vm1631_vm7, %v1538_v12  ;;  %1632 = vst.msk [vmem:[#allocation2] sm:$0xf] %vm1631_vm7, %v1536_v20  ;;  %v3244_v12 = vld [vmem:[%s3936_s24 + $0x170] sm:$0xff]  ;;  %v3243_v20 = vld [vmem:[%s3936_s24 + $0x168] sm:$0xff] }
 0x173   : > { %2096 = vrot.lane.b32.xlu1 %v3694_v44, %s3885_s4  ;;  %2094 = vrot.lane.b32.xlu0 %v3693_v47, %s3885_s4  ;;  %v3666_v60 = vpack.c.bf16 %v3244_v12, %v3244_v12 }
 0x175   : > { %v1570_v63 = vpop.permute.xlu1 %1569  ;;  %v1568_v7 = vpop.permute.xlu0 %1567 }
 0x176   : > { %1649 = vst.msk [vmem:[#allocation2 + $0x44] sm:$0xf] %vm1631_vm7, %v1570_v63  ;;  %1648 = vst.msk [vmem:[#allocation2 + $0x40] sm:$0xf] %vm1631_vm7, %v1568_v7 }
 0x177   : > { %2317 = vrot.lane.b32.xlu1 %v4574_v31, %s3887_s9  ;;  %2315 = vrot.lane.b32.xlu0 %v4576_v2, %s3887_s9 }
 0x179   : > { %v1542_v34 = vpop.permute.xlu1 %1541  ;;  %v1540_v35 = vpop.permute.xlu0 %1539 }
 0x17a   : > { %1635 = vst.msk [vmem:[#allocation2 + $0xc] sm:$0xf] %vm1631_vm7, %v1542_v34  ;;  %1634 = vst.msk [vmem:[#allocation2 + $0x8] sm:$0xf] %vm1631_vm7, %v1540_v35  ;;  %v3665_v34 = vpack.c.bf16 %v3243_v20, %v3243_v20 }
 0x17b   : > { %2349 = vrot.lane.b32.xlu1 %v4586_v17, %s3887_s9  ;;  %2347 = vrot.lane.b32.xlu0 %v4588_v25, %s3887_s9 }
 0x17d   : > { %v1574_v54 = vpop.permute.xlu1 %1573  ;;  %v1572_v55 = vpop.permute.xlu0 %1571 }
 0x17e   : > { %1651 = vst.msk [vmem:[#allocation2 + $0x4c] sm:$0xf] %vm1631_vm7, %v1574_v54  ;;  %1650 = vst.msk [vmem:[#allocation2 + $0x48] sm:$0xf] %vm1631_vm7, %v1572_v55  ;;  %v3292_v55 = vld [vmem:[%s3936_s24 + $0xb1] sm:$0xff] }
 0x17f   : > { %2321 = vrot.lane.b32.xlu1 %v3710_v53, %s3887_s9  ;;  %2319 = vrot.lane.b32.xlu0 %v3709_v42, %s3887_s9  ;;  %v3682_v59 = vpack.c.bf16 %v3292_v55, %v3292_v55 }
 0x181   : > { %v1796_v58 = vpop.permute.xlu1 %1795  ;;  %v1794_v49 = vpop.permute.xlu0 %1793 }
 0x182   : > { %1891 = vst.msk [vmem:[#allocation2 + $0x4] sm:$0xf] %vm1889_vm8, %v1796_v58  ;;  %1890 = vst.msk [vmem:[#allocation2] sm:$0xf] %vm1889_vm8, %v1794_v49 }
 0x183   : > { %2353 = vrot.lane.b32.xlu1 %v3726_v48, %s3887_s9  ;;  %2351 = vrot.lane.b32.xlu0 %v3725_v27, %s3887_s9 }
 0x185   : > { %v1828_v31 = vpop.permute.xlu1 %1827  ;;  %v1826_v2 = vpop.permute.xlu0 %1825 }
 0x186   : > { %1907 = vst.msk [vmem:[#allocation2 + $0x44] sm:$0xf] %vm1889_vm8, %v1828_v31  ;;  %1906 = vst.msk [vmem:[#allocation2 + $0x40] sm:$0xf] %vm1889_vm8, %v1826_v2  ;;  %v3308_v31 = vld [vmem:[%s3936_s24 + $0x171] sm:$0xff]  ;;  %v3307_v2 = vld [vmem:[%s3936_s24 + $0x169] sm:$0xff] }
 0x187   : > { %1328 = vrot.lane.b32.xlu1 %v3694_v44, %s3882_s28  ;;  %1326 = vrot.lane.b32.xlu0 %v3693_v47, %s3882_s28  ;;  %v3650_v44 = vpack.c.bf16 %v3228_v22, %v3228_v22  ;;  %v3649_v47 = vpack.c.bf16 %v3227_v23, %v3227_v23  ;;  %v3698_v13 = vpack.c.bf16 %v3308_v31, %v3308_v31 }
 0x188   : > { %v3697_v16 = vpack.c.bf16 %v3307_v2, %v3307_v2 }
 0x189   : > { %v1800_v17 = vpop.permute.xlu1 %1799  ;;  %v1798_v25 = vpop.permute.xlu0 %1797 }
 0x18a   : > { %1893 = vst.msk [vmem:[#allocation2 + $0xc] sm:$0xf] %vm1889_vm8, %v1800_v17  ;;  %1892 = vst.msk [vmem:[#allocation2 + $0x8] sm:$0xf] %vm1889_vm8, %v1798_v25 }
 0x18b   : > { %1300 = vrot.lane.b32.xlu1 %v4674_v32, %s3882_s28  ;;  %1298 = vrot.lane.b32.xlu0 %v4676_v4, %s3882_s28 }
 0x18d   : > { %v1832_v61 = vpop.permute.xlu1 %1831  ;;  %v1830_v62 = vpop.permute.xlu0 %1829 }
 0x18e   : > { %1909 = vst.msk [vmem:[#allocation2 + $0x4c] sm:$0xf] %vm1889_vm8, %v1832_v61  ;;  %1908 = vst.msk [vmem:[#allocation2 + $0x48] sm:$0xf] %vm1889_vm8, %v1830_v62  ;;  %v3356_v61 = vld [vmem:[%s3936_s24 + $0xb2] sm:$0xff]  ;;  %v3355_v62 = vld [vmem:[%s3936_s24 + $0xaa] sm:$0xff] }
 0x18f   : > { %1332 = vrot.lane.b32.xlu1 %v4686_v30, %s3882_s28  ;;  %1330 = vrot.lane.b32.xlu0 %v4688_v28, %s3882_s28  ;;  %v3714_v38 = vpack.c.bf16 %v3356_v61, %v3356_v61  ;;  %v3713_v41 = vpack.c.bf16 %v3355_v62, %v3355_v62  ;;  %v3248_v61 = vld [vmem:[%s3936_s24 + $0x1a0] sm:$0xff]  ;;  %v3247_v62 = vld [vmem:[%s3936_s24 + $0x198] sm:$0xff] }
 0x191   : > { %v2053_v8 = vpop.permute.xlu1 %2052  ;;  %v2051_v9 = vpop.permute.xlu0 %2050 }
 0x192   : > { %2148 = vst.msk [vmem:[#allocation2 + $0x4] sm:$0xf] %vm2146_vm9, %v2053_v8  ;;  %2147 = vst.msk [vmem:[#allocation2] sm:$0xf] %vm2146_vm9, %v2051_v9 }
 0x193   : > { %1553 = vrot.lane.b32.xlu1 %v3710_v53, %s3883_s29  ;;  %1551 = vrot.lane.b32.xlu0 %v3709_v42, %s3883_s29 }
 0x195   : > { %v2085_v45 = vpop.permute.xlu1 %2084  ;;  %v2083_v46 = vpop.permute.xlu0 %2082 }
 0x196   : > { %2164 = vst.msk [vmem:[#allocation2 + $0x44] sm:$0xf] %vm2146_vm9, %v2085_v45  ;;  %2163 = vst.msk [vmem:[#allocation2 + $0x40] sm:$0xf] %vm2146_vm9, %v2083_v46  ;;  %v3372_v45 = vld [vmem:[%s3936_s24 + $0x172] sm:$0xff]  ;;  %v3371_v46 = vld [vmem:[%s3936_s24 + $0x16a] sm:$0xff] }
 0x197   : > { %1585 = vrot.lane.b32.xlu1 %v3726_v48, %s3883_s29  ;;  %1583 = vrot.lane.b32.xlu0 %v3725_v27, %s3883_s29  ;;  %v3291_v48 = vld [vmem:[%s3936_s24 + $0xa9] sm:$0xff]  ;;  %v3730_v5 = vpack.c.bf16 %v3372_v45, %v3372_v45  ;;  %v3729_v36 = vpack.c.bf16 %v3371_v46, %v3371_v46  ;;  %v3669_v45 = vpack.c.bf16 %v3247_v62, %v3247_v62 }
 0x198   : > { %v3681_v1 = vpack.c.bf16 %v3291_v48, %v3291_v48 }
 0x199   : > { %v2057_v21 = vpop.permute.xlu1 %2056  ;;  %v2055_v24 = vpop.permute.xlu0 %2054 }
 0x19a   : > { %2150 = vst.msk [vmem:[#allocation2 + $0xc] sm:$0xf] %vm2146_vm9, %v2057_v21  ;;  %2149 = vst.msk [vmem:[#allocation2 + $0x8] sm:$0xf] %vm2146_vm9, %v2055_v24 }
 0x19b   : > { %1557 = vrot.lane.b32.xlu1 %v4706_v0, %s3883_s29  ;;  %1555 = vrot.lane.b32.xlu0 %v4708_v29, %s3883_s29 }
 0x19d   : > { %v2089_v40 = vpop.permute.xlu1 %2088  ;;  %v2087_v6 = vpop.permute.xlu0 %2086 }
 0x19e   : > { %2166 = vst.msk [vmem:[#allocation2 + $0x4c] sm:$0xf] %vm2146_vm9, %v2089_v40  ;;  %2165 = vst.msk [vmem:[#allocation2 + $0x48] sm:$0xf] %vm2146_vm9, %v2087_v6 }
 0x19f   : > { %1589 = vrot.lane.b32.xlu1 %v4718_v50, %s3883_s29  ;;  %1587 = vrot.lane.b32.xlu0 %v4720_v56, %s3883_s29 }
 0x1a1   : > { %v2310_v51 = vpop.permute.xlu1 %2309  ;;  %v2308_v18 = vpop.permute.xlu0 %2307 }
 0x1a2   : > { %2405 = vst.msk [vmem:[#allocation2 + $0x4] sm:$0xf] %vm2403_vm10, %v2310_v51  ;;  %2404 = vst.msk [vmem:[#allocation2] sm:$0xf] %vm2403_vm10, %v2308_v18 }
 0x1a3   : > { %1811 = vrot.lane.b32.xlu1 %v3648_v10, %s3884_s30  ;;  %1809 = vrot.lane.b32.xlu0 %v3647_v11, %s3884_s30  ;;  %v4814_v10 = vpack.c.bf16 %v3104_v39, %v3104_v39  ;;  %v4816_v11 = vpack.c.bf16 %v3103_v3, %v3103_v3 }
 0x1a5   : > { %v2342_v33 = vpop.permute.xlu1 %2341  ;;  %v2340_v37 = vpop.permute.xlu0 %2339 }
 0x1a6   : > { %2421 = vst.msk [vmem:[#allocation2 + $0x44] sm:$0xf] %vm2403_vm10, %v2342_v33  ;;  %2420 = vst.msk [vmem:[#allocation2 + $0x40] sm:$0xf] %vm2403_vm10, %v2340_v37 }
 0x1a7   : > { %1843 = vrot.lane.b32.xlu1 %v3664_v52, %s3884_s30  ;;  %1841 = vrot.lane.b32.xlu0 %v3663_v19, %s3884_s30  ;;  %v4826_v52 = vpack.c.bf16 %v3120_v14, %v3120_v14  ;;  %v4828_v19 = vpack.c.bf16 %v3119_v15, %v3119_v15 }
 0x1a9   : > { %v2314_v63 = vpop.permute.xlu1 %2313  ;;  %v2312_v7 = vpop.permute.xlu0 %2311  ;;  %v3823_v57 = vld [vmem:[#allocation2] sm:$0xff]  }
 0x1aa   : > { %2407 = vst.msk [vmem:[#allocation2 + $0xc] sm:$0xf] %vm2403_vm10, %v2314_v63  ;;  %2406 = vst.msk [vmem:[#allocation2 + $0x8] sm:$0xf] %vm2403_vm10, %v2312_v7  ;;  %3757 = vmatprep.mubr.msk.bf16.mxu0 %vm2570_vm11, %v3823_v57  ;;  %v3184_v57 = vld [vmem:[%s3936_s24 + $0x18a] sm:$0xff] }
 0x1ab   : > { %1815 = vrot.lane.b32.xlu1 %v3650_v44, %s3884_s30  ;;  %1813 = vrot.lane.b32.xlu0 %v3649_v47, %s3884_s30  ;;  %v3168_v44 = vld [vmem:[%s3936_s24 + $0xca] sm:$0xff]  ;;  %v3167_v47 = vld [vmem:[%s3936_s24 + $0xc2] sm:$0xff] }
 0x1ac   : > { %v4846_v63 = vpack.c.bf16 %v3168_v44, %v3168_v44  ;;  %v4848_v7 = vpack.c.bf16 %v3167_v47, %v3167_v47 }
 0x1ad   : > { %v2346_v35 = vpop.permute.xlu1 %2345  ;;  %v2344_v53 = vpop.permute.xlu0 %2343  ;;  %v3825_v42 = vld [vmem:[#allocation2 + $0x40] sm:$0xff]  }
 0x1ae   : > { %2423 = vst.msk [vmem:[#allocation2 + $0x4c] sm:$0xf] %vm2403_vm10, %v2346_v35  ;;  %2422 = vst.msk [vmem:[#allocation2 + $0x48] sm:$0xf] %vm2403_vm10, %v2344_v53  ;;  %3773 = vmatprep.mubr.msk.bf16.mxu1 %vm2570_vm11, %v3825_v42  ;;  %v4858_v53 = vpack.c.bf16 %v3184_v57, %v3184_v57 }
 0x1af   : > { %1847 = vrot.lane.b32.xlu1 %v3666_v60, %s3884_s30  ;;  %1845 = vrot.lane.b32.xlu0 %v3665_v34, %s3884_s30  ;;  %v3183_v60 = vld [vmem:[%s3936_s24 + $0x182] sm:$0xff] }
 0x1b0   : > { %v4860_v42 = vpack.c.bf16 %v3183_v60, %v3183_v60 }
 0x1b1   : > { %v1321_v43 = vpop.permute.xlu1 %1320  ;;  %v1319_v26 = vpop.permute.xlu0 %1318  ;;  %v3826_v54 = vld [vmem:[#allocation2 + $0x8] sm:$0xff]  }
 0x1b2   : > { %1396 = vst.msk [vmem:[#allocation2 + $0x54] sm:$0xf] %vm1374_vm6, %v1321_v43  ;;  %1395 = vst.msk [vmem:[#allocation2 + $0x50] sm:$0xf] %vm1374_vm6, %v1319_v26  ;;  %3758 = vmatmul.mubr.msk.bf16.vlgmr.msra.gmra.mxu0 %vm2570_vm11, %v3826_v54  ;;  %v3230_v43 = vld [vmem:[%s3936_s24 + $0xc8] sm:$0xff]  ;;  %v3229_v26 = vld [vmem:[%s3936_s24 + $0xc0] sm:$0xff] }
 0x1b3   : > { %2068 = vrot.lane.b32.xlu1 %v4674_v32, %s3885_s4  ;;  %2066 = vrot.lane.b32.xlu0 %v4676_v4, %s3885_s4  ;;  %v3652_v48 = vpack.c.bf16 %v3230_v43, %v3230_v43 }
 0x1b5   : > { %v1325_v27 = vpop.permute.xlu1 %1324  ;;  %v1323_v58 = vpop.permute.xlu0 %1322  ;;  %v3827_v49 = vld [vmem:[#allocation2 + $0x48] sm:$0xff]  }
 0x1b6   : > { %1398 = vst.msk [vmem:[#allocation2 + $0x5c] sm:$0xf] %vm1374_vm6, %v1325_v27  ;;  %1397 = vst.msk [vmem:[#allocation2 + $0x58] sm:$0xf] %vm1374_vm6, %v1323_v58  ;;  %3774 = vmatmul.mubr.msk.bf16.vlgmr.msra.gmra.mxu1 %vm2570_vm11, %v3827_v49  ;;  %v3651_v27 = vpack.c.bf16 %v3229_v26, %v3229_v26  ;;  %v3246_v58 = vld [vmem:[%s3936_s24 + $0x188] sm:$0xff]  ;;  %v3245_v49 = vld [vmem:[%s3936_s24 + $0x180] sm:$0xff] }
 0x1b7   : > { %2100 = vrot.lane.b32.xlu1 %v4686_v30, %s3885_s4  ;;  %2098 = vrot.lane.b32.xlu0 %v4688_v28, %s3885_s4  ;;  %v3668_v2 = vpack.c.bf16 %v3246_v58, %v3246_v58 }
 0x1b9   : > { %v1546_v32 = vpop.permute.xlu1 %1545  ;;  %v1544_v4 = vpop.permute.xlu0 %1543 }
 0x1ba   : > { %1637 = vst.msk [vmem:[#allocation2 + $0x14] sm:$0xf] %vm1631_vm7, %v1546_v32  ;;  %1636 = vst.msk [vmem:[#allocation2 + $0x10] sm:$0xf] %vm1631_vm7, %v1544_v4  ;;  %v3667_v32 = vpack.c.bf16 %v3245_v49, %v3245_v49  ;;  %v3232_v4 = vld [vmem:[%s3936_s24 + $0xe0] sm:$0xff] }
 0x1bb   : > { %2072 = vrot.lane.b32.xlu1 %v3682_v59, %s3885_s4  ;;  %2070 = vrot.lane.b32.xlu0 %v3681_v1, %s3885_s4 }
 0x1bd   : > { %v1578_v17 = vpop.permute.xlu1 %1577  ;;  %v1576_v25 = vpop.permute.xlu0 %1575 }
 0x1be   : > { %1653 = vst.msk [vmem:[#allocation2 + $0x54] sm:$0xf] %vm1631_vm7, %v1578_v17  ;;  %1652 = vst.msk [vmem:[#allocation2 + $0x50] sm:$0xf] %vm1631_vm7, %v1576_v25 }
 0x1bf   : > { %2104 = vrot.lane.b32.xlu1 %v3698_v13, %s3885_s4  ;;  %2102 = vrot.lane.b32.xlu0 %v3697_v16, %s3885_s4 }
 0x1c1   : > { %v1550_v30 = vpop.permute.xlu1 %1549  ;;  %v1548_v28 = vpop.permute.xlu0 %1547 }
 0x1c2   : > { %1639 = vst.msk [vmem:[#allocation2 + $0x1c] sm:$0xf] %vm1631_vm7, %v1550_v30  ;;  %1638 = vst.msk [vmem:[#allocation2 + $0x18] sm:$0xf] %vm1631_vm7, %v1548_v28  ;;  %v3654_v30 = vpack.c.bf16 %v3232_v4, %v3232_v4 }
 0x1c3   : > { %2325 = vrot.lane.b32.xlu1 %v4706_v0, %s3887_s9  ;;  %2323 = vrot.lane.b32.xlu0 %v4708_v29, %s3887_s9 }
 0x1c5   : > { %v1582_v8 = vpop.permute.xlu1 %1581  ;;  %v1580_v9 = vpop.permute.xlu0 %1579 }
 0x1c6   : > { %1655 = vst.msk [vmem:[#allocation2 + $0x5c] sm:$0xf] %vm1631_vm7, %v1582_v8  ;;  %1654 = vst.msk [vmem:[#allocation2 + $0x58] sm:$0xf] %vm1631_vm7, %v1580_v9 }
 0x1c7   : > { %2357 = vrot.lane.b32.xlu1 %v4718_v50, %s3887_s9  ;;  %2355 = vrot.lane.b32.xlu0 %v4720_v56, %s3887_s9 }
 0x1c9   : > { %v1804_v0 = vpop.permute.xlu1 %1803  ;;  %v1802_v29 = vpop.permute.xlu0 %1801 }
 0x1ca   : > { %1895 = vst.msk [vmem:[#allocation2 + $0x14] sm:$0xf] %vm1889_vm8, %v1804_v0  ;;  %1894 = vst.msk [vmem:[#allocation2 + $0x10] sm:$0xf] %vm1889_vm8, %v1802_v29 }
 0x1cb   : > { %2329 = vrot.lane.b32.xlu1 %v3714_v38, %s3887_s9  ;;  %2327 = vrot.lane.b32.xlu0 %v3713_v41, %s3887_s9 }
 0x1cd   : > { %v1836_v21 = vpop.permute.xlu1 %1835  ;;  %v1834_v24 = vpop.permute.xlu0 %1833 }
 0x1ce   : > { %1911 = vst.msk [vmem:[#allocation2 + $0x54] sm:$0xf] %vm1889_vm8, %v1836_v21  ;;  %1910 = vst.msk [vmem:[#allocation2 + $0x50] sm:$0xf] %vm1889_vm8, %v1834_v24  ;;  %v3296_v21 = vld [vmem:[%s3936_s24 + $0xe1] sm:$0xff]  ;;  %v3295_v24 = vld [vmem:[%s3936_s24 + $0xd9] sm:$0xff] }
 0x1cf   : > { %2361 = vrot.lane.b32.xlu1 %v3730_v5, %s3887_s9  ;;  %2359 = vrot.lane.b32.xlu0 %v3729_v36, %s3887_s9  ;;  %v3686_v39 = vpack.c.bf16 %v3296_v21, %v3296_v21  ;;  %v3685_v3 = vpack.c.bf16 %v3295_v24, %v3295_v24 }
 0x1d1   : > { %v1808_v50 = vpop.permute.xlu1 %1807  ;;  %v1806_v56 = vpop.permute.xlu0 %1805 }
 0x1d2   : > { %1897 = vst.msk [vmem:[#allocation2 + $0x1c] sm:$0xf] %vm1889_vm8, %v1808_v50  ;;  %1896 = vst.msk [vmem:[#allocation2 + $0x18] sm:$0xf] %vm1889_vm8, %v1806_v56 }
 0x1d3   : > { %1304 = vrot.lane.b32.xlu1 %v3682_v59, %s3882_s28  ;;  %1302 = vrot.lane.b32.xlu0 %v3681_v1, %s3882_s28 }
 0x1d5   : > { %v1840_v40 = vpop.permute.xlu1 %1839  ;;  %v1838_v6 = vpop.permute.xlu0 %1837 }
 0x1d6   : > { %1913 = vst.msk [vmem:[#allocation2 + $0x5c] sm:$0xf] %vm1889_vm8, %v1840_v40  ;;  %1912 = vst.msk [vmem:[#allocation2 + $0x58] sm:$0xf] %vm1889_vm8, %v1838_v6  ;;  %v3312_v40 = vld [vmem:[%s3936_s24 + $0x1a1] sm:$0xff]  ;;  %v3311_v6 = vld [vmem:[%s3936_s24 + $0x199] sm:$0xff] }
 0x1d7   : > { %1336 = vrot.lane.b32.xlu1 %v3698_v13, %s3882_s28  ;;  %1334 = vrot.lane.b32.xlu0 %v3697_v16, %s3882_s28  ;;  %v3231_v13 = vld [vmem:[%s3936_s24 + $0xd8] sm:$0xff]  ;;  %v3702_v14 = vpack.c.bf16 %v3312_v40, %v3312_v40  ;;  %v3701_v15 = vpack.c.bf16 %v3311_v6, %v3311_v6 }
 0x1d8   : > { %v3653_v28 = vpack.c.bf16 %v3231_v13, %v3231_v13 }
 0x1d9   : > { %v2061_v51 = vpop.permute.xlu1 %2060  ;;  %v2059_v18 = vpop.permute.xlu0 %2058 }
 0x1da   : > { %2152 = vst.msk [vmem:[#allocation2 + $0x14] sm:$0xf] %vm2146_vm9, %v2061_v51  ;;  %2151 = vst.msk [vmem:[#allocation2 + $0x10] sm:$0xf] %vm2146_vm9, %v2059_v18 }
 0x1db   : > { %1308 = vrot.lane.b32.xlu1 %v4814_v10, %s3882_s28  ;;  %1306 = vrot.lane.b32.xlu0 %v4816_v11, %s3882_s28 }
 0x1dd   : > { %v2093_v22 = vpop.permute.xlu1 %2092  ;;  %v2091_v23 = vpop.permute.xlu0 %2090 }
 0x1de   : > { %2168 = vst.msk [vmem:[#allocation2 + $0x54] sm:$0xf] %vm2146_vm9, %v2093_v22  ;;  %2167 = vst.msk [vmem:[#allocation2 + $0x50] sm:$0xf] %vm2146_vm9, %v2091_v23  ;;  %v3360_v22 = vld [vmem:[%s3936_s24 + $0xe2] sm:$0xff]  ;;  %v3359_v23 = vld [vmem:[%s3936_s24 + $0xda] sm:$0xff] }
 0x1df   : > { %1340 = vrot.lane.b32.xlu1 %v4826_v52, %s3882_s28  ;;  %1338 = vrot.lane.b32.xlu0 %v4828_v19, %s3882_s28  ;;  %v3718_v44 = vpack.c.bf16 %v3360_v22, %v3360_v22  ;;  %v3717_v47 = vpack.c.bf16 %v3359_v23, %v3359_v23 }
 0x1e1   : > { %v2065_v33 = vpop.permute.xlu1 %2064  ;;  %v2063_v37 = vpop.permute.xlu0 %2062 }
 0x1e2   : > { %2154 = vst.msk [vmem:[#allocation2 + $0x1c] sm:$0xf] %vm2146_vm9, %v2065_v33  ;;  %2153 = vst.msk [vmem:[#allocation2 + $0x18] sm:$0xf] %vm2146_vm9, %v2063_v37 }
 0x1e3   : > { %1561 = vrot.lane.b32.xlu1 %v3714_v38, %s3883_s29  ;;  %1559 = vrot.lane.b32.xlu0 %v3713_v41, %s3883_s29  ;;  %v3670_v41 = vpack.c.bf16 %v3248_v61, %v3248_v61 }
 0x1e5   : > { %v2097_v12 = vpop.permute.xlu1 %2096  ;;  %v2095_v20 = vpop.permute.xlu0 %2094 }
 0x1e6   : > { %2170 = vst.msk [vmem:[#allocation2 + $0x5c] sm:$0xf] %vm2146_vm9, %v2097_v12  ;;  %2169 = vst.msk [vmem:[#allocation2 + $0x58] sm:$0xf] %vm2146_vm9, %v2095_v20  ;;  %v3376_v12 = vld [vmem:[%s3936_s24 + $0x1a2] sm:$0xff]  ;;  %v3375_v20 = vld [vmem:[%s3936_s24 + $0x19a] sm:$0xff] }
 0x1e7   : > { %1593 = vrot.lane.b32.xlu1 %v3730_v5, %s3883_s29  ;;  %1591 = vrot.lane.b32.xlu0 %v3729_v36, %s3883_s29  ;;  %v3734_v57 = vpack.c.bf16 %v3376_v12, %v3376_v12  ;;  %v3733_v60 = vpack.c.bf16 %v3375_v20, %v3375_v20 }
 0x1e9   : > { %v2318_v34 = vpop.permute.xlu1 %2317  ;;  %v2316_v35 = vpop.permute.xlu0 %2315 }
 0x1ea   : > { %2409 = vst.msk [vmem:[#allocation2 + $0x14] sm:$0xf] %vm2403_vm10, %v2318_v34  ;;  %2408 = vst.msk [vmem:[#allocation2 + $0x10] sm:$0xf] %vm2403_vm10, %v2316_v35 }
 0x1eb   : > { %1565 = vrot.lane.b32.xlu1 %v4846_v63, %s3883_s29  ;;  %1563 = vrot.lane.b32.xlu0 %v4848_v7, %s3883_s29 }
 0x1ed   : > { %v2350_v54 = vpop.permute.xlu1 %2349  ;;  %v2348_v55 = vpop.permute.xlu0 %2347 }
 0x1ee   : > { %2425 = vst.msk [vmem:[#allocation2 + $0x54] sm:$0xf] %vm2403_vm10, %v2350_v54  ;;  %2424 = vst.msk [vmem:[#allocation2 + $0x50] sm:$0xf] %vm2403_vm10, %v2348_v55 }
 0x1ef   : > { %1597 = vrot.lane.b32.xlu1 %v4858_v53, %s3883_s29  ;;  %1595 = vrot.lane.b32.xlu0 %v4860_v42, %s3883_s29 }
 0x1f1   : > { %v2322_v59 = vpop.permute.xlu1 %2321  ;;  %v2320_v1 = vpop.permute.xlu0 %2319  ;;  %v3828_v31 = vld [vmem:[#allocation2 + $0x10] sm:$0xff]  }
 0x1f2   : > { %2411 = vst.msk [vmem:[#allocation2 + $0x1c] sm:$0xf] %vm2403_vm10, %v2322_v59  ;;  %2410 = vst.msk [vmem:[#allocation2 + $0x18] sm:$0xf] %vm2403_vm10, %v2320_v1  ;;  %3761 = vmatprep.mubr.msk.bf16.mxu0 %vm2570_vm11, %v3828_v31 }
 0x1f3   : > { %1819 = vrot.lane.b32.xlu1 %v3652_v48, %s3884_s30  ;;  %1817 = vrot.lane.b32.xlu0 %v3651_v27, %s3884_s30 }
 0x1f5   : > { %v2354_v16 = vpop.permute.xlu1 %2353  ;;  %v2352_v17 = vpop.permute.xlu0 %2351  ;;  %v3829_v25 = vld [vmem:[#allocation2 + $0x50] sm:$0xff]  }
 0x1f6   : > { %2427 = vst.msk [vmem:[#allocation2 + $0x5c] sm:$0xf] %vm2403_vm10, %v2354_v16  ;;  %2426 = vst.msk [vmem:[#allocation2 + $0x58] sm:$0xf] %vm2403_vm10, %v2352_v17  ;;  %3777 = vmatprep.mubr.msk.bf16.mxu1 %vm2570_vm11, %v3829_v25 }
 0x1f7   : > { %1851 = vrot.lane.b32.xlu1 %v3668_v2, %s3884_s30  ;;  %1849 = vrot.lane.b32.xlu0 %v3667_v32, %s3884_s30 }
 0x1f9   : > { %v1329_v8 = vpop.permute.xlu1 %1328  ;;  %v1327_v9 = vpop.permute.xlu0 %1326  ;;  %v3830_v38 = vld [vmem:[#allocation2 + $0x18] sm:$0xff]  }
 0x1fa   : > { %1400 = vst.msk [vmem:[#allocation2 + $0x64] sm:$0xf] %vm1374_vm6, %v1329_v8  ;;  %1399 = vst.msk [vmem:[#allocation2 + $0x60] sm:$0xf] %vm1374_vm6, %v1327_v9  ;;  %3762 = vmatmul.mubr.msk.bf16.gmra.mxu0 %vm2570_vm11, %v3830_v38 }
 0x1fb   : > { %1823 = vrot.lane.b32.xlu1 %v3654_v30, %s3884_s30  ;;  %1821 = vrot.lane.b32.xlu0 %v3653_v28, %s3884_s30 }
 0x1fd   : > { %v1301_v46 = vpop.permute.xlu1 %1300  ;;  %v1299_v0 = vpop.permute.xlu0 %1298  ;;  %v3831_v29 = vld [vmem:[#allocation2 + $0x58] sm:$0xff]  }
 0x1fe   : > { %1386 = vst.msk [vmem:[#allocation2 + $0x2c] sm:$0xf] %vm1374_vm6, %v1301_v46  ;;  %1385 = vst.msk [vmem:[#allocation2 + $0x28] sm:$0xf] %vm1374_vm6, %v1299_v0  ;;  %3778 = vmatmul.mubr.msk.bf16.gmra.mxu1 %vm2570_vm11, %v3831_v29 }
 0x1ff   : > { %1855 = vrot.lane.b32.xlu1 %v3670_v41, %s3884_s30  ;;  %1853 = vrot.lane.b32.xlu0 %v3669_v45, %s3884_s30 }
 0x201   : > { %v1333_v5 = vpop.permute.xlu1 %1332  ;;  %v1331_v36 = vpop.permute.xlu0 %1330 }
 0x202   : > { %1402 = vst.msk [vmem:[#allocation2 + $0x6c] sm:$0xf] %vm1374_vm6, %v1333_v5  ;;  %1401 = vst.msk [vmem:[#allocation2 + $0x68] sm:$0xf] %vm1374_vm6, %v1331_v36 }
 0x203   : > { %2076 = vrot.lane.b32.xlu1 %v4814_v10, %s3885_s4  ;;  %2074 = vrot.lane.b32.xlu0 %v4816_v11, %s3885_s4 }
 0x205   : > { %v1554_v50 = vpop.permute.xlu1 %1553  ;;  %v1552_v56 = vpop.permute.xlu0 %1551 }
 0x206   : > { %1641 = vst.msk [vmem:[#allocation2 + $0x24] sm:$0xf] %vm1631_vm7, %v1554_v50  ;;  %1640 = vst.msk [vmem:[#allocation2 + $0x20] sm:$0xf] %vm1631_vm7, %v1552_v56 }
 0x207   : > { %2108 = vrot.lane.b32.xlu1 %v4826_v52, %s3885_s4  ;;  %2106 = vrot.lane.b32.xlu0 %v4828_v19, %s3885_s4 }
 0x209   : > { %v1586_v10 = vpop.permute.xlu1 %1585  ;;  %v1584_v11 = vpop.permute.xlu0 %1583 }
 0x20a   : > { %1657 = vst.msk [vmem:[#allocation2 + $0x64] sm:$0xf] %vm1631_vm7, %v1586_v10  ;;  %1656 = vst.msk [vmem:[#allocation2 + $0x60] sm:$0xf] %vm1631_vm7, %v1584_v11 }
 0x20b   : > { %2080 = vrot.lane.b32.xlu1 %v3686_v39, %s3885_s4  ;;  %2078 = vrot.lane.b32.xlu0 %v3685_v3, %s3885_s4 }
 0x20d   : > { %v1558_v51 = vpop.permute.xlu1 %1557  ;;  %v1556_v18 = vpop.permute.xlu0 %1555 }
 0x20e   : > { %1643 = vst.msk [vmem:[#allocation2 + $0x2c] sm:$0xf] %vm1631_vm7, %v1558_v51  ;;  %1642 = vst.msk [vmem:[#allocation2 + $0x28] sm:$0xf] %vm1631_vm7, %v1556_v18  ;;  %v4990_v51 = vld [vmem:[#allocation3] ss:$0 sm:$0xff] }
 0x20f   : > { %2112 = vrot.lane.b32.xlu1 %v3702_v14, %s3885_s4  ;;  %2110 = vrot.lane.b32.xlu0 %v3701_v15, %s3885_s4 }
 0x211   : > { %v1590_v52 = vpop.permute.xlu1 %1589  ;;  %v1588_v19 = vpop.permute.xlu0 %1587 }
 0x212   : > { %1659 = vst.msk [vmem:[#allocation2 + $0x6c] sm:$0xf] %vm1631_vm7, %v1590_v52  ;;  %1658 = vst.msk [vmem:[#allocation2 + $0x68] sm:$0xf] %vm1631_vm7, %v1588_v19 }
 0x213   : > { %2333 = vrot.lane.b32.xlu1 %v4846_v63, %s3887_s9  ;;  %2331 = vrot.lane.b32.xlu0 %v4848_v7, %s3887_s9 }
 0x215   : > { %v1812_v33 = vpop.permute.xlu1 %1811  ;;  %v1810_v37 = vpop.permute.xlu0 %1809 }
 0x216   : > { %1899 = vst.msk [vmem:[#allocation2 + $0x24] sm:$0xf] %vm1889_vm8, %v1812_v33  ;;  %1898 = vst.msk [vmem:[#allocation2 + $0x20] sm:$0xf] %vm1889_vm8, %v1810_v37 }
 0x217   : > { %2365 = vrot.lane.b32.xlu1 %v4858_v53, %s3887_s9  ;;  %2363 = vrot.lane.b32.xlu0 %v4860_v42, %s3887_s9 }
 0x219   : > { %v1844_v63 = vpop.permute.xlu1 %1843  ;;  %v1842_v7 = vpop.permute.xlu0 %1841 }
 0x21a   : > { %1915 = vst.msk [vmem:[#allocation2 + $0x64] sm:$0xf] %vm1889_vm8, %v1844_v63  ;;  %1914 = vst.msk [vmem:[#allocation2 + $0x60] sm:$0xf] %vm1889_vm8, %v1842_v7 }
 0x21b   : > { %2337 = vrot.lane.b32.xlu1 %v3718_v44, %s3887_s9  ;;  %2335 = vrot.lane.b32.xlu0 %v3717_v47, %s3887_s9 }
 0x21d   : > { %v1816_v34 = vpop.permute.xlu1 %1815  ;;  %v1814_v35 = vpop.permute.xlu0 %1813 }
 0x21e   : > { %1901 = vst.msk [vmem:[#allocation2 + $0x2c] sm:$0xf] %vm1889_vm8, %v1816_v34  ;;  %1900 = vst.msk [vmem:[#allocation2 + $0x28] sm:$0xf] %vm1889_vm8, %v1814_v35 }
 0x21f   : > { %2369 = vrot.lane.b32.xlu1 %v3734_v57, %s3887_s9  ;;  %2367 = vrot.lane.b32.xlu0 %v3733_v60, %s3887_s9 }
 0x221   : > { %v1848_v53 = vpop.permute.xlu1 %1847  ;;  %v1846_v42 = vpop.permute.xlu0 %1845 }
 0x222   : > { %1917 = vst.msk [vmem:[#allocation2 + $0x6c] sm:$0xf] %vm1889_vm8, %v1848_v53  ;;  %1916 = vst.msk [vmem:[#allocation2 + $0x68] sm:$0xf] %vm1889_vm8, %v1846_v42 }
 0x225   : > { %v2069_v43 = vpop.permute.xlu1 %2068  ;;  %v2067_v26 = vpop.permute.xlu0 %2066 }
 0x226   : > { %2156 = vst.msk [vmem:[#allocation2 + $0x24] sm:$0xf] %vm2146_vm9, %v2069_v43  ;;  %2155 = vst.msk [vmem:[#allocation2 + $0x20] sm:$0xf] %vm2146_vm9, %v2067_v26 }
 0x229   : > { %v2101_v54 = vpop.permute.xlu1 %2100  ;;  %v2099_v55 = vpop.permute.xlu0 %2098 }
 0x22a   : > { %2172 = vst.msk [vmem:[#allocation2 + $0x64] sm:$0xf] %vm2146_vm9, %v2101_v54  ;;  %2171 = vst.msk [vmem:[#allocation2 + $0x60] sm:$0xf] %vm2146_vm9, %v2099_v55 }
 0x22d   : > { %v2073_v48 = vpop.permute.xlu1 %2072  ;;  %v2071_v27 = vpop.permute.xlu0 %2070 }
 0x22e   : > { %2158 = vst.msk [vmem:[#allocation2 + $0x2c] sm:$0xf] %vm2146_vm9, %v2073_v48  ;;  %2157 = vst.msk [vmem:[#allocation2 + $0x28] sm:$0xf] %vm2146_vm9, %v2071_v27 }
 0x231   : > { %v2105_v58 = vpop.permute.xlu1 %2104  ;;  %v2103_v49 = vpop.permute.xlu0 %2102 }
 0x232   : > { %2174 = vst.msk [vmem:[#allocation2 + $0x6c] sm:$0xf] %vm2146_vm9, %v2105_v58  ;;  %2173 = vst.msk [vmem:[#allocation2 + $0x68] sm:$0xf] %vm2146_vm9, %v2103_v49 }
 0x235   : > { %v2326_v59 = vpop.permute.xlu1 %2325  ;;  %v2324_v1 = vpop.permute.xlu0 %2323 }
 0x236   : > { %2413 = vst.msk [vmem:[#allocation2 + $0x24] sm:$0xf] %vm2403_vm10, %v2326_v59  ;;  %2412 = vst.msk [vmem:[#allocation2 + $0x20] sm:$0xf] %vm2403_vm10, %v2324_v1 }
 0x239   : > { %v2358_v31 = vpop.permute.xlu1 %2357  ;;  %v2356_v2 = vpop.permute.xlu0 %2355 }
 0x23a   : > { %2429 = vst.msk [vmem:[#allocation2 + $0x64] sm:$0xf] %vm2403_vm10, %v2358_v31  ;;  %2428 = vst.msk [vmem:[#allocation2 + $0x60] sm:$0xf] %vm2403_vm10, %v2356_v2 }
 0x23d   : > { %v2330_v32 = vpop.permute.xlu1 %2329  ;;  %v2328_v4 = vpop.permute.xlu0 %2327  ;;  %v3832_v13 = vld [vmem:[#allocation2 + $0x20] sm:$0xff]  }
 0x23e   : > { %2415 = vst.msk [vmem:[#allocation2 + $0x2c] sm:$0xf] %vm2403_vm10, %v2330_v32  ;;  %2414 = vst.msk [vmem:[#allocation2 + $0x28] sm:$0xf] %vm2403_vm10, %v2328_v4  ;;  %3765 = vmatprep.mubr.msk.bf16.mxu0 %vm2570_vm11, %v3832_v13 }
 0x241   : > { %v2362_v16 = vpop.permute.xlu1 %2361  ;;  %v2360_v17 = vpop.permute.xlu0 %2359  ;;  %v3833_v25 = vld [vmem:[#allocation2 + $0x60] sm:$0xff]  }
 0x242   : > { %2431 = vst.msk [vmem:[#allocation2 + $0x6c] sm:$0xf] %vm2403_vm10, %v2362_v16  ;;  %2430 = vst.msk [vmem:[#allocation2 + $0x68] sm:$0xf] %vm2403_vm10, %v2360_v17  ;;  %3781 = vmatprep.mubr.msk.bf16.mxu1 %vm2570_vm11, %v3833_v25 }
 0x245   : > { %v1305_v30 = vpop.permute.xlu1 %1304  ;;  %v1303_v28 = vpop.permute.xlu0 %1302  ;;  %v3834_v61 = vld [vmem:[#allocation2 + $0x28] sm:$0xff]  }
 0x246   : > { %1388 = vst.msk [vmem:[#allocation2 + $0x34] sm:$0xf] %vm1374_vm6, %v1305_v30  ;;  %1387 = vst.msk [vmem:[#allocation2 + $0x30] sm:$0xf] %vm1374_vm6, %v1303_v28  ;;  %3766 = vmatmul.mubr.msk.bf16.gmra.mxu0 %vm2570_vm11, %v3834_v61 }
 0x249   : > { %v1337_v62 = vpop.permute.xlu1 %1336  ;;  %v1335_v8 = vpop.permute.xlu0 %1334  ;;  %v3835_v9 = vld [vmem:[#allocation2 + $0x68] sm:$0xff]  }
 0x24a   : > { %1404 = vst.msk [vmem:[#allocation2 + $0x74] sm:$0xf] %vm1374_vm6, %v1337_v62  ;;  %1403 = vst.msk [vmem:[#allocation2 + $0x70] sm:$0xf] %vm1374_vm6, %v1335_v8  ;;  %3782 = vmatmul.mubr.msk.bf16.gmra.mxu1 %vm2570_vm11, %v3835_v9 }
 0x24d   : > { %v1309_v38 = vpop.permute.xlu1 %1308  ;;  %v1307_v41 = vpop.permute.xlu0 %1306 }
 0x24e   : > { %1390 = vst.msk [vmem:[#allocation2 + $0x3c] sm:$0xf] %vm1374_vm6, %v1309_v38  ;;  %1389 = vst.msk [vmem:[#allocation2 + $0x38] sm:$0xf] %vm1374_vm6, %v1307_v41 }
 0x251   : > { %v1341_v45 = vpop.permute.xlu1 %1340  ;;  %v1339_v46 = vpop.permute.xlu0 %1338 }
 0x252   : > { %1406 = vst.msk [vmem:[#allocation2 + $0x7c] sm:$0xf] %vm1374_vm6, %v1341_v45  ;;  %1405 = vst.msk [vmem:[#allocation2 + $0x78] sm:$0xf] %vm1374_vm6, %v1339_v46 }
 0x255   : > { %v1562_v0 = vpop.permute.xlu1 %1561  ;;  %v1560_v29 = vpop.permute.xlu0 %1559 }
 0x256   : > { %1645 = vst.msk [vmem:[#allocation2 + $0x34] sm:$0xf] %vm1631_vm7, %v1562_v0  ;;  %1644 = vst.msk [vmem:[#allocation2 + $0x30] sm:$0xf] %vm1631_vm7, %v1560_v29 }
 0x259   : > { %v1594_v5 = vpop.permute.xlu1 %1593  ;;  %v1592_v36 = vpop.permute.xlu0 %1591 }
 0x25a   : > { %1661 = vst.msk [vmem:[#allocation2 + $0x74] sm:$0xf] %vm1631_vm7, %v1594_v5  ;;  %1660 = vst.msk [vmem:[#allocation2 + $0x70] sm:$0xf] %vm1631_vm7, %v1592_v36 }
 0x25d   : > { %v1566_v21 = vpop.permute.xlu1 %1565  ;;  %v1564_v24 = vpop.permute.xlu0 %1563 }
 0x25e   : > { %1647 = vst.msk [vmem:[#allocation2 + $0x3c] sm:$0xf] %vm1631_vm7, %v1566_v21  ;;  %1646 = vst.msk [vmem:[#allocation2 + $0x38] sm:$0xf] %vm1631_vm7, %v1564_v24 }
 0x261   : > { %v1598_v50 = vpop.permute.xlu1 %1597  ;;  %v1596_v56 = vpop.permute.xlu0 %1595 }
 0x262   : > { %1663 = vst.msk [vmem:[#allocation2 + $0x7c] sm:$0xf] %vm1631_vm7, %v1598_v50  ;;  %1662 = vst.msk [vmem:[#allocation2 + $0x78] sm:$0xf] %vm1631_vm7, %v1596_v56 }
 0x265   : > { %v1820_v39 = vpop.permute.xlu1 %1819  ;;  %v1818_v3 = vpop.permute.xlu0 %1817 }
 0x266   : > { %1903 = vst.msk [vmem:[#allocation2 + $0x34] sm:$0xf] %vm1889_vm8, %v1820_v39  ;;  %1902 = vst.msk [vmem:[#allocation2 + $0x30] sm:$0xf] %vm1889_vm8, %v1818_v3 }
 0x269   : > { %v1852_v40 = vpop.permute.xlu1 %1851  ;;  %v1850_v6 = vpop.permute.xlu0 %1849 }
 0x26a   : > { %1919 = vst.msk [vmem:[#allocation2 + $0x74] sm:$0xf] %vm1889_vm8, %v1852_v40  ;;  %1918 = vst.msk [vmem:[#allocation2 + $0x70] sm:$0xf] %vm1889_vm8, %v1850_v6 }
 0x26d   : > { %v1824_v10 = vpop.permute.xlu1 %1823  ;;  %v1822_v11 = vpop.permute.xlu0 %1821 }
 0x26e   : > { %1905 = vst.msk [vmem:[#allocation2 + $0x3c] sm:$0xf] %vm1889_vm8, %v1824_v10  ;;  %1904 = vst.msk [vmem:[#allocation2 + $0x38] sm:$0xf] %vm1889_vm8, %v1822_v11 }
 0x271   : > { %v1856_v14 = vpop.permute.xlu1 %1855  ;;  %v1854_v15 = vpop.permute.xlu0 %1853 }
 0x272   : > { %1921 = vst.msk [vmem:[#allocation2 + $0x7c] sm:$0xf] %vm1889_vm8, %v1856_v14  ;;  %1920 = vst.msk [vmem:[#allocation2 + $0x78] sm:$0xf] %vm1889_vm8, %v1854_v15  ;;  %v3759_v18 = vpop.f32.mrf.mxu0 }
 0x273   : > { %v2669_v52 = vadd.f32 %v3759_v18, %v4990_v51 }
 0x274   : > { %v2660_v23 = vpop.f32.mrf.mxu0 }
 0x275   : > { %v2077_v19 = vpop.permute.xlu1 %2076  ;;  %v2075_v22 = vpop.permute.xlu0 %2074  ;;  %v2789_v33 = vmax.f32 %v2669_v52, 0.0  ;;  %v2661_v37 = vadd.f32 %v4990_v51, %v2660_v23 }
 0x276   : > { %2160 = vst.msk [vmem:[#allocation2 + $0x34] sm:$0xf] %vm2146_vm9, %v2077_v19  ;;  %2159 = vst.msk [vmem:[#allocation2 + $0x30] sm:$0xf] %vm2146_vm9, %v2075_v22  ;;  %v3760_v44 = vpop.f32.mrf.mxu0  ;;  %v3775_v47 = vpop.f32.mrf.mxu1 }
 0x277   : > { %2822 = vst.msk [vmem:[%s4997_s15 + $0x10] sm:$0xff] %vm2819_vm12, %v2789_v33  ;;  %v2787_v12 = vmax.f32 %v2661_v37, 0.0  ;;  %v2672_v20 = vadd.f32 %v3760_v44, %v4990_v51  ;;  %v2733_v63 = vadd.f32 %v3775_v47, %v4990_v51 }
 0x278   : > { %v2663_v60 = vpop.f32.mrf.mxu0  ;;  %v2724_v34 = vpop.f32.mrf.mxu1 }
 0x279   : > { %v2109_v7 = vpop.permute.xlu1 %2108  ;;  %v2107_v57 = vpop.permute.xlu0 %2106  ;;  %2820 = vst.msk [vmem:[%s4997_s15] sm:$0xff] %vm2819_vm12, %v2787_v12  ;;  %v2790_v35 = vmax.f32 %v2672_v20, 0.0  ;;  %v2805_v53 = vmax.f32 %v2733_v63, 0.0  ;;  %v2664_v42 = vadd.f32 %v4990_v51, %v2663_v60  ;;  %v2725_v43 = vadd.f32 %v4990_v51, %v2724_v34 }
 0x27a   : > { %2176 = vst.msk [vmem:[#allocation2 + $0x74] sm:$0xf] %vm2146_vm9, %v2109_v7  ;;  %2175 = vst.msk [vmem:[#allocation2 + $0x70] sm:$0xf] %vm2146_vm9, %v2107_v57  ;;  %v3776_v26 = vpop.f32.mrf.mxu1 }
 0x27b   : > { %2823 = vst.msk [vmem:[%s4997_s15 + $0x18] sm:$0xff] %vm2819_vm12, %v2790_v35  ;;  %2838 = vst.msk [vmem:[%s4997_s15 + $0x90] sm:$0xff] %vm2819_vm12, %v2805_v53  ;;  %v2788_v54 = vmax.f32 %v2664_v42, 0.0  ;;  %v2803_v55 = vmax.f32 %v2725_v43, 0.0  ;;  %v2736_v48 = vadd.f32 %v3776_v26, %v4990_v51 }
 0x27c   : > { %v2727_v49 = vpop.f32.mrf.mxu1 }
 0x27d   : > { %v2081_v27 = vpop.permute.xlu1 %2080  ;;  %v2079_v58 = vpop.permute.xlu0 %2078  ;;  %2821 = vst.msk [vmem:[%s4997_s15 + $0x8] sm:$0xff] %vm2819_vm12, %v2788_v54  ;;  %2836 = vst.msk [vmem:[%s4997_s15 + $0x80] sm:$0xff] %vm2819_vm12, %v2803_v55  ;;  %v2806_v59 = vmax.f32 %v2736_v48, 0.0  ;;  %v2728_v1 = vadd.f32 %v4990_v51, %v2727_v49 }
 0x27e   : > { %2162 = vst.msk [vmem:[#allocation2 + $0x3c] sm:$0xf] %vm2146_vm9, %v2081_v27  ;;  %2161 = vst.msk [vmem:[#allocation2 + $0x38] sm:$0xf] %vm2146_vm9, %v2079_v58 }
 0x27f   : > { %2839 = vst.msk [vmem:[%s4997_s15 + $0x98] sm:$0xff] %vm2819_vm12, %v2806_v59  ;;  %v2804_v31 = vmax.f32 %v2728_v1, 0.0 }
 0x281   : > { %v2113_v2 = vpop.permute.xlu1 %2112  ;;  %v2111_v32 = vpop.permute.xlu0 %2110  ;;  %2837 = vst.msk [vmem:[%s4997_s15 + $0x88] sm:$0xff] %vm2819_vm12, %v2804_v31 }
 0x282   : > { %2178 = vst.msk [vmem:[#allocation2 + $0x7c] sm:$0xf] %vm2146_vm9, %v2113_v2  ;;  %2177 = vst.msk [vmem:[#allocation2 + $0x78] sm:$0xf] %vm2146_vm9, %v2111_v32 }
 0x285   : > { %v2334_v4 = vpop.permute.xlu1 %2333  ;;  %v2332_v13 = vpop.permute.xlu0 %2331 }
 0x286   : > { %2417 = vst.msk [vmem:[#allocation2 + $0x34] sm:$0xf] %vm2403_vm10, %v2334_v4  ;;  %2416 = vst.msk [vmem:[#allocation2 + $0x30] sm:$0xf] %vm2403_vm10, %v2332_v13 }
 0x289   : > { %v2366_v16 = vpop.permute.xlu1 %2365  ;;  %v2364_v17 = vpop.permute.xlu0 %2363 }
 0x28a   : > { %2433 = vst.msk [vmem:[#allocation2 + $0x74] sm:$0xf] %vm2403_vm10, %v2366_v16  ;;  %2432 = vst.msk [vmem:[#allocation2 + $0x70] sm:$0xf] %vm2403_vm10, %v2364_v17 }
 0x28d   : > { %v2338_v25 = vpop.permute.xlu1 %2337  ;;  %v2336_v30 = vpop.permute.xlu0 %2335  ;;  %v3836_v28 = vld [vmem:[#allocation2 + $0x30] sm:$0xff]  }
 0x28e   : > { %2419 = vst.msk [vmem:[#allocation2 + $0x3c] sm:$0xf] %vm2403_vm10, %v2338_v25  ;;  %2418 = vst.msk [vmem:[#allocation2 + $0x38] sm:$0xf] %vm2403_vm10, %v2336_v30  ;;  %3769 = vmatprep.mubr.msk.bf16.mxu0 %vm2570_vm11, %v3836_v28 }
 0x291   : > { %v2370_v61 = vpop.permute.xlu1 %2369  ;;  %v2368_v62 = vpop.permute.xlu0 %2367  ;;  %v3837_v8 = vld [vmem:[#allocation2 + $0x70] sm:$0xff]  }
 0x292   : > { %2435 = vst.msk [vmem:[#allocation2 + $0x7c] sm:$0xf] %vm2403_vm10, %v2370_v61  ;;  %2434 = vst.msk [vmem:[#allocation2 + $0x78] sm:$0xf] %vm2403_vm10, %v2368_v62  ;;  %3785 = vmatprep.mubr.msk.bf16.mxu1 %vm2570_vm11, %v3837_v8 }
 0x295   : > { %v3838_v9 = vld [vmem:[#allocation2 + $0x38] sm:$0xff]  }
 0x296   : > { %3770 = vmatmul.mubr.msk.bf16.gmra.mxu0 %vm2570_vm11, %v3838_v9 }
 0x299   : > { %v3839_v38 = vld [vmem:[#allocation2 + $0x78] sm:$0xff]  }
 0x29a   : > { %3786 = vmatmul.mubr.msk.bf16.gmra.mxu1 %vm2570_vm11, %v3839_v38 }
 0x2ba   : > { %v3763_v41 = vpop.f32.mrf.mxu0 }
 0x2bb   : > { %v2685_v45 = vadd.f32 %v3763_v41, %v4990_v51 }
 0x2bc   : > { %v2676_v46 = vpop.f32.mrf.mxu0 }
 0x2bd   : > { %v2793_v0 = vmax.f32 %v2685_v45, 0.0  ;;  %v2677_v29 = vadd.f32 %v4990_v51, %v2676_v46 }
 0x2be   : > { %v3764_v5 = vpop.f32.mrf.mxu0  ;;  %v3779_v36 = vpop.f32.mrf.mxu1 }
 0x2bf   : > { %2826 = vst.msk [vmem:[%s4997_s15 + $0x30] sm:$0xff] %vm2819_vm12, %v2793_v0  ;;  %v2791_v21 = vmax.f32 %v2677_v29, 0.0  ;;  %v2688_v24 = vadd.f32 %v3764_v5, %v4990_v51  ;;  %v2749_v50 = vadd.f32 %v3779_v36, %v4990_v51 }
 0x2c0   : > { %v2679_v56 = vpop.f32.mrf.mxu0  ;;  %v2740_v39 = vpop.f32.mrf.mxu1 }
 0x2c1   : > { %2824 = vst.msk [vmem:[%s4997_s15 + $0x20] sm:$0xff] %vm2819_vm12, %v2791_v21  ;;  %v2794_v3 = vmax.f32 %v2688_v24, 0.0  ;;  %v2809_v40 = vmax.f32 %v2749_v50, 0.0  ;;  %v2680_v6 = vadd.f32 %v4990_v51, %v2679_v56  ;;  %v2741_v10 = vadd.f32 %v4990_v51, %v2740_v39 }
 0x2c2   : > { %v3780_v11 = vpop.f32.mrf.mxu1 }
 0x2c3   : > { %2827 = vst.msk [vmem:[%s4997_s15 + $0x38] sm:$0xff] %vm2819_vm12, %v2794_v3  ;;  %2842 = vst.msk [vmem:[%s4997_s15 + $0xb0] sm:$0xff] %vm2819_vm12, %v2809_v40  ;;  %v2792_v14 = vmax.f32 %v2680_v6, 0.0  ;;  %v2807_v15 = vmax.f32 %v2741_v10, 0.0  ;;  %v2752_v18 = vadd.f32 %v3780_v11, %v4990_v51 }
 0x2c4   : > { %v2743_v52 = vpop.f32.mrf.mxu1 }
 0x2c5   : > { %2825 = vst.msk [vmem:[%s4997_s15 + $0x28] sm:$0xff] %vm2819_vm12, %v2792_v14  ;;  %2840 = vst.msk [vmem:[%s4997_s15 + $0xa0] sm:$0xff] %vm2819_vm12, %v2807_v15  ;;  %v2810_v19 = vmax.f32 %v2752_v18, 0.0  ;;  %v2744_v22 = vadd.f32 %v4990_v51, %v2743_v52 }
 0x2c7   : > { %2843 = vst.msk [vmem:[%s4997_s15 + $0xb8] sm:$0xff] %vm2819_vm12, %v2810_v19  ;;  %v2808_v23 = vmax.f32 %v2744_v22, 0.0 }
 0x2c9   : > { %2841 = vst.msk [vmem:[%s4997_s15 + $0xa8] sm:$0xff] %vm2819_vm12, %v2808_v23 }
 0x306   : > { %v3767_v33 = vpop.f32.mrf.mxu0 }
 0x307   : > { %v2701_v37 = vadd.f32 %v3767_v33, %v4990_v51 }
 0x308   : > { %v2692_v44 = vpop.f32.mrf.mxu0 }
 0x309   : > { %v2797_v47 = vmax.f32 %v2701_v37, 0.0  ;;  %v2693_v12 = vadd.f32 %v4990_v51, %v2692_v44 }
 0x30a   : > { %v3768_v20 = vpop.f32.mrf.mxu0  ;;  %v3783_v63 = vpop.f32.mrf.mxu1 }
 0x30b   : > { %2830 = vst.msk [vmem:[%s4997_s15 + $0x50] sm:$0xff] %vm2819_vm12, %v2797_v47  ;;  %v2795_v7 = vmax.f32 %v2693_v12, 0.0  ;;  %v2704_v57 = vadd.f32 %v3768_v20, %v4990_v51  ;;  %v2765_v60 = vadd.f32 %v3783_v63, %v4990_v51 }
 0x30c   : > { %v2695_v34 = vpop.f32.mrf.mxu0  ;;  %v2756_v35 = vpop.f32.mrf.mxu1 }
 0x30d   : > { %2828 = vst.msk [vmem:[%s4997_s15 + $0x40] sm:$0xff] %vm2819_vm12, %v2795_v7  ;;  %v2798_v53 = vmax.f32 %v2704_v57, 0.0  ;;  %v2813_v42 = vmax.f32 %v2765_v60, 0.0  ;;  %v2696_v43 = vadd.f32 %v4990_v51, %v2695_v34  ;;  %v2757_v26 = vadd.f32 %v4990_v51, %v2756_v35 }
 0x30e   : > { %v3784_v54 = vpop.f32.mrf.mxu1 }
 0x30f   : > { %2831 = vst.msk [vmem:[%s4997_s15 + $0x58] sm:$0xff] %vm2819_vm12, %v2798_v53  ;;  %2846 = vst.msk [vmem:[%s4997_s15 + $0xd0] sm:$0xff] %vm2819_vm12, %v2813_v42  ;;  %v2796_v55 = vmax.f32 %v2696_v43, 0.0  ;;  %v2811_v48 = vmax.f32 %v2757_v26, 0.0  ;;  %v2768_v27 = vadd.f32 %v3784_v54, %v4990_v51 }
 0x310   : > { %v2759_v58 = vpop.f32.mrf.mxu1 }
 0x311   : > { %2829 = vst.msk [vmem:[%s4997_s15 + $0x48] sm:$0xff] %vm2819_vm12, %v2796_v55  ;;  %2844 = vst.msk [vmem:[%s4997_s15 + $0xc0] sm:$0xff] %vm2819_vm12, %v2811_v48  ;;  %v2814_v49 = vmax.f32 %v2768_v27, 0.0  ;;  %v2760_v59 = vadd.f32 %v4990_v51, %v2759_v58 }
 0x313   : > { %2847 = vst.msk [vmem:[%s4997_s15 + $0xd8] sm:$0xff] %vm2819_vm12, %v2814_v49  ;;  %v2812_v1 = vmax.f32 %v2760_v59, 0.0 }
 0x315   : > { %2845 = vst.msk [vmem:[%s4997_s15 + $0xc8] sm:$0xff] %vm2819_vm12, %v2812_v1 }
 0x356   : > { %v3771_v31 = vpop.f32.mrf.mxu0 }
 0x357   : > { %v2717_v2 = vadd.f32 %v3771_v31, %v4990_v51 }
 0x358   : > { %v2708_v32 = vpop.f32.mrf.mxu0 }
 0x359   : > { %v2801_v4 = vmax.f32 %v2717_v2, 0.0  ;;  %v2709_v13 = vadd.f32 %v4990_v51, %v2708_v32 }
 0x35a   : > { %v3772_v16 = vpop.f32.mrf.mxu0  ;;  %v3787_v17 = vpop.f32.mrf.mxu1 }
 0x35b   : > { %2834 = vst.msk [vmem:[%s4997_s15 + $0x70] sm:$0xff] %vm2819_vm12, %v2801_v4  ;;  %v2799_v25 = vmax.f32 %v2709_v13, 0.0  ;;  %v2720_v30 = vadd.f32 %v3772_v16, %v4990_v51  ;;  %v2781_v28 = vadd.f32 %v3787_v17, %v4990_v51 }
 0x35c   : > { %v2711_v61 = vpop.f32.mrf.mxu0  ;;  %v2772_v62 = vpop.f32.mrf.mxu1 }
 0x35d   : > { %2832 = vst.msk [vmem:[%s4997_s15 + $0x60] sm:$0xff] %vm2819_vm12, %v2799_v25  ;;  %v2802_v8 = vmax.f32 %v2720_v30, 0.0  ;;  %v2817_v9 = vmax.f32 %v2781_v28, 0.0  ;;  %v2712_v38 = vadd.f32 %v4990_v51, %v2711_v61  ;;  %v2773_v41 = vadd.f32 %v4990_v51, %v2772_v62 }
 0x35e   : > { %v3788_v45 = vpop.f32.mrf.mxu1 }
 0x35f   : > { %2835 = vst.msk [vmem:[%s4997_s15 + $0x78] sm:$0xff] %vm2819_vm12, %v2802_v8  ;;  %2850 = vst.msk [vmem:[%s4997_s15 + $0xf0] sm:$0xff] %vm2819_vm12, %v2817_v9  ;;  %v2800_v46 = vmax.f32 %v2712_v38, 0.0  ;;  %v2815_v0 = vmax.f32 %v2773_v41, 0.0  ;;  %v2784_v29 = vadd.f32 %v3788_v45, %v4990_v51 }
 0x360   : > { %v2775_v5 = vpop.f32.mrf.mxu1 }
 0x361   : > { %2833 = vst.msk [vmem:[%s4997_s15 + $0x68] sm:$0xff] %vm2819_vm12, %v2800_v46  ;;  %2848 = vst.msk [vmem:[%s4997_s15 + $0xe0] sm:$0xff] %vm2819_vm12, %v2815_v0  ;;  %v2818_v36 = vmax.f32 %v2784_v29, 0.0  ;;  %v2776_v21 = vadd.f32 %v4990_v51, %v2775_v5 }
 0x363   : > { %2851 = vst.msk [vmem:[%s4997_s15 + $0xf8] sm:$0xff] %vm2819_vm12, %v2818_v36  ;;  %v2816_v24 = vmax.f32 %v2776_v21, 0.0 }
 0x365   : > { %2849 = vst.msk [vmem:[%s4997_s15 + $0xe8] sm:$0xff] %vm2819_vm12, %v2816_v24 }
 0x366 PF: > { %s14_s12 = sadd.s32 1, %s3876_s12  }
 0x367   : > { %p11_p1 = scmp.ge.s32.totalorder %s14_s12, 4  }
 0x369   :  { %13 = sbr.rel (!%p11_p1) target bundleno = 1 (0x1), region = 69 }
 0x36e   :  { %2873 = vsyncpa [#allocation4], 1 }
 0x36f   :  { %2875 = vsyncpa [#allocation4 + $0x1], 1 }

// kernel: deep_ca_unet_forward.10
= control target key start
LH: loop header
LB: loop body
LE: loop exit
PB: predicated region body
PF: predicated region fallthrough
CT: control target
= control target key end

     0   :  { %s1536_s12 = smov 0   ;;  %s1902_s0 = inlined_call_operand.vmem [shape: f32[2,10,10,32], index: 0, kind: input, shape index: {}]   ;;  %s1903_s1 = inlined_call_operand.vmem [shape: bf16[288,64], index: 1, kind: input, shape index: {}]   ;;  %s1904_s2 = inlined_call_operand.vmem [shape: f32[1,64], index: 2, kind: input, shape index: {}]   ;;  %s1905_s3 = inlined_call_operand.vmem [shape: f32[2,8,8,64], index: 3, kind: output, shape index: {}]  }
   0x1 LB: > { %s1148_s13 = sadd.s32 4294967295, %s1511_s12   ;;  %p1152_p0 = scmp.ge.s32.totalorder %s1511_s12, 1  ;;  %s1511_s12 = sphi %s1536_s12, %s13_s12  }
   0x2   : > { %p137_p1 = scmp.lt.s32.totalorder %s1511_s12, 3 }
   0x4   : > { %p138_p2 = pnand %p1152_p0, %p137_p1 }
   0x5   : > { %p161_p3 = scmp.lt.s32.totalorder (!%p138_p2), %s1148_s13, 1  ;;  %s1513_s30 = smov (!%p138_p2), 32  }
   0x6   : > { %141 = sbr.rel (%p138_p2) target bundleno = 443 (0x1bb), region = 32  ;;  %s1514_s6 = smov (!%p138_p2), 64  }
   0x7   : > { %s1515_s19 = smov (!%p138_p2), 96  }
   0xb   : > { %v1472_v0 = vld [vmem:[%s1903_s1 + $0x78] sm:$0xff]   ;;  %s1907_s13 = smov (!%p161_p3, %s1148_s13), 1  ;;  %v1474_v2 = vld [vmem:[%s1903_s1 + $0x70] sm:$0xff]   ;;  %v1476_v4 = vld [vmem:[%s1903_s1 + $0x68] sm:$0xff]   ;;  %vm212_vm0 = vcmask 257024   ;;  %vm277_vm1 = vcmask 519424  }
   0xc   : > { %v1473_v1 = vld [vmem:[%s1903_s1 + $0x38] sm:$0xff]   ;;  %1386 = vmatprep.subr.bf16.mxu0 %v1472_v0  ;;  %1444 = vmatprep.subr.bf16.mxu1 %v1472_v0  ;;  %s1460_s20 = smul.u32 160, %s1907_s13  ;;  %v1475_v3 = vld [vmem:[%s1903_s1 + $0x30] sm:$0xff]   ;;  %v1477_v13 = vld [vmem:[%s1903_s1 + $0x28] sm:$0xff]   ;;  %vm342_vm2 = vcmask 781824   ;;  %vm408_vm3 = vcmask 1044224  }
   0xd   : > { %1387 = vmatpush3.bf16.msra.mxu0 %v1473_v1  ;;  %1452 = vmatpush3.bf16.msra.mxu1 %v1473_v1  ;;  %v1478_v57 = vld [vmem:[%s1903_s1 + $0x60] sm:$0xff]   ;;  %v1480_v60 = vld [vmem:[%s1903_s1 + $0x58] sm:$0xff]   ;;  %v1482_v62 = vld [vmem:[%s1903_s1 + $0x50] sm:$0xff]   ;;  %vm933_vm4 = vcmask 261120   ;;  %s1313_s7 = sshll.u32 %s1907_s13, 6  ;;  %vm1084_vm5 = vcmask 523264  }
   0xe   : > { %1388 = vmatprep.subr.bf16.mxu0 %v1474_v2  ;;  %1445 = vmatprep.subr.bf16.mxu1 %v1474_v2  ;;  %s1565_s27 = scalar_lea.vmem %s1902_s0, %s1460_s20  ;;  %v1479_v59 = vld [vmem:[%s1903_s1 + $0x20] sm:$0xff]   ;;  %v1481_v61 = vld [vmem:[%s1903_s1 + $0x18] sm:$0xff]   ;;  %v1483_v63 = vld [vmem:[%s1903_s1 + $0x10] sm:$0xff]   ;;  %s1881_s10 = scalar_lea.vmem %s1905_s3, %s1313_s7 }
   0xf   : > { %v1212_v5 = vld [vmem:[%s1565_s27 + $0x12] sm:$0xff]  ;;  %v221_v6 = vld [vmem:[%s1565_s27 + $0x1] sm:$0xff] }
  0x10   : > { %v1213_v7 = vld [vmem:[%s1565_s27 + $0x22] sm:$0xff]  ;;  %v1570_v8 = vpack.c.bf16 %v1212_v5, %v1212_v5  ;;  %v1322_v9 = vpack.c.bf16 %v221_v6, %v221_v6  ;;  %v222_v11 = vld [vmem:[%s1565_s27 + $0x11] sm:$0xff] }
  0x11   : > { %v1572_v10 = vpack.c.bf16 %v1213_v7, %v1213_v7  ;;  %v1229_v12 = vld [vmem:[%s1565_s27 + $0x30] sm:$0xff]  ;;  %1389 = vmatpush3.bf16.msra.mxu0 %v1475_v3  ;;  %1453 = vmatpush3.bf16.msra.mxu1 %v1475_v3  ;;  %v1323_v14 = vpack.c.bf16 %v222_v11, %v222_v11  ;;  %v1580_v15 = vld [vmem:[%s1565_s27 + $0x2] sm:$0xff] }
  0x12   : > { %v1582_v16 = vpack.c.bf16 %v1229_v12, %v1229_v12  ;;  %v1228_v17 = vld [vmem:[%s1565_s27 + $0x20] sm:$0xff]  ;;  %v1180_v18 = vld [vmem:[%s1565_s27 + $0x10] sm:$0xff]  ;;  %1390 = vmatprep.subr.bf16.mxu0 %v1476_v4  ;;  %1446 = vmatprep.subr.bf16.mxu1 %v1476_v4  ;;  %v1330_v37 = vpack.c.bf16 %v1580_v15, %v1580_v15  ;;  %v1484_v0 = vld [vmem:[%s1903_s1 + $0x48] sm:$0xff]  }
  0x13   : > { %v1245_v19 = vld [vmem:[%s1565_s27 + $0x31] sm:$0xff]  ;;  %497 = vrot.lane.b32.xlu1 %v1570_v8, %s1513_s30  ;;  %253 = vrot.lane.b32.xlu0 %v1322_v9, %s1513_s30  ;;  %v1590_v20 = vpack.c.bf16 %v1228_v17, %v1228_v17  ;;  %v1592_v21 = vpack.c.bf16 %v1180_v18, %v1180_v18  ;;  %v1244_v23 = vld [vmem:[%s1565_s27 + $0x21] sm:$0xff]  ;;  %698 = vst.msk [vmem:[#allocation2 + $0x8] sm:$0xf] %vm212_vm0, %v1572_v10  ;;  %457 = vst.msk [vmem:[#allocation2 + $0x4] sm:$0xf] %vm212_vm0, %v1323_v14 }
  0x14   : > { %v1594_v22 = vpack.c.bf16 %v1245_v19, %v1245_v19  ;;  %v228_v24 = vld [vmem:[%s1565_s27 + $0x71] sm:$0xff]  ;;  %v1600_v25 = vpack.c.bf16 %v1244_v23, %v1244_v23  ;;  %v227_v27 = vld [vmem:[%s1565_s27 + $0x61] sm:$0xff]  ;;  %216 = vst.msk [vmem:[#allocation2 + $0x24] sm:$0xf] %vm212_vm0, %v1582_v16 }
  0x15   : > { %v1602_v26 = vpack.c.bf16 %v228_v24, %v228_v24  ;;  %v1219_v28 = vld [vmem:[%s1565_s27 + $0x82] sm:$0xff]  ;;  %v1218_v29 = vld [vmem:[%s1565_s27 + $0x72] sm:$0xff]  ;;  %v1610_v30 = vpack.c.bf16 %v227_v27, %v227_v27  ;;  %214 = vst.msk [vmem:[#allocation2 + $0xc] sm:$0xf] %vm212_vm0, %v1592_v21  ;;  %1391 = vmatpush3.bf16.msra.mxu0 %v1477_v13  ;;  %1454 = vmatpush3.bf16.msra.mxu1 %v1477_v13  ;;  %215 = vst.msk [vmem:[#allocation2 + $0x18] sm:$0xf] %vm212_vm0, %v1590_v20 }
  0x16   : > { %v1612_v31 = vpack.c.bf16 %v1219_v28, %v1219_v28  ;;  %v1614_v32 = vpack.c.bf16 %v1218_v29, %v1218_v29  ;;  %v292_v33 = vld [vmem:[%s1565_s27 + $0x62] sm:$0xff]  ;;  %459 = vst.msk [vmem:[#allocation2 + $0x1c] sm:$0xf] %vm212_vm0, %v1594_v22  ;;  %v1186_v35 = vld [vmem:[%s1565_s27 + $0x70] sm:$0xff]  ;;  %458 = vst.msk [vmem:[#allocation2 + $0x10] sm:$0xf] %vm212_vm0, %v1600_v25  ;;  %1392 = vmatprep.subr.bf16.mxu0 %v1478_v57  ;;  %1447 = vmatprep.subr.bf16.mxu1 %v1478_v57 }
  0x17   : > { %v1623_v34 = vpack.c.bf16 %v292_v33, %v292_v33  ;;  %v1250_v36 = vld [vmem:[%s1565_s27 + $0x81] sm:$0xff]  ;;  %463 = vst.msk [vmem:[#allocation2 + $0x4c] sm:$0xf] %vm212_vm0, %v1602_v26  ;;  %499 = vrot.lane.b32.xlu1 %v1572_v10, %s1513_s30  ;;  %255 = vrot.lane.b32.xlu0 %v1323_v14, %s1513_s30  ;;  %v1636_v38 = vpack.c.bf16 %v1186_v35, %v1186_v35  ;;  %v1214_v41 = vld [vmem:[%s1565_s27 + $0x32] sm:$0xff]  ;;  %462 = vst.msk [vmem:[#allocation2 + $0x40] sm:$0xf] %vm212_vm0, %v1610_v30 }
  0x18   : > { %v1638_v39 = vpack.c.bf16 %v1250_v36, %v1250_v36  ;;  %v1215_v40 = vld [vmem:[%s1565_s27 + $0x42] sm:$0xff]  ;;  %703 = vst.msk [vmem:[#allocation2 + $0x44] sm:$0xf] %vm212_vm0, %v1614_v32  ;;  %704 = vst.msk [vmem:[#allocation2 + $0x50] sm:$0xf] %vm212_vm0, %v1612_v31  ;;  %v1650_v43 = vpack.c.bf16 %v1214_v41, %v1214_v41  ;;  %v1231_v44 = vld [vmem:[%s1565_s27 + $0x50] sm:$0xff] }
  0x19   : > { %v1648_v42 = vpack.c.bf16 %v1215_v40, %v1215_v40  ;;  %v1230_v45 = vld [vmem:[%s1565_s27 + $0x40] sm:$0xff]  ;;  %v1247_v46 = vld [vmem:[%s1565_s27 + $0x51] sm:$0xff]  ;;  %702 = vst.msk [vmem:[#allocation2 + $0x38] sm:$0xf] %vm212_vm0, %v1623_v34  ;;  %v1657_v47 = vpack.c.bf16 %v1231_v44, %v1231_v44  ;;  %220 = vst.msk [vmem:[#allocation2 + $0x54] sm:$0xf] %vm212_vm0, %v1636_v38  ;;  %1393 = vmatpush3.bf16.msra.mxu0 %v1479_v59  ;;  %1455 = vmatpush3.bf16.msra.mxu1 %v1479_v59 }
  0x1a   : > { %v1659_v48 = vpack.c.bf16 %v1230_v45, %v1230_v45  ;;  %v1661_v49 = vpack.c.bf16 %v1247_v46, %v1247_v46  ;;  %v1246_v50 = vld [vmem:[%s1565_s27 + $0x41] sm:$0xff]  ;;  %v1216_v51 = vld [vmem:[%s1565_s27 + $0x52] sm:$0xff]  ;;  %464 = vst.msk [vmem:[#allocation2 + $0x58] sm:$0xf] %vm212_vm0, %v1638_v39  ;;  %699 = vst.msk [vmem:[#allocation2 + $0x14] sm:$0xf] %vm212_vm0, %v1650_v43  ;;  %1394 = vmatprep.subr.bf16.mxu0 %v1480_v60  ;;  %1448 = vmatprep.subr.bf16.mxu1 %v1480_v60 }
  0x1b   : > { %v1232_v52 = vld [vmem:[%s1565_s27 + $0x60] sm:$0xff]  ;;  %v1670_v53 = vpack.c.bf16 %v1246_v50, %v1246_v50  ;;  %v1672_v54 = vpack.c.bf16 %v1216_v51, %v1216_v51  ;;  %700 = vst.msk [vmem:[#allocation2 + $0x20] sm:$0xf] %vm212_vm0, %v1648_v42  ;;  %320 = vrot.lane.b32.xlu1 %v1570_v8, %s1514_s6  ;;  %318 = vrot.lane.b32.xlu0 %v1330_v37, %s1514_s6  ;;  %218 = vst.msk [vmem:[#allocation2 + $0x3c] sm:$0xf] %vm212_vm0, %v1657_v47  ;;  %v1485_v1 = vld [vmem:[%s1903_s1 + $0x8] sm:$0xff]  }
  0x1c   : > { %v1674_v55 = vpack.c.bf16 %v1232_v52, %v1232_v52  ;;  %v172_v56 = vld [vmem:[%s1565_s27] sm:$0xff]  ;;  %217 = vst.msk [vmem:[#allocation2 + $0x30] sm:$0xf] %vm212_vm0, %v1659_v48  ;;  %461 = vst.msk [vmem:[#allocation2 + $0x34] sm:$0xf] %vm212_vm0, %v1661_v49  ;;  %v1235_v4 = vld [vmem:[%s1565_s27 + $0x90] sm:$0xff] }
  0x1d   : > { %v1314_v58 = vpack.c.bf16 %v172_v56, %v172_v56  ;;  %460 = vst.msk [vmem:[#allocation2 + $0x28] sm:$0xf] %vm212_vm0, %v1670_v53  ;;  %701 = vst.msk [vmem:[#allocation2 + $0x2c] sm:$0xf] %vm212_vm0, %v1672_v54  ;;  %1395 = vmatpush3.bf16.msra.mxu0 %v1481_v61  ;;  %1456 = vmatpush3.bf16.msra.mxu1 %v1481_v61  ;;  %v1486_v2 = vld [vmem:[%s1903_s1 + $0x40] sm:$0xff]   ;;  %v1369_v6 = vpack.c.bf16 %v1235_v4, %v1235_v4  ;;  %v1251_v8 = vld [vmem:[%s1565_s27 + $0x91] sm:$0xff] }
  0x1e   : > { %219 = vst.msk [vmem:[#allocation2 + $0x48] sm:$0xf] %vm212_vm0, %v1674_v55  ;;  %1396 = vmatprep.subr.bf16.mxu0 %v1482_v62  ;;  %1449 = vmatprep.subr.bf16.mxu1 %v1482_v62  ;;  %v1487_v3 = vld [vmem:[%s1903_s1] sm:$0xff]   ;;  %v1377_v9 = vpack.c.bf16 %v1251_v8, %v1251_v8  ;;  %v1762_v11 = vld [vmem:[%s1903_s1 + $0x88] sm:$0xff]   ;;  %v1267_v12 = vld [vmem:[%s1565_s27 + $0x92] sm:$0xff] }
  0x1f   : > { %213 = vst.msk [vmem:[#allocation2] sm:$0xf] %vm212_vm0, %v1314_v58  ;;  %564 = vrot.lane.b32.xlu1 %v1582_v16, %s1514_s6  ;;  %562 = vrot.lane.b32.xlu0 %v1590_v20, %s1514_s6  ;;  %v1234_v5 = vld [vmem:[%s1565_s27 + $0x80] sm:$0xff]  ;;  %v1385_v13 = vpack.c.bf16 %v1267_v12, %v1267_v12 }
  0x20   : > { %v1368_v7 = vpack.c.bf16 %v1234_v5, %v1234_v5  ;;  %v1495_v46 = vld [vmem:[%s1903_s1 + $0x80] sm:$0xff]  }
  0x21   : > { %1397 = vmatpush3.bf16.msra.mxu0 %v1483_v63  ;;  %1457 = vmatpush3.bf16.msra.mxu1 %v1483_v63  ;;  %705 = vst.msk [vmem:[#allocation2 + $0x5c] sm:$0xf] %vm212_vm0, %v1385_v13  ;;  %v1496_v45 = vld [vmem:[#allocation2 + $0x8] ss:$12 sps:$4 sm:$0xff]   ;;  %v1498_v52 = vld [vmem:[#allocation2 + $0x38] ss:$12 sps:$4 sm:$0xff]  }
  0x22   : > { %1398 = vmatprep.subr.bf16.mxu0 %v1484_v0  ;;  %1450 = vmatprep.subr.bf16.mxu1 %v1484_v0 }
  0x23   : > { %386 = vrot.lane.b32.xlu1 %v1590_v20, %s1515_s19  ;;  %384 = vrot.lane.b32.xlu0 %v1592_v21, %s1515_s19 }
  0x24   : > { %v1497_v51 = vld [vmem:[#allocation2 + $0x20] ss:$12 sps:$4 sm:$0xff]  }
  0x25   : > { %1399 = vmatpush3.bf16.msra.mxu0 %v1485_v1  ;;  %1458 = vmatpush3.bf16.msra.mxu1 %v1485_v1 }
  0x26   : > { %1400 = vmatprep.subr.bf16.mxu0 %v1486_v2  ;;  %1451 = vmatprep.subr.bf16.mxu1 %v1486_v2 }
  0x27   : > { %628 = vrot.lane.b32.xlu1 %v1594_v22, %s1515_s19  ;;  %626 = vrot.lane.b32.xlu0 %v1600_v25, %s1515_s19 }
  0x28   : > { %v1499_v57 = vld [vmem:[#allocation2 + $0x50] ss:$12 sps:$4 sm:$0xff]  }
  0x29   : > { %1401 = vmatpush3.bf16.msra.mxu0 %v1487_v3  ;;  %1459 = vmatpush3.bf16.msra.mxu1 %v1487_v3 }
  0x2a   : > { %1432 = vmatprep.subr.bf16.mxu1 %v1762_v11 }
  0x2b   : > { %267 = vrot.lane.b32.xlu1 %v1602_v26, %s1513_s30  ;;  %265 = vrot.lane.b32.xlu0 %v1610_v30, %s1513_s30 }
  0x2f   : > { %511 = vrot.lane.b32.xlu1 %v1612_v31, %s1513_s30  ;;  %509 = vrot.lane.b32.xlu0 %v1614_v32, %s1513_s30 }
  0x33   : > { %332 = vrot.lane.b32.xlu1 %v1614_v32, %s1514_s6  ;;  %330 = vrot.lane.b32.xlu0 %v1623_v34, %s1514_s6 }
  0x37   : > { %576 = vrot.lane.b32.xlu1 %v1369_v6, %s1514_s6  ;;  %574 = vrot.lane.b32.xlu0 %v1368_v7, %s1514_s6 }
  0x3b   : > { %398 = vrot.lane.b32.xlu1 %v1368_v7, %s1515_s19  ;;  %396 = vrot.lane.b32.xlu0 %v1636_v38, %s1515_s19 }
  0x3f   : > { %640 = vrot.lane.b32.xlu1 %v1377_v9, %s1515_s19  ;;  %638 = vrot.lane.b32.xlu0 %v1638_v39, %s1515_s19 }
  0x43   : > { %259 = vrot.lane.b32.xlu1 %v1594_v22, %s1513_s30  ;;  %257 = vrot.lane.b32.xlu0 %v1600_v25, %s1513_s30 }
  0x47   : > { %503 = vrot.lane.b32.xlu1 %v1648_v42, %s1513_s30  ;;  %501 = vrot.lane.b32.xlu0 %v1650_v43, %s1513_s30 }
  0x4b   : > { %324 = vrot.lane.b32.xlu1 %v1650_v43, %s1514_s6  ;;  %322 = vrot.lane.b32.xlu0 %v1572_v10, %s1514_s6 }
  0x4f   : > { %568 = vrot.lane.b32.xlu1 %v1657_v47, %s1514_s6  ;;  %566 = vrot.lane.b32.xlu0 %v1659_v48, %s1514_s6 }
  0x53   : > { %390 = vrot.lane.b32.xlu1 %v1659_v48, %s1515_s19  ;;  %388 = vrot.lane.b32.xlu0 %v1582_v16, %s1515_s19 }
  0x57   : > { %632 = vrot.lane.b32.xlu1 %v1661_v49, %s1515_s19  ;;  %630 = vrot.lane.b32.xlu0 %v1670_v53, %s1515_s19 }
  0x5b   : > { %263 = vrot.lane.b32.xlu1 %v1661_v49, %s1513_s30  ;;  %261 = vrot.lane.b32.xlu0 %v1670_v53, %s1513_s30 }
  0x5f   : > { %507 = vrot.lane.b32.xlu1 %v1623_v34, %s1513_s30  ;;  %505 = vrot.lane.b32.xlu0 %v1672_v54, %s1513_s30 }
  0x63   : > { %328 = vrot.lane.b32.xlu1 %v1672_v54, %s1514_s6  ;;  %326 = vrot.lane.b32.xlu0 %v1648_v42, %s1514_s6 }
  0x67   : > { %572 = vrot.lane.b32.xlu1 %v1636_v38, %s1514_s6  ;;  %570 = vrot.lane.b32.xlu0 %v1674_v55, %s1514_s6 }
  0x6b   : > { %394 = vrot.lane.b32.xlu1 %v1674_v55, %s1515_s19  ;;  %392 = vrot.lane.b32.xlu0 %v1657_v47, %s1515_s19 }
  0x6f   : > { %636 = vrot.lane.b32.xlu1 %v1602_v26, %s1515_s19  ;;  %634 = vrot.lane.b32.xlu0 %v1610_v30, %s1515_s19 }
  0x85   : > { %v498_v10 = vpop.permute.xlu1 %497  ;;  %v254_v14 = vpop.permute.xlu0 %253 }
  0x86   : > { %521 = vst.msk [vmem:[#allocation2 + $0x4] sm:$0xf] %vm277_vm1, %v498_v10  ;;  %278 = vst.msk [vmem:[#allocation2] sm:$0xf] %vm277_vm1, %v254_v14 }
  0x89   : > { %v500_v15 = vpop.permute.xlu1 %499  ;;  %v256_v16 = vpop.permute.xlu0 %255 }
  0x8a   : > { %522 = vst.msk [vmem:[#allocation2 + $0x10] sm:$0xf] %vm277_vm1, %v500_v15  ;;  %279 = vst.msk [vmem:[#allocation2 + $0xc] sm:$0xf] %vm277_vm1, %v256_v16 }
  0x8d   : > { %v321_v17 = vpop.permute.xlu1 %320  ;;  %v319_v18 = vpop.permute.xlu0 %318 }
  0x8e   : > { %344 = vst.msk [vmem:[#allocation2 + $0xc] sm:$0xf] %vm342_vm2, %v321_v17  ;;  %343 = vst.msk [vmem:[#allocation2] sm:$0xf] %vm342_vm2, %v319_v18 }
  0x91   : > { %v565_v19 = vpop.permute.xlu1 %564  ;;  %v563_v20 = vpop.permute.xlu0 %562 }
  0x92   : > { %587 = vst.msk [vmem:[#allocation2 + $0x10] sm:$0xf] %vm342_vm2, %v565_v19  ;;  %586 = vst.msk [vmem:[#allocation2 + $0x4] sm:$0xf] %vm342_vm2, %v563_v20 }
  0x95   : > { %v387_v21 = vpop.permute.xlu1 %386  ;;  %v385_v22 = vpop.permute.xlu0 %384 }
  0x96   : > { %410 = vst.msk [vmem:[#allocation2 + $0xc] sm:$0xf] %vm408_vm3, %v387_v21  ;;  %409 = vst.msk [vmem:[#allocation2] sm:$0xf] %vm408_vm3, %v385_v22  ;;  %v1276_v21 = vld [vmem:[%s1904_s2] ss:$0 sm:$0xff] }
  0x99   : > { %v629_v23 = vpop.permute.xlu1 %628  ;;  %v627_v24 = vpop.permute.xlu0 %626 }
  0x9a   : > { %651 = vst.msk [vmem:[#allocation2 + $0x10] sm:$0xf] %vm408_vm3, %v629_v23  ;;  %650 = vst.msk [vmem:[#allocation2 + $0x4] sm:$0xf] %vm408_vm3, %v627_v24 }
  0x9d   : > { %v268_v25 = vpop.permute.xlu1 %267  ;;  %v266_v26 = vpop.permute.xlu0 %265  ;;  %v1488_v29 = vld [vmem:[#allocation2] ss:$12 sps:$4 sm:$0xff]  }
  0x9e   : > { %285 = vst.msk [vmem:[#allocation2 + $0x54] sm:$0xf] %vm277_vm1, %v268_v25  ;;  %284 = vst.msk [vmem:[#allocation2 + $0x48] sm:$0xf] %vm277_vm1, %v266_v26 }
  0xa1   : > { %v512_v27 = vpop.permute.xlu1 %511  ;;  %v510_v28 = vpop.permute.xlu0 %509  ;;  %v1490_v30 = vld [vmem:[#allocation2 + $0x4] ss:$12 sps:$4 sm:$0xff]  }
  0xa2   : > { %528 = vst.msk [vmem:[#allocation2 + $0x58] sm:$0xf] %vm277_vm1, %v512_v27  ;;  %527 = vst.msk [vmem:[#allocation2 + $0x4c] sm:$0xf] %vm277_vm1, %v510_v28  ;;  %978 = vmatprep.mubr.bf16.mxu0 %v1490_v30 }
  0xa3   : > { %979 = vmatmul.mubr.bf16.vlgmr.msra.gmra.mxu0 %v1488_v29 }
  0xa5   : > { %v333_v31 = vpop.permute.xlu1 %332  ;;  %v331_v32 = vpop.permute.xlu0 %330 }
  0xa6   : > { %350 = vst.msk [vmem:[#allocation2 + $0x54] sm:$0xf] %vm342_vm2, %v333_v31  ;;  %349 = vst.msk [vmem:[#allocation2 + $0x48] sm:$0xf] %vm342_vm2, %v331_v32 }
  0xa9   : > { %v577_v33 = vpop.permute.xlu1 %576  ;;  %v575_v34 = vpop.permute.xlu0 %574 }
  0xaa   : > { %593 = vst.msk [vmem:[#allocation2 + $0x58] sm:$0xf] %vm342_vm2, %v577_v33  ;;  %592 = vst.msk [vmem:[#allocation2 + $0x4c] sm:$0xf] %vm342_vm2, %v575_v34 }
  0xad   : > { %v399_v35 = vpop.permute.xlu1 %398  ;;  %v397_v36 = vpop.permute.xlu0 %396 }
  0xae   : > { %416 = vst.msk [vmem:[#allocation2 + $0x54] sm:$0xf] %vm408_vm3, %v399_v35  ;;  %415 = vst.msk [vmem:[#allocation2 + $0x48] sm:$0xf] %vm408_vm3, %v397_v36 }
  0xb1   : > { %v641_v37 = vpop.permute.xlu1 %640  ;;  %v639_v38 = vpop.permute.xlu0 %638 }
  0xb2   : > { %657 = vst.msk [vmem:[#allocation2 + $0x58] sm:$0xf] %vm408_vm3, %v641_v37  ;;  %656 = vst.msk [vmem:[#allocation2 + $0x4c] sm:$0xf] %vm408_vm3, %v639_v38 }
  0xb5   : > { %v260_v39 = vpop.permute.xlu1 %259  ;;  %v258_v40 = vpop.permute.xlu0 %257  ;;  %v1491_v43 = vld [vmem:[#allocation2 + $0x48] ss:$12 sps:$4 sm:$0xff]  }
  0xb6   : > { %281 = vst.msk [vmem:[#allocation2 + $0x24] sm:$0xf] %vm277_vm1, %v260_v39  ;;  %280 = vst.msk [vmem:[#allocation2 + $0x18] sm:$0xf] %vm277_vm1, %v258_v40 }
  0xb9   : > { %v504_v41 = vpop.permute.xlu1 %503  ;;  %v502_v42 = vpop.permute.xlu0 %501  ;;  %v1493_v44 = vld [vmem:[#allocation2 + $0x4c] ss:$12 sps:$4 sm:$0xff]  }
  0xba   : > { %524 = vst.msk [vmem:[#allocation2 + $0x28] sm:$0xf] %vm277_vm1, %v504_v41  ;;  %523 = vst.msk [vmem:[#allocation2 + $0x1c] sm:$0xf] %vm277_vm1, %v502_v42  ;;  %1002 = vmatprep.mubr.bf16.mxu1 %v1493_v44 }
  0xbb   : > { %1003 = vmatmul.mubr.bf16.vlgmr.msra.gmra.mxu1 %v1491_v43 }
  0xbc   : > { %1433 = vmatpush3.bf16.msra.mxu1 %v1762_v11  ;;  %1436 = vmatprep.mubr.msk.bf16.mxu1 %vm933_vm4, %v1496_v45 }
  0xbd   : > { %v325_v47 = vpop.permute.xlu1 %324  ;;  %v323_v48 = vpop.permute.xlu0 %322  ;;  %1434 = vmatprep.subr.bf16.mxu1 %v1495_v46 }
  0xbe   : > { %346 = vst.msk [vmem:[#allocation2 + $0x24] sm:$0xf] %vm342_vm2, %v325_v47  ;;  %345 = vst.msk [vmem:[#allocation2 + $0x18] sm:$0xf] %vm342_vm2, %v323_v48 }
  0xc0   : > { %1435 = vmatpush3.bf16.msra.mxu1 %v1495_v46 }
  0xc1   : > { %v569_v49 = vpop.permute.xlu1 %568  ;;  %v567_v50 = vpop.permute.xlu0 %566 }
  0xc2   : > { %589 = vst.msk [vmem:[#allocation2 + $0x28] sm:$0xf] %vm342_vm2, %v569_v49  ;;  %588 = vst.msk [vmem:[#allocation2 + $0x1c] sm:$0xf] %vm342_vm2, %v567_v50 }
  0xc3   : > { %1437 = vmatmul.mubr.msk.bf16.vlgmr.msra.gmra.mxu1 %vm933_vm4, %v1497_v51 }
  0xc4   : > { %1440 = vmatprep.mubr.msk.bf16.mxu1 %vm933_vm4, %v1498_v52 }
  0xc5   : > { %v391_v53 = vpop.permute.xlu1 %390  ;;  %v389_v54 = vpop.permute.xlu0 %388 }
  0xc6   : > { %412 = vst.msk [vmem:[#allocation2 + $0x24] sm:$0xf] %vm408_vm3, %v391_v53  ;;  %411 = vst.msk [vmem:[#allocation2 + $0x18] sm:$0xf] %vm408_vm3, %v389_v54 }
  0xc9   : > { %v633_v55 = vpop.permute.xlu1 %632  ;;  %v631_v56 = vpop.permute.xlu0 %630 }
  0xca   : > { %653 = vst.msk [vmem:[#allocation2 + $0x28] sm:$0xf] %vm408_vm3, %v633_v55  ;;  %652 = vst.msk [vmem:[#allocation2 + $0x1c] sm:$0xf] %vm408_vm3, %v631_v56 }
  0xcb   : > { %1441 = vmatmul.mubr.msk.bf16.gmra.mxu1 %vm933_vm4, %v1499_v57 }
  0xcd   : > { %v264_v58 = vpop.permute.xlu1 %263  ;;  %v262_v59 = vpop.permute.xlu0 %261 }
  0xce   : > { %283 = vst.msk [vmem:[#allocation2 + $0x3c] sm:$0xf] %vm277_vm1, %v264_v58  ;;  %282 = vst.msk [vmem:[#allocation2 + $0x30] sm:$0xf] %vm277_vm1, %v262_v59 }
  0xd1   : > { %v508_v60 = vpop.permute.xlu1 %507  ;;  %v506_v61 = vpop.permute.xlu0 %505  ;;  %v710_v62 = vld [vmem:[#allocation2 + $0x18] sm:$0xff]  ;;  %v712_v63 = vld [vmem:[#allocation2 + $0x24] sm:$0xff] }
  0xd2   : > { %v1500_v0 = vld [vmem:[#allocation2 + $0x1c] ss:$12 sps:$4 sm:$0xff]   ;;  %526 = vst.msk [vmem:[#allocation2 + $0x40] sm:$0xf] %vm277_vm1, %v508_v60  ;;  %525 = vst.msk [vmem:[#allocation2 + $0x34] sm:$0xf] %vm277_vm1, %v506_v61  ;;  %v1280_v1 = vcombine.low %v710_v62, %v712_v63 }
  0xd3   : > { %986 = vmatprep.mubr.bf16.mxu0 %v1500_v0 }
  0xd4   : > { %987 = vmatmul.mubr.bf16.gmra.mxu0 %v1280_v1 }
  0xd5   : > { %v329_v2 = vpop.permute.xlu1 %328  ;;  %v327_v3 = vpop.permute.xlu0 %326 }
  0xd6   : > { %348 = vst.msk [vmem:[#allocation2 + $0x3c] sm:$0xf] %vm342_vm2, %v329_v2  ;;  %347 = vst.msk [vmem:[#allocation2 + $0x30] sm:$0xf] %vm342_vm2, %v327_v3 }
  0xd9   : > { %v573_v4 = vpop.permute.xlu1 %572  ;;  %v571_v5 = vpop.permute.xlu0 %570 }
  0xda   : > { %591 = vst.msk [vmem:[#allocation2 + $0x40] sm:$0xf] %vm342_vm2, %v573_v4  ;;  %590 = vst.msk [vmem:[#allocation2 + $0x34] sm:$0xf] %vm342_vm2, %v571_v5 }
  0xdd   : > { %v395_v6 = vpop.permute.xlu1 %394  ;;  %v393_v7 = vpop.permute.xlu0 %392 }
  0xde   : > { %414 = vst.msk [vmem:[#allocation2 + $0x3c] sm:$0xf] %vm408_vm3, %v395_v6  ;;  %413 = vst.msk [vmem:[#allocation2 + $0x30] sm:$0xf] %vm408_vm3, %v393_v7 }
  0xe1   : > { %v637_v8 = vpop.permute.xlu1 %636  ;;  %v635_v9 = vpop.permute.xlu0 %634 }
  0xe2   : > { %655 = vst.msk [vmem:[#allocation2 + $0x40] sm:$0xf] %vm408_vm3, %v637_v8  ;;  %654 = vst.msk [vmem:[#allocation2 + $0x34] sm:$0xf] %vm408_vm3, %v635_v9 }
  0xe5   : > { %v1504_v12 = vld [vmem:[#allocation2 + $0x30] ss:$12 sps:$4 sm:$0xff]  }
  0xe9   : > { %v1502_v11 = vld [vmem:[#allocation2 + $0x34] ss:$12 sps:$4 sm:$0xff]  }
  0xea   : > { %994 = vmatprep.mubr.bf16.mxu0 %v1502_v11 }
  0xeb   : > { %995 = vmatmul.mubr.bf16.gmra.mxu0 %v1504_v12 }
 0x163   : > { %v1402_v13 = vpop.f32.mrf.mxu0 }
 0x165   : > { %v1403_v10 = vpop.f32.mrf.mxu0 }
 0x166   : > { %v1404_v18 = vadd.f32 %v1403_v10, %v1402_v13 }
 0x167   : > { %v1405_v15 = vpop.f32.mrf.mxu0 }
 0x168   : > { %v981_v24 = vadd.f32 %v1404_v18, %v1276_v21 }
 0x169   : > { %v1406_v19 = vpop.f32.mrf.mxu0 }
 0x16a   : > { %v1407_v23 = vadd.f32 %v1406_v19, %v1405_v15 }
 0x16c   : > { %v984_v30 = vadd.f32 %v1407_v23, %v1276_v21 }
 0x17b   : > { %v1420_v14 = vpop.f32.mrf.mxu1 }
 0x17d   : > { %v1421_v16 = vpop.f32.mrf.mxu1 }
 0x17e   : > { %v1422_v26 = vadd.f32 %v1421_v16, %v1420_v14 }
 0x17f   : > { %v1423_v17 = vpop.f32.mrf.mxu1 }
 0x180   : > { %v1005_v34 = vadd.f32 %v1422_v26, %v1276_v21 }
 0x181   : > { %v1424_v20 = vpop.f32.mrf.mxu1 }
 0x182   : > { %v1425_v32 = vadd.f32 %v1424_v20, %v1423_v17 }
 0x183   : > { %v1438_v22 = vpop.f32.mrf.mxu1 }
 0x184   : > { %v1008_v40 = vadd.f32 %v1425_v32, %v1276_v21 }
 0x185   : > { %v1045_v25 = vpop.f32.mrf.mxu1 }
 0x186   : > { %v1046_v27 = vadd.f32 %v1045_v25, %v981_v24 }
 0x187   : > { %v1439_v28 = vpop.f32.mrf.mxu1 }
 0x188   : > { %v1076_v29 = vmax.f32 %v1046_v27, 0.0 }
 0x189   : > { %v1048_v31 = vpop.f32.mrf.mxu1 }
 0x18a   : > { %1085 = vst.msk [vmem:[%s1881_s10] sm:$0xff] %vm1084_vm5, %v1076_v29  ;;  %v1049_v33 = vadd.f32 %v1048_v31, %v984_v30 }
 0x18b   : > { %v1442_v35 = vpop.f32.mrf.mxu1 }
 0x18c   : > { %v1077_v36 = vmax.f32 %v1049_v33, 0.0  ;;  %v1070_v37 = vadd.f32 %v1442_v35, %v1005_v34 }
 0x18d   : > { %v1061_v38 = vpop.f32.mrf.mxu1 }
 0x18e   : > { %1086 = vst.msk [vmem:[%s1881_s10 + $0x8] sm:$0xff] %vm1084_vm5, %v1077_v36  ;;  %v1082_v39 = vmax.f32 %v1070_v37, 0.0 }
 0x18f   : > { %v1443_v41 = vpop.f32.mrf.mxu1 }
 0x190   : > { %1091 = vst.msk [vmem:[%s1881_s10 + $0x30] sm:$0xff] %vm1084_vm5, %v1082_v39  ;;  %v1073_v42 = vadd.f32 %v1443_v41, %v1008_v40 }
 0x191   : > { %v1064_v2 = vpop.f32.mrf.mxu1 }
 0x192   : > { %v1083_v43 = vmax.f32 %v1073_v42, 0.0 }
 0x194   : > { %v1408_v44 = vpop.f32.mrf.mxu0  ;;  %1092 = vst.msk [vmem:[%s1881_s10 + $0x38] sm:$0xff] %vm1084_vm5, %v1083_v43 }
 0x196   : > { %v1409_v45 = vpop.f32.mrf.mxu0 }
 0x197   : > { %v1410_v46 = vadd.f32 %v1409_v45, %v1408_v44 }
 0x198   : > { %v1411_v47 = vpop.f32.mrf.mxu0 }
 0x199   : > { %v989_v48 = vadd.f32 %v1410_v46, %v1276_v21 }
 0x19a   : > { %v1412_v49 = vpop.f32.mrf.mxu0 }
 0x19b   : > { %v1054_v50 = vadd.f32 %v1438_v22, %v989_v48  ;;  %v1413_v51 = vadd.f32 %v1412_v49, %v1411_v47 }
 0x19d   : > { %v1078_v52 = vmax.f32 %v1054_v50, 0.0  ;;  %v992_v53 = vadd.f32 %v1413_v51, %v1276_v21 }
 0x19f   : > { %1087 = vst.msk [vmem:[%s1881_s10 + $0x10] sm:$0xff] %vm1084_vm5, %v1078_v52  ;;  %v1057_v54 = vadd.f32 %v1439_v28, %v992_v53 }
 0x1a1   : > { %v1079_v55 = vmax.f32 %v1057_v54, 0.0 }
 0x1a3   : > { %1088 = vst.msk [vmem:[%s1881_s10 + $0x18] sm:$0xff] %vm1084_vm5, %v1079_v55 }
 0x1ab   : > { %v1414_v56 = vpop.f32.mrf.mxu0 }
 0x1ad   : > { %v1415_v57 = vpop.f32.mrf.mxu0 }
 0x1ae   : > { %v1416_v58 = vadd.f32 %v1415_v57, %v1414_v56 }
 0x1af   : > { %v1417_v59 = vpop.f32.mrf.mxu0 }
 0x1b0   : > { %v997_v60 = vadd.f32 %v1416_v58, %v1276_v21 }
 0x1b1   : > { %v1418_v61 = vpop.f32.mrf.mxu0 }
 0x1b2   : > { %v1062_v62 = vadd.f32 %v1061_v38, %v997_v60  ;;  %v1419_v63 = vadd.f32 %v1418_v61, %v1417_v59 }
 0x1b4   : > { %v1080_v0 = vmax.f32 %v1062_v62, 0.0  ;;  %v1000_v1 = vadd.f32 %v1419_v63, %v1276_v21 }
 0x1b6   : > { %1089 = vst.msk [vmem:[%s1881_s10 + $0x20] sm:$0xff] %vm1084_vm5, %v1080_v0  ;;  %v1065_v3 = vadd.f32 %v1064_v2, %v1000_v1 }
 0x1b8   : > { %v1081_v4 = vmax.f32 %v1065_v3, 0.0 }
 0x1ba   : > { %1090 = vst.msk [vmem:[%s1881_s10 + $0x28] sm:$0xff] %vm1084_vm5, %v1081_v4 }
 0x1bb PF: > { %s13_s12 = sadd.s32 1, %s1511_s12  }
 0x1bc   : > { %p10_p4 = scmp.ge.s32.totalorder %s13_s12, 4  }
 0x1be   :  { %12 = sbr.rel (!%p10_p4) target bundleno = 1 (0x1), region = 64 }

// kernel: deep_ca_unet_forward.12
= control target key start
LH: loop header
LB: loop body
LE: loop exit
PB: predicated region body
PF: predicated region fallthrough
CT: control target
= control target key end

     0   :  { %s1189_s12 = smov 0   ;;  %s1367_s0 = inlined_call_operand.vmem [shape: f32[2,6,6,64], index: 0, kind: input, shape index: {}]   ;;  %s1368_s1 = inlined_call_operand.vmem [shape: bf16[576,128], index: 1, kind: input, shape index: {}]   ;;  %s1369_s2 = inlined_call_operand.vmem [shape: f32[1,128], index: 2, kind: input, shape index: {}]   ;;  %s1370_s3 = inlined_call_operand.vmem [shape: f32[2,4,4,128], index: 3, kind: output, shape index: {}]  }
   0x1 LB: > { %s910_s13 = sadd.s32 4294967295, %s1164_s12   ;;  %p914_p0 = scmp.ge.s32.totalorder %s1164_s12, 1  ;;  %s1164_s12 = sphi %s1189_s12, %s13_s12  }
   0x2   : > { %p137_p1 = scmp.lt.s32.totalorder %s1164_s12, 3 }
   0x4   : > { %p138_p2 = pnand %p914_p0, %p137_p1 }
   0x5   : > { %p161_p3 = scmp.lt.s32.totalorder (!%p138_p2), %s910_s13, 1  ;;  %s1166_s30 = smov (!%p138_p2), 64  }
   0x6   : > { %141 = sbr.rel (%p138_p2) target bundleno = 366 (0x16e), region = 32 }
   0xb   : > { %v1105_v0 = vld [vmem:[%s1368_s1 + $0x78] sm:$0xff]   ;;  %s1372_s13 = smov (!%p161_p3, %s910_s13), 1  ;;  %v1107_v2 = vld [vmem:[%s1368_s1 + $0x70] sm:$0xff]   ;;  %v1109_v4 = vld [vmem:[%s1368_s1 + $0x68] sm:$0xff]   ;;  %vm192_vm0 = vcmask 519168   ;;  %v1167_v57 = vmov 0.0  }
   0xc   : > { %v1106_v1 = vld [vmem:[%s1368_s1 + $0x38] sm:$0xff]   ;;  %1024 = vmatprep.subr.bf16.mxu0 %v1105_v0  ;;  %s1085_s20 = smul.u32 48, %s1372_s13  ;;  %v1108_v3 = vld [vmem:[%s1368_s1 + $0x30] sm:$0xff]   ;;  %v1110_v5 = vld [vmem:[%s1368_s1 + $0x28] sm:$0xff]   ;;  %vm219_vm1 = vcmask 1043968   ;;  %vm1168_vm2 = vmmov 0  }
   0xd   : > { %1025 = vmatpush3.bf16.msra.mxu0 %v1106_v1  ;;  %v1111_v19 = vld [vmem:[%s1368_s1 + $0xf8] sm:$0xff]   ;;  %v1113_v22 = vld [vmem:[%s1368_s1 + $0x60] sm:$0xff]   ;;  %v1115_v25 = vld [vmem:[%s1368_s1 + $0xf0] sm:$0xff]   ;;  %vm716_vm3 = vcmask 523264   ;;  %s1005_s19 = sshll.u32 %s1372_s13, 4 }
   0xe   : > { %1026 = vmatprep.subr.bf16.mxu0 %v1107_v2  ;;  %s1218_s27 = scalar_lea.vmem %s1367_s0, %s1085_s20  ;;  %v1112_v21 = vld [vmem:[%s1368_s1 + $0xb8] sm:$0xff]   ;;  %1046 = vmatprep.subr.bf16.mxu1 %v1111_v19  ;;  %v1114_v23 = vld [vmem:[%s1368_s1 + $0x20] sm:$0xff]   ;;  %v1116_v27 = vld [vmem:[%s1368_s1 + $0xb0] sm:$0xff]   ;;  %s170_s22 = scalar_lea.vmem %s1370_s3, %s1005_s19 }
   0xf   : > { %v1097_v6 = vld [vmem:[%s1218_s27 + $0x8] ss:$8 sps:$4 sm:$0xff]   ;;  %v1099_v9 = vld [vmem:[%s1218_s27 + $0x18] ss:$8 sps:$4 sm:$0xff]   ;;  %1047 = vmatpush3.bf16.msra.mxu1 %v1112_v21 }
  0x10   : > { %v1098_v7 = vld [vmem:[%s1218_s27 + $0x1] ss:$8 sps:$4 sm:$0xff]   ;;  %v1012_v8 = vpack.c.bf16 %v1097_v6, %v1097_v6  ;;  %v1100_v11 = vld [vmem:[%s1218_s27 + $0x11] ss:$8 sps:$4 sm:$0xff]   ;;  %v1013_v12 = vpack.c.bf16 %v1099_v9, %v1099_v9  ;;  %1048 = vmatprep.subr.bf16.mxu1 %v1115_v25 }
  0x11   : > { %1027 = vmatpush3.bf16.msra.mxu0 %v1108_v3  ;;  %v1008_v10 = vpack.c.bf16 %v1098_v7, %v1098_v7  ;;  %v1101_v13 = vld [vmem:[%s1218_s27 + $0x1a] ss:$8 sps:$4 sm:$0xff]   ;;  %v1009_v14 = vpack.c.bf16 %v1100_v11, %v1100_v11  ;;  %v1102_v15 = vld [vmem:[%s1218_s27 + $0xa] ss:$8 sps:$4 sm:$0xff]  }
  0x12   : > { %1028 = vmatprep.subr.bf16.mxu0 %v1109_v4  ;;  %263 = vrot.lane.b32.xlu1 %v1012_v8, %s1166_s30  ;;  %v1103_v16 = vld [vmem:[%s1218_s27 + $0x21] ss:$8 sps:$4 sm:$0xff]   ;;  %v1104_v17 = vld [vmem:[%s1218_s27 + $0x11] ss:$8 sps:$4 sm:$0xff]   ;;  %v1017_v18 = vpack.c.bf16 %v1101_v13, %v1101_v13  ;;  %v1016_v20 = vpack.c.bf16 %v1102_v15, %v1102_v15 }
  0x13   : > { %213 = vrot.lane.b32.xlu0 %v1008_v10, %s1166_s30  ;;  %v1021_v24 = vpack.c.bf16 %v1103_v16, %v1103_v16  ;;  %v1020_v26 = vpack.c.bf16 %v1104_v17, %v1104_v17  ;;  %v1117_v28 = vld [vmem:[%s1368_s1 + $0x58] sm:$0xff]   ;;  %1049 = vmatpush3.bf16.msra.mxu1 %v1116_v27  ;;  %v1119_v30 = vld [vmem:[%s1368_s1 + $0xe8] sm:$0xff]   ;;  %v1123_v36 = vld [vmem:[%s1368_s1 + $0x50] sm:$0xff]  }
  0x14   : > { %v1118_v29 = vld [vmem:[%s1368_s1 + $0x18] sm:$0xff]   ;;  %v1120_v31 = vld [vmem:[%s1218_s27 + $0x2] ss:$8 sps:$4 sm:$0xff]   ;;  %1050 = vmatprep.subr.bf16.mxu1 %v1119_v30  ;;  %v1124_v37 = vld [vmem:[%s1368_s1 + $0x10] sm:$0xff]  }
  0x15   : > { %1029 = vmatpush3.bf16.msra.mxu0 %v1110_v5  ;;  %v1121_v32 = vld [vmem:[%s1218_s27] ss:$8 sps:$4 sm:$0xff]   ;;  %v1010_v33 = vpack.c.bf16 %v1120_v31, %v1120_v31  ;;  %v1126_v39 = vld [vmem:[%s1218_s27 + $0x12] ss:$8 sps:$4 sm:$0xff]  }
  0x16   : > { %265 = vrot.lane.b32.xlu1 %v1013_v12, %s1166_s30  ;;  %1030 = vmatprep.subr.bf16.mxu0 %v1113_v22  ;;  %v1122_v34 = vld [vmem:[%s1368_s1 + $0xa8] sm:$0xff]   ;;  %v1006_v35 = vpack.c.bf16 %v1121_v32, %v1121_v32  ;;  %v1125_v38 = vld [vmem:[%s1368_s1 + $0xe0] sm:$0xff]   ;;  %v1127_v40 = vld [vmem:[%s1218_s27 + $0x10] ss:$8 sps:$4 sm:$0xff]   ;;  %v1011_v41 = vpack.c.bf16 %v1126_v39, %v1126_v39 }
  0x17   : > { %215 = vrot.lane.b32.xlu0 %v1009_v14, %s1166_s30  ;;  %242 = vst.msk [vmem:[#allocation2 + $0x4] sm:$0xf] %vm192_vm0, %v1010_v33  ;;  %1051 = vmatpush3.bf16.msra.mxu1 %v1122_v34  ;;  %v1128_v42 = vld [vmem:[%s1368_s1 + $0xa0] sm:$0xff]   ;;  %v1007_v43 = vpack.c.bf16 %v1127_v40, %v1127_v40  ;;  %v1129_v44 = vld [vmem:[%s1368_s1 + $0x48] sm:$0xff]   ;;  %v1131_v46 = vld [vmem:[%s1368_s1 + $0xd8] sm:$0xff]  }
  0x18   : > { %193 = vst.msk [vmem:[#allocation2] sm:$0xf] %vm192_vm0, %v1006_v35  ;;  %1052 = vmatprep.subr.bf16.mxu1 %v1125_v38  ;;  %243 = vst.msk [vmem:[#allocation2 + $0x18] sm:$0xf] %vm192_vm0, %v1011_v41  ;;  %v1130_v45 = vld [vmem:[%s1368_s1 + $0x8] sm:$0xff]   ;;  %v1134_v50 = vld [vmem:[%s1368_s1 + $0x98] sm:$0xff]  }
  0x19   : > { %1031 = vmatpush3.bf16.msra.mxu0 %v1114_v23  ;;  %194 = vst.msk [vmem:[#allocation2 + $0x14] sm:$0xf] %vm192_vm0, %v1007_v43  ;;  %v1132_v47 = vld [vmem:[%s1218_s27 + $0x19] ss:$8 sps:$4 sm:$0xff]   ;;  %v1133_v48 = vld [vmem:[%s1218_s27 + $0x9] ss:$8 sps:$4 sm:$0xff]  }
  0x1a   : > { %313 = vrot.lane.b32.xlu1 %v1017_v18, %s1166_s30  ;;  %1032 = vmatprep.subr.bf16.mxu0 %v1117_v28  ;;  %v1015_v49 = vpack.c.bf16 %v1132_v47, %v1132_v47  ;;  %v1014_v51 = vpack.c.bf16 %v1133_v48, %v1133_v48  ;;  %v1135_v52 = vld [vmem:[%s1368_s1 + $0x40] sm:$0xff]   ;;  %v1137_v54 = vld [vmem:[%s1368_s1 + $0xd0] sm:$0xff]   ;;  %v1144_v61 = vld [vmem:[%s1368_s1 + $0xc8] sm:$0xff]  }
  0x1b   : > { %311 = vrot.lane.b32.xlu0 %v1016_v20, %s1166_s30  ;;  %1053 = vmatpush3.bf16.msra.mxu1 %v1128_v42  ;;  %v1136_v53 = vld [vmem:[%s1368_s1] sm:$0xff]   ;;  %v1139_v56 = vld [vmem:[%s1218_s27 + $0x10] ss:$8 sps:$4 sm:$0xff]   ;;  %v1146_v62 = vld [vmem:[%s1368_s1 + $0x88] sm:$0xff]  }
  0x1c   : > { %1054 = vmatprep.subr.bf16.mxu1 %v1131_v46  ;;  %292 = vst.msk [vmem:[#allocation2 + $0x1c] sm:$0xf] %vm192_vm0, %v1015_v49  ;;  %291 = vst.msk [vmem:[#allocation2 + $0x8] sm:$0xf] %vm192_vm0, %v1014_v51  ;;  %v1138_v55 = vld [vmem:[%s1218_s27 + $0x20] ss:$8 sps:$4 sm:$0xff]   ;;  %v1018_v60 = vpack.c.bf16 %v1139_v56, %v1139_v56 }
  0x1d   : > { %1033 = vmatpush3.bf16.msra.mxu0 %v1118_v29  ;;  %v1019_v58 = vpack.c.bf16 %v1138_v55, %v1138_v55  ;;  %v1140_v59 = vld [vmem:[%s1368_s1 + $0x90] sm:$0xff]   ;;  %v1147_v63 = vld [vmem:[%s1368_s1 + $0xc0] sm:$0xff]   ;;  %v1145_v12 = vld [vmem:[%s1368_s1 + $0x118] sm:$0xff]  }
  0x1e   : > { %362 = vrot.lane.b32.xlu1 %v1021_v24, %s1166_s30  ;;  %1034 = vmatprep.subr.bf16.mxu0 %v1123_v36  ;;  %340 = vst.msk [vmem:[#allocation2 + $0xc] sm:$0xf] %vm192_vm0, %v1018_v60  ;;  %v1149_v0 = vld [vmem:[%s1368_s1 + $0x80] sm:$0xff]   ;;  %v1155_v1 = vld [vmem:[%s1218_s27 + $0x12] ss:$8 sps:$4 sm:$0xff]   ;;  %v1153_v17 = vld [vmem:[%s1368_s1 + $0x108] sm:$0xff]  }
  0x1f   : > { %360 = vrot.lane.b32.xlu0 %v1020_v26, %s1166_s30  ;;  %1055 = vmatpush3.bf16.msra.mxu1 %v1134_v50  ;;  %341 = vst.msk [vmem:[#allocation2 + $0x20] sm:$0xf] %vm192_vm0, %v1019_v58  ;;  %v1156_v2 = vld [vmem:[%s1218_s27 + $0x22] ss:$8 sps:$4 sm:$0xff]   ;;  %v1022_v3 = vpack.c.bf16 %v1155_v1, %v1155_v1  ;;  %v1148_v16 = vld [vmem:[%s1368_s1 + $0x110] sm:$0xff]  }
  0x20   : > { %1056 = vmatprep.subr.bf16.mxu1 %v1137_v54  ;;  %v1023_v4 = vpack.c.bf16 %v1156_v2, %v1156_v2  ;;  %v1154_v20 = vld [vmem:[%s1368_s1 + $0x100] sm:$0xff]  }
  0x21   : > { %1035 = vmatpush3.bf16.msra.mxu0 %v1124_v37  ;;  %388 = vst.msk [vmem:[#allocation2 + $0x10] sm:$0xf] %vm192_vm0, %v1022_v3  ;;  %v960_v26 = vld [vmem:[%s1369_s2] ss:$0 sm:$0xff] }
  0x22   : > { %1036 = vmatprep.subr.bf16.mxu0 %v1129_v44  ;;  %389 = vst.msk [vmem:[#allocation2 + $0x24] sm:$0xf] %vm192_vm0, %v1023_v4 }
  0x23   : > { %1057 = vmatpush3.bf16.msra.mxu1 %v1140_v59 }
  0x24   : > { %1058 = vmatprep.subr.bf16.mxu1 %v1144_v61 }
  0x25   : > { %1037 = vmatpush3.bf16.msra.mxu0 %v1130_v45 }
  0x26   : > { %1038 = vmatprep.subr.bf16.mxu0 %v1135_v52 }
  0x27   : > { %1059 = vmatpush3.bf16.msra.mxu1 %v1146_v62 }
  0x28   : > { %1060 = vmatprep.subr.bf16.mxu1 %v1147_v63 }
  0x29   : > { %1039 = vmatpush3.bf16.msra.mxu0 %v1136_v53  ;;  %v1157_v21 = vld [vmem:[#allocation2 + $0x10] ss:$20 sps:$4 sm:$0xff]  }
  0x2a   : > { %1073 = vmatprep.subr.bf16.mxu0 %v1167_v57 }
  0x2b   : > { %1061 = vmatpush3.bf16.msra.mxu1 %v1149_v0 }
  0x84   : > { %v264_v5 = vpop.permute.xlu1 %263 }
  0x85   : > { %269 = vst.msk [vmem:[#allocation2 + $0x4] sm:$0xf] %vm219_vm1, %v264_v5  ;;  %v214_v6 = vpop.permute.xlu0 %213 }
  0x86   : > { %220 = vst.msk [vmem:[#allocation2] sm:$0xf] %vm219_vm1, %v214_v6 }
  0x88   : > { %v266_v7 = vpop.permute.xlu1 %265 }
  0x89   : > { %270 = vst.msk [vmem:[#allocation2 + $0x18] sm:$0xf] %vm219_vm1, %v266_v7  ;;  %v216_v8 = vpop.permute.xlu0 %215 }
  0x8a   : > { %221 = vst.msk [vmem:[#allocation2 + $0x14] sm:$0xf] %vm219_vm1, %v216_v8 }
  0x8c   : > { %v314_v9 = vpop.permute.xlu1 %313 }
  0x8d   : > { %318 = vst.msk [vmem:[#allocation2 + $0x1c] sm:$0xf] %vm219_vm1, %v314_v9  ;;  %v312_v10 = vpop.permute.xlu0 %311 }
  0x8e   : > { %317 = vst.msk [vmem:[#allocation2 + $0x8] sm:$0xf] %vm219_vm1, %v312_v10 }
  0x90   : > { %v363_v11 = vpop.permute.xlu1 %362  ;;  %v1143_v15 = vld [vmem:[#allocation2 + $0x4] ss:$20 sps:$4 sm:$0xff]  }
  0x91   : > { %367 = vst.msk [vmem:[#allocation2 + $0x20] sm:$0xf] %vm219_vm1, %v363_v11  ;;  %v361_v13 = vpop.permute.xlu0 %360  ;;  %v1141_v14 = vld [vmem:[#allocation2] ss:$20 sps:$4 sm:$0xff]   ;;  %752 = vmatprep.mubr.bf16.mxu0 %v1143_v15 }
  0x92   : > { %366 = vst.msk [vmem:[#allocation2 + $0xc] sm:$0xf] %vm219_vm1, %v361_v13  ;;  %753 = vmatmul.mubr.bf16.vlgmr.msra.gmra.mxu0 %v1141_v14 }
  0x93   : > { %1074 = vmatpush3.bf16.msra.mxu0 %v1145_v12  ;;  %1081 = vmatprep.mubr.msk.bf16.mxu0 %vm1168_vm2, %v1167_v57 }
  0x94   : > { %1075 = vmatprep.subr.bf16.mxu0 %v1167_v57 }
  0x95   : > { %v1150_v18 = vld [vmem:[#allocation2 + $0x8] ss:$20 sps:$4 sm:$0xff]  }
  0x97   : > { %1076 = vmatpush3.bf16.msra.mxu0 %v1148_v16 }
  0x98   : > { %1077 = vmatprep.subr.bf16.mxu0 %v1167_v57 }
  0x99   : > { %v1152_v19 = vld [vmem:[#allocation2 + $0xc] ss:$20 sps:$4 sm:$0xff]  }
  0x9a   : > { %793 = vmatprep.mubr.bf16.mxu1 %v1152_v19 }
  0x9b   : > { %794 = vmatmul.mubr.bf16.vlgmr.msra.gmra.mxu1 %v1150_v18  ;;  %1078 = vmatpush3.bf16.msra.mxu0 %v1153_v17 }
  0x9c   : > { %1079 = vmatprep.subr.bf16.mxu0 %v1167_v57 }
  0x9f   : > { %1080 = vmatpush3.bf16.msra.mxu0 %v1154_v20 }
  0xa2   : > { %1082 = vmatmul.mubr.msk.bf16.vlgmr.msra.gmra.mxu0 %vm716_vm3, %v1157_v21 }
 0x152   : > { %v1040_v22 = vpop.f32.mrf.mxu0 }
 0x154   : > { %v1041_v23 = vpop.f32.mrf.mxu0 }
 0x155   : > { %v1042_v25 = vadd.f32 %v1041_v23, %v1040_v22 }
 0x156   : > { %v1043_v24 = vpop.f32.mrf.mxu0 }
 0x157   : > { %v755_v30 = vadd.f32 %v1042_v25, %v960_v26 }
 0x158   : > { %v1044_v27 = vpop.f32.mrf.mxu0 }
 0x159   : > { %v1045_v31 = vadd.f32 %v1044_v27, %v1043_v24 }
 0x15b   : > { %v1062_v28 = vpop.f32.mrf.mxu1  ;;  %v758_v36 = vadd.f32 %v1045_v31, %v960_v26 }
 0x15d   : > { %v1063_v29 = vpop.f32.mrf.mxu1 }
 0x15e   : > { %v1064_v32 = vadd.f32 %v1063_v29, %v1062_v28 }
 0x15f   : > { %v1065_v33 = vpop.f32.mrf.mxu1 }
 0x160   : > { %v796_v34 = vadd.f32 %v1064_v32, %v755_v30 }
 0x161   : > { %v1066_v35 = vpop.f32.mrf.mxu1 }
 0x162   : > { %v1067_v37 = vadd.f32 %v1066_v35, %v1065_v33  ;;  %v836_v38 = vpop.f32.mrf.mxu0 }
 0x163   : > { %v837_v39 = vadd.f32 %v836_v38, %v796_v34 }
 0x164   : > { %v799_v40 = vadd.f32 %v1067_v37, %v758_v36  ;;  %v1083_v41 = vpop.f32.mrf.mxu0 }
 0x165   : > { %v843_v42 = vmax.f32 %v837_v39, 0.0 }
 0x166   : > { %v839_v43 = vpop.f32.mrf.mxu0 }
 0x167   : > { %v847_v44 = vcombine.high %v843_v42, %v843_v42  ;;  %851 = vst [vmem:[%s170_s22] sm:$0xf] %v843_v42  ;;  %v840_v45 = vadd.f32 %v839_v43, %v799_v40 }
 0x168   : > { %v1084_v46 = vpop.f32.mrf.mxu0 }
 0x169   : > { %852 = vst [vmem:[%s170_s22 + $0x4] sm:$0xf] %v847_v44  ;;  %v844_v47 = vmax.f32 %v840_v45, 0.0 }
 0x16b   : > { %v848_v48 = vcombine.high %v844_v47, %v844_v47  ;;  %853 = vst [vmem:[%s170_s22 + $0x8] sm:$0xf] %v844_v47 }
 0x16d   : > { %854 = vst [vmem:[%s170_s22 + $0xc] sm:$0xf] %v848_v48 }
 0x16e PF: > { %s13_s12 = sadd.s32 1, %s1164_s12  }
 0x16f   : > { %p10_p4 = scmp.ge.s32.totalorder %s13_s12, 4  }
 0x171   :  { %12 = sbr.rel (!%p10_p4) target bundleno = 1 (0x1), region = 64 }

// kernel: deep_ca_unet_forward.11
= control target key start
LH: loop header
LB: loop body
LE: loop exit
PB: predicated region body
PF: predicated region fallthrough
CT: control target
= control target key end

     0   :  { %s1253_s12 = smov 0   ;;  %s1474_s0 = inlined_call_operand.vmem [shape: f32[2,5,5,256], index: 0, kind: input, shape index: {}]   ;;  %s1475_s1 = inlined_call_operand.vmem [shape: bf16[576,64], index: 1, kind: input, shape index: {}]   ;;  %s1476_s2 = inlined_call_operand.vmem [shape: f32[1,64], index: 2, kind: input, shape index: {}]   ;;  %s1477_s3 = inlined_call_operand.vmem [shape: f32[2,4,4,64], index: 3, kind: output, shape index: {}]  }
   0x1 LB: > { %s968_s13 = sadd.s32 4294967295, %s1228_s12   ;;  %p972_p0 = scmp.ge.s32.totalorder %s1228_s12, 1  ;;  %s1228_s12 = sphi %s1253_s12, %s13_s12  }
   0x2   : > { %p137_p1 = scmp.lt.s32.totalorder %s1228_s12, 3 }
   0x4   : > { %p138_p2 = pnand %p972_p0, %p137_p1 }
   0x5   : > { %p161_p3 = scmp.lt.s32.totalorder (!%p138_p2), %s968_s13, 1  ;;  %s1230_s30 = smov (!%p138_p2), 64  }
   0x6   : > { %141 = sbr.rel (%p138_p2) target bundleno = 367 (0x16f), region = 32 }
   0xb   : > { %v1163_v0 = vld [vmem:[%s1475_s1 + $0x78] sm:$0xff]   ;;  %s1481_s13 = smov (!%p161_p3, %s968_s13), 1  ;;  %v1165_v2 = vld [vmem:[%s1475_s1 + $0x70] sm:$0xff]   ;;  %vm230_vm0 = vcmask 1042432   ;;  %vm231_vm1 = vcmask 1046532   ;;  %v1169_v21 = vld [vmem:[%s1475_s1 + $0x68] sm:$0xff]  }
   0xc   : > { %v1164_v1 = vld [vmem:[%s1475_s1 + $0x38] sm:$0xff]   ;;  %1082 = vmatprep.subr.bf16.mxu0 %v1163_v0  ;;  %s1143_s20 = smul.u32 80, %s1481_s13  ;;  %v1166_v3 = vld [vmem:[%s1475_s1 + $0x30] sm:$0xff]   ;;  %vm1302_vm2 = vmor %vm230_vm0, %vm231_vm1  ;;  %vm192_vm3 = vcmask 519168   ;;  %vm215_vm4 = vcmask 1043968   ;;  %vm1232_vm5 = vmmov 0  }
   0xd   : > { %1083 = vmatpush3.bf16.msra.mxu0 %v1164_v1  ;;  %v1167_v4 = vld [vmem:[%s1475_s1 + $0xf8] sm:$0xff]   ;;  %v1170_v30 = vld [vmem:[%s1475_s1 + $0x28] sm:$0xff]   ;;  %v1171_v35 = vld [vmem:[%s1475_s1 + $0xf0] sm:$0xff]   ;;  %vm774_vm6 = vcmask 523264   ;;  %s1063_s19 = sshll.u32 %s1481_s13, 4 }
   0xe   : > { %1084 = vmatprep.subr.bf16.mxu0 %v1165_v2  ;;  %s1282_s27 = scalar_lea.vmem %s1474_s0, %s1143_s20  ;;  %v1168_v5 = vld [vmem:[%s1475_s1 + $0xb8] sm:$0xff]   ;;  %1104 = vmatprep.subr.bf16.mxu1 %v1167_v4  ;;  %v1172_v39 = vld [vmem:[%s1475_s1 + $0xb0] sm:$0xff]   ;;  %v1173_v41 = vld [vmem:[%s1475_s1 + $0x60] sm:$0xff]   ;;  %s170_s22 = scalar_lea.vmem %s1477_s3, %s1063_s19 }
   0xf   : > { %v1155_v6 = vld [vmem:[%s1282_s27 + $0x8] ss:$16 sps:$4 sm:$0xff]   ;;  %1105 = vmatpush3.bf16.msra.mxu1 %v1168_v5  ;;  %v1174_v43 = vld [vmem:[%s1475_s1 + $0x20] sm:$0xff]   ;;  %v219_v51 = vld [vmem:[%s1282_s27 + $0x10] sm:$0x1e] }
  0x10   : > { %v1156_v7 = vld [vmem:[%s1282_s27 + $0x8] ss:$16 sps:$4 sm:$0xff]   ;;  %v1072_v8 = vpack.c.bf16 %v1155_v6, %v1155_v6  ;;  %1106 = vmatprep.subr.bf16.mxu1 %v1171_v35  ;;  %v1179_v49 = vld [vmem:[%s1475_s1 + $0xe0] sm:$0xff]   ;;  %v227_v53 = vcombine.high %v219_v51, %v219_v51  ;;  %v981_v55 = vrot.slane %v219_v51, 9  ;;  %v1183_v59 = vld [vmem:[%s1475_s1 + $0x50] sm:$0xff]  }
  0x11   : > { %1085 = vmatpush3.bf16.msra.mxu0 %v1166_v3  ;;  %v1157_v9 = vld [vmem:[%s1282_s27 + $0x28] ss:$16 sps:$4 sm:$0xff]   ;;  %v1070_v10 = vpack.c.bf16 %v1156_v7, %v1156_v7  ;;  %v218_v50 = vld [vmem:[%s1282_s27] sm:$0x1e]  ;;  %v1184_v60 = vld [vmem:[%s1475_s1 + $0x10] sm:$0xff]  }
  0x12   : > { %v1158_v11 = vld [vmem:[%s1282_s27 + $0x28] ss:$16 sps:$4 sm:$0xff]   ;;  %307 = vrot.lane.b32.xlu1 %v1072_v8, %s1230_s30  ;;  %v1073_v12 = vpack.c.bf16 %v1157_v9, %v1157_v9  ;;  %1086 = vmatprep.subr.bf16.mxu0 %v1169_v21  ;;  %v226_v52 = vcombine.high %v218_v50, %v218_v50  ;;  %v980_v54 = vrot.slane %v218_v50, 9  ;;  %v1182_v56 = vld [vmem:[%s1475_s1 + $0xa0] sm:$0xff]   ;;  %v239_v58 = vrot.slane %v227_v53, 5 }
  0x13   : > { %v317_v13 = vld [vmem:[%s1282_s27 + $0x28] sm:$0x1e]  ;;  %v318_v14 = vld [vmem:[%s1282_s27 + $0x38] sm:$0x1e]  ;;  %281 = vrot.lane.b32.xlu0 %v1070_v10, %s1230_s30  ;;  %v1071_v16 = vpack.c.bf16 %v1158_v11, %v1158_v11  ;;  %1107 = vmatpush3.bf16.msra.mxu1 %v1172_v39  ;;  %v220_v0 = vld [vmem:[%s1282_s27 + $0x20] sm:$0x1e] }
  0x14   : > { %v315_v15 = vld [vmem:[%s1282_s27 + $0x8] sm:$0x1e]  ;;  %v325_v17 = vcombine.high %v317_v13, %v317_v13  ;;  %v326_v18 = vcombine.high %v318_v14, %v318_v14  ;;  %v992_v19 = vrot.slane %v317_v13, 9  ;;  %v316_v20 = vld [vmem:[%s1282_s27 + $0x18] sm:$0x1e]  ;;  %v993_v23 = vrot.slane %v318_v14, 9 }
  0x15   : > { %v323_v24 = vcombine.high %v315_v15, %v315_v15  ;;  %v324_v25 = vcombine.high %v316_v20, %v316_v20  ;;  %v990_v26 = vrot.slane %v315_v15, 9  ;;  %v991_v29 = vrot.slane %v316_v20, 9  ;;  %1087 = vmatpush3.bf16.msra.mxu0 %v1170_v30  ;;  %v1175_v45 = vld [vmem:[%s1475_s1 + $0xe8] sm:$0xff]   ;;  %v1177_v47 = vld [vmem:[%s1475_s1 + $0x58] sm:$0xff]   ;;  %v221_v1 = vld [vmem:[%s1282_s27 + $0x30] sm:$0x1e] }
  0x16   : > { %v337_v27 = vrot.slane %v325_v17, 5  ;;  %v341_v28 = vrot.slane %v326_v18, 5  ;;  %309 = vrot.lane.b32.xlu1 %v1073_v12, %s1230_s30  ;;  %1088 = vmatprep.subr.bf16.mxu0 %v1173_v41  ;;  %v1176_v46 = vld [vmem:[%s1475_s1 + $0xa8] sm:$0xff]   ;;  %v1178_v48 = vld [vmem:[%s1475_s1 + $0x18] sm:$0xff]   ;;  %v235_v57 = vrot.slane %v226_v52, 5  ;;  %v240_v62 = vsel %vm1302_vm2, %v981_v55, %v239_v58  ;;  %v1191_v15 = vld [vmem:[%s1475_s1 + $0xd0] sm:$0xff]  }
  0x17   : > { %v329_v31 = vrot.slane %v323_v24, 5  ;;  %v333_v32 = vrot.slane %v324_v25, 5  ;;  %283 = vrot.lane.b32.xlu0 %v1071_v16, %s1230_s30  ;;  %1108 = vmatprep.subr.bf16.mxu1 %v1175_v45  ;;  %v1185_v63 = vld [vmem:[%s1475_s1 + $0xd8] sm:$0xff]   ;;  %v228_v3 = vcombine.high %v220_v0, %v220_v0  ;;  %v229_v4 = vcombine.high %v221_v1, %v221_v1  ;;  %v1189_v8 = vld [vmem:[%s1475_s1 + $0x48] sm:$0xff]   ;;  %v1192_v17 = vld [vmem:[%s1475_s1 + $0x90] sm:$0xff]  }
  0x18   : > { %v338_v33 = vsel %vm1302_vm2, %v992_v19, %v337_v27  ;;  %v342_v34 = vsel %vm1302_vm2, %v993_v23, %v341_v28  ;;  %1109 = vmatpush3.bf16.msra.mxu1 %v1176_v46  ;;  %v236_v61 = vsel %vm1302_vm2, %v980_v54, %v235_v57  ;;  %v982_v5 = vrot.slane %v220_v0, 9  ;;  %v1188_v6 = vld [vmem:[%s1475_s1 + $0x98] sm:$0xff]   ;;  %v1190_v12 = vld [vmem:[%s1475_s1 + $0x8] sm:$0xff]   ;;  %v1193_v18 = vld [vmem:[%s1475_s1 + $0x40] sm:$0xff]  }
  0x19   : > { %v344_v36 = vcombine.low %v338_v33, %v342_v34  ;;  %v330_v37 = vsel %vm1302_vm2, %v990_v26, %v329_v31  ;;  %v334_v38 = vsel %vm1302_vm2, %v991_v29, %v333_v32  ;;  %1089 = vmatpush3.bf16.msra.mxu0 %v1174_v43  ;;  %1110 = vmatprep.subr.bf16.mxu1 %v1179_v49  ;;  %v983_v7 = vrot.slane %v221_v1, 9  ;;  %v1194_v20 = vld [vmem:[%s1475_s1] sm:$0xff]   ;;  %v1195_v21 = vld [vmem:[%s1475_s1 + $0xc8] sm:$0xff]   ;;  %v1008_v43 = vld [vmem:[%s1282_s27 + $0x10] sm:$0x1e] }
  0x1a   : > { %v343_v40 = vcombine.low %v330_v37, %v334_v38  ;;  %1090 = vmatprep.subr.bf16.mxu0 %v1177_v47  ;;  %v249_v2 = vcombine.low %v236_v61, %v240_v62  ;;  %v243_v10 = vrot.slane %v228_v3, 5  ;;  %v247_v11 = vrot.slane %v229_v4, 5  ;;  %v1196_v23 = vld [vmem:[%s1475_s1 + $0x88] sm:$0xff]   ;;  %v1197_v24 = vld [vmem:[%s1282_s27] ss:$16 sps:$4 sm:$0xff]  }
  0x1b   : > { %v1075_v42 = vpack.c.bf16 %v344_v36, %v344_v36  ;;  %v1231_v25 = vmov 0.0   ;;  %v1198_v26 = vld [vmem:[%s1282_s27 + $0x20] ss:$16 sps:$4 sm:$0xff]   ;;  %v1064_v27 = vpack.c.bf16 %v1197_v24, %v1197_v24  ;;  %v414_v47 = vcombine.high %v1008_v43, %v1008_v43 }
  0x1c   : > { %v1074_v44 = vpack.c.bf16 %v343_v40, %v343_v40  ;;  %1111 = vmatpush3.bf16.msra.mxu1 %v1182_v56  ;;  %v1068_v9 = vpack.c.bf16 %v249_v2, %v249_v2  ;;  %v244_v13 = vsel %vm1302_vm2, %v982_v5, %v243_v10  ;;  %v248_v14 = vsel %vm1302_vm2, %v983_v7, %v247_v11  ;;  %v1199_v28 = vld [vmem:[%s1282_s27] ss:$16 sps:$4 sm:$0xff]  }
  0x1d   : > { %355 = vrot.lane.b32.xlu1 %v1075_v42, %s1230_s30  ;;  %1091 = vmatpush3.bf16.msra.mxu0 %v1178_v48  ;;  %v250_v16 = vcombine.low %v244_v13, %v248_v14  ;;  %v1065_v29 = vpack.c.bf16 %v1198_v26, %v1198_v26  ;;  %v1200_v30 = vld [vmem:[%s1282_s27 + $0x20] ss:$16 sps:$4 sm:$0xff]   ;;  %193 = vst.msk [vmem:[#allocation2] sm:$0xf] %vm192_vm3, %v1064_v27  ;;  %v1012_v49 = vrot.slane %v1008_v43, 9  ;;  %v420_v55 = vrot.slane %v414_v47, 5 }
  0x1e   : > { %353 = vrot.lane.b32.xlu0 %v1074_v44, %s1230_s30  ;;  %1092 = vmatprep.subr.bf16.mxu0 %v1183_v59  ;;  %261 = vst.msk [vmem:[#allocation2 + $0x4] sm:$0xf] %vm192_vm3, %v1068_v9  ;;  %v1066_v31 = vpack.c.bf16 %v1199_v28, %v1199_v28  ;;  %v1204_v32 = vld [vmem:[%s1475_s1 + $0xc0] sm:$0xff]   ;;  %v1067_v33 = vpack.c.bf16 %v1200_v30, %v1200_v30  ;;  %v1010_v45 = vld [vmem:[%s1282_s27 + $0x30] sm:$0x1e]  ;;  %v1215_v14 = vld [vmem:[%s1475_s1 + $0x108] sm:$0xff]  }
  0x1f   : > { %1112 = vmatprep.subr.bf16.mxu1 %v1185_v63  ;;  %v1069_v19 = vpack.c.bf16 %v250_v16, %v250_v16  ;;  %194 = vst.msk [vmem:[#allocation2 + $0x14] sm:$0xf] %vm192_vm3, %v1065_v29  ;;  %v1206_v34 = vld [vmem:[%s1475_s1 + $0x80] sm:$0xff]   ;;  %v416_v51 = vcombine.high %v1010_v45, %v1010_v45  ;;  %v1014_v53 = vrot.slane %v1010_v45, 9  ;;  %v421_v59 = vsel %vm1302_vm2, %v1012_v49, %v420_v55  ;;  %v1214_v11 = vld [vmem:[%s1475_s1 + $0x110] sm:$0xff]  }
  0x20   : > { %1113 = vmatpush3.bf16.msra.mxu1 %v1188_v6  ;;  %216 = vst.msk [vmem:[#allocation2] sm:$0xf] %vm215_vm4, %v1066_v31  ;;  %217 = vst.msk [vmem:[#allocation2 + $0x14] sm:$0xf] %vm215_vm4, %v1067_v33  ;;  %v1207_v35 = vld [vmem:[%s1282_s27 + $0x10] ss:$16 sps:$4 sm:$0xff]  }
  0x21   : > { %1093 = vmatpush3.bf16.msra.mxu0 %v1184_v60  ;;  %1114 = vmatprep.subr.bf16.mxu1 %v1191_v15  ;;  %262 = vst.msk [vmem:[#allocation2 + $0x18] sm:$0xf] %vm192_vm3, %v1069_v19  ;;  %v1208_v36 = vld [vmem:[%s1282_s27 + $0x30] ss:$16 sps:$4 sm:$0xff]   ;;  %v1076_v37 = vpack.c.bf16 %v1207_v35, %v1207_v35  ;;  %v428_v57 = vrot.slane %v416_v51, 5 }
  0x22   : > { %1094 = vmatprep.subr.bf16.mxu0 %v1189_v8  ;;  %v1209_v38 = vld [vmem:[%s1282_s27 + $0x10] ss:$16 sps:$4 sm:$0xff]   ;;  %v1077_v39 = vpack.c.bf16 %v1208_v36, %v1208_v36  ;;  %v1205_v8 = vld [vmem:[%s1475_s1 + $0x118] sm:$0xff]  }
  0x23   : > { %v1210_v40 = vld [vmem:[%s1282_s27 + $0x30] ss:$16 sps:$4 sm:$0xff]   ;;  %382 = vst.msk [vmem:[#allocation2 + $0xc] sm:$0xf] %vm192_vm3, %v1076_v37  ;;  %v1078_v41 = vpack.c.bf16 %v1209_v38, %v1209_v38  ;;  %v429_v61 = vsel %vm1302_vm2, %v1014_v53, %v428_v57 }
  0x24   : > { %1115 = vmatpush3.bf16.msra.mxu1 %v1192_v17  ;;  %383 = vst.msk [vmem:[#allocation2 + $0x20] sm:$0xf] %vm192_vm3, %v1077_v39  ;;  %v1079_v42 = vpack.c.bf16 %v1210_v40, %v1210_v40  ;;  %v1009_v44 = vld [vmem:[%s1282_s27 + $0x20] sm:$0x1e]  ;;  %v1018_v24 = vld [vmem:[%s1476_s2] ss:$0 sm:$0xff] }
  0x25   : > { %1095 = vmatpush3.bf16.msra.mxu0 %v1190_v12  ;;  %1116 = vmatprep.subr.bf16.mxu1 %v1195_v21  ;;  %404 = vst.msk [vmem:[#allocation2 + $0xc] sm:$0xf] %vm215_vm4, %v1078_v41  ;;  %v1011_v46 = vld [vmem:[%s1282_s27 + $0x40] sm:$0x1e]  ;;  %v415_v48 = vcombine.high %v1009_v44, %v1009_v44  ;;  %v1013_v50 = vrot.slane %v1009_v44, 9 }
  0x26   : > { %1096 = vmatprep.subr.bf16.mxu0 %v1193_v18  ;;  %405 = vst.msk [vmem:[#allocation2 + $0x20] sm:$0xf] %vm215_vm4, %v1079_v42  ;;  %v417_v52 = vcombine.high %v1011_v46, %v1011_v46  ;;  %v1015_v54 = vrot.slane %v1011_v46, 9  ;;  %v1216_v15 = vld [vmem:[%s1475_s1 + $0x100] sm:$0xff]  }
  0x27   : > { %v424_v56 = vrot.slane %v415_v48, 5  ;;  %v1201_v9 = vld [vmem:[#allocation2] ss:$20 sps:$4 sm:$0xff]  }
  0x28   : > { %1117 = vmatpush3.bf16.msra.mxu1 %v1196_v23  ;;  %v432_v58 = vrot.slane %v417_v52, 5 }
  0x29   : > { %1097 = vmatpush3.bf16.msra.mxu0 %v1194_v20  ;;  %1118 = vmatprep.subr.bf16.mxu1 %v1204_v32  ;;  %v425_v60 = vsel %vm1302_vm2, %v1013_v50, %v424_v56 }
  0x2a   : > { %1131 = vmatprep.subr.bf16.mxu0 %v1231_v25  ;;  %v433_v62 = vsel %vm1302_vm2, %v1015_v54, %v432_v58  ;;  %v434_v63 = vcombine.low %v421_v59, %v425_v60 }
  0x2b   : > { %v435_v0 = vcombine.low %v429_v61, %v433_v62 }
  0x2c   : > { %1119 = vmatpush3.bf16.msra.mxu1 %v1206_v34  ;;  %v1080_v1 = vpack.c.bf16 %v434_v63, %v434_v63 }
  0x2d   : > { %v1081_v2 = vpack.c.bf16 %v435_v0, %v435_v0  ;;  %v1213_v13 = vld [vmem:[#allocation2 + $0xc] ss:$20 sps:$4 sm:$0xff]  }
  0x2e   : > { %446 = vst.msk [vmem:[#allocation2 + $0x10] sm:$0xf] %vm192_vm3, %v1080_v1  ;;  %851 = vmatprep.mubr.bf16.mxu1 %v1213_v13 }
  0x2f   : > { %447 = vst.msk [vmem:[#allocation2 + $0x24] sm:$0xf] %vm192_vm3, %v1081_v2 }
  0x36   : > { %v1221_v16 = vld [vmem:[#allocation2 + $0x10] ss:$20 sps:$4 sm:$0xff]  }
  0x84   : > { %v308_v3 = vpop.permute.xlu1 %307 }
  0x85   : > { %313 = vst.msk [vmem:[#allocation2 + $0x8] sm:$0xf] %vm192_vm3, %v308_v3  ;;  %v282_v4 = vpop.permute.xlu0 %281 }
  0x86   : > { %287 = vst.msk [vmem:[#allocation2 + $0x4] sm:$0xf] %vm215_vm4, %v282_v4 }
  0x88   : > { %v310_v5 = vpop.permute.xlu1 %309 }
  0x89   : > { %314 = vst.msk [vmem:[#allocation2 + $0x1c] sm:$0xf] %vm192_vm3, %v310_v5  ;;  %v284_v6 = vpop.permute.xlu0 %283 }
  0x8a   : > { %288 = vst.msk [vmem:[#allocation2 + $0x18] sm:$0xf] %vm215_vm4, %v284_v6 }
  0x8f   : > { %v356_v22 = vpop.permute.xlu1 %355 }
  0x90   : > { %360 = vst.msk [vmem:[#allocation2 + $0x1c] sm:$0xf] %vm215_vm4, %v356_v22  ;;  %v354_v7 = vpop.permute.xlu0 %353 }
  0x91   : > { %359 = vst.msk [vmem:[#allocation2 + $0x8] sm:$0xf] %vm215_vm4, %v354_v7  ;;  %v1203_v10 = vld [vmem:[#allocation2 + $0x4] ss:$20 sps:$4 sm:$0xff]  }
  0x92   : > { %810 = vmatprep.mubr.bf16.mxu0 %v1203_v10 }
  0x93   : > { %811 = vmatmul.mubr.bf16.vlgmr.msra.gmra.mxu0 %v1201_v9 }
  0x94   : > { %1132 = vmatpush3.bf16.msra.mxu0 %v1205_v8  ;;  %1139 = vmatprep.mubr.msk.bf16.mxu0 %vm1232_vm5, %v1231_v25 }
  0x95   : > { %1133 = vmatprep.subr.bf16.mxu0 %v1231_v25 }
  0x98   : > { %v1211_v12 = vld [vmem:[#allocation2 + $0x8] ss:$20 sps:$4 sm:$0xff]   ;;  %1134 = vmatpush3.bf16.msra.mxu0 %v1214_v11 }
  0x99   : > { %852 = vmatmul.mubr.bf16.vlgmr.msra.gmra.mxu1 %v1211_v12  ;;  %1135 = vmatprep.subr.bf16.mxu0 %v1231_v25 }
  0x9c   : > { %1136 = vmatpush3.bf16.msra.mxu0 %v1215_v14 }
  0x9d   : > { %1137 = vmatprep.subr.bf16.mxu0 %v1231_v25 }
  0xa0   : > { %1138 = vmatpush3.bf16.msra.mxu0 %v1216_v15 }
  0xa3   : > { %1140 = vmatmul.mubr.msk.bf16.vlgmr.msra.gmra.mxu0 %vm774_vm6, %v1221_v16 }
 0x153   : > { %v1098_v17 = vpop.f32.mrf.mxu0 }
 0x155   : > { %v1099_v18 = vpop.f32.mrf.mxu0 }
 0x156   : > { %v1100_v23 = vadd.f32 %v1099_v18, %v1098_v17 }
 0x157   : > { %v1101_v19 = vpop.f32.mrf.mxu0 }
 0x158   : > { %v813_v25 = vadd.f32 %v1100_v23, %v1018_v24 }
 0x159   : > { %v1120_v20 = vpop.f32.mrf.mxu1  ;;  %v1102_v26 = vpop.f32.mrf.mxu0 }
 0x15a   : > { %v1103_v30 = vadd.f32 %v1102_v26, %v1101_v19 }
 0x15b   : > { %v1121_v21 = vpop.f32.mrf.mxu1 }
 0x15c   : > { %v1122_v28 = vadd.f32 %v1121_v21, %v1120_v20  ;;  %v816_v34 = vadd.f32 %v1103_v30, %v1018_v24 }
 0x15d   : > { %v1123_v27 = vpop.f32.mrf.mxu1 }
 0x15e   : > { %v854_v32 = vadd.f32 %v1122_v28, %v813_v25 }
 0x15f   : > { %v1124_v29 = vpop.f32.mrf.mxu1 }
 0x160   : > { %v1125_v31 = vadd.f32 %v1124_v29, %v1123_v27 }
 0x162   : > { %v857_v38 = vadd.f32 %v1125_v31, %v816_v34 }
 0x163   : > { %v894_v33 = vpop.f32.mrf.mxu0 }
 0x164   : > { %v895_v35 = vadd.f32 %v894_v33, %v854_v32 }
 0x165   : > { %v1141_v36 = vpop.f32.mrf.mxu0 }
 0x166   : > { %v901_v37 = vmax.f32 %v895_v35, 0.0 }
 0x167   : > { %v897_v39 = vpop.f32.mrf.mxu0 }
 0x168   : > { %v905_v40 = vcombine.high %v901_v37, %v901_v37  ;;  %909 = vst.msk [vmem:[%s170_s22] sm:$0xf] %vm192_vm3, %v901_v37  ;;  %v898_v41 = vadd.f32 %v897_v39, %v857_v38 }
 0x169   : > { %v1142_v42 = vpop.f32.mrf.mxu0 }
 0x16a   : > { %910 = vst.msk [vmem:[%s170_s22 + $0x4] sm:$0xf] %vm192_vm3, %v905_v40  ;;  %v902_v43 = vmax.f32 %v898_v41, 0.0 }
 0x16c   : > { %v906_v44 = vcombine.high %v902_v43, %v902_v43  ;;  %911 = vst.msk [vmem:[%s170_s22 + $0x8] sm:$0xf] %vm192_vm3, %v902_v43 }
 0x16e   : > { %912 = vst.msk [vmem:[%s170_s22 + $0xc] sm:$0xf] %vm192_vm3, %v906_v44 }
 0x16f PF: > { %s13_s12 = sadd.s32 1, %s1228_s12  }
 0x170   : > { %p10_p4 = scmp.ge.s32.totalorder %s13_s12, 4  }
 0x172   :  { %12 = sbr.rel (!%p10_p4) target bundleno = 1 (0x1), region = 63 }

// kernel: deep_ca_unet_forward.13
= control target key start
LH: loop header
LB: loop body
LE: loop exit
PB: predicated region body
PF: predicated region fallthrough
CT: control target
= control target key end

     0   :  { %s1639_s12 = smov 0   ;;  %s1930_s0 = inlined_call_operand.vmem [shape: f32[2,3,3,512], index: 0, kind: input, shape index: {}]   ;;  %s1931_s1 = inlined_call_operand.vmem [shape: bf16[1152,128], index: 1, kind: input, shape index: {}]   ;;  %s1932_s2 = inlined_call_operand.vmem [shape: f32[1,128], index: 2, kind: input, shape index: {}]   ;;  %s1933_s3 = inlined_call_operand.vmem [shape: f32[2,2,2,128], index: 3, kind: output, shape index: {}]  }
   0x1 LB: > { %s1295_s13 = sadd.s32 4294967295, %s1614_s12   ;;  %p1299_p0 = scmp.ge.s32.totalorder %s1614_s12, 1  ;;  %s1614_s12 = sphi %s1639_s12, %s13_s12  }
   0x2   : > { %p137_p1 = scmp.lt.s32.totalorder %s1614_s12, 3 }
   0x4   : > { %p138_p2 = pnand %p1299_p0, %p137_p1 }
   0x5   : > { %p161_p3 = scmp.lt.s32.totalorder (!%p138_p2), %s1295_s13, 1 }
   0x6   : > { %141 = sbr.rel (%p138_p2) target bundleno = 315 (0x13b), region = 32 }
   0xb   : > { %v1528_v0 = vld [vmem:[%s1931_s1 + $0x78] sm:$0xff]   ;;  %v1532_v4 = vld [vmem:[%s1931_s1 + $0x70] sm:$0xff]   ;;  %v1536_v8 = vld [vmem:[%s1931_s1 + $0x68] sm:$0xff]   ;;  %s1937_s13 = smov (!%p161_p3, %s1295_s13), 1  ;;  %vm222_vm0 = vcmask 1040384   ;;  %v180_v29 = vlaneseq  ;;  %vm223_vm1 = vcmask 1042434  }
   0xc   : > { %v1529_v1 = vld [vmem:[%s1931_s1 + $0x38] sm:$0xff]   ;;  %1399 = vmatprep.subr.bf16.mxu0 %v1528_v0  ;;  %v1533_v5 = vld [vmem:[%s1931_s1 + $0x30] sm:$0xff]   ;;  %v1537_v9 = vld [vmem:[%s1931_s1 + $0x28] sm:$0xff]   ;;  %s1516_s18 = smul.u32 48, %s1937_s13  ;;  %vm225_vm2 = vcmask 1044484   ;;  %vm227_vm5 = vcmask 1046534  }
   0xd   : > { %v1530_v2 = vld [vmem:[%s1931_s1 + $0xf8] sm:$0xff]   ;;  %1400 = vmatpush3.bf16.msra.mxu0 %v1529_v1  ;;  %v1534_v6 = vld [vmem:[%s1931_s1 + $0xf0] sm:$0xff]   ;;  %v1538_v10 = vld [vmem:[%s1931_s1 + $0xe8] sm:$0xff]   ;;  %v1616_v33 = vmov 1983009808   ;;  %v181_v35 = vshrl.u32 %v180_v29, 7 }
   0xe   : > { %v1531_v3 = vld [vmem:[%s1931_s1 + $0xb8] sm:$0xff]   ;;  %1421 = vmatprep.subr.bf16.mxu1 %v1530_v2  ;;  %1401 = vmatprep.subr.bf16.mxu0 %v1532_v4  ;;  %v1535_v7 = vld [vmem:[%s1931_s1 + $0xb0] sm:$0xff]   ;;  %v1539_v11 = vld [vmem:[%s1931_s1 + $0xa8] sm:$0xff]   ;;  %s1750_s29 = scalar_lea.vmem %s1930_s0, %s1516_s18  ;;  %v178_v34 = vunpack.c.l.s4 %v1616_v33  ;;  %vm1618_vm7 = vmmov 0   ;;  %s1398_s16 = sshll.u32 %s1937_s13, 2 }
   0xf   : > { %1422 = vmatpush3.bf16.msra.mxu1 %v1531_v3  ;;  %v1540_v12 = vld [vmem:[%s1931_s1 + $0x60] sm:$0xff]   ;;  %v1544_v16 = vld [vmem:[%s1931_s1 + $0x58] sm:$0xff]   ;;  %v1548_v20 = vld [vmem:[%s1931_s1 + $0x50] sm:$0xff]   ;;  %s170_s19 = scalar_lea.vmem %s1933_s3, %s1398_s16 }
  0x10   : > { %1423 = vmatprep.subr.bf16.mxu1 %v1534_v6  ;;  %v1541_v13 = vld [vmem:[%s1931_s1 + $0x20] sm:$0xff]   ;;  %v1545_v17 = vld [vmem:[%s1931_s1 + $0x18] sm:$0xff]   ;;  %v1549_v21 = vld [vmem:[%s1931_s1 + $0x10] sm:$0xff]   ;;  %v179_v37 = vunpack.c.0.s8 %v178_v34 }
  0x11   : > { %1402 = vmatpush3.bf16.msra.mxu0 %v1533_v5  ;;  %v1542_v14 = vld [vmem:[%s1931_s1 + $0xe0] sm:$0xff]   ;;  %v1546_v18 = vld [vmem:[%s1931_s1 + $0xd8] sm:$0xff]   ;;  %v1550_v22 = vld [vmem:[%s1931_s1 + $0xd0] sm:$0xff]  }
  0x12   : > { %1403 = vmatprep.subr.bf16.mxu0 %v1536_v8  ;;  %v1543_v15 = vld [vmem:[%s1931_s1 + $0xa0] sm:$0xff]   ;;  %v1547_v19 = vld [vmem:[%s1931_s1 + $0x98] sm:$0xff]   ;;  %v1551_v23 = vld [vmem:[%s1931_s1 + $0x90] sm:$0xff]   ;;  %v1759_v43 = vsub.s32 %v179_v37, %v181_v35 }
  0x13   : > { %1424 = vmatpush3.bf16.msra.mxu1 %v1535_v7  ;;  %v1552_v24 = vld [vmem:[%s1931_s1 + $0x48] sm:$0xff]   ;;  %v1556_v28 = vld [vmem:[%s1931_s1 + $0x40] sm:$0xff]   ;;  %vm224_vm3 = vmor %vm222_vm0, %vm223_vm1 }
  0x14   : > { %1425 = vmatprep.subr.bf16.mxu1 %v1538_v10  ;;  %v1553_v25 = vld [vmem:[%s1931_s1 + $0x8] sm:$0xff]   ;;  %v1557_v30 = vld [vmem:[%s1931_s1] sm:$0xff]   ;;  %vm226_vm4 = vmor %vm224_vm3, %vm225_vm2 }
  0x15   : > { %1404 = vmatpush3.bf16.msra.mxu0 %v1537_v9  ;;  %v1554_v26 = vld [vmem:[%s1931_s1 + $0xc8] sm:$0xff]   ;;  %v1558_v31 = vld [vmem:[%s1931_s1 + $0xc0] sm:$0xff]   ;;  %v1304_v39 = vld.sshfl [vmem:[%s1750_s29 + $0x10] sm:$0x12 pattern:$0x76325410] }
  0x16   : > { %1405 = vmatprep.subr.bf16.mxu0 %v1540_v12  ;;  %v1555_v27 = vld [vmem:[%s1931_s1 + $0x88] sm:$0xff]   ;;  %v1559_v32 = vld [vmem:[%s1750_s29] ss:$16 sps:$4 sm:$0x33]   ;;  %v221_v44 = vcombine.high %v1304_v39, %v1304_v39  ;;  %vm1761_vm6 = vmor %vm226_vm4, %vm227_vm5  ;;  %v1306_v46 = vrot.slane %v1304_v39, 9 }
  0x17   : > { %1426 = vmatpush3.bf16.msra.mxu1 %v1539_v11  ;;  %v1560_v36 = vld [vmem:[%s1750_s29 + $0x4] ss:$16 sps:$4 sm:$0x33]   ;;  %v1561_v47 = vld [vmem:[%s1750_s29 + $0x8] ss:$16 sps:$4 sm:$0x33]   ;;  %v183_v50 = vrot.slane %v1559_v32, %v1759_v43 }
  0x18   : > { %1427 = vmatprep.subr.bf16.mxu1 %v1542_v14  ;;  %v1303_v38 = vld.sshfl [vmem:[%s1750_s29] sm:$0x12 pattern:$0x76325410]  ;;  %v1563_v49 = vld [vmem:[%s1931_s1 + $0x178] sm:$0xff]   ;;  %v198_v51 = vrot.slane %v1560_v36, %v1759_v43  ;;  %v235_v52 = vrot.slane %v221_v44, 7  ;;  %v259_v53 = vrot.slane %v1561_v47, %v1759_v43 }
  0x19   : > { %1406 = vmatpush3.bf16.msra.mxu0 %v1541_v13  ;;  %v213_v40 = vcombine.high %v1303_v38, %v1303_v38  ;;  %v1305_v41 = vrot.slane %v1303_v38, 9  ;;  %v1562_v42 = vld [vmem:[%s1931_s1 + $0x80] sm:$0xff]   ;;  %v185_v55 = vpack.c.bf16 %v183_v50, %v183_v50  ;;  %v1566_v59 = vld [vmem:[%s1931_s1 + $0x1f8] sm:$0xff]   ;;  %v1568_v6 = vld [vmem:[%s1931_s1 + $0x170] sm:$0xff]  }
  0x1a   : > { %1407 = vmatprep.subr.bf16.mxu0 %v1544_v16  ;;  %v200_v56 = vpack.c.bf16 %v198_v51, %v198_v51  ;;  %v1776_v57 = vsel %vm1761_vm6, %v1306_v46, %v235_v52  ;;  %v261_v58 = vpack.c.bf16 %v259_v53, %v259_v53  ;;  %v1565_v2 = vld [vmem:[%s1931_s1 + $0x138] sm:$0xff]   ;;  %v1569_v8 = vld [vmem:[%s1931_s1 + $0x130] sm:$0xff]   ;;  %v1572_v11 = vld [vmem:[%s1931_s1 + $0x168] sm:$0xff]  }
  0x1b   : > { %1428 = vmatpush3.bf16.msra.mxu1 %v1543_v15  ;;  %v231_v48 = vrot.slane %v213_v40, 7  ;;  %186 = vst [vmem:[#allocation2] sm:$0x3] %v185_v55  ;;  %v1567_v5 = vld [vmem:[%s1931_s1 + $0x1b8] sm:$0xff]   ;;  %v1570_v9 = vld [vmem:[%s1931_s1 + $0x1f0] sm:$0xff]   ;;  %v1573_v12 = vld [vmem:[%s1931_s1 + $0x128] sm:$0xff]  }
  0x1c   : > { %1429 = vmatprep.subr.bf16.mxu1 %v1546_v18  ;;  %201 = vst [vmem:[#allocation2 + $0x2] sm:$0x3] %v200_v56  ;;  %262 = vst [vmem:[#allocation2 + $0x6] sm:$0x3] %v261_v58  ;;  %v1571_v10 = vld [vmem:[%s1931_s1 + $0x1b0] sm:$0xff]   ;;  %v1574_v13 = vld [vmem:[%s1931_s1 + $0x1e8] sm:$0xff]  }
  0x1d   : > { %1408 = vmatpush3.bf16.msra.mxu0 %v1545_v17  ;;  %v232_v54 = vsel %vm1761_vm6, %v1305_v41, %v231_v48  ;;  %v1575_v14 = vld [vmem:[%s1931_s1 + $0x1a8] sm:$0xff]   ;;  %v1576_v15 = vld [vmem:[%s1931_s1 + $0x160] sm:$0xff]   ;;  %v1580_v18 = vld [vmem:[%s1931_s1 + $0x158] sm:$0xff]  }
  0x1e   : > { %1409 = vmatprep.subr.bf16.mxu0 %v1548_v20  ;;  %v237_v60 = vcombine.low %v232_v54, %v1776_v57  ;;  %v1577_v16 = vld [vmem:[%s1931_s1 + $0x120] sm:$0xff]   ;;  %v1582_v20 = vld [vmem:[%s1931_s1 + $0x1d8] sm:$0xff]   ;;  %v1586_v36 = vld [vmem:[%s1931_s1 + $0x1d0] sm:$0xff]  }
  0x1f   : > { %1430 = vmatpush3.bf16.msra.mxu1 %v1547_v19  ;;  %v1578_v17 = vld [vmem:[%s1931_s1 + $0x1e0] sm:$0xff]   ;;  %v1583_v29 = vld [vmem:[%s1931_s1 + $0x198] sm:$0xff]   ;;  %v1585_v41 = vld [vmem:[%s1931_s1 + $0x110] sm:$0xff]  }
  0x20   : > { %1431 = vmatprep.subr.bf16.mxu1 %v1550_v22  ;;  %v244_v61 = vrot.slane %v237_v60, %v1759_v43  ;;  %v1579_v19 = vld [vmem:[%s1931_s1 + $0x1a0] sm:$0xff]   ;;  %v1581_v22 = vld [vmem:[%s1931_s1 + $0x118] sm:$0xff]   ;;  %v1588_v46 = vld [vmem:[%s1931_s1 + $0x148] sm:$0xff]  }
  0x21   : > { %1410 = vmatpush3.bf16.msra.mxu0 %v1549_v21  ;;  %v1595_v21 = vld [vmem:[%s1750_s29 + $0xc] ss:$16 sps:$4 sm:$0x33]   ;;  %v1596_v32 = vld [vmem:[%s1750_s29 + $0x10] ss:$16 sps:$4 sm:$0x33]  }
  0x22   : > { %1411 = vmatprep.subr.bf16.mxu0 %v1552_v24  ;;  %v246_v62 = vpack.c.bf16 %v244_v61, %v244_v61  ;;  %v1584_v24 = vld [vmem:[%s1931_s1 + $0x150] sm:$0xff]   ;;  %v329_v38 = vrot.slane %v1596_v32, %v1759_v43  ;;  %v1590_v50 = vld [vmem:[%s1931_s1 + $0x1c8] sm:$0xff]   ;;  %v1592_v53 = vld [vmem:[%s1931_s1 + $0x140] sm:$0xff]  }
  0x23   : > { %1432 = vmatpush3.bf16.msra.mxu1 %v1551_v23  ;;  %v1307_v23 = vld.sshfl [vmem:[%s1750_s29 + $0x8] sm:$0x12 pattern:$0x76325410]  ;;  %v1594_v58 = vld [vmem:[%s1931_s1 + $0x1c0] sm:$0xff]   ;;  %v1600_v45 = vld [vmem:[%s1931_s1 + $0x238] sm:$0xff]  }
  0x24   : > { %1433 = vmatprep.subr.bf16.mxu1 %v1554_v26  ;;  %247 = vst [vmem:[#allocation2 + $0x4] sm:$0x3] %v246_v62  ;;  %v1308_v26 = vld.sshfl [vmem:[%s1750_s29 + $0x18] sm:$0x12 pattern:$0x76325410]  ;;  %v331_v44 = vpack.c.bf16 %v329_v38, %v329_v38 }
  0x25   : > { %1412 = vmatpush3.bf16.msra.mxu0 %v1553_v25  ;;  %v274_v25 = vrot.slane %v1595_v21, %v1759_v43  ;;  %v1597_v35 = vld [vmem:[%s1750_s29 + $0x14] ss:$16 sps:$4 sm:$0x33]   ;;  %v1589_v52 = vld [vmem:[%s1931_s1 + $0x108] sm:$0xff]  }
  0x26   : > { %1413 = vmatprep.subr.bf16.mxu0 %v1556_v28  ;;  %v1309_v28 = vrot.slane %v1307_v23, 9  ;;  %v344_v40 = vrot.slane %v1597_v35, %v1759_v43  ;;  %332 = vst [vmem:[#allocation2 + $0xc] sm:$0x3] %v331_v44  ;;  %v1591_v55 = vld [vmem:[%s1931_s1 + $0x188] sm:$0xff]   ;;  %v1593_v61 = vld [vmem:[%s1931_s1 + $0x100] sm:$0xff]  }
  0x27   : > { %1434 = vmatpush3.bf16.msra.mxu1 %v1555_v27  ;;  %v289_v27 = vcombine.high %v1307_v23, %v1307_v23  ;;  %v276_v33 = vpack.c.bf16 %v274_v25, %v274_v25  ;;  %v1318_v56 = vld.sshfl [vmem:[%s1750_s29 + $0x20] sm:$0x12 pattern:$0x76325410]  ;;  %v1321_v35 = vld [vmem:[%s1932_s2] ss:$0 sm:$0xff] }
  0x28   : > { %1435 = vmatprep.subr.bf16.mxu1 %v1558_v31  ;;  %v1310_v31 = vrot.slane %v1308_v26, 9  ;;  %v346_v48 = vpack.c.bf16 %v344_v40, %v344_v40  ;;  %v1320_v60 = vrot.slane %v1318_v56, 9 }
  0x29   : > { %1414 = vmatpush3.bf16.msra.mxu0 %v1557_v30  ;;  %v297_v30 = vcombine.high %v1308_v26, %v1308_v26  ;;  %v300_v34 = vrot.slane %v289_v27, 7  ;;  %277 = vst [vmem:[#allocation2 + $0x8] sm:$0x3] %v276_v33 }
  0x2a   : > { %1443 = vmatprep.subr.bf16.mxu0 %v1563_v49  ;;  %v1587_v49 = vld [vmem:[%s1931_s1 + $0x190] sm:$0xff]   ;;  %347 = vst [vmem:[#allocation2 + $0xe] sm:$0x3] %v346_v48 }
  0x2b   : > { %1436 = vmatpush3.bf16.msra.mxu1 %v1562_v42  ;;  %v387_v63 = vld [vmem:[#allocation2] sm:$0xff]  ;;  %v304_v37 = vrot.slane %v297_v30, 7  ;;  %v301_v39 = vsel %vm1761_vm6, %v1309_v28, %v300_v34 }
  0x2c   : > { %1465 = vmatprep.subr.bf16.mxu1 %v1566_v59  ;;  %v551_v0 = vrot.slane %v387_v63, %v1759_v43  ;;  %v544_v1 = vcombine.high %v387_v63, %v387_v63  ;;  %v367_v59 = vcombine.high %v1318_v56, %v1318_v56  ;;  %v1598_v63 = vld [vmem:[%s1931_s1 + $0x180] sm:$0xff]  }
  0x2d   : > { %v305_v42 = vsel %vm1761_vm6, %v1310_v31, %v304_v37 }
  0x2e   : > { %v559_v3 = vcombine.high %v551_v0, %v551_v0  ;;  %v558_v4 = vrot.slane %v544_v1, %v1759_v43  ;;  %v306_v47 = vcombine.low %v301_v39, %v305_v42  ;;  %v374_v62 = vrot.slane %v367_v59, 7 }
  0x30   : > { %1058 = vmatprep.mubr.bf16.mxu0 %v559_v3  ;;  %v560_v7 = vcombine.high %v558_v4, %v558_v4  ;;  %v313_v51 = vrot.slane %v306_v47, %v1759_v43 }
  0x31   : > { %1059 = vmatmul.mubr.bf16.vlgmr.msra.gmra.mxu0 %v551_v0  ;;  %v375_v0 = vsel %vm1761_vm6, %v1320_v60, %v374_v62 }
  0x32   : > { %1098 = vmatprep.mubr.bf16.mxu1 %v560_v7  ;;  %1444 = vmatpush3.bf16.msra.mxu0 %v1565_v2  ;;  %v315_v54 = vpack.c.bf16 %v313_v51, %v313_v51  ;;  %v376_v1 = vcombine.low %v1776_v57, %v375_v0  ;;  %v1617_v2 = vmov 0.0  }
  0x33   : > { %1099 = vmatmul.mubr.bf16.vlgmr.msra.gmra.mxu1 %v558_v4  ;;  %1445 = vmatprep.subr.bf16.mxu0 %v1568_v6 }
  0x34   : > { %1466 = vmatpush3.bf16.msra.mxu1 %v1567_v5  ;;  %316 = vst [vmem:[#allocation2 + $0xa] sm:$0x3] %v315_v54  ;;  %v383_v4 = vrot.slane %v376_v1, %v1759_v43 }
  0x35   : > { %1467 = vmatprep.subr.bf16.mxu1 %v1570_v9 }
  0x36   : > { %1446 = vmatpush3.bf16.msra.mxu0 %v1569_v8  ;;  %v385_v7 = vpack.c.bf16 %v383_v4, %v383_v4 }
  0x37   : > { %1447 = vmatprep.subr.bf16.mxu0 %v1572_v11  ;;  %v1602_v11 = vld [vmem:[%s1931_s1 + $0x228] sm:$0xff]  }
  0x38   : > { %1468 = vmatpush3.bf16.msra.mxu1 %v1571_v10  ;;  %386 = vst [vmem:[#allocation2 + $0x10] sm:$0x3] %v385_v7  ;;  %v1601_v10 = vld [vmem:[%s1931_s1 + $0x230] sm:$0xff]  }
  0x39   : > { %1469 = vmatprep.subr.bf16.mxu1 %v1574_v13  ;;  %v1604_v13 = vld [vmem:[%s1931_s1 + $0x218] sm:$0xff]  }
  0x3a   : > { %1448 = vmatpush3.bf16.msra.mxu0 %v1573_v12  ;;  %v1603_v12 = vld [vmem:[%s1931_s1 + $0x220] sm:$0xff]  }
  0x3b   : > { %1449 = vmatprep.subr.bf16.mxu0 %v1576_v15  ;;  %v388_v3 = vld [vmem:[#allocation2 + $0x8] sm:$0xff] }
  0x3c   : > { %1470 = vmatpush3.bf16.msra.mxu1 %v1575_v14  ;;  %v568_v5 = vrot.slane %v388_v3, %v1759_v43  ;;  %v561_v6 = vcombine.high %v388_v3, %v388_v3  ;;  %v1605_v14 = vld [vmem:[%s1931_s1 + $0x210] sm:$0xff]   ;;  %v1606_v15 = vld [vmem:[%s1931_s1 + $0x208] sm:$0xff]  }
  0x3d   : > { %1471 = vmatprep.subr.bf16.mxu1 %v1578_v17 }
  0x3e   : > { %1450 = vmatpush3.bf16.msra.mxu0 %v1577_v16  ;;  %v576_v8 = vcombine.high %v568_v5, %v568_v5  ;;  %v575_v9 = vrot.slane %v561_v6, %v1759_v43  ;;  %v1607_v16 = vld [vmem:[%s1931_s1 + $0x200] sm:$0xff]  }
  0x3f   : > { %1451 = vmatprep.subr.bf16.mxu0 %v1580_v18  ;;  %v1322_v17 = vld.sshfl [vmem:[#allocation2 + $0x10] sm:$0x3 pattern:$0x76325410] }
  0x40   : > { %1472 = vmatpush3.bf16.msra.mxu1 %v1579_v19  ;;  %1138 = vmatprep.mubr.bf16.mxu0 %v576_v8  ;;  %v577_v57 = vcombine.high %v575_v9, %v575_v9 }
  0x41   : > { %1473 = vmatprep.subr.bf16.mxu1 %v1582_v20 }
  0x42   : > { %1452 = vmatpush3.bf16.msra.mxu0 %v1581_v22  ;;  %1178 = vmatprep.mubr.bf16.mxu1 %v577_v57 }
  0x43   : > { %1453 = vmatprep.subr.bf16.mxu0 %v1584_v24 }
  0x44   : > { %1474 = vmatpush3.bf16.msra.mxu1 %v1583_v29 }
  0x45   : > { %1475 = vmatprep.subr.bf16.mxu1 %v1586_v36 }
  0x46   : > { %1454 = vmatpush3.bf16.msra.mxu0 %v1585_v41 }
  0x47   : > { %1455 = vmatprep.subr.bf16.mxu0 %v1588_v46 }
  0x48   : > { %1476 = vmatpush3.bf16.msra.mxu1 %v1587_v49 }
  0x49   : > { %1477 = vmatprep.subr.bf16.mxu1 %v1590_v50 }
  0x4a   : > { %1456 = vmatpush3.bf16.msra.mxu0 %v1589_v52 }
  0x4b   : > { %1457 = vmatprep.subr.bf16.mxu0 %v1592_v53 }
  0x4c   : > { %1478 = vmatpush3.bf16.msra.mxu1 %v1591_v55 }
  0x4d   : > { %1479 = vmatprep.subr.bf16.mxu1 %v1594_v58 }
  0x4e   : > { %1458 = vmatpush3.bf16.msra.mxu0 %v1593_v61 }
  0x4f   : > { %1496 = vmatprep.subr.bf16.mxu0 %v1617_v2 }
  0x50   : > { %1480 = vmatpush3.bf16.msra.mxu1 %v1598_v63 }
  0x51   : > { %1139 = vmatmul.mubr.bf16.vlgmr.msra.gmra.mxu0 %v568_v5 }
  0x52   : > { %1497 = vmatpush3.bf16.msra.mxu0 %v1600_v45  ;;  %1512 = vmatprep.mubr.msk.bf16.mxu0 %vm1618_vm7, %v1617_v2 }
  0x53   : > { %1179 = vmatmul.mubr.bf16.vlgmr.msra.gmra.mxu1 %v575_v9  ;;  %1498 = vmatprep.subr.bf16.mxu0 %v1617_v2 }
  0x56   : > { %1499 = vmatpush3.bf16.msra.mxu0 %v1601_v10 }
  0x57   : > { %1500 = vmatprep.subr.bf16.mxu0 %v1617_v2 }
  0x5a   : > { %1501 = vmatpush3.bf16.msra.mxu0 %v1602_v11 }
  0x5b   : > { %1502 = vmatprep.subr.bf16.mxu0 %v1617_v2 }
  0x5e   : > { %1503 = vmatpush3.bf16.msra.mxu0 %v1603_v12 }
  0x5f   : > { %1504 = vmatprep.subr.bf16.mxu0 %v1617_v2 }
  0x62   : > { %1505 = vmatpush3.bf16.msra.mxu0 %v1604_v13 }
  0x63   : > { %1506 = vmatprep.subr.bf16.mxu0 %v1617_v2 }
  0x66   : > { %1507 = vmatpush3.bf16.msra.mxu0 %v1605_v14 }
  0x67   : > { %1508 = vmatprep.subr.bf16.mxu0 %v1617_v2 }
  0x6a   : > { %1509 = vmatpush3.bf16.msra.mxu0 %v1606_v15 }
  0x6b   : > { %1510 = vmatprep.subr.bf16.mxu0 %v1617_v2 }
  0x6e   : > { %1511 = vmatpush3.bf16.msra.mxu0 %v1607_v16 }
  0x71   : > { %1513 = vmatmul.mubr.bf16.vlgmr.msra.gmra.mxu0 %v1322_v17 }
  0xf1   : > { %v1415_v18 = vpop.f32.mrf.mxu0 }
  0xf3   : > { %v1416_v19 = vpop.f32.mrf.mxu0  ;;  %v1437_v20 = vpop.f32.mrf.mxu1 }
  0xf4   : > { %v1417_v34 = vadd.f32 %v1416_v19, %v1415_v18 }
  0xf5   : > { %v1418_v21 = vpop.f32.mrf.mxu0  ;;  %v1438_v22 = vpop.f32.mrf.mxu1 }
  0xf6   : > { %v1061_v36 = vadd.f32 %v1417_v34, %v1321_v35  ;;  %v1439_v37 = vadd.f32 %v1438_v22, %v1437_v20 }
  0xf7   : > { %v1419_v23 = vpop.f32.mrf.mxu0  ;;  %v1440_v24 = vpop.f32.mrf.mxu1 }
  0xf8   : > { %v1101_v39 = vadd.f32 %v1439_v37, %v1061_v36 }
  0xf9   : > { %v1441_v25 = vpop.f32.mrf.mxu1 }
 0x111   : > { %v1459_v26 = vpop.f32.mrf.mxu0 }
 0x113   : > { %v1460_v27 = vpop.f32.mrf.mxu0  ;;  %v1481_v28 = vpop.f32.mrf.mxu1 }
 0x114   : > { %v1461_v38 = vadd.f32 %v1460_v27, %v1459_v26 }
 0x115   : > { %v1462_v29 = vpop.f32.mrf.mxu0  ;;  %v1482_v30 = vpop.f32.mrf.mxu1 }
 0x116   : > { %v1141_v40 = vadd.f32 %v1461_v38, %v1101_v39  ;;  %v1483_v41 = vadd.f32 %v1482_v30, %v1481_v28 }
 0x117   : > { %v1463_v31 = vpop.f32.mrf.mxu0  ;;  %v1484_v32 = vpop.f32.mrf.mxu1 }
 0x118   : > { %v1181_v42 = vadd.f32 %v1483_v41, %v1141_v40 }
 0x119   : > { %v1485_v33 = vpop.f32.mrf.mxu1 }
 0x131   : > { %v1220_v44 = vpop.f32.mrf.mxu0 }
 0x132   : > { %v1221_v46 = vadd.f32 %v1220_v44, %v1181_v42 }
 0x133   : > { %v1514_v47 = vpop.f32.mrf.mxu0 }
 0x134   : > { %v1226_v48 = vmax.f32 %v1221_v46, 0.0 }
 0x135   : > { %v1223_v49 = vpop.f32.mrf.mxu0 }
 0x136   : > { %v1234_v50 = vrot.slane %v1226_v48, %v1759_v43  ;;  %1395 = vst.sshfl [vmem:[%s170_s19] sm:$0x3 pattern:$0x76325410] %v1226_v48 }
 0x137   : > { %v1515_v51 = vpop.f32.mrf.mxu0 }
 0x138   : > { %v1235_v52 = vcombine.high %v1234_v50, %v1234_v50 }
 0x13a   : > { %1239 = vst [vmem:[%s170_s19 + $0x2] sm:$0x3] %v1235_v52 }
 0x13b PF: > { %s13_s12 = sadd.s32 1, %s1614_s12  }
 0x13c   : > { %p10_p4 = scmp.ge.s32.totalorder %s13_s12, 4  }
 0x13e   :  { %12 = sbr.rel (!%p10_p4) target bundleno = 1 (0x1), region = 63 }

// kernel: deep_ca_unet_forward.14
= control target key start
LH: loop header
LB: loop body
LE: loop exit
PB: predicated region body
PF: predicated region fallthrough
CT: control target
= control target key end

     0   :  { %s1965_s12 = smov 0   ;;  %s2448_s0 = inlined_call_operand.vmem [shape: f32[2,4,4,128], index: 0, kind: input, shape index: {}]   ;;  %s2449_s1 = inlined_call_operand.vmem [shape: bf16[1152,256], index: 1, kind: input, shape index: {}]   ;;  %s2450_s2 = inlined_call_operand.vmem [shape: f32[1,256], index: 2, kind: input, shape index: {}]   ;;  %s2451_s3 = inlined_call_operand.vmem [shape: f32[2,2,2,256], index: 3, kind: output, shape index: {}]  }
   0x1 LB: > { %s1518_s13 = sadd.s32 4294967295, %s1941_s12   ;;  %p1522_p0 = scmp.ge.s32.totalorder %s1941_s12, 1  ;;  %s1941_s12 = sphi %s1965_s12, %s13_s12  }
   0x2   : > { %p137_p1 = scmp.lt.s32.totalorder %s1941_s12, 3 }
   0x4   : > { %p138_p2 = pnand %p1522_p0, %p137_p1 }
   0x5   : > { %p161_p3 = scmp.lt.s32.totalorder (!%p138_p2), %s1518_s13, 1 }
   0x6   : > { %141 = sbr.rel (%p138_p2) target bundleno = 378 (0x17a), region = 32 }
   0xb   : > { %v1699_v0 = vld [vmem:[%s2449_s1 + $0x74] ss:$8 sps:$4 sm:$0xff]   ;;  %v1701_v1 = vld [vmem:[%s2449_s1 + $0x70] ss:$8 sps:$4 sm:$0xff]   ;;  %v1705_v4 = vld [vmem:[%s2449_s1 + $0x64] ss:$8 sps:$4 sm:$0xff]   ;;  %v180_v39 = vlaneseq }
   0xc   : > { %1241 = vmatprep.subr.bf16.mxu0 %v1699_v0  ;;  %v1702_v2 = vld [vmem:[%s2449_s1 + $0x174] ss:$8 sps:$4 sm:$0xff]   ;;  %v1704_v3 = vld [vmem:[%s2449_s1 + $0x170] ss:$8 sps:$4 sm:$0xff]   ;;  %v1707_v5 = vld [vmem:[%s2449_s1 + $0x60] ss:$8 sps:$4 sm:$0xff]  }
   0xd   : > { %1242 = vmatpush1.bf16.msra.mxu0 %v1701_v1  ;;  %1282 = vmatprep.subr.bf16.mxu1 %v1702_v2  ;;  %v1708_v6 = vld [vmem:[%s2449_s1 + $0x164] ss:$8 sps:$4 sm:$0xff]   ;;  %v1710_v7 = vld [vmem:[%s2449_s1 + $0x160] ss:$8 sps:$4 sm:$0xff]   ;;  %v1711_v8 = vld [vmem:[%s2449_s1 + $0x54] ss:$8 sps:$4 sm:$0xff]  }
   0xe   : > { %1283 = vmatpush1.bf16.msra.mxu1 %v1704_v3  ;;  %1243 = vmatprep.subr.bf16.mxu0 %v1705_v4  ;;  %v1713_v9 = vld [vmem:[%s2449_s1 + $0x50] ss:$8 sps:$4 sm:$0xff]   ;;  %v1714_v10 = vld [vmem:[%s2449_s1 + $0x154] ss:$8 sps:$4 sm:$0xff]   ;;  %v1717_v11 = vld [vmem:[%s2449_s1 + $0x44] ss:$8 sps:$4 sm:$0xff]  }
   0xf   : > { %1284 = vmatprep.subr.bf16.mxu1 %v1708_v6  ;;  %v1716_v12 = vld [vmem:[%s2449_s1 + $0x150] ss:$8 sps:$4 sm:$0xff]   ;;  %v1720_v13 = vld [vmem:[%s2449_s1 + $0x144] ss:$8 sps:$4 sm:$0xff]   ;;  %v1719_v14 = vld [vmem:[%s2449_s1 + $0x40] ss:$8 sps:$4 sm:$0xff]  }
  0x10   : > { %v1723_v15 = vld [vmem:[%s2449_s1 + $0x34] ss:$8 sps:$4 sm:$0xff]   ;;  %v1722_v16 = vld [vmem:[%s2449_s1 + $0x140] ss:$8 sps:$4 sm:$0xff]   ;;  %v1725_v18 = vld [vmem:[%s2449_s1 + $0x30] ss:$8 sps:$4 sm:$0xff]  }
  0x11   : > { %1244 = vmatpush1.bf16.msra.mxu0 %v1707_v5  ;;  %v1726_v17 = vld [vmem:[%s2449_s1 + $0x134] ss:$8 sps:$4 sm:$0xff]   ;;  %v1729_v19 = vld [vmem:[%s2449_s1 + $0x24] ss:$8 sps:$4 sm:$0xff]   ;;  %v1728_v20 = vld [vmem:[%s2449_s1 + $0x130] ss:$8 sps:$4 sm:$0xff]  }
  0x12   : > { %1245 = vmatprep.subr.bf16.mxu0 %v1711_v8  ;;  %1285 = vmatpush1.bf16.msra.mxu1 %v1710_v7  ;;  %v1732_v21 = vld [vmem:[%s2449_s1 + $0x124] ss:$8 sps:$4 sm:$0xff]   ;;  %v1731_v22 = vld [vmem:[%s2449_s1 + $0x20] ss:$8 sps:$4 sm:$0xff]   ;;  %v1735_v23 = vld [vmem:[%s2449_s1 + $0x14] ss:$8 sps:$4 sm:$0xff]  }
  0x13   : > { %1286 = vmatprep.subr.bf16.mxu1 %v1714_v10  ;;  %v1734_v24 = vld [vmem:[%s2449_s1 + $0x120] ss:$8 sps:$4 sm:$0xff]   ;;  %v1738_v25 = vld [vmem:[%s2449_s1 + $0x114] ss:$8 sps:$4 sm:$0xff]   ;;  %v1737_v26 = vld [vmem:[%s2449_s1 + $0x10] ss:$8 sps:$4 sm:$0xff]  }
  0x14   : > { %v1741_v27 = vld [vmem:[%s2449_s1 + $0x4] ss:$8 sps:$4 sm:$0xff]   ;;  %v1740_v28 = vld [vmem:[%s2449_s1 + $0x110] ss:$8 sps:$4 sm:$0xff]   ;;  %v1743_v30 = vld [vmem:[%s2449_s1] ss:$8 sps:$4 sm:$0xff]  }
  0x15   : > { %1246 = vmatpush1.bf16.msra.mxu0 %v1713_v9  ;;  %v1744_v29 = vld [vmem:[%s2449_s1 + $0x104] ss:$8 sps:$4 sm:$0xff]   ;;  %v1747_v31 = vld [vmem:[%s2449_s1 + $0xf4] ss:$8 sps:$4 sm:$0xff]   ;;  %v1746_v32 = vld [vmem:[%s2449_s1 + $0x100] ss:$8 sps:$4 sm:$0xff]  }
  0x16   : > { %1247 = vmatprep.subr.bf16.mxu0 %v1717_v11  ;;  %1287 = vmatpush1.bf16.msra.mxu1 %v1716_v12  ;;  %v1750_v33 = vld [vmem:[%s2449_s1 + $0x1f4] ss:$8 sps:$4 sm:$0xff]   ;;  %v1749_v34 = vld [vmem:[%s2449_s1 + $0xf0] ss:$8 sps:$4 sm:$0xff]   ;;  %v1753_v35 = vld [vmem:[%s2449_s1 + $0xe4] ss:$8 sps:$4 sm:$0xff]  }
  0x17   : > { %1288 = vmatprep.subr.bf16.mxu1 %v1720_v13  ;;  %v1752_v36 = vld [vmem:[%s2449_s1 + $0x1f0] ss:$8 sps:$4 sm:$0xff]   ;;  %s2453_s13 = smov (!%p161_p3, %s1518_s13), 1  ;;  %v1943_v37 = vmov 1983009808   ;;  %v2103_v45 = vshrl.u32 %v180_v39, 7 }
  0x18   : > { %v178_v38 = vunpack.c.l.s4 %v1943_v37  ;;  %v1756_v40 = vld [vmem:[%s2449_s1 + $0x1e4] ss:$8 sps:$4 sm:$0xff]   ;;  %v1755_v41 = vld [vmem:[%s2449_s1 + $0xe0] ss:$8 sps:$4 sm:$0xff]   ;;  %v1759_v42 = vld [vmem:[%s2449_s1 + $0xd4] ss:$8 sps:$4 sm:$0xff]  }
  0x19   : > { %1248 = vmatpush1.bf16.msra.mxu0 %v1719_v14  ;;  %v1758_v43 = vld [vmem:[%s2449_s1 + $0x1e0] ss:$8 sps:$4 sm:$0xff]   ;;  %s1687_s21 = sshll.u32 %s2453_s13, 4  ;;  %v1762_v46 = vld [vmem:[%s2449_s1 + $0x1d4] ss:$8 sps:$4 sm:$0xff]   ;;  %s1688_s11 = sshll.u32 %s2453_s13, 3 }
  0x1a   : > { %1249 = vmatprep.subr.bf16.mxu0 %v1723_v15  ;;  %1289 = vmatpush1.bf16.msra.mxu1 %v1722_v16  ;;  %v179_v44 = vunpack.c.0.s8 %v178_v38  ;;  %v1761_v47 = vld [vmem:[%s2449_s1 + $0xd0] ss:$8 sps:$4 sm:$0xff]   ;;  %v1765_v49 = vld [vmem:[%s2449_s1 + $0xc4] ss:$8 sps:$4 sm:$0xff]   ;;  %s2120_s5 = scalar_lea.vmem %s2448_s0, %s1687_s21  ;;  %v1767_v50 = vld [vmem:[%s2449_s1 + $0xc0] ss:$8 sps:$4 sm:$0xff]   ;;  %s170_s16 = scalar_lea.vmem %s2451_s3, %s1688_s11 }
  0x1b   : > { %1290 = vmatprep.subr.bf16.mxu1 %v1726_v17  ;;  %v1764_v48 = vld [vmem:[%s2449_s1 + $0x1d0] ss:$8 sps:$4 sm:$0xff]   ;;  %v1768_v51 = vld [vmem:[%s2449_s1 + $0x1c4] ss:$8 sps:$4 sm:$0xff]   ;;  %v1771_v53 = vld [vmem:[%s2449_s1 + $0xb4] ss:$8 sps:$4 sm:$0xff]  }
  0x1c   : > { %v2129_v52 = vsub.s32 %v179_v44, %v2103_v45  ;;  %v1770_v54 = vld [vmem:[%s2449_s1 + $0x1c0] ss:$8 sps:$4 sm:$0xff]   ;;  %v1774_v58 = vld [vmem:[%s2449_s1 + $0x1b4] ss:$8 sps:$4 sm:$0xff]   ;;  %v1773_v60 = vld [vmem:[%s2449_s1 + $0xb0] ss:$8 sps:$4 sm:$0xff]  }
  0x1d   : > { %1250 = vmatpush1.bf16.msra.mxu0 %v1725_v18  ;;  %v1926_v55 = vld.sshfl [vmem:[%s2120_s5] sm:$0xf pattern:$0x76325410]  ;;  %v1776_v0 = vld [vmem:[%s2449_s1 + $0x1b0] ss:$8 sps:$4 sm:$0xff]  }
  0x1e   : > { %1251 = vmatprep.subr.bf16.mxu0 %v1729_v19  ;;  %1291 = vmatpush1.bf16.msra.mxu1 %v1728_v20  ;;  %v1927_v56 = vld.sshfl [vmem:[%s2120_s5 + $0x1] sm:$0xf pattern:$0x76325410]  ;;  %v185_v61 = vpack.c.bf16 %v1926_v55, %v1926_v55  ;;  %v1783_v5 = vld [vmem:[%s2449_s1 + $0x94] ss:$8 sps:$4 sm:$0xff]  }
  0x1f   : > { %1292 = vmatprep.subr.bf16.mxu1 %v1732_v21  ;;  %v1928_v57 = vld.sshfl [vmem:[%s2120_s5 + $0x2] sm:$0xf pattern:$0x76325410]  ;;  %v200_v63 = vpack.c.bf16 %v1927_v56, %v1927_v56  ;;  %v1786_v7 = vld [vmem:[%s2449_s1 + $0x194] ss:$8 sps:$4 sm:$0xff]  }
  0x20   : > { %v1929_v59 = vld.sshfl [vmem:[%s2120_s5 + $0x4] sm:$0xf pattern:$0x76325410]  ;;  %186 = vst [vmem:[#allocation2] sm:$0x3] %v185_v61  ;;  %v215_v1 = vpack.c.bf16 %v1928_v57, %v1928_v57 }
  0x21   : > { %1252 = vmatpush1.bf16.msra.mxu0 %v1731_v22  ;;  %v1777_v62 = vld [vmem:[%s2449_s1 + $0xa4] ss:$8 sps:$4 sm:$0xff]   ;;  %201 = vst [vmem:[#allocation2 + $0x2] sm:$0x3] %v200_v63  ;;  %v231_v3 = vpack.c.bf16 %v1929_v59, %v1929_v59  ;;  %v1779_v4 = vld [vmem:[%s2449_s1 + $0xa0] ss:$8 sps:$4 sm:$0xff]  }
  0x22   : > { %1253 = vmatprep.subr.bf16.mxu0 %v1735_v23  ;;  %1293 = vmatpush1.bf16.msra.mxu1 %v1734_v24  ;;  %v1780_v2 = vld [vmem:[%s2449_s1 + $0x1a4] ss:$8 sps:$4 sm:$0xff]   ;;  %216 = vst [vmem:[#allocation2 + $0x4] sm:$0x3] %v215_v1  ;;  %v1782_v6 = vld [vmem:[%s2449_s1 + $0x1a0] ss:$8 sps:$4 sm:$0xff]  }
  0x23   : > { %1294 = vmatprep.subr.bf16.mxu1 %v1738_v25  ;;  %232 = vst [vmem:[#allocation2 + $0x6] sm:$0x3] %v231_v3  ;;  %v1785_v8 = vld [vmem:[%s2449_s1 + $0x90] ss:$8 sps:$4 sm:$0xff]   ;;  %v1789_v9 = vld [vmem:[%s2449_s1 + $0x84] ss:$8 sps:$4 sm:$0xff]  }
  0x24   : > { %v1788_v10 = vld [vmem:[%s2449_s1 + $0x190] ss:$8 sps:$4 sm:$0xff]   ;;  %v1792_v11 = vld [vmem:[%s2449_s1 + $0x184] ss:$8 sps:$4 sm:$0xff]   ;;  %v1791_v12 = vld [vmem:[%s2449_s1 + $0x80] ss:$8 sps:$4 sm:$0xff]  }
  0x25   : > { %1254 = vmatpush1.bf16.msra.mxu0 %v1737_v26  ;;  %v1801_v15 = vld [vmem:[%s2449_s1 + $0x274] ss:$8 sps:$4 sm:$0xff]   ;;  %v1798_v17 = vld [vmem:[%s2449_s1 + $0x180] ss:$8 sps:$4 sm:$0xff]   ;;  %v1799_v19 = vld [vmem:[%s2449_s1 + $0x270] ss:$8 sps:$4 sm:$0xff]  }
  0x26   : > { %1255 = vmatprep.subr.bf16.mxu0 %v1741_v27  ;;  %1295 = vmatpush1.bf16.msra.mxu1 %v1740_v28  ;;  %v1805_v21 = vld [vmem:[%s2449_s1 + $0x374] ss:$8 sps:$4 sm:$0xff]   ;;  %v1808_v23 = vld [vmem:[%s2449_s1 + $0x264] ss:$8 sps:$4 sm:$0xff]   ;;  %v1803_v24 = vld [vmem:[%s2449_s1 + $0x370] ss:$8 sps:$4 sm:$0xff]  }
  0x27   : > { %1296 = vmatprep.subr.bf16.mxu1 %v1744_v29  ;;  %v1811_v25 = vld [vmem:[%s2449_s1 + $0x364] ss:$8 sps:$4 sm:$0xff]   ;;  %v1806_v26 = vld [vmem:[%s2449_s1 + $0x260] ss:$8 sps:$4 sm:$0xff]   ;;  %v1814_v27 = vld [vmem:[%s2449_s1 + $0x254] ss:$8 sps:$4 sm:$0xff]  }
  0x28   : > { %v1809_v28 = vld [vmem:[%s2449_s1 + $0x360] ss:$8 sps:$4 sm:$0xff]   ;;  %v1817_v29 = vld [vmem:[%s2449_s1 + $0x354] ss:$8 sps:$4 sm:$0xff]   ;;  %v1824_v38 = vld [vmem:[%s2449_s1 + $0x230] ss:$8 sps:$4 sm:$0xff]  }
  0x29   : > { %1256 = vmatpush1.bf16.msra.mxu0 %v1743_v30  ;;  %v1812_v30 = vld [vmem:[%s2449_s1 + $0x250] ss:$8 sps:$4 sm:$0xff]   ;;  %v1829_v37 = vld [vmem:[%s2449_s1 + $0x334] ss:$8 sps:$4 sm:$0xff]   ;;  %v1832_v39 = vld [vmem:[%s2449_s1 + $0x224] ss:$8 sps:$4 sm:$0xff]  }
  0x2a   : > { %1257 = vmatprep.subr.bf16.mxu0 %v1747_v31  ;;  %1297 = vmatpush1.bf16.msra.mxu1 %v1746_v32  ;;  %v309_v13 = vld [vmem:[#allocation2] sm:$0xff]  ;;  %v1815_v32 = vld [vmem:[%s2449_s1 + $0x350] ss:$8 sps:$4 sm:$0xff]   ;;  %v1853_v59 = vld [vmem:[%s2449_s1 + $0x3f4] ss:$8 sps:$4 sm:$0xff]  }
  0x2b   : > { %1298 = vmatprep.subr.bf16.mxu1 %v1750_v33  ;;  %v478_v14 = vrot.slane %v309_v13, %v2129_v52  ;;  %v471_v16 = vcombine.high %v309_v13, %v309_v13  ;;  %v1820_v31 = vld [vmem:[%s2449_s1 + $0x244] ss:$8 sps:$4 sm:$0xff]   ;;  %v1833_v44 = vld [vmem:[%s2449_s1 + $0x320] ss:$8 sps:$4 sm:$0xff]   ;;  %v1848_v61 = vld [vmem:[%s2449_s1 + $0x2f0] ss:$8 sps:$4 sm:$0xff]  }
  0x2c   : > { %v1823_v33 = vld [vmem:[%s2449_s1 + $0x344] ss:$8 sps:$4 sm:$0xff]   ;;  %v1845_v55 = vld [vmem:[%s2449_s1 + $0x300] ss:$8 sps:$4 sm:$0xff]   ;;  %v1851_v1 = vld [vmem:[%s2449_s1 + $0x3f0] ss:$8 sps:$4 sm:$0xff]  }
  0x2d   : > { %1258 = vmatpush2.bf16.msra.mxu0 %v1749_v34  ;;  %v486_v18 = vcombine.high %v478_v14, %v478_v14  ;;  %v485_v20 = vrot.slane %v471_v16, %v2129_v52  ;;  %v1818_v34 = vld [vmem:[%s2449_s1 + $0x240] ss:$8 sps:$4 sm:$0xff]   ;;  %v1856_v63 = vld [vmem:[%s2449_s1 + $0x2e4] ss:$8 sps:$4 sm:$0xff]  }
  0x2e   : > { %1259 = vmatprep.subr.bf16.mxu0 %v1753_v35  ;;  %1299 = vmatpush2.bf16.msra.mxu1 %v1752_v36  ;;  %v1826_v35 = vld [vmem:[%s2449_s1 + $0x234] ss:$8 sps:$4 sm:$0xff]   ;;  %v1821_v36 = vld [vmem:[%s2449_s1 + $0x340] ss:$8 sps:$4 sm:$0xff]   ;;  %v1859_v3 = vld [vmem:[%s2449_s1 + $0x3e4] ss:$8 sps:$4 sm:$0xff]  }
  0x2f   : > { %1300 = vmatprep.subr.bf16.mxu1 %v1756_v40  ;;  %1273 = vmatprep.mubr.bf16.mxu0 %v486_v18  ;;  %v487_v22 = vcombine.high %v485_v20, %v485_v20  ;;  %v1827_v40 = vld [vmem:[%s2449_s1 + $0x330] ss:$8 sps:$4 sm:$0xff]   ;;  %v1931_v56 = vld.sshfl [vmem:[%s2120_s5 + $0x6] sm:$0xf pattern:$0x76325410] }
  0x30   : > { %v1932_v57 = vld.sshfl [vmem:[%s2120_s5 + $0x8] sm:$0xf pattern:$0x76325410] }
  0x31   : > { %1260 = vmatpush2.bf16.msra.mxu0 %v1755_v41  ;;  %1314 = vmatprep.mubr.bf16.mxu1 %v487_v22  ;;  %v1835_v41 = vld [vmem:[%s2449_s1 + $0x324] ss:$8 sps:$4 sm:$0xff]   ;;  %v1869_v18 = vld [vmem:[%s2449_s1 + $0x3c0] ss:$8 sps:$4 sm:$0xff]   ;;  %v1877_v22 = vld [vmem:[%s2449_s1 + $0x3b4] ss:$8 sps:$4 sm:$0xff]  }
  0x32   : > { %1261 = vmatprep.subr.bf16.mxu0 %v1759_v42  ;;  %1301 = vmatpush2.bf16.msra.mxu1 %v1758_v43  ;;  %v1830_v42 = vld [vmem:[%s2449_s1 + $0x220] ss:$8 sps:$4 sm:$0xff]   ;;  %v1838_v43 = vld [vmem:[%s2449_s1 + $0x214] ss:$8 sps:$4 sm:$0xff]  }
  0x33   : > { %1302 = vmatprep.subr.bf16.mxu1 %v1762_v46  ;;  %v1836_v46 = vld [vmem:[%s2449_s1 + $0x210] ss:$8 sps:$4 sm:$0xff]  }
  0x35   : > { %1262 = vmatpush2.bf16.msra.mxu0 %v1761_v47  ;;  %v1841_v47 = vld [vmem:[%s2449_s1 + $0x314] ss:$8 sps:$4 sm:$0xff]  }
  0x36   : > { %1263 = vmatprep.subr.bf16.mxu0 %v1765_v49  ;;  %1303 = vmatpush2.bf16.msra.mxu1 %v1764_v48  ;;  %v1839_v48 = vld [vmem:[%s2449_s1 + $0x310] ss:$8 sps:$4 sm:$0xff]   ;;  %v1844_v49 = vld [vmem:[%s2449_s1 + $0x204] ss:$8 sps:$4 sm:$0xff]  }
  0x37   : > { %1304 = vmatprep.subr.bf16.mxu1 %v1768_v51  ;;  %v1847_v51 = vld [vmem:[%s2449_s1 + $0x304] ss:$8 sps:$4 sm:$0xff]  }
  0x39   : > { %1264 = vmatpush2.bf16.msra.mxu0 %v1767_v50  ;;  %v1842_v50 = vld [vmem:[%s2449_s1 + $0x200] ss:$8 sps:$4 sm:$0xff]  }
  0x3a   : > { %1265 = vmatprep.subr.bf16.mxu0 %v1771_v53  ;;  %1305 = vmatpush2.bf16.msra.mxu1 %v1770_v54  ;;  %v1850_v53 = vld [vmem:[%s2449_s1 + $0x2f4] ss:$8 sps:$4 sm:$0xff]   ;;  %v1930_v54 = vld.sshfl [vmem:[%s2120_s5 + $0x5] sm:$0xf pattern:$0x76325410] }
  0x3b   : > { %1306 = vmatprep.subr.bf16.mxu1 %v1774_v58  ;;  %v1933_v58 = vld.sshfl [vmem:[%s2120_s5 + $0x9] sm:$0xf pattern:$0x76325410] }
  0x3d   : > { %1266 = vmatpush2.bf16.msra.mxu0 %v1773_v60  ;;  %v246_v60 = vpack.c.bf16 %v1930_v54, %v1930_v54  ;;  %v1919_v54 = vld [vmem:[%s2449_s1 + $0x410] ss:$8 sps:$4 sm:$0xff]  }
  0x3e   : > { %1267 = vmatprep.subr.bf16.mxu0 %v1777_v62  ;;  %1307 = vmatpush2.bf16.msra.mxu1 %v1776_v0  ;;  %v261_v62 = vpack.c.bf16 %v1931_v56, %v1931_v56  ;;  %v277_v0 = vpack.c.bf16 %v1932_v57, %v1932_v57  ;;  %v1922_v56 = vld [vmem:[%s2449_s1 + $0x400] ss:$8 sps:$4 sm:$0xff]  }
  0x3f   : > { %1308 = vmatprep.subr.bf16.mxu1 %v1780_v2  ;;  %247 = vst [vmem:[#allocation2 + $0x8] sm:$0x3] %v246_v60  ;;  %v292_v2 = vpack.c.bf16 %v1933_v58, %v1933_v58  ;;  %v460_v58 = vsub.s32 0, %v2103_v45  ;;  %v464_v60 = vsub.s32 1, %v2103_v45 }
  0x40   : > { %262 = vst [vmem:[#allocation2 + $0xa] sm:$0x3] %v261_v62  ;;  %278 = vst [vmem:[#allocation2 + $0xc] sm:$0x3] %v277_v0 }
  0x41   : > { %1268 = vmatpush2.bf16.msra.mxu0 %v1779_v4  ;;  %v1854_v4 = vld [vmem:[%s2449_s1 + $0x2e0] ss:$8 sps:$4 sm:$0xff]   ;;  %293 = vst [vmem:[#allocation2 + $0xe] sm:$0x3] %v292_v2 }
  0x42   : > { %1269 = vmatprep.subr.bf16.mxu0 %v1783_v5  ;;  %1309 = vmatpush2.bf16.msra.mxu1 %v1782_v6  ;;  %v1862_v5 = vld [vmem:[%s2449_s1 + $0x2d4] ss:$8 sps:$4 sm:$0xff]   ;;  %v1857_v6 = vld [vmem:[%s2449_s1 + $0x3e0] ss:$8 sps:$4 sm:$0xff]  }
  0x43   : > { %1310 = vmatprep.subr.bf16.mxu1 %v1786_v7  ;;  %v1865_v7 = vld [vmem:[%s2449_s1 + $0x3d4] ss:$8 sps:$4 sm:$0xff]  }
  0x45   : > { %1270 = vmatpush2.bf16.msra.mxu0 %v1785_v8  ;;  %v1860_v8 = vld [vmem:[%s2449_s1 + $0x2d0] ss:$8 sps:$4 sm:$0xff]  }
  0x46   : > { %1271 = vmatprep.subr.bf16.mxu0 %v1789_v9  ;;  %1311 = vmatpush2.bf16.msra.mxu1 %v1788_v10  ;;  %v1868_v9 = vld [vmem:[%s2449_s1 + $0x2c4] ss:$8 sps:$4 sm:$0xff]   ;;  %v1863_v10 = vld [vmem:[%s2449_s1 + $0x3d0] ss:$8 sps:$4 sm:$0xff]  }
  0x47   : > { %1312 = vmatprep.subr.bf16.mxu1 %v1792_v11  ;;  %v1934_v11 = vld.sshfl [vmem:[%s2120_s5 + $0xa] sm:$0xf pattern:$0x76325410] }
  0x48   : > { %v310_v13 = vld [vmem:[#allocation2 + $0x8] sm:$0xff] }
  0x49   : > { %1272 = vmatpush2.bf16.msra.mxu0 %v1791_v12  ;;  %v1871_v12 = vld [vmem:[%s2449_s1 + $0x3c4] ss:$8 sps:$4 sm:$0xff]   ;;  %v488_v16 = vcombine.high %v310_v13, %v310_v13 }
  0x4a   : > { %1323 = vmatprep.subr.bf16.mxu0 %v1801_v15  ;;  %1313 = vmatpush2.bf16.msra.mxu1 %v1798_v17  ;;  %v495_v15 = vrot.slane %v310_v13, %v2129_v52  ;;  %v1874_v17 = vld [vmem:[%s2449_s1 + $0x2b4] ss:$8 sps:$4 sm:$0xff]  }
  0x4b   : > { %1364 = vmatprep.subr.bf16.mxu1 %v1805_v21  ;;  %v307_v21 = vpack.c.bf16 %v1934_v11, %v1934_v11 }
  0x4c   : > { %1274 = vmatmul.mubr.bf16.vlgmr.msra.gmra.mxu0 %v478_v14  ;;  %v1866_v14 = vld [vmem:[%s2449_s1 + $0x2c0] ss:$8 sps:$4 sm:$0xff]  }
  0x4d   : > { %1324 = vmatpush1.bf16.msra.mxu0 %v1799_v19  ;;  %1315 = vmatmul.mubr.bf16.vlgmr.msra.gmra.mxu1 %v485_v20  ;;  %v503_v19 = vcombine.high %v495_v15, %v495_v15  ;;  %v502_v20 = vrot.slane %v488_v16, %v2129_v52  ;;  %308 = vst [vmem:[#allocation2 + $0x10] sm:$0x3] %v307_v21 }
  0x4e   : > { %1325 = vmatprep.subr.bf16.mxu0 %v1808_v23  ;;  %1365 = vmatpush1.bf16.msra.mxu1 %v1803_v24  ;;  %v1872_v23 = vld [vmem:[%s2449_s1 + $0x2b0] ss:$8 sps:$4 sm:$0xff]  }
  0x4f   : > { %1366 = vmatprep.subr.bf16.mxu1 %v1811_v25  ;;  %1355 = vmatprep.mubr.bf16.mxu0 %v503_v19  ;;  %v504_v24 = vcombine.high %v502_v20, %v502_v20  ;;  %v1880_v25 = vld [vmem:[%s2449_s1 + $0x2a4] ss:$8 sps:$4 sm:$0xff]  }
  0x51   : > { %1326 = vmatpush1.bf16.msra.mxu0 %v1806_v26  ;;  %v1875_v26 = vld [vmem:[%s2449_s1 + $0x3b0] ss:$8 sps:$4 sm:$0xff]   ;;  %1396 = vmatprep.mubr.bf16.mxu1 %v504_v24 }
  0x52   : > { %1327 = vmatprep.subr.bf16.mxu0 %v1814_v27  ;;  %1367 = vmatpush1.bf16.msra.mxu1 %v1809_v28  ;;  %v1883_v27 = vld [vmem:[%s2449_s1 + $0x3a4] ss:$8 sps:$4 sm:$0xff]   ;;  %v1878_v28 = vld [vmem:[%s2449_s1 + $0x2a0] ss:$8 sps:$4 sm:$0xff]  }
  0x53   : > { %1368 = vmatprep.subr.bf16.mxu1 %v1817_v29  ;;  %v1886_v29 = vld [vmem:[%s2449_s1 + $0x294] ss:$8 sps:$4 sm:$0xff]  }
  0x54   : > { %v1539_v57 = vld.sshfl [vmem:[#allocation2 + $0x10] sm:$0x3 pattern:$0x76325410] }
  0x55   : > { %1328 = vmatpush1.bf16.msra.mxu0 %v1812_v30  ;;  %v1881_v30 = vld [vmem:[%s2449_s1 + $0x3a0] ss:$8 sps:$4 sm:$0xff]  }
  0x56   : > { %1329 = vmatprep.subr.bf16.mxu0 %v1820_v31  ;;  %1369 = vmatpush1.bf16.msra.mxu1 %v1815_v32  ;;  %v1889_v31 = vld [vmem:[%s2449_s1 + $0x394] ss:$8 sps:$4 sm:$0xff]   ;;  %v1884_v32 = vld [vmem:[%s2449_s1 + $0x290] ss:$8 sps:$4 sm:$0xff]  }
  0x57   : > { %1370 = vmatprep.subr.bf16.mxu1 %v1823_v33  ;;  %v1892_v33 = vld [vmem:[%s2449_s1 + $0x284] ss:$8 sps:$4 sm:$0xff]  }
  0x59   : > { %1330 = vmatpush1.bf16.msra.mxu0 %v1818_v34  ;;  %v1887_v34 = vld [vmem:[%s2449_s1 + $0x390] ss:$8 sps:$4 sm:$0xff]  }
  0x5a   : > { %1331 = vmatprep.subr.bf16.mxu0 %v1826_v35  ;;  %1371 = vmatpush1.bf16.msra.mxu1 %v1821_v36  ;;  %v1895_v35 = vld [vmem:[%s2449_s1 + $0x384] ss:$8 sps:$4 sm:$0xff]   ;;  %v1890_v36 = vld [vmem:[%s2449_s1 + $0x280] ss:$8 sps:$4 sm:$0xff]  }
  0x5b   : > { %1372 = vmatprep.subr.bf16.mxu1 %v1829_v37  ;;  %v1902_v37 = vld [vmem:[%s2449_s1 + $0x474] ss:$8 sps:$4 sm:$0xff]  }
  0x5d   : > { %1332 = vmatpush1.bf16.msra.mxu0 %v1824_v38  ;;  %v1893_v38 = vld [vmem:[%s2449_s1 + $0x380] ss:$8 sps:$4 sm:$0xff]  }
  0x5e   : > { %1333 = vmatprep.subr.bf16.mxu0 %v1832_v39  ;;  %1373 = vmatpush1.bf16.msra.mxu1 %v1827_v40  ;;  %v1900_v39 = vld [vmem:[%s2449_s1 + $0x470] ss:$8 sps:$4 sm:$0xff]   ;;  %v1906_v40 = vld [vmem:[%s2449_s1 + $0x464] ss:$8 sps:$4 sm:$0xff]  }
  0x5f   : > { %1374 = vmatprep.subr.bf16.mxu1 %v1835_v41  ;;  %v1904_v41 = vld [vmem:[%s2449_s1 + $0x460] ss:$8 sps:$4 sm:$0xff]  }
  0x61   : > { %1334 = vmatpush1.bf16.msra.mxu0 %v1830_v42  ;;  %v1944_v42 = vmov 0  }
  0x62   : > { %1335 = vmatprep.subr.bf16.mxu0 %v1838_v43  ;;  %1375 = vmatpush1.bf16.msra.mxu1 %v1833_v44  ;;  %v1909_v43 = vld [vmem:[%s2449_s1 + $0x454] ss:$8 sps:$4 sm:$0xff]   ;;  %v1907_v44 = vld [vmem:[%s2449_s1 + $0x450] ss:$8 sps:$4 sm:$0xff]  }
  0x63   : > { %1376 = vmatprep.subr.bf16.mxu1 %v1841_v47  ;;  %v1910_v47 = vld [vmem:[%s2449_s1 + $0x440] ss:$8 sps:$4 sm:$0xff]  }
  0x65   : > { %1336 = vmatpush1.bf16.msra.mxu0 %v1836_v46  ;;  %v1912_v46 = vld [vmem:[%s2449_s1 + $0x444] ss:$8 sps:$4 sm:$0xff]  }
  0x66   : > { %1337 = vmatprep.subr.bf16.mxu0 %v1844_v49  ;;  %1377 = vmatpush1.bf16.msra.mxu1 %v1839_v48  ;;  %v1915_v48 = vld [vmem:[%s2449_s1 + $0x434] ss:$8 sps:$4 sm:$0xff]   ;;  %v1913_v49 = vld [vmem:[%s2449_s1 + $0x430] ss:$8 sps:$4 sm:$0xff]  }
  0x67   : > { %1378 = vmatprep.subr.bf16.mxu1 %v1847_v51  ;;  %v1916_v51 = vld [vmem:[%s2449_s1 + $0x420] ss:$8 sps:$4 sm:$0xff]  }
  0x69   : > { %1338 = vmatpush1.bf16.msra.mxu0 %v1842_v50  ;;  %v1918_v50 = vld [vmem:[%s2449_s1 + $0x424] ss:$8 sps:$4 sm:$0xff]  }
  0x6a   : > { %1339 = vmatprep.subr.bf16.mxu0 %v1850_v53  ;;  %1379 = vmatpush1.bf16.msra.mxu1 %v1845_v55  ;;  %v1921_v53 = vld [vmem:[%s2449_s1 + $0x414] ss:$8 sps:$4 sm:$0xff]   ;;  %v1924_v55 = vld [vmem:[%s2449_s1 + $0x404] ss:$8 sps:$4 sm:$0xff]  }
  0x6b   : > { %1380 = vmatprep.subr.bf16.mxu1 %v1853_v59  ;;  %v456_v59 = vld [vmem:[%s2450_s2] sm:$0x3] }
  0x6c   : > { %v465_v62 = vrot.slane %v456_v59, %v464_v60 }
  0x6d   : > { %1340 = vmatpush2.bf16.msra.mxu0 %v1848_v61  ;;  %v461_v61 = vrot.slane %v456_v59, %v460_v58 }
  0x6e   : > { %1341 = vmatprep.subr.bf16.mxu0 %v1856_v63  ;;  %1381 = vmatpush2.bf16.msra.mxu1 %v1851_v1 }
  0x6f   : > { %1382 = vmatprep.subr.bf16.mxu1 %v1859_v3 }
  0x71   : > { %1342 = vmatpush2.bf16.msra.mxu0 %v1854_v4 }
  0x72   : > { %1343 = vmatprep.subr.bf16.mxu0 %v1862_v5  ;;  %1383 = vmatpush2.bf16.msra.mxu1 %v1857_v6 }
  0x73   : > { %1384 = vmatprep.subr.bf16.mxu1 %v1865_v7 }
  0x75   : > { %1344 = vmatpush2.bf16.msra.mxu0 %v1860_v8 }
  0x76   : > { %1345 = vmatprep.subr.bf16.mxu0 %v1868_v9  ;;  %1385 = vmatpush2.bf16.msra.mxu1 %v1863_v10 }
  0x77   : > { %1386 = vmatprep.subr.bf16.mxu1 %v1871_v12 }
  0x79   : > { %1346 = vmatpush2.bf16.msra.mxu0 %v1866_v14 }
  0x7a   : > { %1347 = vmatprep.subr.bf16.mxu0 %v1874_v17  ;;  %1387 = vmatpush2.bf16.msra.mxu1 %v1869_v18 }
  0x7b   : > { %1388 = vmatprep.subr.bf16.mxu1 %v1877_v22 }
  0x7d   : > { %1348 = vmatpush2.bf16.msra.mxu0 %v1872_v23 }
  0x7e   : > { %1349 = vmatprep.subr.bf16.mxu0 %v1880_v25  ;;  %1389 = vmatpush2.bf16.msra.mxu1 %v1875_v26 }
  0x7f   : > { %1390 = vmatprep.subr.bf16.mxu1 %v1883_v27 }
  0x81   : > { %1350 = vmatpush2.bf16.msra.mxu0 %v1878_v28 }
  0x82   : > { %1351 = vmatprep.subr.bf16.mxu0 %v1886_v29  ;;  %1391 = vmatpush2.bf16.msra.mxu1 %v1881_v30 }
  0x83   : > { %1392 = vmatprep.subr.bf16.mxu1 %v1889_v31 }
  0x85   : > { %1352 = vmatpush2.bf16.msra.mxu0 %v1884_v32 }
  0x86   : > { %1353 = vmatprep.subr.bf16.mxu0 %v1892_v33  ;;  %1393 = vmatpush2.bf16.msra.mxu1 %v1887_v34 }
  0x87   : > { %1394 = vmatprep.subr.bf16.mxu1 %v1895_v35 }
  0x89   : > { %1354 = vmatpush2.bf16.msra.mxu0 %v1890_v36 }
  0x8a   : > { %1405 = vmatprep.subr.bf16.mxu0 %v1902_v37  ;;  %1395 = vmatpush2.bf16.msra.mxu1 %v1893_v38 }
  0x8c   : > { %1356 = vmatmul.mubr.bf16.vlgmr.msra.gmra.mxu0 %v495_v15 }
  0x8d   : > { %1406 = vmatpush1.bf16.msra.mxu0 %v1900_v39  ;;  %1437 = vmatprep.mubr.bf16.mxu0 %v1944_v42 }
  0x8e   : > { %1397 = vmatmul.mubr.bf16.vlgmr.msra.gmra.mxu1 %v502_v20  ;;  %1407 = vmatprep.subr.bf16.mxu0 %v1906_v40 }
  0x91   : > { %1408 = vmatpush1.bf16.msra.mxu0 %v1904_v41 }
  0x92   : > { %1409 = vmatprep.subr.bf16.mxu0 %v1909_v43 }
  0x95   : > { %1410 = vmatpush1.bf16.msra.mxu0 %v1907_v44 }
  0x96   : > { %1411 = vmatprep.subr.bf16.mxu0 %v1912_v46 }
  0x99   : > { %1412 = vmatpush1.bf16.msra.mxu0 %v1910_v47 }
  0x9a   : > { %1413 = vmatprep.subr.bf16.mxu0 %v1915_v48 }
  0x9d   : > { %1414 = vmatpush1.bf16.msra.mxu0 %v1913_v49 }
  0x9e   : > { %1415 = vmatprep.subr.bf16.mxu0 %v1918_v50 }
  0xa1   : > { %1416 = vmatpush1.bf16.msra.mxu0 %v1916_v51 }
  0xa2   : > { %1417 = vmatprep.subr.bf16.mxu0 %v1921_v53 }
  0xa5   : > { %1418 = vmatpush1.bf16.msra.mxu0 %v1919_v54 }
  0xa6   : > { %1419 = vmatprep.subr.bf16.mxu0 %v1924_v55 }
  0xa9   : > { %1420 = vmatpush1.bf16.msra.mxu0 %v1922_v56 }
  0xac   : > { %1438 = vmatmul.mubr.bf16.vlgmr.msra.gmra.mxu0 %v1539_v57 }
 0x10c   : > { %v1275_v63 = vpop.f32.mrf.mxu0 }
 0x10d   : > { %v1276_v0 = vadd.f32 %v1275_v63, %v461_v61  ;;  %v1316_v2 = vpop.f32.mrf.mxu1 }
 0x10e   : > { %v1277_v1 = vpop.f32.mrf.mxu0 }
 0x10f   : > { %v1278_v3 = vadd.f32 %v1277_v1, %v465_v62  ;;  %v1317_v4 = vadd.f32 %v1316_v2, %v1276_v0  ;;  %v1318_v6 = vpop.f32.mrf.mxu1 }
 0x110   : > { %v1279_v5 = vpop.f32.mrf.mxu0 }
 0x111   : > { %v1319_v7 = vadd.f32 %v1318_v6, %v1278_v3  ;;  %v1320_v9 = vpop.f32.mrf.mxu1 }
 0x112   : > { %v1280_v8 = vpop.f32.mrf.mxu0 }
 0x113   : > { %v1321_v10 = vpop.f32.mrf.mxu1 }
 0x14c   : > { %v1357_v11 = vpop.f32.mrf.mxu0 }
 0x14d   : > { %v1358_v18 = vadd.f32 %v1357_v11, %v1317_v4 }
 0x14e   : > { %v1359_v12 = vpop.f32.mrf.mxu0  ;;  %v1398_v13 = vpop.f32.mrf.mxu1 }
 0x14f   : > { %v1360_v19 = vadd.f32 %v1359_v12, %v1319_v7  ;;  %v1399_v20 = vadd.f32 %v1398_v13, %v1358_v18 }
 0x150   : > { %v1361_v14 = vpop.f32.mrf.mxu0  ;;  %v1400_v45 = vpop.f32.mrf.mxu1 }
 0x151   : > { %v1401_v22 = vadd.f32 %v1400_v45, %v1360_v19 }
 0x152   : > { %v1362_v15 = vpop.f32.mrf.mxu0  ;;  %v1402_v16 = vpop.f32.mrf.mxu1 }
 0x154   : > { %v1403_v17 = vpop.f32.mrf.mxu1 }
 0x16c   : > { %v1439_v21 = vpop.f32.mrf.mxu0 }
 0x16d   : > { %v1440_v23 = vadd.f32 %v1439_v21, %v1399_v20 }
 0x16e   : > { %v1441_v24 = vpop.f32.mrf.mxu0 }
 0x16f   : > { %v1442_v25 = vadd.f32 %v1441_v24, %v1401_v22  ;;  %v1446_v27 = vmax.f32 %v1440_v23, 0.0 }
 0x170   : > { %v1443_v26 = vpop.f32.mrf.mxu0 }
 0x171   : > { %v1447_v28 = vmax.f32 %v1442_v25, 0.0 }
 0x172   : > { %v1444_v29 = vpop.f32.mrf.mxu0 }
 0x173   : > { %v1450_v30 = vcombine.low %v1446_v27, %v1447_v28 }
 0x175   : > { %v1457_v31 = vrot.slane %v1450_v30, %v2129_v52  ;;  %1684 = vst.sshfl [vmem:[%s170_s16] sm:$0x33 pattern:$0x76325410] %v1450_v30 }
 0x177   : > { %v1458_v32 = vcombine.high %v1457_v31, %v1457_v31 }
 0x179   : > { %1462 = vst [vmem:[%s170_s16 + $0x4] sm:$0xf] %v1458_v32 }
 0x17a PF: > { %s13_s12 = sadd.s32 1, %s1941_s12  }
 0x17b   : > { %p10_p4 = scmp.ge.s32.totalorder %s13_s12, 4  }
 0x17d   :  { %12 = sbr.rel (!%p10_p4) target bundleno = 1 (0x1), region = 64 }

// kernel: deep_ca_unet_forward.15
= control target key start
LH: loop header
LB: loop body
LE: loop exit
PB: predicated region body
PF: predicated region fallthrough
CT: control target
= control target key end

     0   :  { %8 = vsyncpa [#allocation4], 0  ;;  %s3615_s0 = inlined_call_operand.vmem [shape: f32[2,4,4,256], index: 0, kind: input, shape index: {}]   ;;  %s3616_s1 = inlined_call_operand.vmem [shape: bf16[2304,128], index: 1, kind: input, shape index: {}]   ;;  %s3617_s2 = inlined_call_operand.vmem [shape: f32[1,128], index: 2, kind: input, shape index: {}]   ;;  %s3618_s3 = inlined_call_operand.hbm [shape: f32[2,2,2,128], index: 3, kind: output, shape index: {}]  }
   0x1   :  { %10 = vsyncpa [#allocation4 + $0x1], 0  ;;  %s3007_s12 = smov 0   ;;  %s3009_s13 = smov 0  }
   0x2   :  { %s3011_s14 = smov 0   ;;  %s3013_s15 = smov 0  }
   0x3 LB: > { %s3028_s16 = sadd.s32 4294967295, %s2981_s15   ;;  %s2315_s17 = sadd.s32 4294967294, %s2981_s15   ;;  %s2981_s15 = sphi %s3013_s15, %s3626_s15   ;;  %s2977_s14 = sphi %s3011_s14, %s3625_s14   ;;  %s2973_s13 = sphi %s3009_s13, %s3624_s13   ;;  %s2969_s12 = sphi %s3007_s12, %s3623_s12  }
   0x4   : > { %s3032_s18 = sadd.s32 1, %s2981_s15   ;;  %s91_s19 = sadd.s32 1, %s2977_s14 }
   0x5   : > { %s88_s20 = ssub.s32 %s2981_s15, %s3032_s18  ;;  %p101_p0 = scmp.ne.s32.totalorder %s2977_s14, %s2973_s13 }
   0x6   : > { %p89_p1 = scmp.eq.s32.totalorder %s88_s20, 0  ;;  %p102_p2 = scmp.eq.s32.totalorder %s3028_s16, 1 }
   0x7   : > { %p107_p3 = scmp.ne.s32.totalorder %s2973_s13, %s2969_s12  ;;  %p108_p4 = scmp.eq.s32.totalorder %s2315_s17, 1 }
   0x8   : > { %s3043_s21 = scalar_select %p89_p1, %s2977_s14, %s91_s19  }
   0x9   : > { %p3045_p5 = por %p102_p2, %p101_p0  ;;  %p3049_p6 = por %p108_p4, %p107_p3 }
   0xa   : > { %p2318_p7 = scmp.ge.s32.totalorder %s2981_s15, 1  ;;  %p140_p8 = scmp.lt.s32.totalorder %s2981_s15, 3 }
   0xc   : > { %p141_p9 = pnand %p2318_p7, %p140_p8 }
   0xd   : > { %p164_p10 = scmp.lt.s32.totalorder (!%p141_p9), %s3028_s16, 1  ;;  %s161_s24 = sand.u32 (!%p141_p9), 1, %s2973_s13  }
   0xe   : > { %144 = sbr.rel (%p141_p9) target bundleno = 407 (0x197), region = 32  ;;  %s2319_s25 = sshll.u32 (!%p141_p9), %s161_s24, 2 }
   0xf   : > { %s163_s26 = scalar_lea.vmem (!%p141_p9), [#allocation3], %s2319_s25  ;;  %s3575_s4 = scalar_lea.sflag (!%p141_p9), [#allocation4], %s161_s24 }
  0x13   : > { %v2773_v0 = vld [vmem:[%s3616_s1 + $0x78] sm:$0xff]   ;;  %v2777_v4 = vld [vmem:[%s3616_s1 + $0x70] sm:$0xff]   ;;  %v2781_v8 = vld [vmem:[%s3616_s1 + $0x68] sm:$0xff]   ;;  %v192_v23 = vlaneseq  ;;  %s165_s9 = scalar_select %p164_p10, %s3028_s16, 1  ;;  %vm233_vm0 = vcmask 1040384   ;;  %vm234_vm1 = vcmask 1042434  }
  0x14   : > { %v2774_v1 = vld [vmem:[%s3616_s1 + $0x38] sm:$0xff]   ;;  %2533 = vmatprep.subr.bf16.mxu0 %v2773_v0  ;;  %v2778_v5 = vld [vmem:[%s3616_s1 + $0x30] sm:$0xff]   ;;  %v2782_v9 = vld [vmem:[%s3616_s1 + $0x28] sm:$0xff]   ;;  %vm236_vm2 = vcmask 1044484   ;;  %vm238_vm3 = vcmask 1046534  }
  0x15   : > { %v2775_v2 = vld [vmem:[%s3616_s1 + $0xf8] sm:$0xff]   ;;  %2534 = vmatpush3.bf16.msra.mxu0 %v2774_v1  ;;  %v2779_v6 = vld [vmem:[%s3616_s1 + $0xf0] sm:$0xff]   ;;  %v2783_v10 = vld [vmem:[%s3616_s1 + $0xe8] sm:$0xff]   ;;  %v193_v28 = vshrl.u32 %v192_v23, 7  ;;  %s2531_s27 = sshll.u32 %s165_s9, 5 }
  0x16   : > { %v2776_v3 = vld [vmem:[%s3616_s1 + $0xb8] sm:$0xff]   ;;  %2555 = vmatprep.subr.bf16.mxu1 %v2775_v2  ;;  %2535 = vmatprep.subr.bf16.mxu0 %v2777_v4  ;;  %v2780_v7 = vld [vmem:[%s3616_s1 + $0xb0] sm:$0xff]   ;;  %v2784_v11 = vld [vmem:[%s3616_s1 + $0xa8] sm:$0xff]   ;;  %s3153_s9 = scalar_lea.vmem %s3615_s0, %s2531_s27  ;;  %v2983_v35 = vmov 1983009808   ;;  %s2253_s27 = sshll.u32 %s163_s26, 4  ;;  %s3568_s27 = int_to_ptr.vmem [resolvable:$true] %s2253_s27 }
  0x17   : > { %2556 = vmatpush3.bf16.msra.mxu1 %v2776_v3  ;;  %v2785_v12 = vld [vmem:[%s3616_s1 + $0x60] sm:$0xff]   ;;  %v2789_v16 = vld [vmem:[%s3616_s1 + $0x58] sm:$0xff]   ;;  %v2793_v20 = vld [vmem:[%s3616_s1 + $0x50] sm:$0xff]   ;;  %v190_v36 = vunpack.c.l.s4 %v2983_v35  ;;  %s2921_s5 = scalar_lea.vmem %s3568_s27, 64 }
  0x18   : > { %2557 = vmatprep.subr.bf16.mxu1 %v2779_v6  ;;  %v2786_v13 = vld [vmem:[%s3616_s1 + $0x20] sm:$0xff]   ;;  %v2790_v17 = vld [vmem:[%s3616_s1 + $0x18] sm:$0xff]   ;;  %v2794_v21 = vld [vmem:[%s3616_s1 + $0x10] sm:$0xff]   ;;  %p2922_p11 = scmp.ne.s32.totalorder %s3568_s27, %s2921_s5 }
  0x19   : > { %2536 = vmatpush3.bf16.msra.mxu0 %v2778_v5  ;;  %v2787_v14 = vld [vmem:[%s3616_s1 + $0xe0] sm:$0xff]   ;;  %v2791_v18 = vld [vmem:[%s3616_s1 + $0xd8] sm:$0xff]   ;;  %v2795_v22 = vld [vmem:[%s3616_s1 + $0xd0] sm:$0xff]   ;;  %v191_v39 = vunpack.c.0.s8 %v190_v36 }
  0x1a   : > { %2537 = vmatprep.subr.bf16.mxu0 %v2781_v8  ;;  %v2788_v15 = vld [vmem:[%s3616_s1 + $0xa0] sm:$0xff]   ;;  %v2792_v19 = vld [vmem:[%s3616_s1 + $0x98] sm:$0xff]   ;;  %v2796_v24 = vld [vmem:[%s3616_s1 + $0x90] sm:$0xff]   ;;  %p2923_p12 = pnand %p2922_p11, %p3045_p5 }
  0x1b   : > { %2558 = vmatpush3.bf16.msra.mxu1 %v2780_v7  ;;  %v2797_v25 = vld [vmem:[%s3616_s1 + $0x48] sm:$0xff]   ;;  %v2801_v30 = vld [vmem:[%s3616_s1 + $0x40] sm:$0xff]   ;;  %vm235_vm4 = vmor %vm233_vm0, %vm234_vm1  ;;  %v3173_v48 = vsub.s32 %v191_v39, %v193_v28 }
  0x1c   : > { %2559 = vmatprep.subr.bf16.mxu1 %v2783_v10  ;;  %v2798_v26 = vld [vmem:[%s3616_s1 + $0x8] sm:$0xff]   ;;  %v2802_v31 = vld [vmem:[%s3616_s1] sm:$0xff]   ;;  %vm237_vm5 = vmor %vm235_vm4, %vm236_vm2  ;;  %p2924_p13 = pneg %p2923_p12 }
  0x1d   : > { %2538 = vmatpush3.bf16.msra.mxu0 %v2782_v9  ;;  %v2799_v27 = vld [vmem:[%s3616_s1 + $0xc8] sm:$0xff]   ;;  %v2803_v32 = vld [vmem:[%s3616_s1 + $0xc0] sm:$0xff]   ;;  %vm3163_vm6 = vmor %vm237_vm5, %vm238_vm3 }
  0x1e   : > { %2539 = vmatprep.subr.bf16.mxu0 %v2785_v12  ;;  %v2800_v29 = vld [vmem:[%s3616_s1 + $0x88] sm:$0xff]   ;;  %v2322_v33 = vld.sshfl [vmem:[%s3153_s9] sm:$0xf pattern:$0x76325410]  ;;  %v2805_v47 = vld [vmem:[%s3616_s1 + $0x178] sm:$0xff]  }
  0x1f   : > { %2560 = vmatpush3.bf16.msra.mxu1 %v2784_v11  ;;  %v3158_v34 = vld.sshfl [vmem:[%s3153_s9 + $0x8] sm:$0xf pattern:$0x76325410]  ;;  %v2804_v44 = vld [vmem:[%s3616_s1 + $0x80] sm:$0xff]   ;;  %v2808_v51 = vld [vmem:[%s3616_s1 + $0x1f8] sm:$0xff]  }
  0x20   : > { %2561 = vmatprep.subr.bf16.mxu1 %v2787_v14  ;;  %v2326_v37 = vld.sshfl [vmem:[%s3153_s9] sm:$0x5a pattern:$0x76325410]  ;;  %v188_v38 = vcombine.low %v2322_v33, %v3158_v34  ;;  %v2807_v0 = vld [vmem:[%s3616_s1 + $0x138] sm:$0xff]   ;;  %v2810_v4 = vld [vmem:[%s3616_s1 + $0x170] sm:$0xff]  }
  0x21   : > { %2540 = vmatpush3.bf16.msra.mxu0 %v2786_v13  ;;  %v2327_v40 = vld.sshfl [vmem:[%s3153_s9 + $0x8] sm:$0x5a pattern:$0x76325410]  ;;  %v224_v41 = vcombine.high %v2326_v37, %v2326_v37  ;;  %v2328_v43 = vrot.slane %v2326_v37, 9  ;;  %v2809_v3 = vld [vmem:[%s3616_s1 + $0x1b8] sm:$0xff]  }
  0x22   : > { %2541 = vmatprep.subr.bf16.mxu0 %v2789_v16  ;;  %v232_v45 = vcombine.high %v2327_v40, %v2327_v40  ;;  %v2329_v46 = vrot.slane %v2327_v40, 9  ;;  %v195_v52 = vrot.slane %v188_v38, %v3173_v48  ;;  %v2811_v6 = vld [vmem:[%s3616_s1 + $0x130] sm:$0xff]   ;;  %v2814_v9 = vld [vmem:[%s3616_s1 + $0x168] sm:$0xff]   ;;  %v2818_v13 = vld [vmem:[%s3616_s1 + $0x160] sm:$0xff]  }
  0x23   : > { %2562 = vmatpush3.bf16.msra.mxu1 %v2788_v15  ;;  %v242_v49 = vrot.slane %v224_v41, 7  ;;  %v2812_v7 = vld [vmem:[%s3616_s1 + $0x1f0] sm:$0xff]   ;;  %v2815_v10 = vld [vmem:[%s3616_s1 + $0x128] sm:$0xff]   ;;  %v2819_v16 = vld [vmem:[%s3616_s1 + $0x120] sm:$0xff]  }
  0x24   : > { %2563 = vmatprep.subr.bf16.mxu1 %v2791_v18  ;;  %v246_v50 = vrot.slane %v232_v45, 7  ;;  %v196_v55 = vcombine.high %v195_v52, %v195_v52  ;;  %v2813_v8 = vld [vmem:[%s3616_s1 + $0x1b0] sm:$0xff]   ;;  %v2816_v11 = vld [vmem:[%s3616_s1 + $0x1e8] sm:$0xff]   ;;  %v2822_v23 = vld [vmem:[%s3616_s1 + $0x158] sm:$0xff]  }
  0x25   : > { %2542 = vmatpush3.bf16.msra.mxu0 %v2790_v17  ;;  %v243_v53 = vsel %vm3163_vm6, %v2328_v43, %v242_v49  ;;  %v2817_v12 = vld [vmem:[%s3616_s1 + $0x1a8] sm:$0xff]   ;;  %v2332_v14 = vld.sshfl [vmem:[%s3153_s9] sm:$0xf0 pattern:$0x76325410]  ;;  %v2827_v33 = vld [vmem:[%s3616_s1 + $0x110] sm:$0xff]  }
  0x26   : > { %2543 = vmatprep.subr.bf16.mxu0 %v2793_v20  ;;  %v3183_v54 = vsel %vm3163_vm6, %v2329_v46, %v246_v50  ;;  %v2324_v57 = vpack.c.bf16 %v196_v55, %v195_v52  ;;  %v3224_v15 = vld.sshfl [vmem:[%s3153_s9 + $0x8] sm:$0xf0 pattern:$0x76325410]  ;;  %v2829_v35 = vld [vmem:[%s3616_s1 + $0x190] sm:$0xff]   ;;  %v2834_v40 = vld [vmem:[%s3616_s1 + $0x140] sm:$0xff]  }
  0x27   : > { %2564 = vmatpush3.bf16.msra.mxu1 %v2792_v19  ;;  %v248_v56 = vcombine.low %v243_v53, %v3183_v54  ;;  %v2334_v17 = vcombine.high %v2332_v14, %v3224_v15  ;;  %v3231_v18 = vld.sshfl [vmem:[%s3153_s9 + $0x10] sm:$0xf pattern:$0x76325410]  ;;  %v2820_v19 = vld [vmem:[%s3616_s1 + $0x1e0] sm:$0xff]   ;;  %v2830_v36 = vld [vmem:[%s3616_s1 + $0x148] sm:$0xff]  }
  0x28   : > { %2565 = vmatprep.subr.bf16.mxu1 %v2795_v22  ;;  %2325 = vst.sshfl [vmem:[#allocation2] sm:$0x33 pattern:$0x76325410] %v2324_v57  ;;  %v337_v20 = vcombine.low %v3158_v34, %v3231_v18  ;;  %v2828_v34 = vld [vmem:[%s3616_s1 + $0x1d0] sm:$0xff]   ;;  %v2831_v37 = vld [vmem:[%s3616_s1 + $0x108] sm:$0xff]  }
  0x29   : > { %2544 = vmatpush3.bf16.msra.mxu0 %v2794_v21  ;;  %v255_v58 = vrot.slane %v248_v56, %v3173_v48  ;;  %v2821_v21 = vld [vmem:[%s3616_s1 + $0x1a0] sm:$0xff]   ;;  %v300_v22 = vrot.slane %v2334_v17, %v3173_v48  ;;  %v2832_v38 = vld [vmem:[%s3616_s1 + $0x1c8] sm:$0xff]   ;;  %v2838_v49 = vld [vmem:[%s3616_s1 + $0x278] sm:$0xff]  }
  0x2a   : > { %2545 = vmatprep.subr.bf16.mxu0 %v2797_v25  ;;  %v2823_v25 = vld [vmem:[%s3616_s1 + $0x118] sm:$0xff]   ;;  %v2833_v39 = vld [vmem:[%s3616_s1 + $0x188] sm:$0xff]   ;;  %v2836_v43 = vld [vmem:[%s3616_s1 + $0x1c0] sm:$0xff]  }
  0x2b   : > { %2566 = vmatpush3.bf16.msra.mxu1 %v2796_v24  ;;  %v256_v59 = vcombine.high %v255_v58, %v255_v58  ;;  %v344_v24 = vrot.slane %v337_v20, %v3173_v48  ;;  %v2835_v46 = vld [vmem:[%s3616_s1 + $0x100] sm:$0xff]   ;;  %v2841_v53 = vld [vmem:[%s3616_s1 + $0x2f8] sm:$0xff]   ;;  %v2843_v56 = vld [vmem:[%s3616_s1 + $0x270] sm:$0xff]  }
  0x2c   : > { %2567 = vmatprep.subr.bf16.mxu1 %v2799_v27  ;;  %v2824_v27 = vld [vmem:[%s3616_s1 + $0x1d8] sm:$0xff]  }
  0x2d   : > { %2546 = vmatpush3.bf16.msra.mxu0 %v2798_v26  ;;  %v2330_v60 = vpack.c.bf16 %v256_v59, %v255_v58  ;;  %v301_v26 = vcombine.high %v300_v22, %v300_v22  ;;  %v345_v28 = vcombine.high %v344_v24, %v344_v24  ;;  %v2840_v55 = vld [vmem:[%s3616_s1 + $0x238] sm:$0xff]   ;;  %v2845_v58 = vld [vmem:[%s3616_s1 + $0x2f0] sm:$0xff]  }
  0x2e   : > { %2547 = vmatprep.subr.bf16.mxu0 %v2801_v30  ;;  %v2842_v57 = vld [vmem:[%s3616_s1 + $0x2b8] sm:$0xff]   ;;  %v2844_v59 = vld [vmem:[%s3616_s1 + $0x230] sm:$0xff]  }
  0x2f   : > { %2568 = vmatpush3.bf16.msra.mxu1 %v2800_v29  ;;  %2331 = vst.sshfl [vmem:[#allocation2 + $0x4] sm:$0x33 pattern:$0x76325410] %v2330_v60  ;;  %v2825_v29 = vld [vmem:[%s3616_s1 + $0x198] sm:$0xff]   ;;  %v2335_v30 = vpack.c.bf16 %v301_v26, %v300_v22  ;;  %v2847_v60 = vld [vmem:[%s3616_s1 + $0x268] sm:$0xff]  }
  0x30   : > { %2569 = vmatprep.subr.bf16.mxu1 %v2803_v32  ;;  %v2341_v32 = vpack.c.bf16 %v345_v28, %v344_v24  ;;  %v2858_v20 = vld [vmem:[%s3616_s1 + $0x298] sm:$0xff]   ;;  %v2862_v26 = vld [vmem:[%s3616_s1 + $0x290] sm:$0xff]   ;;  %v2865_v28 = vld [vmem:[%s3616_s1 + $0x2c8] sm:$0xff]  }
  0x31   : > { %2548 = vmatpush3.bf16.msra.mxu0 %v2802_v31  ;;  %v2826_v31 = vld [vmem:[%s3616_s1 + $0x150] sm:$0xff]   ;;  %2336 = vst.sshfl [vmem:[#allocation2 + $0x8] sm:$0x33 pattern:$0x76325410] %v2335_v30  ;;  %v2867_v30 = vld [vmem:[%s3616_s1 + $0x240] sm:$0xff]  }
  0x32   : > { %2577 = vmatprep.subr.bf16.mxu0 %v2805_v47  ;;  %2342 = vst.sshfl [vmem:[#allocation2 + $0xc] sm:$0x33 pattern:$0x76325410] %v2341_v32  ;;  %v2869_v32 = vld [vmem:[%s3616_s1 + $0x2c0] sm:$0xff]  }
  0x33   : > { %2570 = vmatpush3.bf16.msra.mxu1 %v2804_v44 }
  0x34   : > { %2599 = vmatprep.subr.bf16.mxu1 %v2808_v51  ;;  %v2837_v51 = vld [vmem:[%s3616_s1 + $0x180] sm:$0xff]  }
  0x36   : > { %v602_v61 = vld [vmem:[#allocation2] sm:$0xff] }
  0x37   : > { %v914_v62 = vrot.slane %v602_v61, %v3173_v48  ;;  %v907_v63 = vcombine.high %v602_v61, %v602_v61  ;;  %v2846_v61 = vld [vmem:[%s3616_s1 + $0x2b0] sm:$0xff]  }
  0x39   : > { %v922_v1 = vcombine.high %v914_v62, %v914_v62  ;;  %v921_v2 = vrot.slane %v907_v63, %v3173_v48  ;;  %v603_v41 = vld [vmem:[#allocation2 + $0x8] sm:$0xff] }
  0x3a   : > { %v931_v44 = vrot.slane %v603_v41, %v3173_v48  ;;  %v924_v45 = vcombine.high %v603_v41, %v603_v41  ;;  %v2848_v63 = vld [vmem:[%s3616_s1 + $0x228] sm:$0xff]  }
  0x3b   : > { %1897 = vmatprep.mubr.bf16.mxu0 %v922_v1  ;;  %v923_v5 = vcombine.high %v921_v2, %v921_v2  ;;  %v2850_v1 = vld [vmem:[%s3616_s1 + $0x2a8] sm:$0xff]  }
  0x3c   : > { %1898 = vmatmul.mubr.bf16.vlgmr.msra.gmra.mxu0 %v914_v62  ;;  %v939_v47 = vcombine.high %v931_v44, %v931_v44  ;;  %v938_v50 = vrot.slane %v924_v45, %v3173_v48  ;;  %v2849_v62 = vld [vmem:[%s3616_s1 + $0x2e8] sm:$0xff]   ;;  %v2876_v45 = vld [vmem:[%s3616_s1 + $0x370] sm:$0xff]  }
  0x3d   : > { %1937 = vmatprep.mubr.bf16.mxu1 %v923_v5  ;;  %2578 = vmatpush3.bf16.msra.mxu0 %v2807_v0  ;;  %v2851_v0 = vld [vmem:[%s3616_s1 + $0x260] sm:$0xff]  }
  0x3e   : > { %1938 = vmatmul.mubr.bf16.vlgmr.msra.gmra.mxu1 %v921_v2  ;;  %2579 = vmatprep.subr.bf16.mxu0 %v2810_v4  ;;  %v940_v52 = vcombine.high %v938_v50, %v938_v50  ;;  %v2852_v2 = vld [vmem:[%s3616_s1 + $0x220] sm:$0xff]  }
  0x3f   : > { %2600 = vmatpush3.bf16.msra.mxu1 %v2809_v3  ;;  %1977 = vmatprep.mubr.bf16.mxu0 %v939_v47  ;;  %v2346_v3 = vld.sshfl [vmem:[%s3153_s9 + $0x10] sm:$0x5a pattern:$0x76325410]  ;;  %v2853_v4 = vld [vmem:[%s3616_s1 + $0x2e0] sm:$0xff]  }
  0x40   : > { %2601 = vmatprep.subr.bf16.mxu1 %v2812_v7  ;;  %2017 = vmatprep.mubr.bf16.mxu1 %v940_v52  ;;  %v381_v5 = vcombine.high %v2346_v3, %v2346_v3  ;;  %v3340_v7 = vld.sshfl [vmem:[%s3153_s9 + $0x10] sm:$0xf0 pattern:$0x76325410]  ;;  %v2881_v52 = vld [vmem:[%s3616_s1 + $0x328] sm:$0xff]  }
  0x41   : > { %2580 = vmatpush3.bf16.msra.mxu0 %v2811_v6  ;;  %v2348_v6 = vrot.slane %v2346_v3, 9  ;;  %v2877_v47 = vld [vmem:[%s3616_s1 + $0x330] sm:$0xff]  }
  0x42   : > { %2581 = vmatprep.subr.bf16.mxu0 %v2814_v9  ;;  %v2355_v9 = vcombine.high %v3224_v15, %v3340_v7  ;;  %v2856_v15 = vld [vmem:[%s3616_s1 + $0x218] sm:$0xff]  }
  0x43   : > { %2602 = vmatpush3.bf16.msra.mxu1 %v2813_v8  ;;  %v2854_v8 = vld [vmem:[%s3616_s1 + $0x2a0] sm:$0xff]  }
  0x44   : > { %2603 = vmatprep.subr.bf16.mxu1 %v2816_v11  ;;  %v388_v11 = vrot.slane %v381_v5, 7  ;;  %v2889_v5 = vld [vmem:[%s3616_s1 + $0x318] sm:$0xff]  }
  0x45   : > { %2582 = vmatpush3.bf16.msra.mxu0 %v2815_v10  ;;  %v2855_v10 = vld [vmem:[%s3616_s1 + $0x258] sm:$0xff]  }
  0x46   : > { %2583 = vmatprep.subr.bf16.mxu0 %v2818_v13  ;;  %v2857_v13 = vld [vmem:[%s3616_s1 + $0x2d8] sm:$0xff]   ;;  %v3356_v14 = vsel %vm3163_vm6, %v2348_v6, %v388_v11 }
  0x47   : > { %2604 = vmatpush3.bf16.msra.mxu1 %v2817_v12  ;;  %v442_v12 = vrot.slane %v2355_v9, %v3173_v48  ;;  %v2891_v11 = vld [vmem:[%s3616_s1 + $0x398] sm:$0xff]  }
  0x48   : > { %2605 = vmatprep.subr.bf16.mxu1 %v2820_v19  ;;  %v2859_v19 = vld [vmem:[%s3616_s1 + $0x250] sm:$0xff]  }
  0x49   : > { %2584 = vmatpush3.bf16.msra.mxu0 %v2819_v16  ;;  %v390_v16 = vcombine.low %v3183_v54, %v3356_v14  ;;  %v443_v17 = vcombine.high %v442_v12, %v442_v12  ;;  %v2860_v54 = vld [vmem:[%s3616_s1 + $0x210] sm:$0xff]  }
  0x4a   : > { %2585 = vmatprep.subr.bf16.mxu0 %v2822_v23  ;;  %v2861_v23 = vld [vmem:[%s3616_s1 + $0x2d0] sm:$0xff]  }
  0x4b   : > { %2606 = vmatpush3.bf16.msra.mxu1 %v2821_v21  ;;  %v397_v21 = vrot.slane %v390_v16, %v3173_v48  ;;  %v2356_v22 = vpack.c.bf16 %v443_v17, %v442_v12  ;;  %v2894_v12 = vld [vmem:[%s3616_s1 + $0x3d0] sm:$0xff]   ;;  %v2898_v17 = vld [vmem:[%s3616_s1 + $0x3c8] sm:$0xff]  }
  0x4c   : > { %2607 = vmatprep.subr.bf16.mxu1 %v2824_v27  ;;  %v2895_v16 = vld [vmem:[%s3616_s1 + $0x390] sm:$0xff]  }
  0x4d   : > { %2586 = vmatpush3.bf16.msra.mxu0 %v2823_v25  ;;  %v398_v24 = vcombine.high %v397_v21, %v397_v21  ;;  %2357 = vst.sshfl [vmem:[#allocation2 + $0x14] sm:$0x33 pattern:$0x76325410] %v2356_v22  ;;  %v2863_v25 = vld [vmem:[%s3616_s1 + $0x248] sm:$0xff]  }
  0x4e   : > { %2587 = vmatprep.subr.bf16.mxu0 %v2826_v31  ;;  %v2866_v31 = vld [vmem:[%s3616_s1 + $0x288] sm:$0xff]  }
  0x4f   : > { %2608 = vmatpush3.bf16.msra.mxu1 %v2825_v29  ;;  %v2349_v27 = vpack.c.bf16 %v398_v24, %v397_v21  ;;  %v2864_v29 = vld [vmem:[%s3616_s1 + $0x208] sm:$0xff]   ;;  %v2900_v21 = vld [vmem:[%s3616_s1 + $0x340] sm:$0xff]   ;;  %v2375_v24 = vld.sshfl [vmem:[%s3153_s9 + $0x18] sm:$0xf0 pattern:$0x76325410] }
  0x50   : > { %2609 = vmatprep.subr.bf16.mxu1 %v2828_v34  ;;  %v2871_v34 = vld [vmem:[%s3616_s1 + $0x378] sm:$0xff]   ;;  %v2899_v22 = vld [vmem:[%s3616_s1 + $0x388] sm:$0xff]  }
  0x51   : > { %2588 = vmatpush3.bf16.msra.mxu0 %v2827_v33  ;;  %2350 = vst.sshfl [vmem:[#allocation2 + $0x10] sm:$0x33 pattern:$0x76325410] %v2349_v27  ;;  %v2868_v33 = vld [vmem:[%s3616_s1 + $0x200] sm:$0xff]  }
  0x52   : > { %2589 = vmatprep.subr.bf16.mxu0 %v2830_v36  ;;  %v2903_v27 = vld [vmem:[%s3616_s1 + $0x380] sm:$0xff]  }
  0x53   : > { %2610 = vmatpush3.bf16.msra.mxu1 %v2829_v35  ;;  %v2870_v35 = vld [vmem:[%s3616_s1 + $0x280] sm:$0xff]  }
  0x54   : > { %2611 = vmatprep.subr.bf16.mxu1 %v2832_v38 }
  0x55   : > { %2590 = vmatpush3.bf16.msra.mxu0 %v2831_v37  ;;  %v2874_v37 = vld [vmem:[%s3616_s1 + $0x3f8] sm:$0xff]  }
  0x56   : > { %2591 = vmatprep.subr.bf16.mxu0 %v2834_v40  ;;  %v2873_v40 = vld [vmem:[%s3616_s1 + $0x338] sm:$0xff]  }
  0x57   : > { %2612 = vmatpush3.bf16.msra.mxu1 %v2833_v39 }
  0x58   : > { %2613 = vmatprep.subr.bf16.mxu1 %v2836_v43  ;;  %v604_v36 = vld [vmem:[#allocation2 + $0x10] sm:$0xff] }
  0x59   : > { %2592 = vmatpush3.bf16.msra.mxu0 %v2835_v46  ;;  %v948_v38 = vrot.slane %v604_v36, %v3173_v48  ;;  %v941_v39 = vcombine.high %v604_v36, %v604_v36  ;;  %v2907_v36 = vld [vmem:[%s3616_s1 + $0x470] sm:$0xff]  }
  0x5a   : > { %2621 = vmatprep.subr.bf16.mxu0 %v2838_v49  ;;  %v2878_v49 = vld [vmem:[%s3616_s1 + $0x3f0] sm:$0xff]  }
  0x5b   : > { %2614 = vmatpush3.bf16.msra.mxu1 %v2837_v51  ;;  %v956_v41 = vcombine.high %v948_v38, %v948_v38  ;;  %v955_v43 = vrot.slane %v941_v39, %v3173_v48  ;;  %v2880_v51 = vld [vmem:[%s3616_s1 + $0x368] sm:$0xff]  }
  0x5c   : > { %1978 = vmatmul.mubr.bf16.vlgmr.msra.gmra.mxu0 %v931_v44  ;;  %2643 = vmatprep.subr.bf16.mxu1 %v2841_v53  ;;  %v2875_v44 = vld [vmem:[%s3616_s1 + $0x3b8] sm:$0xff]   ;;  %v2882_v53 = vld [vmem:[%s3616_s1 + $0x3e8] sm:$0xff]  }
  0x5d   : > { %2622 = vmatpush3.bf16.msra.mxu0 %v2840_v55  ;;  %2057 = vmatprep.mubr.bf16.mxu0 %v956_v41  ;;  %v957_v46 = vcombine.high %v955_v43, %v955_v43  ;;  %v2883_v55 = vld [vmem:[%s3616_s1 + $0x3a8] sm:$0xff]   ;;  %v2911_v41 = vld [vmem:[%s3616_s1 + $0x460] sm:$0xff]  }
  0x5e   : > { %2018 = vmatmul.mubr.bf16.vlgmr.msra.gmra.mxu1 %v938_v50  ;;  %2623 = vmatprep.subr.bf16.mxu0 %v2843_v56  ;;  %v2879_v50 = vld [vmem:[%s3616_s1 + $0x3b0] sm:$0xff]   ;;  %v2884_v56 = vld [vmem:[%s3616_s1 + $0x360] sm:$0xff]   ;;  %v2909_v39 = vld [vmem:[%s3616_s1 + $0x468] sm:$0xff]  }
  0x5f   : > { %2644 = vmatpush3.bf16.msra.mxu1 %v2842_v57  ;;  %2097 = vmatprep.mubr.bf16.mxu1 %v957_v46  ;;  %v2361_v57 = vld.sshfl [vmem:[%s3153_s9 + $0x18] sm:$0xf pattern:$0x76325410] }
  0x60   : > { %2645 = vmatprep.subr.bf16.mxu1 %v2845_v58  ;;  %v2885_v58 = vld [vmem:[%s3616_s1 + $0x320] sm:$0xff]   ;;  %v2913_v46 = vld [vmem:[%s3616_s1 + $0x458] sm:$0xff]  }
  0x61   : > { %2624 = vmatpush3.bf16.msra.mxu0 %v2844_v59  ;;  %v2886_v59 = vld [vmem:[%s3616_s1 + $0x3e0] sm:$0xff]  }
  0x62   : > { %2625 = vmatprep.subr.bf16.mxu0 %v2847_v60  ;;  %v479_v60 = vcombine.low %v3231_v18, %v2361_v57  ;;  %v2890_v18 = vld [vmem:[%s3616_s1 + $0x3d8] sm:$0xff]   ;;  %v2379_v57 = vld [vmem:[%s3617_s2] ss:$0 sm:$0xff] }
  0x63   : > { %2646 = vmatpush3.bf16.msra.mxu1 %v2846_v61  ;;  %v2367_v61 = vld.sshfl [vmem:[%s3153_s9 + $0x18] sm:$0x5a pattern:$0x76325410]  ;;  %s2532_s9 = sshll.u32 %s3028_s16, 6  ;;  %s2984_s16 = smov [#allocation3]  }
  0x64   : > { %2647 = vmatprep.subr.bf16.mxu1 %v2849_v62  ;;  %v2888_v62 = vld [vmem:[%s3616_s1 + $0x358] sm:$0xff]   ;;  %s3573_s30 = scalar_lea.hbm %s3618_s3, %s2532_s9  ;;  %s2925_s6 = sshll.u32 %s2984_s16, 4  ;;  %s2926_s6 = int_to_ptr.vmem [resolvable:$false] %s2925_s6 }
  0x65   : > { %2626 = vmatpush3.bf16.msra.mxu0 %v2848_v63  ;;  %v523_v63 = vcombine.high %v2367_v61, %v2367_v61  ;;  %s2927_s7 = scalar_lea.vmem %s2926_s6, 128  ;;  %p2928_p0 = scmp.lt.s32.totalorder %s3568_s27, %s2926_s6 }
  0x66   : > { %2627 = vmatprep.subr.bf16.mxu0 %v2851_v0  ;;  %v2369_v0 = vrot.slane %v2367_v61, 9  ;;  %p2929_p1 = scmp.lt.s32.totalorder %s2927_s7, %s2921_s5 }
  0x67   : > { %2648 = vmatpush3.bf16.msra.mxu1 %v2850_v1  ;;  %v486_v1 = vrot.slane %v479_v60, %v3173_v48  ;;  %v530_v3 = vrot.slane %v523_v63, 7 }
  0x68   : > { %2649 = vmatprep.subr.bf16.mxu1 %v2853_v4  ;;  %p2930_p2 = por %p2929_p1, %p2928_p0 }
  0x69   : > { %2628 = vmatpush3.bf16.msra.mxu0 %v2852_v2  ;;  %v2887_v2 = vld [vmem:[%s3616_s1 + $0x3a0] sm:$0xff]   ;;  %v487_v4 = vcombine.high %v486_v1, %v486_v1  ;;  %v531_v6 = vsel %vm3163_vm6, %v2369_v0, %v530_v3 }
  0x6a   : > { %2629 = vmatprep.subr.bf16.mxu0 %v2855_v10  ;;  %v532_v10 = vcombine.low %v3356_v14, %v531_v6  ;;  %v2896_v14 = vld [vmem:[%s3616_s1 + $0x348] sm:$0xff]   ;;  %p2931_p3 = pnand %p2930_p2, %p2924_p13 }
  0x6b   : > { %2650 = vmatpush3.bf16.msra.mxu1 %v2854_v8  ;;  %v2892_v8 = vld [vmem:[%s3616_s1 + $0x350] sm:$0xff]   ;;  %v2362_v9 = vpack.c.bf16 %v487_v4, %v486_v1 }
  0x6c   : > { %2651 = vmatprep.subr.bf16.mxu1 %v2857_v13  ;;  %v539_v42 = vrot.slane %v532_v10, %v3173_v48  ;;  %v2893_v13 = vld [vmem:[%s3616_s1 + $0x310] sm:$0xff]  }
  0x6d   : > { %2630 = vmatpush3.bf16.msra.mxu0 %v2856_v15  ;;  %2363 = vst.sshfl [vmem:[#allocation2 + $0x18] sm:$0x33 pattern:$0x76325410] %v2362_v9 }
  0x6e   : > { %2631 = vmatprep.subr.bf16.mxu0 %v2859_v19  ;;  %v540_v15 = vcombine.high %v539_v42, %v539_v42 }
  0x6f   : > { %2652 = vmatpush3.bf16.msra.mxu1 %v2858_v20  ;;  %v2897_v20 = vld [vmem:[%s3616_s1 + $0x308] sm:$0xff]  }
  0x70   : > { %2653 = vmatprep.subr.bf16.mxu1 %v2861_v23  ;;  %v2370_v19 = vpack.c.bf16 %v540_v15, %v539_v42  ;;  %v2902_v23 = vld [vmem:[%s3616_s1 + $0x3c0] sm:$0xff]  }
  0x71   : > { %2632 = vmatpush3.bf16.msra.mxu0 %v2860_v54  ;;  %v2901_v54 = vld [vmem:[%s3616_s1 + $0x300] sm:$0xff]  }
  0x72   : > { %2633 = vmatprep.subr.bf16.mxu0 %v2863_v25  ;;  %2371 = vst.sshfl [vmem:[#allocation2 + $0x1c] sm:$0x33 pattern:$0x76325410] %v2370_v19  ;;  %v2904_v25 = vld [vmem:[%s3616_s1 + $0x478] sm:$0xff]  }
  0x73   : > { %2654 = vmatpush3.bf16.msra.mxu1 %v2862_v26  ;;  %v2376_v26 = vcombine.high %v3340_v7, %v2375_v24  ;;  %v2906_v7 = vld [vmem:[%s3616_s1 + $0x438] sm:$0xff]  }
  0x74   : > { %2655 = vmatprep.subr.bf16.mxu1 %v2865_v28 }
  0x75   : > { %2634 = vmatpush3.bf16.msra.mxu0 %v2864_v29  ;;  %v584_v28 = vrot.slane %v2376_v26, %v3173_v48 }
  0x76   : > { %2635 = vmatprep.subr.bf16.mxu0 %v2867_v30 }
  0x77   : > { %2656 = vmatpush3.bf16.msra.mxu1 %v2866_v31 }
  0x78   : > { %2657 = vmatprep.subr.bf16.mxu1 %v2869_v32  ;;  %v585_v32 = vcombine.high %v584_v28, %v584_v28 }
  0x79   : > { %2636 = vmatpush3.bf16.msra.mxu0 %v2868_v33  ;;  %v605_v29 = vld [vmem:[#allocation2 + $0x18] sm:$0xff] }
  0x7a   : > { %2665 = vmatprep.subr.bf16.mxu0 %v2871_v34  ;;  %v965_v30 = vrot.slane %v605_v29, %v3173_v48  ;;  %v958_v31 = vcombine.high %v605_v29, %v605_v29 }
  0x7b   : > { %2658 = vmatpush3.bf16.msra.mxu1 %v2870_v35  ;;  %v2377_v35 = vpack.c.bf16 %v585_v32, %v584_v28 }
  0x7c   : > { %2687 = vmatprep.subr.bf16.mxu1 %v2874_v37  ;;  %2058 = vmatmul.mubr.bf16.vlgmr.msra.gmra.mxu0 %v948_v38  ;;  %v973_v33 = vcombine.high %v965_v30, %v965_v30  ;;  %v972_v34 = vrot.slane %v958_v31, %v3173_v48  ;;  %v2908_v38 = vld [vmem:[%s3616_s1 + $0x430] sm:$0xff]  }
  0x7d   : > { %2666 = vmatpush3.bf16.msra.mxu0 %v2873_v40  ;;  %2378 = vst.sshfl [vmem:[#allocation2 + $0x20] sm:$0x33 pattern:$0x76325410] %v2377_v35  ;;  %v2910_v40 = vld [vmem:[%s3616_s1 + $0x428] sm:$0xff]  }
  0x7e   : > { %2098 = vmatmul.mubr.bf16.vlgmr.msra.gmra.mxu1 %v955_v43  ;;  %2667 = vmatprep.subr.bf16.mxu0 %v2876_v45  ;;  %v974_v37 = vcombine.high %v972_v34, %v972_v34  ;;  %v2912_v45 = vld [vmem:[%s3616_s1 + $0x420] sm:$0xff]  }
  0x7f   : > { %2688 = vmatpush3.bf16.msra.mxu1 %v2875_v44  ;;  %2137 = vmatprep.mubr.bf16.mxu0 %v973_v33 }
  0x80   : > { %2689 = vmatprep.subr.bf16.mxu1 %v2878_v49  ;;  %2177 = vmatprep.mubr.bf16.mxu1 %v974_v37  ;;  %v2915_v49 = vld [vmem:[%s3616_s1 + $0x450] sm:$0xff]  }
  0x81   : > { %2668 = vmatpush3.bf16.msra.mxu0 %v2877_v47  ;;  %v2914_v47 = vld [vmem:[%s3616_s1 + $0x418] sm:$0xff]  }
  0x82   : > { %2669 = vmatprep.subr.bf16.mxu0 %v2880_v51  ;;  %v2917_v51 = vld [vmem:[%s3616_s1 + $0x448] sm:$0xff]  }
  0x83   : > { %2690 = vmatpush3.bf16.msra.mxu1 %v2879_v50  ;;  %v2916_v50 = vld [vmem:[%s3616_s1 + $0x410] sm:$0xff]  }
  0x84   : > { %2691 = vmatprep.subr.bf16.mxu1 %v2882_v53  ;;  %v2380_v43 = vld.sshfl [vmem:[#allocation2 + $0x20] sm:$0x33 pattern:$0x76325410] }
  0x85   : > { %2670 = vmatpush3.bf16.msra.mxu0 %v2881_v52  ;;  %v982_v44 = vcombine.high %v2380_v43, %v2380_v43  ;;  %v2918_v52 = vld [vmem:[%s3616_s1 + $0x408] sm:$0xff]   ;;  %v2919_v53 = vld [vmem:[%s3616_s1 + $0x440] sm:$0xff]  }
  0x86   : > { %2671 = vmatprep.subr.bf16.mxu0 %v2884_v56 }
  0x87   : > { %2692 = vmatpush3.bf16.msra.mxu1 %v2883_v55  ;;  %v2920_v55 = vld [vmem:[%s3616_s1 + $0x400] sm:$0xff]  }
  0x88   : > { %2693 = vmatprep.subr.bf16.mxu1 %v2886_v59 }
  0x89   : > { %2672 = vmatpush3.bf16.msra.mxu0 %v2885_v58 }
  0x8a   : > { %2673 = vmatprep.subr.bf16.mxu0 %v2888_v62 }
  0x8b   : > { %2694 = vmatpush3.bf16.msra.mxu1 %v2887_v2 }
  0x8c   : > { %2695 = vmatprep.subr.bf16.mxu1 %v2890_v18 }
  0x8d   : > { %2674 = vmatpush3.bf16.msra.mxu0 %v2889_v5 }
  0x8e   : > { %2675 = vmatprep.subr.bf16.mxu0 %v2892_v8 }
  0x8f   : > { %2696 = vmatpush3.bf16.msra.mxu1 %v2891_v11 }
  0x90   : > { %2697 = vmatprep.subr.bf16.mxu1 %v2894_v12 }
  0x91   : > { %2676 = vmatpush3.bf16.msra.mxu0 %v2893_v13 }
  0x92   : > { %2677 = vmatprep.subr.bf16.mxu0 %v2896_v14 }
  0x93   : > { %2698 = vmatpush3.bf16.msra.mxu1 %v2895_v16 }
  0x94   : > { %2699 = vmatprep.subr.bf16.mxu1 %v2898_v17 }
  0x95   : > { %2678 = vmatpush3.bf16.msra.mxu0 %v2897_v20 }
  0x96   : > { %2679 = vmatprep.subr.bf16.mxu0 %v2900_v21 }
  0x97   : > { %2700 = vmatpush3.bf16.msra.mxu1 %v2899_v22 }
  0x98   : > { %2701 = vmatprep.subr.bf16.mxu1 %v2902_v23 }
  0x99   : > { %2680 = vmatpush3.bf16.msra.mxu0 %v2901_v54 }
  0x9a   : > { %2709 = vmatprep.subr.bf16.mxu0 %v2904_v25 }
  0x9b   : > { %2702 = vmatpush3.bf16.msra.mxu1 %v2903_v27 }
  0x9c   : > { %2138 = vmatmul.mubr.bf16.vlgmr.msra.gmra.mxu0 %v965_v30 }
  0x9d   : > { %2710 = vmatpush3.bf16.msra.mxu0 %v2906_v7  ;;  %2217 = vmatprep.mubr.bf16.mxu0 %v982_v44 }
  0x9e   : > { %2178 = vmatmul.mubr.bf16.vlgmr.msra.gmra.mxu1 %v972_v34  ;;  %2711 = vmatprep.subr.bf16.mxu0 %v2907_v36 }
  0xa1   : > { %2712 = vmatpush3.bf16.msra.mxu0 %v2908_v38 }
  0xa2   : > { %2713 = vmatprep.subr.bf16.mxu0 %v2909_v39 }
  0xa5   : > { %2714 = vmatpush3.bf16.msra.mxu0 %v2910_v40 }
  0xa6   : > { %2715 = vmatprep.subr.bf16.mxu0 %v2911_v41 }
  0xa9   : > { %2716 = vmatpush3.bf16.msra.mxu0 %v2912_v45 }
  0xaa   : > { %2717 = vmatprep.subr.bf16.mxu0 %v2913_v46 }
  0xad   : > { %2718 = vmatpush3.bf16.msra.mxu0 %v2914_v47 }
  0xae   : > { %2719 = vmatprep.subr.bf16.mxu0 %v2915_v49 }
  0xb1   : > { %2720 = vmatpush3.bf16.msra.mxu0 %v2916_v50 }
  0xb2   : > { %2721 = vmatprep.subr.bf16.mxu0 %v2917_v51 }
  0xb5   : > { %2722 = vmatpush3.bf16.msra.mxu0 %v2918_v52 }
  0xb6   : > { %2723 = vmatprep.subr.bf16.mxu0 %v2919_v53 }
  0xb9   : > { %2724 = vmatpush3.bf16.msra.mxu0 %v2920_v55 }
  0xbc   : > { %2218 = vmatmul.mubr.bf16.vlgmr.msra.gmra.mxu0 %v2380_v43 }
  0xfc   : > { %v2549_v56 = vpop.f32.mrf.mxu0 }
  0xfe   : > { %v2550_v58 = vpop.f32.mrf.mxu0  ;;  %v2571_v59 = vpop.f32.mrf.mxu1 }
  0xff   : > { %v2551_v60 = vadd.f32 %v2550_v58, %v2549_v56 }
 0x100   : > { %v2552_v61 = vpop.f32.mrf.mxu0  ;;  %v2572_v62 = vpop.f32.mrf.mxu1 }
 0x101   : > { %v1900_v63 = vadd.f32 %v2551_v60, %v2379_v57  ;;  %v2573_v0 = vadd.f32 %v2572_v62, %v2571_v59 }
 0x102   : > { %v2553_v1 = vpop.f32.mrf.mxu0  ;;  %v2574_v2 = vpop.f32.mrf.mxu1 }
 0x103   : > { %v1940_v3 = vadd.f32 %v2573_v0, %v1900_v63 }
 0x104   : > { %v2575_v18 = vpop.f32.mrf.mxu1 }
 0x11c   : > { %v2593_v4 = vpop.f32.mrf.mxu0 }
 0x11e   : > { %v2594_v5 = vpop.f32.mrf.mxu0  ;;  %v2615_v6 = vpop.f32.mrf.mxu1 }
 0x11f   : > { %v2595_v8 = vadd.f32 %v2594_v5, %v2593_v4 }
 0x120   : > { %v2596_v9 = vpop.f32.mrf.mxu0  ;;  %v2616_v10 = vpop.f32.mrf.mxu1 }
 0x121   : > { %v1980_v11 = vadd.f32 %v2595_v8, %v1940_v3  ;;  %v2617_v12 = vadd.f32 %v2616_v10, %v2615_v6 }
 0x122   : > { %v2597_v42 = vpop.f32.mrf.mxu0  ;;  %v2618_v13 = vpop.f32.mrf.mxu1 }
 0x123   : > { %v2020_v14 = vadd.f32 %v2617_v12, %v1980_v11 }
 0x124   : > { %v2619_v15 = vpop.f32.mrf.mxu1 }
 0x13c   : > { %v2637_v16 = vpop.f32.mrf.mxu0 }
 0x13e   : > { %v2638_v17 = vpop.f32.mrf.mxu0  ;;  %v2659_v19 = vpop.f32.mrf.mxu1 }
 0x13f   : > { %v2639_v32 = vadd.f32 %v2638_v17, %v2637_v16 }
 0x140   : > { %v2640_v20 = vpop.f32.mrf.mxu0  ;;  %v2660_v21 = vpop.f32.mrf.mxu1 }
 0x141   : > { %v2060_v33 = vadd.f32 %v2639_v32, %v2020_v14  ;;  %v2661_v34 = vadd.f32 %v2660_v21, %v2659_v19 }
 0x142   : > { %v2641_v22 = vpop.f32.mrf.mxu0  ;;  %v2662_v23 = vpop.f32.mrf.mxu1 }
 0x143   : > { %v2100_v35 = vadd.f32 %v2661_v34, %v2060_v33 }
 0x144   : > { %v2663_v54 = vpop.f32.mrf.mxu1 }
 0x15c   : > { %v2681_v24 = vpop.f32.mrf.mxu0 }
 0x15e   : > { %v2682_v25 = vpop.f32.mrf.mxu0  ;;  %v2703_v26 = vpop.f32.mrf.mxu1 }
 0x15f   : > { %v2683_v7 = vadd.f32 %v2682_v25, %v2681_v24 }
 0x160   : > { %v2684_v27 = vpop.f32.mrf.mxu0  ;;  %v2704_v28 = vpop.f32.mrf.mxu1 }
 0x161   : > { %v2140_v36 = vadd.f32 %v2683_v7, %v2100_v35  ;;  %v2705_v37 = vadd.f32 %v2704_v28, %v2703_v26 }
 0x162   : > { %v2685_v29 = vpop.f32.mrf.mxu0  ;;  %v2706_v30 = vpop.f32.mrf.mxu1 }
 0x163   : > { %v2180_v40 = vadd.f32 %v2705_v37, %v2140_v36 }
 0x164   : > { %v2707_v31 = vpop.f32.mrf.mxu1 }
 0x17c   : > { %v2725_v38 = vpop.f32.mrf.mxu0 }
 0x17e   : > { %v2726_v39 = vpop.f32.mrf.mxu0 }
 0x17f   : > { %v2727_v41 = vadd.f32 %v2726_v39, %v2725_v38 }
 0x180   : > { %v2728_v43 = vpop.f32.mrf.mxu0 }
 0x181   : > { %v2220_v44 = vadd.f32 %v2727_v41, %v2180_v40 }
 0x182   : > { %v2729_v45 = vpop.f32.mrf.mxu0 }
 0x183   : > { %v2225_v46 = vmax.f32 %v2220_v44, 0.0 }
 0x185   : > { %v2233_v47 = vrot.slane %v2225_v46, %v3173_v48  ;;  %2525 = vst.sshfl [vmem:[%s163_s26] sm:$0x3 pattern:$0x76325410] %v2225_v46 }
 0x187   : > { %v2234_v49 = vcombine.high %v2233_v47, %v2233_v47 }
 0x189   : > { %2238 = vst [vmem:[%s163_s26 + $0x2] sm:$0x3] %v2234_v49 }
 0x18a   : > { %2934 = shalt.err (!%p2931_p3)
}
 0x18b   : > { %s2935_s8 = scalar_lea.hbm %s3573_s30, 64  ;;  %s2939_s17 = scalar_lea.hbm %s3618_s3, 128 }
 0x18c   : > { %p2936_p4 = scmp.ne.s32.totalorder %s3573_s30, %s2935_s8  ;;  %p2940_p9 = scmp.lt.s32.totalorder %s3573_s30, %s3618_s3 }
 0x18d   : > { %p2941_p10 = scmp.lt.s32.totalorder %s2939_s17, %s2935_s8 }
 0x18e   : > { %p2937_p7 = pnand %p2936_p4, %p3045_p5 }
 0x18f   : > { %p2942_p11 = por %p2941_p10, %p2940_p9 }
 0x190   : > { %p2938_p8 = pneg %p2937_p7 }
 0x192   : > { %p2943_p12 = pnand %p2942_p11, %p2938_p8 }
 0x194   : > { %2946 = shalt.err (!%p2943_p12)
}
 0x195   : > { %s2985_s24 = smov 32   ;;  %s2986_s25 = smov 2  }
 0x196   : > { %2731 = dma.vmem_to_hbm [thread:$0]  (%p3045_p5), %s3568_s27, 64, %s3573_s30, %s3575_s4, %s2985_s24, %s2985_s24, %s2986_s25  }
 0x197 PF: > { %p2737_p13 = scmp.ge.s32.totalorder %s2981_s15, 2  ;;  %s2268_s26 = sand.u32 1, %s2969_s12  }
 0x198   : > { %s2269_s9 = scalar_lea.sflag [#allocation4], %s2268_s26 }
 0x199   : > { %p2734_p0 = pnand %p2737_p13, %p3049_p6 }
 0x19b   : > { %p2735_p1 = pneg %p2734_p0 }
 0x19d   : > { %2964 = dma.done.wait (%p2735_p1), %s2269_s9, 64  }
 0x19e   : > { %2966 = vsyncadd (%p2735_p1), %s2269_s9, 4294967232  ;;  %p13_p2 = scmp.ge.s32.totalorder %s3032_s18, 4   ;;  %s3623_s12 = smov %s2973_s13 }
 0x19f   : > { %s3624_s13 = smov %s2977_s14  ;;  %s3625_s14 = smov %s3043_s21 }
 0x1a0   : > { %s3626_s15 = smov %s3032_s18  ;;  %15 = sbr.rel (!%p13_p2) target bundleno = 3 (0x3), region = 69 }
 0x1a5   :  { %2274 = vsyncpa [#allocation4], 1 }
 0x1a6   :  { %2276 = vsyncpa [#allocation4 + $0x1], 1 }

</bundles_post_ra>
